<compile_context>
chip_gen: v6e
topology: v6e:2x2x1
jax: 0.10.0
libtpu: 0.0.40
codegen_flags: <defaults>
</compile_context>

<pallas_src>
import functools

import jax
import jax.numpy as jnp
import numpy as np
from jax import lax
from jax.experimental import pallas as pl
from jax.experimental.pallas import tpu as pltpu


# Network geometry fixed by the PyTorch module (28x28 single-channel input).
H_IN = 28
C1_K, C1_OUT = 5, 20            # conv1: 1 -> 20, 5x5
H1 = H_IN - C1_K + 1            # 24
P1 = H1 // 2                    # 12 after 2x2/2 pool
C2_K, C2_OUT = 5, 64            # conv2: 20 -> 64, 5x5
H2 = P1 - C2_K + 1              # 8
P2 = H2 // 2                    # 4 after 2x2/2 pool
FC1_OUT, FC2_OUT = 600, 10


# ------------------------------ Pallas kernel ------------------------------ #
def _net_kernel(p1_ref, w1_ref, b1_ref, w2_ref, b2_ref,
                fc1w_ref, fc1b_ref, fc2w_ref, fc2b_ref,
                out_ref,
                h1_ref, p1p_ref, h2_ref, p2p_ref):
    """Whole Net forward for one batch tile; everything lives in VMEM."""
    T = out_ref.shape[1]                                    # batch tile size

    # ---- conv1 as im2col matmul + bias + ReLU ------------------------------
    y = jnp.dot(p1_ref[...], w1_ref[...], preferred_element_type=jnp.float32)
    y = jnp.maximum(y + b1_ref[...], 0.0)                   # (T*24*24, 20)
    h1_ref[...] = y.reshape(T, H1, H1, C1_OUT)

    # ---- 2x2/2 max pool (strided W read, major-dim reshape for H) ----------
    tw = jnp.maximum(h1_ref[:, :, pl.ds(0, P1, 2), :],
                     h1_ref[:, :, pl.ds(1, P1, 2), :])      # (T, 24, 12, 20)
    p1p_ref[...] = jnp.max(tw.reshape(T, P1, 2, P1, C1_OUT), axis=2)

    # ---- conv2: 25 shifted-tap MXU accumulations (im2col never hits HBM) ---
    acc2 = jnp.zeros((T * H2 * H2, C2_OUT), jnp.float32)
    for i in range(C2_K):
        for j in range(C2_K):
            patch = p1p_ref[:, i:i + H2, j:j + H2, :]       # (T, 8, 8, 20)
            acc2 = acc2 + jnp.dot(patch.reshape(T * H2 * H2, C1_OUT),
                                  w2_ref[i * C2_K + j],
                                  preferred_element_type=jnp.float32)
    h2 = jnp.maximum(acc2 + b2_ref[...], 0.0)               # (T*64, 64)
    h2_ref[...] = h2.reshape(T, H2, H2, C2_OUT)

    tw2 = jnp.maximum(h2_ref[:, :, pl.ds(0, P2, 2), :],
                      h2_ref[:, :, pl.ds(1, P2, 2), :])     # (T, 8, 4, 64)
    p2p_ref[...] = jnp.max(tw2.reshape(T, P2, 2, P2, C2_OUT), axis=2)

    # ---- fc1 + ReLU (weight rows pre-permuted to NHWC flatten order) -------
    acc3 = jnp.zeros((T, FC1_OUT), jnp.float32)
    for hw in range(P2 * P2):
        acc3 = acc3 + jnp.dot(p2p_ref[:, hw // P2, hw % P2, :],   # (T, 64)
                              fc1w_ref[hw],                        # (64, 600)
                              preferred_element_type=jnp.float32)
    h3 = jnp.maximum(acc3 + fc1b_ref[...], 0.0)             # (T, 600)

    # ---- fc2 ----------------------------------------------------------------
    out = jnp.dot(h3, fc2w_ref[...], preferred_element_type=jnp.float32)
    out_ref[0] = out + fc2b_ref[...]                        # (T, 10)


# -------------------------------- JAX glue --------------------------------- #
def prepare_params(params):
    """One-time conversion of PyTorch-convention weights into kernel layout."""
    w1 = jnp.transpose(params["conv1_w"], (2, 3, 1, 0)).reshape(C1_K * C1_K, C1_OUT)
    w2 = jnp.transpose(params["conv2_w"], (2, 3, 1, 0)).reshape(C2_K * C2_K, C1_OUT, C2_OUT)
    # PyTorch's x.view(-1, 64*4*4) flattens (c, h, w); the kernel keeps NHWC,
    # so permute fc1's input axis to (h, w, c) once here instead of
    # transposing the activation inside the kernel.
    fc1w = (params["fc1_w"].reshape(FC1_OUT, C2_OUT, P2, P2)
            .transpose(2, 3, 1, 0).reshape(P2 * P2, C2_OUT, FC1_OUT))
    fc2w = params["fc2_w"].T
    return {
        "w1": w1, "b1": params["conv1_b"].reshape(1, C1_OUT),
        "w2": w2, "b2": params["conv2_b"].reshape(1, C2_OUT),
        "fc1w": fc1w, "fc1b": params["fc1_b"].reshape(1, FC1_OUT),
        "fc2w": fc2w, "fc2b": params["fc2_b"].reshape(1, FC2_OUT),
    }


@functools.partial(jax.jit, static_argnames=("block_n",))
def net_forward(x_nchw, p, *, block_n=2):
    """Forward pass of Net.  x_nchw: (N, 1, 28, 28) f32 -> (N, 10) f32."""
    N = x_nchw.shape[0]
    assert N % block_n == 0, "batch must be divisible by block_n"
    x = x_nchw[:, 0, :, :]                                  # (N, 28, 28); C_in == 1

    # conv1 im2col in glue: only 25 f32 columns (C_in == 1).  conv2's much
    # larger patch matrix is built inside the kernel and never touches HBM.
    cols = [x[:, i:i + H1, j:j + H1] for i in range(C1_K) for j in range(C1_K)]
    patches = jnp.stack(cols, axis=-1).reshape(N * H1 * H1, C1_K * C1_K)

    out = pl.pallas_call(
        _net_kernel,
        out_shape=jax.ShapeDtypeStruct((N // block_n, block_n, FC2_OUT), jnp.float32),
        grid=(N // block_n,),
        in_specs=[
            pl.BlockSpec((block_n * H1 * H1, C1_K * C1_K), lambda i: (i, 0)),
            pl.BlockSpec((C1_K * C1_K, C1_OUT), lambda i: (0, 0)),
            pl.BlockSpec((1, C1_OUT), lambda i: (0, 0)),
            pl.BlockSpec((C2_K * C2_K, C1_OUT, C2_OUT), lambda i: (0, 0, 0)),
            pl.BlockSpec((1, C2_OUT), lambda i: (0, 0)),
            pl.BlockSpec((P2 * P2, C2_OUT, FC1_OUT), lambda i: (0, 0, 0)),
            pl.BlockSpec((1, FC1_OUT), lambda i: (0, 0)),
            pl.BlockSpec((FC1_OUT, FC2_OUT), lambda i: (0, 0)),
            pl.BlockSpec((1, FC2_OUT), lambda i: (0, 0)),
        ],
        out_specs=pl.BlockSpec((1, block_n, FC2_OUT), lambda i: (i, 0, 0)),
        scratch_shapes=[
            pltpu.VMEM((block_n, H1, H1, C1_OUT), jnp.float32),   # conv1 pre-pool
            pltpu.VMEM((block_n, P1, P1, C1_OUT), jnp.float32),   # conv1 pooled
            pltpu.VMEM((block_n, H2, H2, C2_OUT), jnp.float32),   # conv2 pre-pool
            pltpu.VMEM((block_n, P2, P2, C2_OUT), jnp.float32),   # conv2 pooled
        ],
        compiler_params=pltpu.CompilerParams(
            dimension_semantics=("parallel",),
            vmem_limit_bytes=32 * 1024 * 1024,
        ),
    )(patches, p["w1"], p["b1"], p["w2"], p["b2"],
      p["fc1w"], p["fc1b"], p["fc2w"], p["fc2b"])
    return out.reshape(N, FC2_OUT)


def init_params(key):
    """Deterministic synthetic parameters with PyTorch-convention shapes."""
    ks = jax.random.split(key, 8)
    s = 0.1
    return {
        "conv1_w": s * jax.random.normal(ks[0], (20, 1, 5, 5), jnp.float32),
        "conv1_b": s * jax.random.normal(ks[1], (20,), jnp.float32),
        "conv2_w": s * jax.random.normal(ks[2], (64, 20, 5, 5), jnp.float32),
        "conv2_b": s * jax.random.normal(ks[3], (64,), jnp.float32),
        "fc1_w": s * jax.random.normal(ks[4], (600, 64 * 4 * 4), jnp.float32),
        "fc1_b": s * jax.random.normal(ks[5], (600,), jnp.float32),
        "fc2_w": s * jax.random.normal(ks[6], (10, 600), jnp.float32),
        "fc2_b": s * jax.random.normal(ks[7], (10,), jnp.float32),
    }


def reference_forward(x, params):
    """Pure-JAX (XLA) reference matching the PyTorch module exactly."""
    y = lax.conv_general_dilated(x, params["conv1_w"], (1, 1), "VALID",
                                 dimension_numbers=("NCHW", "OIHW", "NCHW"))
    y = jnp.maximum(y + params["conv1_b"].reshape(1, -1, 1, 1), 0.0)
    y = lax.reduce_window(y, -jnp.inf, lax.max, (1, 1, 2, 2), (1, 1, 2, 2), "VALID")
    y = lax.conv_general_dilated(y, params["conv2_w"], (1, 1), "VALID",
                                 dimension_numbers=("NCHW", "OIHW", "NCHW"))
    y = jnp.maximum(y + params["conv2_b"].reshape(1, -1, 1, 1), 0.0)
    y = lax.reduce_window(y, -jnp.inf, lax.max, (1, 1, 2, 2), (1, 1, 2, 2), "VALID")
    y = y.reshape(y.shape[0], -1)
    y = jnp.maximum(y @ params["fc1_w"].T + params["fc1_b"], 0.0)
    return y @ params["fc2_w"].T + params["fc2_b"]


if __name__ == "__main__":
    key = jax.random.PRNGKey(0)
    pkey, xkey = jax.random.split(key)
    params = init_params(pkey)
    prepared = prepare_params(params)          # weight re-layout done once

    # PyTorch NCHW input; 28x28 is required by the 64*4*4 flatten in forward().
    x = jax.random.normal(xkey, (8, 1, 28, 28), jnp.float32)

    out = jax.block_until_ready(net_forward(x, prepared, block_n=2))
    assert out.shape == (8, 10) and out.dtype == jnp.float32

    ref = reference_forward(x, params)
    np.testing.assert_allclose(np.asarray(out), np.asarray(ref), rtol=2e-3, atol=2e-3)

    print("KERNEL_OK")
</pallas_src>

<mosaic_0001>
module attributes {stable_mosaic.version = 11 : i64} {
  func.func @_net_kernel(%arg0: i32, %arg1: memref<1152x25xf32, #tpu.memory_space<vmem>>, %arg2: memref<25x20xf32, #tpu.memory_space<vmem>>, %arg3: memref<1x20xf32, #tpu.memory_space<vmem>>, %arg4: memref<25x20x64xf32, #tpu.memory_space<vmem>>, %arg5: memref<1x64xf32, #tpu.memory_space<vmem>>, %arg6: memref<16x64x600xf32, #tpu.memory_space<vmem>>, %arg7: memref<1x600xf32, #tpu.memory_space<vmem>>, %arg8: memref<600x10xf32, #tpu.memory_space<vmem>>, %arg9: memref<1x10xf32, #tpu.memory_space<vmem>>, %arg10: memref<1x2x10xf32, #tpu.memory_space<vmem>>, %arg11: memref<2x24x24x20xf32, #tpu.memory_space<vmem>>, %arg12: memref<2x12x12x20xf32, #tpu.memory_space<vmem>>, %arg13: memref<2x8x8x64xf32, #tpu.memory_space<vmem>>, %arg14: memref<2x4x4x64xf32, #tpu.memory_space<vmem>>) attributes {dimension_semantics = [#tpu.dimension_semantics<parallel>], iteration_bounds = array<i64: 4>, scalar_prefetch = 0 : i64, scratch_operands = 4 : i64, tpu.core_type = #tpu.core_type<tc>, window_params = [{transform_indices = @transform_0, window_bounds = array<i64: 1152, 25>}, {pipeline_mode = #tpu.pipeline_mode<synchronous>, transform_indices = @transform_1, window_bounds = array<i64: 25, 20>}, {pipeline_mode = #tpu.pipeline_mode<synchronous>, transform_indices = @transform_2, window_bounds = array<i64: 1, 20>}, {pipeline_mode = #tpu.pipeline_mode<synchronous>, transform_indices = @transform_3, window_bounds = array<i64: 25, 20, 64>}, {pipeline_mode = #tpu.pipeline_mode<synchronous>, transform_indices = @transform_4, window_bounds = array<i64: 1, 64>}, {pipeline_mode = #tpu.pipeline_mode<synchronous>, transform_indices = @transform_5, window_bounds = array<i64: 16, 64, 600>}, {pipeline_mode = #tpu.pipeline_mode<synchronous>, transform_indices = @transform_6, window_bounds = array<i64: 1, 600>}, {pipeline_mode = #tpu.pipeline_mode<synchronous>, transform_indices = @transform_7, window_bounds = array<i64: 600, 10>}, {pipeline_mode = #tpu.pipeline_mode<synchronous>, transform_indices = @transform_8, window_bounds = array<i64: 1, 10>}, {transform_indices = @transform_9, window_bounds = array<i64: 1, 2, 10>}]} {
    %c0 = arith.constant 0 : index
    %c0_0 = arith.constant 0 : index
    %0 = vector.load %arg1[%c0, %c0_0] : memref<1152x25xf32, #tpu.memory_space<vmem>>, vector<1152x25xf32>
    %c0_1 = arith.constant 0 : index
    %c0_2 = arith.constant 0 : index
    %1 = vector.load %arg2[%c0_1, %c0_2] : memref<25x20xf32, #tpu.memory_space<vmem>>, vector<25x20xf32>
    %cst = arith.constant dense<0.000000e+00> : vector<1152x20xf32>
    %2 = tpu.matmul %0, %1, %cst {dimension_numbers = #tpu.dot_dimension_numbers<[1], [0], [0], [1], [0, 0, 1, 1], [], []>} : vector<1152x25xf32>, vector<25x20xf32>, vector<1152x20xf32> -> vector<1152x20xf32>
    %c0_3 = arith.constant 0 : index
    %c0_4 = arith.constant 0 : index
    %3 = vector.load %arg3[%c0_3, %c0_4] : memref<1x20xf32, #tpu.memory_space<vmem>>, vector<1x20xf32>
    %4 = vector.broadcast %3 : vector<1x20xf32> to vector<1152x20xf32>
    %5 = arith.addf %2, %4 : vector<1152x20xf32>
    %cst_5 = arith.constant 0.000000e+00 : f32
    %6 = vector.broadcast %cst_5 : f32 to vector<1152x20xf32>
    %7 = arith.maximumf %5, %6 : vector<1152x20xf32>
    %8 = vector.shape_cast %7 : vector<1152x20xf32> to vector<2x24x24x20xf32>
    %c0_6 = arith.constant 0 : index
    %c0_7 = arith.constant 0 : index
    %c0_8 = arith.constant 0 : index
    %c0_9 = arith.constant 0 : index
    %9 = vector.load %arg11[%c0_6, %c0_7, %c0_8, %c0_9] : memref<2x24x24x20xf32, #tpu.memory_space<vmem>>, vector<2x24x24x20xf32>
    tpu.vector_store %arg11[%c0_6, %c0_7, %c0_8, %c0_9], %8 {strides = array<i32>} : memref<2x24x24x20xf32, #tpu.memory_space<vmem>>, vector<2x24x24x20xf32>,
    %c0_10 = arith.constant 0 : index
    %c0_11 = arith.constant 0 : index
    %c0_12 = arith.constant 0 : index
    %c0_13 = arith.constant 0 : index
    %10 = tpu.strided_load %arg11[%c0_10, %c0_11, %c0_12, %c0_13] {strides = array<i32: 1, 1, 2, 1>} : memref<2x24x24x20xf32, #tpu.memory_space<vmem>>, vector<2x24x12x20xf32>
    %c0_14 = arith.constant 0 : index
    %c0_15 = arith.constant 0 : index
    %c1 = arith.constant 1 : index
    %c0_16 = arith.constant 0 : index
    %11 = tpu.strided_load %arg11[%c0_14, %c0_15, %c1, %c0_16] {strides = array<i32: 1, 1, 2, 1>} : memref<2x24x24x20xf32, #tpu.memory_space<vmem>>, vector<2x24x12x20xf32>
    %12 = arith.maximumf %10, %11 : vector<2x24x12x20xf32>
    %13 = vector.shape_cast %12 : vector<2x24x12x20xf32> to vector<2x12x2x12x20xf32>
    %cst_17 = arith.constant dense<0xFF800000> : vector<2x12x12x20xf32>
    %14 = vector.multi_reduction <maximumf>, %13, %cst_17 [2] : vector<2x12x2x12x20xf32> to vector<2x12x12x20xf32>
    %c0_18 = arith.constant 0 : index
    %c0_19 = arith.constant 0 : index
    %c0_20 = arith.constant 0 : index
    %c0_21 = arith.constant 0 : index
    %15 = vector.load %arg12[%c0_18, %c0_19, %c0_20, %c0_21] : memref<2x12x12x20xf32, #tpu.memory_space<vmem>>, vector<2x12x12x20xf32>
    tpu.vector_store %arg12[%c0_18, %c0_19, %c0_20, %c0_21], %14 {strides = array<i32>} : memref<2x12x12x20xf32, #tpu.memory_space<vmem>>, vector<2x12x12x20xf32>,
    %cst_22 = arith.constant 0.000000e+00 : f32
    %16 = vector.broadcast %cst_22 : f32 to vector<128x64xf32>
    %c0_23 = arith.constant 0 : index
    %c0_24 = arith.constant 0 : index
    %c0_25 = arith.constant 0 : index
    %c0_26 = arith.constant 0 : index
    %17 = vector.load %arg12[%c0_23, %c0_24, %c0_25, %c0_26] : memref<2x12x12x20xf32, #tpu.memory_space<vmem>>, vector<2x8x8x20xf32>
    %18 = vector.shape_cast %17 : vector<2x8x8x20xf32> to vector<128x20xf32>
    %c0_27 = arith.constant 0 : index
    %c0_28 = arith.constant 0 : index
    %c0_29 = arith.constant 0 : index
    %19 = vector.load %arg4[%c0_27, %c0_28, %c0_29] : memref<25x20x64xf32, #tpu.memory_space<vmem>>, vector<1x20x64xf32>
    %20 = vector.shape_cast %19 : vector<1x20x64xf32> to vector<20x64xf32>
    %cst_30 = arith.constant dense<0.000000e+00> : vector<128x64xf32>
    %21 = tpu.matmul %18, %20, %cst_30 {dimension_numbers = #tpu.dot_dimension_numbers<[1], [0], [0], [1], [0, 0, 1, 1], [], []>} : vector<128x20xf32>, vector<20x64xf32>, vector<128x64xf32> -> vector<128x64xf32>
    %22 = arith.addf %16, %21 : vector<128x64xf32>
    %c0_31 = arith.constant 0 : index
    %c0_32 = arith.constant 0 : index
    %c1_33 = arith.constant 1 : index
    %c0_34 = arith.constant 0 : index
    %23 = vector.load %arg12[%c0_31, %c0_32, %c1_33, %c0_34] : memref<2x12x12x20xf32, #tpu.memory_space<vmem>>, vector<2x8x8x20xf32>
    %24 = vector.shape_cast %23 : vector<2x8x8x20xf32> to vector<128x20xf32>
    %c1_35 = arith.constant 1 : index
    %c0_36 = arith.constant 0 : index
    %c0_37 = arith.constant 0 : index
    %25 = vector.load %arg4[%c1_35, %c0_36, %c0_37] : memref<25x20x64xf32, #tpu.memory_space<vmem>>, vector<1x20x64xf32>
    %26 = vector.shape_cast %25 : vector<1x20x64xf32> to vector<20x64xf32>
    %cst_38 = arith.constant dense<0.000000e+00> : vector<128x64xf32>
    %27 = tpu.matmul %24, %26, %cst_38 {dimension_numbers = #tpu.dot_dimension_numbers<[1], [0], [0], [1], [0, 0, 1, 1], [], []>} : vector<128x20xf32>, vector<20x64xf32>, vector<128x64xf32> -> vector<128x64xf32>
    %28 = arith.addf %22, %27 : vector<128x64xf32>
    %c0_39 = arith.constant 0 : index
    %c0_40 = arith.constant 0 : index
    %c2 = arith.constant 2 : index
    %c0_41 = arith.constant 0 : index
    %29 = vector.load %arg12[%c0_39, %c0_40, %c2, %c0_41] : memref<2x12x12x20xf32, #tpu.memory_space<vmem>>, vector<2x8x8x20xf32>
    %30 = vector.shape_cast %29 : vector<2x8x8x20xf32> to vector<128x20xf32>
    %c2_42 = arith.constant 2 : index
    %c0_43 = arith.constant 0 : index
    %c0_44 = arith.constant 0 : index
    %31 = vector.load %arg4[%c2_42, %c0_43, %c0_44] : memref<25x20x64xf32, #tpu.memory_space<vmem>>, vector<1x20x64xf32>
    %32 = vector.shape_cast %31 : vector<1x20x64xf32> to vector<20x64xf32>
    %cst_45 = arith.constant dense<0.000000e+00> : vector<128x64xf32>
    %33 = tpu.matmul %30, %32, %cst_45 {dimension_numbers = #tpu.dot_dimension_numbers<[1], [0], [0], [1], [0, 0, 1, 1], [], []>} : vector<128x20xf32>, vector<20x64xf32>, vector<128x64xf32> -> vector<128x64xf32>
    %34 = arith.addf %28, %33 : vector<128x64xf32>
    %c0_46 = arith.constant 0 : index
    %c0_47 = arith.constant 0 : index
    %c3 = arith.constant 3 : index
    %c0_48 = arith.constant 0 : index
    %35 = vector.load %arg12[%c0_46, %c0_47, %c3, %c0_48] : memref<2x12x12x20xf32, #tpu.memory_space<vmem>>, vector<2x8x8x20xf32>
    %36 = vector.shape_cast %35 : vector<2x8x8x20xf32> to vector<128x20xf32>
    %c3_49 = arith.constant 3 : index
    %c0_50 = arith.constant 0 : index
    %c0_51 = arith.constant 0 : index
    %37 = vector.load %arg4[%c3_49, %c0_50, %c0_51] : memref<25x20x64xf32, #tpu.memory_space<vmem>>, vector<1x20x64xf32>
    %38 = vector.shape_cast %37 : vector<1x20x64xf32> to vector<20x64xf32>
    %cst_52 = arith.constant dense<0.000000e+00> : vector<128x64xf32>
    %39 = tpu.matmul %36, %38, %cst_52 {dimension_numbers = #tpu.dot_dimension_numbers<[1], [0], [0], [1], [0, 0, 1, 1], [], []>} : vector<128x20xf32>, vector<20x64xf32>, vector<128x64xf32> -> vector<128x64xf32>
    %40 = arith.addf %34, %39 : vector<128x64xf32>
    %c0_53 = arith.constant 0 : index
    %c0_54 = arith.constant 0 : index
    %c4 = arith.constant 4 : index
    %c0_55 = arith.constant 0 : index
    %41 = vector.load %arg12[%c0_53, %c0_54, %c4, %c0_55] : memref<2x12x12x20xf32, #tpu.memory_space<vmem>>, vector<2x8x8x20xf32>
    %42 = vector.shape_cast %41 : vector<2x8x8x20xf32> to vector<128x20xf32>
    %c4_56 = arith.constant 4 : index
    %c0_57 = arith.constant 0 : index
    %c0_58 = arith.constant 0 : index
    %43 = vector.load %arg4[%c4_56, %c0_57, %c0_58] : memref<25x20x64xf32, #tpu.memory_space<vmem>>, vector<1x20x64xf32>
    %44 = vector.shape_cast %43 : vector<1x20x64xf32> to vector<20x64xf32>
    %cst_59 = arith.constant dense<0.000000e+00> : vector<128x64xf32>
    %45 = tpu.matmul %42, %44, %cst_59 {dimension_numbers = #tpu.dot_dimension_numbers<[1], [0], [0], [1], [0, 0, 1, 1], [], []>} : vector<128x20xf32>, vector<20x64xf32>, vector<128x64xf32> -> vector<128x64xf32>
    %46 = arith.addf %40, %45 : vector<128x64xf32>
    %c0_60 = arith.constant 0 : index
    %c1_61 = arith.constant 1 : index
    %c0_62 = arith.constant 0 : index
    %c0_63 = arith.constant 0 : index
    %47 = vector.load %arg12[%c0_60, %c1_61, %c0_62, %c0_63] : memref<2x12x12x20xf32, #tpu.memory_space<vmem>>, vector<2x8x8x20xf32>
    %48 = vector.shape_cast %47 : vector<2x8x8x20xf32> to vector<128x20xf32>
    %c5 = arith.constant 5 : index
    %c0_64 = arith.constant 0 : index
    %c0_65 = arith.constant 0 : index
    %49 = vector.load %arg4[%c5, %c0_64, %c0_65] : memref<25x20x64xf32, #tpu.memory_space<vmem>>, vector<1x20x64xf32>
    %50 = vector.shape_cast %49 : vector<1x20x64xf32> to vector<20x64xf32>
    %cst_66 = arith.constant dense<0.000000e+00> : vector<128x64xf32>
    %51 = tpu.matmul %48, %50, %cst_66 {dimension_numbers = #tpu.dot_dimension_numbers<[1], [0], [0], [1], [0, 0, 1, 1], [], []>} : vector<128x20xf32>, vector<20x64xf32>, vector<128x64xf32> -> vector<128x64xf32>
    %52 = arith.addf %46, %51 : vector<128x64xf32>
    %c0_67 = arith.constant 0 : index
    %c1_68 = arith.constant 1 : index
    %c1_69 = arith.constant 1 : index
    %c0_70 = arith.constant 0 : index
    %53 = vector.load %arg12[%c0_67, %c1_68, %c1_69, %c0_70] : memref<2x12x12x20xf32, #tpu.memory_space<vmem>>, vector<2x8x8x20xf32>
    %54 = vector.shape_cast %53 : vector<2x8x8x20xf32> to vector<128x20xf32>
    %c6 = arith.constant 6 : index
    %c0_71 = arith.constant 0 : index
    %c0_72 = arith.constant 0 : index
    %55 = vector.load %arg4[%c6, %c0_71, %c0_72] : memref<25x20x64xf32, #tpu.memory_space<vmem>>, vector<1x20x64xf32>
    %56 = vector.shape_cast %55 : vector<1x20x64xf32> to vector<20x64xf32>
    %cst_73 = arith.constant dense<0.000000e+00> : vector<128x64xf32>
    %57 = tpu.matmul %54, %56, %cst_73 {dimension_numbers = #tpu.dot_dimension_numbers<[1], [0], [0], [1], [0, 0, 1, 1], [], []>} : vector<128x20xf32>, vector<20x64xf32>, vector<128x64xf32> -> vector<128x64xf32>
    %58 = arith.addf %52, %57 : vector<128x64xf32>
    %c0_74 = arith.constant 0 : index
    %c1_75 = arith.constant 1 : index
    %c2_76 = arith.constant 2 : index
    %c0_77 = arith.constant 0 : index
    %59 = vector.load %arg12[%c0_74, %c1_75, %c2_76, %c0_77] : memref<2x12x12x20xf32, #tpu.memory_space<vmem>>, vector<2x8x8x20xf32>
    %60 = vector.shape_cast %59 : vector<2x8x8x20xf32> to vector<128x20xf32>
    %c7 = arith.constant 7 : index
    %c0_78 = arith.constant 0 : index
    %c0_79 = arith.constant 0 : index
    %61 = vector.load %arg4[%c7, %c0_78, %c0_79] : memref<25x20x64xf32, #tpu.memory_space<vmem>>, vector<1x20x64xf32>
    %62 = vector.shape_cast %61 : vector<1x20x64xf32> to vector<20x64xf32>
    %cst_80 = arith.constant dense<0.000000e+00> : vector<128x64xf32>
    %63 = tpu.matmul %60, %62, %cst_80 {dimension_numbers = #tpu.dot_dimension_numbers<[1], [0], [0], [1], [0, 0, 1, 1], [], []>} : vector<128x20xf32>, vector<20x64xf32>, vector<128x64xf32> -> vector<128x64xf32>
    %64 = arith.addf %58, %63 : vector<128x64xf32>
    %c0_81 = arith.constant 0 : index
    %c1_82 = arith.constant 1 : index
    %c3_83 = arith.constant 3 : index
    %c0_84 = arith.constant 0 : index
    %65 = vector.load %arg12[%c0_81, %c1_82, %c3_83, %c0_84] : memref<2x12x12x20xf32, #tpu.memory_space<vmem>>, vector<2x8x8x20xf32>
    %66 = vector.shape_cast %65 : vector<2x8x8x20xf32> to vector<128x20xf32>
    %c8 = arith.constant 8 : index
    %c0_85 = arith.constant 0 : index
    %c0_86 = arith.constant 0 : index
    %67 = vector.load %arg4[%c8, %c0_85, %c0_86] : memref<25x20x64xf32, #tpu.memory_space<vmem>>, vector<1x20x64xf32>
    %68 = vector.shape_cast %67 : vector<1x20x64xf32> to vector<20x64xf32>
    %cst_87 = arith.constant dense<0.000000e+00> : vector<128x64xf32>
    %69 = tpu.matmul %66, %68, %cst_87 {dimension_numbers = #tpu.dot_dimension_numbers<[1], [0], [0], [1], [0, 0, 1, 1], [], []>} : vector<128x20xf32>, vector<20x64xf32>, vector<128x64xf32> -> vector<128x64xf32>
    %70 = arith.addf %64, %69 : vector<128x64xf32>
    %c0_88 = arith.constant 0 : index
    %c1_89 = arith.constant 1 : index
    %c4_90 = arith.constant 4 : index
    %c0_91 = arith.constant 0 : index
    %71 = vector.load %arg12[%c0_88, %c1_89, %c4_90, %c0_91] : memref<2x12x12x20xf32, #tpu.memory_space<vmem>>, vector<2x8x8x20xf32>
    %72 = vector.shape_cast %71 : vector<2x8x8x20xf32> to vector<128x20xf32>
    %c9 = arith.constant 9 : index
    %c0_92 = arith.constant 0 : index
    %c0_93 = arith.constant 0 : index
    %73 = vector.load %arg4[%c9, %c0_92, %c0_93] : memref<25x20x64xf32, #tpu.memory_space<vmem>>, vector<1x20x64xf32>
    %74 = vector.shape_cast %73 : vector<1x20x64xf32> to vector<20x64xf32>
    %cst_94 = arith.constant dense<0.000000e+00> : vector<128x64xf32>
    %75 = tpu.matmul %72, %74, %cst_94 {dimension_numbers = #tpu.dot_dimension_numbers<[1], [0], [0], [1], [0, 0, 1, 1], [], []>} : vector<128x20xf32>, vector<20x64xf32>, vector<128x64xf32> -> vector<128x64xf32>
    %76 = arith.addf %70, %75 : vector<128x64xf32>
    %c0_95 = arith.constant 0 : index
    %c2_96 = arith.constant 2 : index
    %c0_97 = arith.constant 0 : index
    %c0_98 = arith.constant 0 : index
    %77 = vector.load %arg12[%c0_95, %c2_96, %c0_97, %c0_98] : memref<2x12x12x20xf32, #tpu.memory_space<vmem>>, vector<2x8x8x20xf32>
    %78 = vector.shape_cast %77 : vector<2x8x8x20xf32> to vector<128x20xf32>
    %c10 = arith.constant 10 : index
    %c0_99 = arith.constant 0 : index
    %c0_100 = arith.constant 0 : index
    %79 = vector.load %arg4[%c10, %c0_99, %c0_100] : memref<25x20x64xf32, #tpu.memory_space<vmem>>, vector<1x20x64xf32>
    %80 = vector.shape_cast %79 : vector<1x20x64xf32> to vector<20x64xf32>
    %cst_101 = arith.constant dense<0.000000e+00> : vector<128x64xf32>
    %81 = tpu.matmul %78, %80, %cst_101 {dimension_numbers = #tpu.dot_dimension_numbers<[1], [0], [0], [1], [0, 0, 1, 1], [], []>} : vector<128x20xf32>, vector<20x64xf32>, vector<128x64xf32> -> vector<128x64xf32>
    %82 = arith.addf %76, %81 : vector<128x64xf32>
    %c0_102 = arith.constant 0 : index
    %c2_103 = arith.constant 2 : index
    %c1_104 = arith.constant 1 : index
    %c0_105 = arith.constant 0 : index
    %83 = vector.load %arg12[%c0_102, %c2_103, %c1_104, %c0_105] : memref<2x12x12x20xf32, #tpu.memory_space<vmem>>, vector<2x8x8x20xf32>
    %84 = vector.shape_cast %83 : vector<2x8x8x20xf32> to vector<128x20xf32>
    %c11 = arith.constant 11 : index
    %c0_106 = arith.constant 0 : index
    %c0_107 = arith.constant 0 : index
    %85 = vector.load %arg4[%c11, %c0_106, %c0_107] : memref<25x20x64xf32, #tpu.memory_space<vmem>>, vector<1x20x64xf32>
    %86 = vector.shape_cast %85 : vector<1x20x64xf32> to vector<20x64xf32>
    %cst_108 = arith.constant dense<0.000000e+00> : vector<128x64xf32>
    %87 = tpu.matmul %84, %86, %cst_108 {dimension_numbers = #tpu.dot_dimension_numbers<[1], [0], [0], [1], [0, 0, 1, 1], [], []>} : vector<128x20xf32>, vector<20x64xf32>, vector<128x64xf32> -> vector<128x64xf32>
    %88 = arith.addf %82, %87 : vector<128x64xf32>
    %c0_109 = arith.constant 0 : index
    %c2_110 = arith.constant 2 : index
    %c2_111 = arith.constant 2 : index
    %c0_112 = arith.constant 0 : index
    %89 = vector.load %arg12[%c0_109, %c2_110, %c2_111, %c0_112] : memref<2x12x12x20xf32, #tpu.memory_space<vmem>>, vector<2x8x8x20xf32>
    %90 = vector.shape_cast %89 : vector<2x8x8x20xf32> to vector<128x20xf32>
    %c12 = arith.constant 12 : index
    %c0_113 = arith.constant 0 : index
    %c0_114 = arith.constant 0 : index
    %91 = vector.load %arg4[%c12, %c0_113, %c0_114] : memref<25x20x64xf32, #tpu.memory_space<vmem>>, vector<1x20x64xf32>
    %92 = vector.shape_cast %91 : vector<1x20x64xf32> to vector<20x64xf32>
    %cst_115 = arith.constant dense<0.000000e+00> : vector<128x64xf32>
    %93 = tpu.matmul %90, %92, %cst_115 {dimension_numbers = #tpu.dot_dimension_numbers<[1], [0], [0], [1], [0, 0, 1, 1], [], []>} : vector<128x20xf32>, vector<20x64xf32>, vector<128x64xf32> -> vector<128x64xf32>
    %94 = arith.addf %88, %93 : vector<128x64xf32>
    %c0_116 = arith.constant 0 : index
    %c2_117 = arith.constant 2 : index
    %c3_118 = arith.constant 3 : index
    %c0_119 = arith.constant 0 : index
    %95 = vector.load %arg12[%c0_116, %c2_117, %c3_118, %c0_119] : memref<2x12x12x20xf32, #tpu.memory_space<vmem>>, vector<2x8x8x20xf32>
    %96 = vector.shape_cast %95 : vector<2x8x8x20xf32> to vector<128x20xf32>
    %c13 = arith.constant 13 : index
    %c0_120 = arith.constant 0 : index
    %c0_121 = arith.constant 0 : index
    %97 = vector.load %arg4[%c13, %c0_120, %c0_121] : memref<25x20x64xf32, #tpu.memory_space<vmem>>, vector<1x20x64xf32>
    %98 = vector.shape_cast %97 : vector<1x20x64xf32> to vector<20x64xf32>
    %cst_122 = arith.constant dense<0.000000e+00> : vector<128x64xf32>
    %99 = tpu.matmul %96, %98, %cst_122 {dimension_numbers = #tpu.dot_dimension_numbers<[1], [0], [0], [1], [0, 0, 1, 1], [], []>} : vector<128x20xf32>, vector<20x64xf32>, vector<128x64xf32> -> vector<128x64xf32>
    %100 = arith.addf %94, %99 : vector<128x64xf32>
    %c0_123 = arith.constant 0 : index
    %c2_124 = arith.constant 2 : index
    %c4_125 = arith.constant 4 : index
    %c0_126 = arith.constant 0 : index
    %101 = vector.load %arg12[%c0_123, %c2_124, %c4_125, %c0_126] : memref<2x12x12x20xf32, #tpu.memory_space<vmem>>, vector<2x8x8x20xf32>
    %102 = vector.shape_cast %101 : vector<2x8x8x20xf32> to vector<128x20xf32>
    %c14 = arith.constant 14 : index
    %c0_127 = arith.constant 0 : index
    %c0_128 = arith.constant 0 : index
    %103 = vector.load %arg4[%c14, %c0_127, %c0_128] : memref<25x20x64xf32, #tpu.memory_space<vmem>>, vector<1x20x64xf32>
    %104 = vector.shape_cast %103 : vector<1x20x64xf32> to vector<20x64xf32>
    %cst_129 = arith.constant dense<0.000000e+00> : vector<128x64xf32>
    %105 = tpu.matmul %102, %104, %cst_129 {dimension_numbers = #tpu.dot_dimension_numbers<[1], [0], [0], [1], [0, 0, 1, 1], [], []>} : vector<128x20xf32>, vector<20x64xf32>, vector<128x64xf32> -> vector<128x64xf32>
    %106 = arith.addf %100, %105 : vector<128x64xf32>
    %c0_130 = arith.constant 0 : index
    %c3_131 = arith.constant 3 : index
    %c0_132 = arith.constant 0 : index
    %c0_133 = arith.constant 0 : index
    %107 = vector.load %arg12[%c0_130, %c3_131, %c0_132, %c0_133] : memref<2x12x12x20xf32, #tpu.memory_space<vmem>>, vector<2x8x8x20xf32>
    %108 = vector.shape_cast %107 : vector<2x8x8x20xf32> to vector<128x20xf32>
    %c15 = arith.constant 15 : index
    %c0_134 = arith.constant 0 : index
    %c0_135 = arith.constant 0 : index
    %109 = vector.load %arg4[%c15, %c0_134, %c0_135] : memref<25x20x64xf32, #tpu.memory_space<vmem>>, vector<1x20x64xf32>
    %110 = vector.shape_cast %109 : vector<1x20x64xf32> to vector<20x64xf32>
    %cst_136 = arith.constant dense<0.000000e+00> : vector<128x64xf32>
    %111 = tpu.matmul %108, %110, %cst_136 {dimension_numbers = #tpu.dot_dimension_numbers<[1], [0], [0], [1], [0, 0, 1, 1], [], []>} : vector<128x20xf32>, vector<20x64xf32>, vector<128x64xf32> -> vector<128x64xf32>
    %112 = arith.addf %106, %111 : vector<128x64xf32>
    %c0_137 = arith.constant 0 : index
    %c3_138 = arith.constant 3 : index
    %c1_139 = arith.constant 1 : index
    %c0_140 = arith.constant 0 : index
    %113 = vector.load %arg12[%c0_137, %c3_138, %c1_139, %c0_140] : memref<2x12x12x20xf32, #tpu.memory_space<vmem>>, vector<2x8x8x20xf32>
    %114 = vector.shape_cast %113 : vector<2x8x8x20xf32> to vector<128x20xf32>
    %c16 = arith.constant 16 : index
    %c0_141 = arith.constant 0 : index
    %c0_142 = arith.constant 0 : index
    %115 = vector.load %arg4[%c16, %c0_141, %c0_142] : memref<25x20x64xf32, #tpu.memory_space<vmem>>, vector<1x20x64xf32>
    %116 = vector.shape_cast %115 : vector<1x20x64xf32> to vector<20x64xf32>
    %cst_143 = arith.constant dense<0.000000e+00> : vector<128x64xf32>
    %117 = tpu.matmul %114, %116, %cst_143 {dimension_numbers = #tpu.dot_dimension_numbers<[1], [0], [0], [1], [0, 0, 1, 1], [], []>} : vector<128x20xf32>, vector<20x64xf32>, vector<128x64xf32> -> vector<128x64xf32>
    %118 = arith.addf %112, %117 : vector<128x64xf32>
    %c0_144 = arith.constant 0 : index
    %c3_145 = arith.constant 3 : index
    %c2_146 = arith.constant 2 : index
    %c0_147 = arith.constant 0 : index
    %119 = vector.load %arg12[%c0_144, %c3_145, %c2_146, %c0_147] : memref<2x12x12x20xf32, #tpu.memory_space<vmem>>, vector<2x8x8x20xf32>
    %120 = vector.shape_cast %119 : vector<2x8x8x20xf32> to vector<128x20xf32>
    %c17 = arith.constant 17 : index
    %c0_148 = arith.constant 0 : index
    %c0_149 = arith.constant 0 : index
    %121 = vector.load %arg4[%c17, %c0_148, %c0_149] : memref<25x20x64xf32, #tpu.memory_space<vmem>>, vector<1x20x64xf32>
    %122 = vector.shape_cast %121 : vector<1x20x64xf32> to vector<20x64xf32>
    %cst_150 = arith.constant dense<0.000000e+00> : vector<128x64xf32>
    %123 = tpu.matmul %120, %122, %cst_150 {dimension_numbers = #tpu.dot_dimension_numbers<[1], [0], [0], [1], [0, 0, 1, 1], [], []>} : vector<128x20xf32>, vector<20x64xf32>, vector<128x64xf32> -> vector<128x64xf32>
    %124 = arith.addf %118, %123 : vector<128x64xf32>
    %c0_151 = arith.constant 0 : index
    %c3_152 = arith.constant 3 : index
    %c3_153 = arith.constant 3 : index
    %c0_154 = arith.constant 0 : index
    %125 = vector.load %arg12[%c0_151, %c3_152, %c3_153, %c0_154] : memref<2x12x12x20xf32, #tpu.memory_space<vmem>>, vector<2x8x8x20xf32>
    %126 = vector.shape_cast %125 : vector<2x8x8x20xf32> to vector<128x20xf32>
    %c18 = arith.constant 18 : index
    %c0_155 = arith.constant 0 : index
    %c0_156 = arith.constant 0 : index
    %127 = vector.load %arg4[%c18, %c0_155, %c0_156] : memref<25x20x64xf32, #tpu.memory_space<vmem>>, vector<1x20x64xf32>
    %128 = vector.shape_cast %127 : vector<1x20x64xf32> to vector<20x64xf32>
    %cst_157 = arith.constant dense<0.000000e+00> : vector<128x64xf32>
    %129 = tpu.matmul %126, %128, %cst_157 {dimension_numbers = #tpu.dot_dimension_numbers<[1], [0], [0], [1], [0, 0, 1, 1], [], []>} : vector<128x20xf32>, vector<20x64xf32>, vector<128x64xf32> -> vector<128x64xf32>
    %130 = arith.addf %124, %129 : vector<128x64xf32>
    %c0_158 = arith.constant 0 : index
    %c3_159 = arith.constant 3 : index
    %c4_160 = arith.constant 4 : index
    %c0_161 = arith.constant 0 : index
    %131 = vector.load %arg12[%c0_158, %c3_159, %c4_160, %c0_161] : memref<2x12x12x20xf32, #tpu.memory_space<vmem>>, vector<2x8x8x20xf32>
    %132 = vector.shape_cast %131 : vector<2x8x8x20xf32> to vector<128x20xf32>
    %c19 = arith.constant 19 : index
    %c0_162 = arith.constant 0 : index
    %c0_163 = arith.constant 0 : index
    %133 = vector.load %arg4[%c19, %c0_162, %c0_163] : memref<25x20x64xf32, #tpu.memory_space<vmem>>, vector<1x20x64xf32>
    %134 = vector.shape_cast %133 : vector<1x20x64xf32> to vector<20x64xf32>
    %cst_164 = arith.constant dense<0.000000e+00> : vector<128x64xf32>
    %135 = tpu.matmul %132, %134, %cst_164 {dimension_numbers = #tpu.dot_dimension_numbers<[1], [0], [0], [1], [0, 0, 1, 1], [], []>} : vector<128x20xf32>, vector<20x64xf32>, vector<128x64xf32> -> vector<128x64xf32>
    %136 = arith.addf %130, %135 : vector<128x64xf32>
    %c0_165 = arith.constant 0 : index
    %c4_166 = arith.constant 4 : index
    %c0_167 = arith.constant 0 : index
    %c0_168 = arith.constant 0 : index
    %137 = vector.load %arg12[%c0_165, %c4_166, %c0_167, %c0_168] : memref<2x12x12x20xf32, #tpu.memory_space<vmem>>, vector<2x8x8x20xf32>
    %138 = vector.shape_cast %137 : vector<2x8x8x20xf32> to vector<128x20xf32>
    %c20 = arith.constant 20 : index
    %c0_169 = arith.constant 0 : index
    %c0_170 = arith.constant 0 : index
    %139 = vector.load %arg4[%c20, %c0_169, %c0_170] : memref<25x20x64xf32, #tpu.memory_space<vmem>>, vector<1x20x64xf32>
    %140 = vector.shape_cast %139 : vector<1x20x64xf32> to vector<20x64xf32>
    %cst_171 = arith.constant dense<0.000000e+00> : vector<128x64xf32>
    %141 = tpu.matmul %138, %140, %cst_171 {dimension_numbers = #tpu.dot_dimension_numbers<[1], [0], [0], [1], [0, 0, 1, 1], [], []>} : vector<128x20xf32>, vector<20x64xf32>, vector<128x64xf32> -> vector<128x64xf32>
    %142 = arith.addf %136, %141 : vector<128x64xf32>
    %c0_172 = arith.constant 0 : index
    %c4_173 = arith.constant 4 : index
    %c1_174 = arith.constant 1 : index
    %c0_175 = arith.constant 0 : index
    %143 = vector.load %arg12[%c0_172, %c4_173, %c1_174, %c0_175] : memref<2x12x12x20xf32, #tpu.memory_space<vmem>>, vector<2x8x8x20xf32>
    %144 = vector.shape_cast %143 : vector<2x8x8x20xf32> to vector<128x20xf32>
    %c21 = arith.constant 21 : index
    %c0_176 = arith.constant 0 : index
    %c0_177 = arith.constant 0 : index
    %145 = vector.load %arg4[%c21, %c0_176, %c0_177] : memref<25x20x64xf32, #tpu.memory_space<vmem>>, vector<1x20x64xf32>
    %146 = vector.shape_cast %145 : vector<1x20x64xf32> to vector<20x64xf32>
    %cst_178 = arith.constant dense<0.000000e+00> : vector<128x64xf32>
    %147 = tpu.matmul %144, %146, %cst_178 {dimension_numbers = #tpu.dot_dimension_numbers<[1], [0], [0], [1], [0, 0, 1, 1], [], []>} : vector<128x20xf32>, vector<20x64xf32>, vector<128x64xf32> -> vector<128x64xf32>
    %148 = arith.addf %142, %147 : vector<128x64xf32>
    %c0_179 = arith.constant 0 : index
    %c4_180 = arith.constant 4 : index
    %c2_181 = arith.constant 2 : index
    %c0_182 = arith.constant 0 : index
    %149 = vector.load %arg12[%c0_179, %c4_180, %c2_181, %c0_182] : memref<2x12x12x20xf32, #tpu.memory_space<vmem>>, vector<2x8x8x20xf32>
    %150 = vector.shape_cast %149 : vector<2x8x8x20xf32> to vector<128x20xf32>
    %c22 = arith.constant 22 : index
    %c0_183 = arith.constant 0 : index
    %c0_184 = arith.constant 0 : index
    %151 = vector.load %arg4[%c22, %c0_183, %c0_184] : memref<25x20x64xf32, #tpu.memory_space<vmem>>, vector<1x20x64xf32>
    %152 = vector.shape_cast %151 : vector<1x20x64xf32> to vector<20x64xf32>
    %cst_185 = arith.constant dense<0.000000e+00> : vector<128x64xf32>
    %153 = tpu.matmul %150, %152, %cst_185 {dimension_numbers = #tpu.dot_dimension_numbers<[1], [0], [0], [1], [0, 0, 1, 1], [], []>} : vector<128x20xf32>, vector<20x64xf32>, vector<128x64xf32> -> vector<128x64xf32>
    %154 = arith.addf %148, %153 : vector<128x64xf32>
    %c0_186 = arith.constant 0 : index
    %c4_187 = arith.constant 4 : index
    %c3_188 = arith.constant 3 : index
    %c0_189 = arith.constant 0 : index
    %155 = vector.load %arg12[%c0_186, %c4_187, %c3_188, %c0_189] : memref<2x12x12x20xf32, #tpu.memory_space<vmem>>, vector<2x8x8x20xf32>
    %156 = vector.shape_cast %155 : vector<2x8x8x20xf32> to vector<128x20xf32>
    %c23 = arith.constant 23 : index
    %c0_190 = arith.constant 0 : index
    %c0_191 = arith.constant 0 : index
    %157 = vector.load %arg4[%c23, %c0_190, %c0_191] : memref<25x20x64xf32, #tpu.memory_space<vmem>>, vector<1x20x64xf32>
    %158 = vector.shape_cast %157 : vector<1x20x64xf32> to vector<20x64xf32>
    %cst_192 = arith.constant dense<0.000000e+00> : vector<128x64xf32>
    %159 = tpu.matmul %156, %158, %cst_192 {dimension_numbers = #tpu.dot_dimension_numbers<[1], [0], [0], [1], [0, 0, 1, 1], [], []>} : vector<128x20xf32>, vector<20x64xf32>, vector<128x64xf32> -> vector<128x64xf32>
    %160 = arith.addf %154, %159 : vector<128x64xf32>
    %c0_193 = arith.constant 0 : index
    %c4_194 = arith.constant 4 : index
    %c4_195 = arith.constant 4 : index
    %c0_196 = arith.constant 0 : index
    %161 = vector.load %arg12[%c0_193, %c4_194, %c4_195, %c0_196] : memref<2x12x12x20xf32, #tpu.memory_space<vmem>>, vector<2x8x8x20xf32>
    %162 = vector.shape_cast %161 : vector<2x8x8x20xf32> to vector<128x20xf32>
    %c24 = arith.constant 24 : index
    %c0_197 = arith.constant 0 : index
    %c0_198 = arith.constant 0 : index
    %163 = vector.load %arg4[%c24, %c0_197, %c0_198] : memref<25x20x64xf32, #tpu.memory_space<vmem>>, vector<1x20x64xf32>
    %164 = vector.shape_cast %163 : vector<1x20x64xf32> to vector<20x64xf32>
    %cst_199 = arith.constant dense<0.000000e+00> : vector<128x64xf32>
    %165 = tpu.matmul %162, %164, %cst_199 {dimension_numbers = #tpu.dot_dimension_numbers<[1], [0], [0], [1], [0, 0, 1, 1], [], []>} : vector<128x20xf32>, vector<20x64xf32>, vector<128x64xf32> -> vector<128x64xf32>
    %166 = arith.addf %160, %165 : vector<128x64xf32>
    %c0_200 = arith.constant 0 : index
    %c0_201 = arith.constant 0 : index
    %167 = vector.load %arg5[%c0_200, %c0_201] : memref<1x64xf32, #tpu.memory_space<vmem>>, vector<1x64xf32>
    %168 = vector.broadcast %167 : vector<1x64xf32> to vector<128x64xf32>
    %169 = arith.addf %166, %168 : vector<128x64xf32>
    %cst_202 = arith.constant 0.000000e+00 : f32
    %170 = vector.broadcast %cst_202 : f32 to vector<128x64xf32>
    %171 = arith.maximumf %169, %170 : vector<128x64xf32>
    %172 = vector.shape_cast %171 : vector<128x64xf32> to vector<2x8x8x64xf32>
    %c0_203 = arith.constant 0 : index
    %c0_204 = arith.constant 0 : index
    %c0_205 = arith.constant 0 : index
    %c0_206 = arith.constant 0 : index
    %173 = vector.load %arg13[%c0_203, %c0_204, %c0_205, %c0_206] : memref<2x8x8x64xf32, #tpu.memory_space<vmem>>, vector<2x8x8x64xf32>
    tpu.vector_store %arg13[%c0_203, %c0_204, %c0_205, %c0_206], %172 {strides = array<i32>} : memref<2x8x8x64xf32, #tpu.memory_space<vmem>>, vector<2x8x8x64xf32>,
    %c0_207 = arith.constant 0 : index
    %c0_208 = arith.constant 0 : index
    %c0_209 = arith.constant 0 : index
    %c0_210 = arith.constant 0 : index
    %174 = tpu.strided_load %arg13[%c0_207, %c0_208, %c0_209, %c0_210] {strides = array<i32: 1, 1, 2, 1>} : memref<2x8x8x64xf32, #tpu.memory_space<vmem>>, vector<2x8x4x64xf32>
    %c0_211 = arith.constant 0 : index
    %c0_212 = arith.constant 0 : index
    %c1_213 = arith.constant 1 : index
    %c0_214 = arith.constant 0 : index
    %175 = tpu.strided_load %arg13[%c0_211, %c0_212, %c1_213, %c0_214] {strides = array<i32: 1, 1, 2, 1>} : memref<2x8x8x64xf32, #tpu.memory_space<vmem>>, vector<2x8x4x64xf32>
    %176 = arith.maximumf %174, %175 : vector<2x8x4x64xf32>
    %177 = vector.shape_cast %176 : vector<2x8x4x64xf32> to vector<2x4x2x4x64xf32>
    %cst_215 = arith.constant dense<0xFF800000> : vector<2x4x4x64xf32>
    %178 = vector.multi_reduction <maximumf>, %177, %cst_215 [2] : vector<2x4x2x4x64xf32> to vector<2x4x4x64xf32>
    %c0_216 = arith.constant 0 : index
    %c0_217 = arith.constant 0 : index
    %c0_218 = arith.constant 0 : index
    %c0_219 = arith.constant 0 : index
    %179 = vector.load %arg14[%c0_216, %c0_217, %c0_218, %c0_219] : memref<2x4x4x64xf32, #tpu.memory_space<vmem>>, vector<2x4x4x64xf32>
    tpu.vector_store %arg14[%c0_216, %c0_217, %c0_218, %c0_219], %178 {strides = array<i32>} : memref<2x4x4x64xf32, #tpu.memory_space<vmem>>, vector<2x4x4x64xf32>,
    %cst_220 = arith.constant 0.000000e+00 : f32
    %180 = vector.broadcast %cst_220 : f32 to vector<2x600xf32>
    %c0_221 = arith.constant 0 : index
    %c0_222 = arith.constant 0 : index
    %c0_223 = arith.constant 0 : index
    %c0_224 = arith.constant 0 : index
    %181 = vector.load %arg14[%c0_221, %c0_222, %c0_223, %c0_224] : memref<2x4x4x64xf32, #tpu.memory_space<vmem>>, vector<2x1x1x64xf32>
    %182 = vector.shape_cast %181 : vector<2x1x1x64xf32> to vector<2x64xf32>
    %c0_225 = arith.constant 0 : index
    %c0_226 = arith.constant 0 : index
    %c0_227 = arith.constant 0 : index
    %183 = vector.load %arg6[%c0_225, %c0_226, %c0_227] : memref<16x64x600xf32, #tpu.memory_space<vmem>>, vector<1x64x600xf32>
    %184 = vector.shape_cast %183 : vector<1x64x600xf32> to vector<64x600xf32>
    %cst_228 = arith.constant dense<0.000000e+00> : vector<2x600xf32>
    %185 = tpu.matmul %182, %184, %cst_228 {dimension_numbers = #tpu.dot_dimension_numbers<[1], [0], [0], [1], [0, 0, 1, 1], [], []>} : vector<2x64xf32>, vector<64x600xf32>, vector<2x600xf32> -> vector<2x600xf32>
    %186 = arith.addf %180, %185 : vector<2x600xf32>
    %c0_229 = arith.constant 0 : index
    %c0_230 = arith.constant 0 : index
    %c1_231 = arith.constant 1 : index
    %c0_232 = arith.constant 0 : index
    %187 = vector.load %arg14[%c0_229, %c0_230, %c1_231, %c0_232] : memref<2x4x4x64xf32, #tpu.memory_space<vmem>>, vector<2x1x1x64xf32>
    %188 = vector.shape_cast %187 : vector<2x1x1x64xf32> to vector<2x64xf32>
    %c1_233 = arith.constant 1 : index
    %c0_234 = arith.constant 0 : index
    %c0_235 = arith.constant 0 : index
    %189 = vector.load %arg6[%c1_233, %c0_234, %c0_235] : memref<16x64x600xf32, #tpu.memory_space<vmem>>, vector<1x64x600xf32>
    %190 = vector.shape_cast %189 : vector<1x64x600xf32> to vector<64x600xf32>
    %cst_236 = arith.constant dense<0.000000e+00> : vector<2x600xf32>
    %191 = tpu.matmul %188, %190, %cst_236 {dimension_numbers = #tpu.dot_dimension_numbers<[1], [0], [0], [1], [0, 0, 1, 1], [], []>} : vector<2x64xf32>, vector<64x600xf32>, vector<2x600xf32> -> vector<2x600xf32>
    %192 = arith.addf %186, %191 : vector<2x600xf32>
    %c0_237 = arith.constant 0 : index
    %c0_238 = arith.constant 0 : index
    %c2_239 = arith.constant 2 : index
    %c0_240 = arith.constant 0 : index
    %193 = vector.load %arg14[%c0_237, %c0_238, %c2_239, %c0_240] : memref<2x4x4x64xf32, #tpu.memory_space<vmem>>, vector<2x1x1x64xf32>
    %194 = vector.shape_cast %193 : vector<2x1x1x64xf32> to vector<2x64xf32>
    %c2_241 = arith.constant 2 : index
    %c0_242 = arith.constant 0 : index
    %c0_243 = arith.constant 0 : index
    %195 = vector.load %arg6[%c2_241, %c0_242, %c0_243] : memref<16x64x600xf32, #tpu.memory_space<vmem>>, vector<1x64x600xf32>
    %196 = vector.shape_cast %195 : vector<1x64x600xf32> to vector<64x600xf32>
    %cst_244 = arith.constant dense<0.000000e+00> : vector<2x600xf32>
    %197 = tpu.matmul %194, %196, %cst_244 {dimension_numbers = #tpu.dot_dimension_numbers<[1], [0], [0], [1], [0, 0, 1, 1], [], []>} : vector<2x64xf32>, vector<64x600xf32>, vector<2x600xf32> -> vector<2x600xf32>
    %198 = arith.addf %192, %197 : vector<2x600xf32>
    %c0_245 = arith.constant 0 : index
    %c0_246 = arith.constant 0 : index
    %c3_247 = arith.constant 3 : index
    %c0_248 = arith.constant 0 : index
    %199 = vector.load %arg14[%c0_245, %c0_246, %c3_247, %c0_248] : memref<2x4x4x64xf32, #tpu.memory_space<vmem>>, vector<2x1x1x64xf32>
    %200 = vector.shape_cast %199 : vector<2x1x1x64xf32> to vector<2x64xf32>
    %c3_249 = arith.constant 3 : index
    %c0_250 = arith.constant 0 : index
    %c0_251 = arith.constant 0 : index
    %201 = vector.load %arg6[%c3_249, %c0_250, %c0_251] : memref<16x64x600xf32, #tpu.memory_space<vmem>>, vector<1x64x600xf32>
    %202 = vector.shape_cast %201 : vector<1x64x600xf32> to vector<64x600xf32>
    %cst_252 = arith.constant dense<0.000000e+00> : vector<2x600xf32>
    %203 = tpu.matmul %200, %202, %cst_252 {dimension_numbers = #tpu.dot_dimension_numbers<[1], [0], [0], [1], [0, 0, 1, 1], [], []>} : vector<2x64xf32>, vector<64x600xf32>, vector<2x600xf32> -> vector<2x600xf32>
    %204 = arith.addf %198, %203 : vector<2x600xf32>
    %c0_253 = arith.constant 0 : index
    %c1_254 = arith.constant 1 : index
    %c0_255 = arith.constant 0 : index
    %c0_256 = arith.constant 0 : index
    %205 = vector.load %arg14[%c0_253, %c1_254, %c0_255, %c0_256] : memref<2x4x4x64xf32, #tpu.memory_space<vmem>>, vector<2x1x1x64xf32>
    %206 = vector.shape_cast %205 : vector<2x1x1x64xf32> to vector<2x64xf32>
    %c4_257 = arith.constant 4 : index
    %c0_258 = arith.constant 0 : index
    %c0_259 = arith.constant 0 : index
    %207 = vector.load %arg6[%c4_257, %c0_258, %c0_259] : memref<16x64x600xf32, #tpu.memory_space<vmem>>, vector<1x64x600xf32>
    %208 = vector.shape_cast %207 : vector<1x64x600xf32> to vector<64x600xf32>
    %cst_260 = arith.constant dense<0.000000e+00> : vector<2x600xf32>
    %209 = tpu.matmul %206, %208, %cst_260 {dimension_numbers = #tpu.dot_dimension_numbers<[1], [0], [0], [1], [0, 0, 1, 1], [], []>} : vector<2x64xf32>, vector<64x600xf32>, vector<2x600xf32> -> vector<2x600xf32>
    %210 = arith.addf %204, %209 : vector<2x600xf32>
    %c0_261 = arith.constant 0 : index
    %c1_262 = arith.constant 1 : index
    %c1_263 = arith.constant 1 : index
    %c0_264 = arith.constant 0 : index
    %211 = vector.load %arg14[%c0_261, %c1_262, %c1_263, %c0_264] : memref<2x4x4x64xf32, #tpu.memory_space<vmem>>, vector<2x1x1x64xf32>
    %212 = vector.shape_cast %211 : vector<2x1x1x64xf32> to vector<2x64xf32>
    %c5_265 = arith.constant 5 : index
    %c0_266 = arith.constant 0 : index
    %c0_267 = arith.constant 0 : index
    %213 = vector.load %arg6[%c5_265, %c0_266, %c0_267] : memref<16x64x600xf32, #tpu.memory_space<vmem>>, vector<1x64x600xf32>
    %214 = vector.shape_cast %213 : vector<1x64x600xf32> to vector<64x600xf32>
    %cst_268 = arith.constant dense<0.000000e+00> : vector<2x600xf32>
    %215 = tpu.matmul %212, %214, %cst_268 {dimension_numbers = #tpu.dot_dimension_numbers<[1], [0], [0], [1], [0, 0, 1, 1], [], []>} : vector<2x64xf32>, vector<64x600xf32>, vector<2x600xf32> -> vector<2x600xf32>
    %216 = arith.addf %210, %215 : vector<2x600xf32>
    %c0_269 = arith.constant 0 : index
    %c1_270 = arith.constant 1 : index
    %c2_271 = arith.constant 2 : index
    %c0_272 = arith.constant 0 : index
    %217 = vector.load %arg14[%c0_269, %c1_270, %c2_271, %c0_272] : memref<2x4x4x64xf32, #tpu.memory_space<vmem>>, vector<2x1x1x64xf32>
    %218 = vector.shape_cast %217 : vector<2x1x1x64xf32> to vector<2x64xf32>
    %c6_273 = arith.constant 6 : index
    %c0_274 = arith.constant 0 : index
    %c0_275 = arith.constant 0 : index
    %219 = vector.load %arg6[%c6_273, %c0_274, %c0_275] : memref<16x64x600xf32, #tpu.memory_space<vmem>>, vector<1x64x600xf32>
    %220 = vector.shape_cast %219 : vector<1x64x600xf32> to vector<64x600xf32>
    %cst_276 = arith.constant dense<0.000000e+00> : vector<2x600xf32>
    %221 = tpu.matmul %218, %220, %cst_276 {dimension_numbers = #tpu.dot_dimension_numbers<[1], [0], [0], [1], [0, 0, 1, 1], [], []>} : vector<2x64xf32>, vector<64x600xf32>, vector<2x600xf32> -> vector<2x600xf32>
    %222 = arith.addf %216, %221 : vector<2x600xf32>
    %c0_277 = arith.constant 0 : index
    %c1_278 = arith.constant 1 : index
    %c3_279 = arith.constant 3 : index
    %c0_280 = arith.constant 0 : index
    %223 = vector.load %arg14[%c0_277, %c1_278, %c3_279, %c0_280] : memref<2x4x4x64xf32, #tpu.memory_space<vmem>>, vector<2x1x1x64xf32>
    %224 = vector.shape_cast %223 : vector<2x1x1x64xf32> to vector<2x64xf32>
    %c7_281 = arith.constant 7 : index
    %c0_282 = arith.constant 0 : index
    %c0_283 = arith.constant 0 : index
    %225 = vector.load %arg6[%c7_281, %c0_282, %c0_283] : memref<16x64x600xf32, #tpu.memory_space<vmem>>, vector<1x64x600xf32>
    %226 = vector.shape_cast %225 : vector<1x64x600xf32> to vector<64x600xf32>
    %cst_284 = arith.constant dense<0.000000e+00> : vector<2x600xf32>
    %227 = tpu.matmul %224, %226, %cst_284 {dimension_numbers = #tpu.dot_dimension_numbers<[1], [0], [0], [1], [0, 0, 1, 1], [], []>} : vector<2x64xf32>, vector<64x600xf32>, vector<2x600xf32> -> vector<2x600xf32>
    %228 = arith.addf %222, %227 : vector<2x600xf32>
    %c0_285 = arith.constant 0 : index
    %c2_286 = arith.constant 2 : index
    %c0_287 = arith.constant 0 : index
    %c0_288 = arith.constant 0 : index
    %229 = vector.load %arg14[%c0_285, %c2_286, %c0_287, %c0_288] : memref<2x4x4x64xf32, #tpu.memory_space<vmem>>, vector<2x1x1x64xf32>
    %230 = vector.shape_cast %229 : vector<2x1x1x64xf32> to vector<2x64xf32>
    %c8_289 = arith.constant 8 : index
    %c0_290 = arith.constant 0 : index
    %c0_291 = arith.constant 0 : index
    %231 = vector.load %arg6[%c8_289, %c0_290, %c0_291] : memref<16x64x600xf32, #tpu.memory_space<vmem>>, vector<1x64x600xf32>
    %232 = vector.shape_cast %231 : vector<1x64x600xf32> to vector<64x600xf32>
    %cst_292 = arith.constant dense<0.000000e+00> : vector<2x600xf32>
    %233 = tpu.matmul %230, %232, %cst_292 {dimension_numbers = #tpu.dot_dimension_numbers<[1], [0], [0], [1], [0, 0, 1, 1], [], []>} : vector<2x64xf32>, vector<64x600xf32>, vector<2x600xf32> -> vector<2x600xf32>
    %234 = arith.addf %228, %233 : vector<2x600xf32>
    %c0_293 = arith.constant 0 : index
    %c2_294 = arith.constant 2 : index
    %c1_295 = arith.constant 1 : index
    %c0_296 = arith.constant 0 : index
    %235 = vector.load %arg14[%c0_293, %c2_294, %c1_295, %c0_296] : memref<2x4x4x64xf32, #tpu.memory_space<vmem>>, vector<2x1x1x64xf32>
    %236 = vector.shape_cast %235 : vector<2x1x1x64xf32> to vector<2x64xf32>
    %c9_297 = arith.constant 9 : index
    %c0_298 = arith.constant 0 : index
    %c0_299 = arith.constant 0 : index
    %237 = vector.load %arg6[%c9_297, %c0_298, %c0_299] : memref<16x64x600xf32, #tpu.memory_space<vmem>>, vector<1x64x600xf32>
    %238 = vector.shape_cast %237 : vector<1x64x600xf32> to vector<64x600xf32>
    %cst_300 = arith.constant dense<0.000000e+00> : vector<2x600xf32>
    %239 = tpu.matmul %236, %238, %cst_300 {dimension_numbers = #tpu.dot_dimension_numbers<[1], [0], [0], [1], [0, 0, 1, 1], [], []>} : vector<2x64xf32>, vector<64x600xf32>, vector<2x600xf32> -> vector<2x600xf32>
    %240 = arith.addf %234, %239 : vector<2x600xf32>
    %c0_301 = arith.constant 0 : index
    %c2_302 = arith.constant 2 : index
    %c2_303 = arith.constant 2 : index
    %c0_304 = arith.constant 0 : index
    %241 = vector.load %arg14[%c0_301, %c2_302, %c2_303, %c0_304] : memref<2x4x4x64xf32, #tpu.memory_space<vmem>>, vector<2x1x1x64xf32>
    %242 = vector.shape_cast %241 : vector<2x1x1x64xf32> to vector<2x64xf32>
    %c10_305 = arith.constant 10 : index
    %c0_306 = arith.constant 0 : index
    %c0_307 = arith.constant 0 : index
    %243 = vector.load %arg6[%c10_305, %c0_306, %c0_307] : memref<16x64x600xf32, #tpu.memory_space<vmem>>, vector<1x64x600xf32>
    %244 = vector.shape_cast %243 : vector<1x64x600xf32> to vector<64x600xf32>
    %cst_308 = arith.constant dense<0.000000e+00> : vector<2x600xf32>
    %245 = tpu.matmul %242, %244, %cst_308 {dimension_numbers = #tpu.dot_dimension_numbers<[1], [0], [0], [1], [0, 0, 1, 1], [], []>} : vector<2x64xf32>, vector<64x600xf32>, vector<2x600xf32> -> vector<2x600xf32>
    %246 = arith.addf %240, %245 : vector<2x600xf32>
    %c0_309 = arith.constant 0 : index
    %c2_310 = arith.constant 2 : index
    %c3_311 = arith.constant 3 : index
    %c0_312 = arith.constant 0 : index
    %247 = vector.load %arg14[%c0_309, %c2_310, %c3_311, %c0_312] : memref<2x4x4x64xf32, #tpu.memory_space<vmem>>, vector<2x1x1x64xf32>
    %248 = vector.shape_cast %247 : vector<2x1x1x64xf32> to vector<2x64xf32>
    %c11_313 = arith.constant 11 : index
    %c0_314 = arith.constant 0 : index
    %c0_315 = arith.constant 0 : index
    %249 = vector.load %arg6[%c11_313, %c0_314, %c0_315] : memref<16x64x600xf32, #tpu.memory_space<vmem>>, vector<1x64x600xf32>
    %250 = vector.shape_cast %249 : vector<1x64x600xf32> to vector<64x600xf32>
    %cst_316 = arith.constant dense<0.000000e+00> : vector<2x600xf32>
    %251 = tpu.matmul %248, %250, %cst_316 {dimension_numbers = #tpu.dot_dimension_numbers<[1], [0], [0], [1], [0, 0, 1, 1], [], []>} : vector<2x64xf32>, vector<64x600xf32>, vector<2x600xf32> -> vector<2x600xf32>
    %252 = arith.addf %246, %251 : vector<2x600xf32>
    %c0_317 = arith.constant 0 : index
    %c3_318 = arith.constant 3 : index
    %c0_319 = arith.constant 0 : index
    %c0_320 = arith.constant 0 : index
    %253 = vector.load %arg14[%c0_317, %c3_318, %c0_319, %c0_320] : memref<2x4x4x64xf32, #tpu.memory_space<vmem>>, vector<2x1x1x64xf32>
    %254 = vector.shape_cast %253 : vector<2x1x1x64xf32> to vector<2x64xf32>
    %c12_321 = arith.constant 12 : index
    %c0_322 = arith.constant 0 : index
    %c0_323 = arith.constant 0 : index
    %255 = vector.load %arg6[%c12_321, %c0_322, %c0_323] : memref<16x64x600xf32, #tpu.memory_space<vmem>>, vector<1x64x600xf32>
    %256 = vector.shape_cast %255 : vector<1x64x600xf32> to vector<64x600xf32>
    %cst_324 = arith.constant dense<0.000000e+00> : vector<2x600xf32>
    %257 = tpu.matmul %254, %256, %cst_324 {dimension_numbers = #tpu.dot_dimension_numbers<[1], [0], [0], [1], [0, 0, 1, 1], [], []>} : vector<2x64xf32>, vector<64x600xf32>, vector<2x600xf32> -> vector<2x600xf32>
    %258 = arith.addf %252, %257 : vector<2x600xf32>
    %c0_325 = arith.constant 0 : index
    %c3_326 = arith.constant 3 : index
    %c1_327 = arith.constant 1 : index
    %c0_328 = arith.constant 0 : index
    %259 = vector.load %arg14[%c0_325, %c3_326, %c1_327, %c0_328] : memref<2x4x4x64xf32, #tpu.memory_space<vmem>>, vector<2x1x1x64xf32>
    %260 = vector.shape_cast %259 : vector<2x1x1x64xf32> to vector<2x64xf32>
    %c13_329 = arith.constant 13 : index
    %c0_330 = arith.constant 0 : index
    %c0_331 = arith.constant 0 : index
    %261 = vector.load %arg6[%c13_329, %c0_330, %c0_331] : memref<16x64x600xf32, #tpu.memory_space<vmem>>, vector<1x64x600xf32>
    %262 = vector.shape_cast %261 : vector<1x64x600xf32> to vector<64x600xf32>
    %cst_332 = arith.constant dense<0.000000e+00> : vector<2x600xf32>
    %263 = tpu.matmul %260, %262, %cst_332 {dimension_numbers = #tpu.dot_dimension_numbers<[1], [0], [0], [1], [0, 0, 1, 1], [], []>} : vector<2x64xf32>, vector<64x600xf32>, vector<2x600xf32> -> vector<2x600xf32>
    %264 = arith.addf %258, %263 : vector<2x600xf32>
    %c0_333 = arith.constant 0 : index
    %c3_334 = arith.constant 3 : index
    %c2_335 = arith.constant 2 : index
    %c0_336 = arith.constant 0 : index
    %265 = vector.load %arg14[%c0_333, %c3_334, %c2_335, %c0_336] : memref<2x4x4x64xf32, #tpu.memory_space<vmem>>, vector<2x1x1x64xf32>
    %266 = vector.shape_cast %265 : vector<2x1x1x64xf32> to vector<2x64xf32>
    %c14_337 = arith.constant 14 : index
    %c0_338 = arith.constant 0 : index
    %c0_339 = arith.constant 0 : index
    %267 = vector.load %arg6[%c14_337, %c0_338, %c0_339] : memref<16x64x600xf32, #tpu.memory_space<vmem>>, vector<1x64x600xf32>
    %268 = vector.shape_cast %267 : vector<1x64x600xf32> to vector<64x600xf32>
    %cst_340 = arith.constant dense<0.000000e+00> : vector<2x600xf32>
    %269 = tpu.matmul %266, %268, %cst_340 {dimension_numbers = #tpu.dot_dimension_numbers<[1], [0], [0], [1], [0, 0, 1, 1], [], []>} : vector<2x64xf32>, vector<64x600xf32>, vector<2x600xf32> -> vector<2x600xf32>
    %270 = arith.addf %264, %269 : vector<2x600xf32>
    %c0_341 = arith.constant 0 : index
    %c3_342 = arith.constant 3 : index
    %c3_343 = arith.constant 3 : index
    %c0_344 = arith.constant 0 : index
    %271 = vector.load %arg14[%c0_341, %c3_342, %c3_343, %c0_344] : memref<2x4x4x64xf32, #tpu.memory_space<vmem>>, vector<2x1x1x64xf32>
    %272 = vector.shape_cast %271 : vector<2x1x1x64xf32> to vector<2x64xf32>
    %c15_345 = arith.constant 15 : index
    %c0_346 = arith.constant 0 : index
    %c0_347 = arith.constant 0 : index
    %273 = vector.load %arg6[%c15_345, %c0_346, %c0_347] : memref<16x64x600xf32, #tpu.memory_space<vmem>>, vector<1x64x600xf32>
    %274 = vector.shape_cast %273 : vector<1x64x600xf32> to vector<64x600xf32>
    %cst_348 = arith.constant dense<0.000000e+00> : vector<2x600xf32>
    %275 = tpu.matmul %272, %274, %cst_348 {dimension_numbers = #tpu.dot_dimension_numbers<[1], [0], [0], [1], [0, 0, 1, 1], [], []>} : vector<2x64xf32>, vector<64x600xf32>, vector<2x600xf32> -> vector<2x600xf32>
    %276 = arith.addf %270, %275 : vector<2x600xf32>
    %c0_349 = arith.constant 0 : index
    %c0_350 = arith.constant 0 : index
    %277 = vector.load %arg7[%c0_349, %c0_350] : memref<1x600xf32, #tpu.memory_space<vmem>>, vector<1x600xf32>
    %278 = vector.broadcast %277 : vector<1x600xf32> to vector<2x600xf32>
    %279 = arith.addf %276, %278 : vector<2x600xf32>
    %cst_351 = arith.constant 0.000000e+00 : f32
    %280 = vector.broadcast %cst_351 : f32 to vector<2x600xf32>
    %281 = arith.maximumf %279, %280 : vector<2x600xf32>
    %c0_352 = arith.constant 0 : index
    %c0_353 = arith.constant 0 : index
    %282 = vector.load %arg8[%c0_352, %c0_353] : memref<600x10xf32, #tpu.memory_space<vmem>>, vector<600x10xf32>
    %cst_354 = arith.constant dense<0.000000e+00> : vector<2x10xf32>
    %283 = tpu.matmul %281, %282, %cst_354 {dimension_numbers = #tpu.dot_dimension_numbers<[1], [0], [0], [1], [0, 0, 1, 1], [], []>} : vector<2x600xf32>, vector<600x10xf32>, vector<2x10xf32> -> vector<2x10xf32>
    %c0_355 = arith.constant 0 : index
    %c0_356 = arith.constant 0 : index
    %284 = vector.load %arg9[%c0_355, %c0_356] : memref<1x10xf32, #tpu.memory_space<vmem>>, vector<1x10xf32>
    %285 = vector.broadcast %284 : vector<1x10xf32> to vector<2x10xf32>
    %286 = arith.addf %283, %285 : vector<2x10xf32>
    %c0_357 = arith.constant 0 : index
    %c0_358 = arith.constant 0 : index
    %c0_359 = arith.constant 0 : index
    %287 = vector.load %arg10[%c0_357, %c0_358, %c0_359] : memref<1x2x10xf32, #tpu.memory_space<vmem>>, vector<1x2x10xf32>
    %288 = vector.shape_cast %287 : vector<1x2x10xf32> to vector<2x10xf32>
    %289 = vector.shape_cast %286 : vector<2x10xf32> to vector<1x2x10xf32>
    tpu.vector_store %arg10[%c0_357, %c0_358, %c0_359], %289 {strides = array<i32>} : memref<1x2x10xf32, #tpu.memory_space<vmem>>, vector<1x2x10xf32>,
    return
  }
  func.func @transform_0(%arg0: i32) -> (i32, i32) {
    %c0_i32 = arith.constant 0 : i32
    %c0_i32_0 = arith.constant 0 : i32
    return %arg0, %c0_i32 : i32, i32
  }
  func.func @transform_1(%arg0: i32) -> (i32, i32) {
    %c0_i32 = arith.constant 0 : i32
    %c0_i32_0 = arith.constant 0 : i32
    %c0_i32_1 = arith.constant 0 : i32
    return %c0_i32, %c0_i32_0 : i32, i32
  }
  func.func @transform_2(%arg0: i32) -> (i32, i32) {
    %c0_i32 = arith.constant 0 : i32
    %c0_i32_0 = arith.constant 0 : i32
    %c0_i32_1 = arith.constant 0 : i32
    return %c0_i32, %c0_i32_0 : i32, i32
  }
  func.func @transform_3(%arg0: i32) -> (i32, i32, i32) {
    %c0_i32 = arith.constant 0 : i32
    %c0_i32_0 = arith.constant 0 : i32
    %c0_i32_1 = arith.constant 0 : i32
    %c0_i32_2 = arith.constant 0 : i32
    return %c0_i32, %c0_i32_0, %c0_i32_1 : i32, i32, i32
  }
  func.func @transform_4(%arg0: i32) -> (i32, i32) {
    %c0_i32 = arith.constant 0 : i32
    %c0_i32_0 = arith.constant 0 : i32
    %c0_i32_1 = arith.constant 0 : i32
    return %c0_i32, %c0_i32_0 : i32, i32
  }
  func.func @transform_5(%arg0: i32) -> (i32, i32, i32) {
    %c0_i32 = arith.constant 0 : i32
    %c0_i32_0 = arith.constant 0 : i32
    %c0_i32_1 = arith.constant 0 : i32
    %c0_i32_2 = arith.constant 0 : i32
    return %c0_i32, %c0_i32_0, %c0_i32_1 : i32, i32, i32
  }
  func.func @transform_6(%arg0: i32) -> (i32, i32) {
    %c0_i32 = arith.constant 0 : i32
    %c0_i32_0 = arith.constant 0 : i32
    %c0_i32_1 = arith.constant 0 : i32
    return %c0_i32, %c0_i32_0 : i32, i32
  }
  func.func @transform_7(%arg0: i32) -> (i32, i32) {
    %c0_i32 = arith.constant 0 : i32
    %c0_i32_0 = arith.constant 0 : i32
    %c0_i32_1 = arith.constant 0 : i32
    return %c0_i32, %c0_i32_0 : i32, i32
  }
  func.func @transform_8(%arg0: i32) -> (i32, i32) {
    %c0_i32 = arith.constant 0 : i32
    %c0_i32_0 = arith.constant 0 : i32
    %c0_i32_1 = arith.constant 0 : i32
    return %c0_i32, %c0_i32_0 : i32, i32
  }
  func.func @transform_9(%arg0: i32) -> (i32, i32, i32) {
    %c0_i32 = arith.constant 0 : i32
    %c0_i32_0 = arith.constant 0 : i32
    %c0_i32_1 = arith.constant 0 : i32
    return %arg0, %c0_i32, %c0_i32_0 : i32, i32, i32
  }
}

</mosaic_0001>

<bundles_post_ra>
// kernel: net_forward.1
= control target key start
LH: loop header
LB: loop body
LE: loop exit
PB: predicated region body
PF: predicated region fallthrough
CT: control target
= control target key end

     0   :  { %14 = vsyncpa [#allocation7], 0  ;;  %s22690_s0 = inlined_call_operand.vmem [shape: f32[4608,25], index: 0, kind: input, shape index: {}]   ;;  %s22691_s1 = inlined_call_operand.vmem [shape: f32[25,20], index: 1, kind: input, shape index: {}]   ;;  %s22692_s2 = inlined_call_operand.vmem [shape: f32[1,20], index: 2, kind: input, shape index: {}]   ;;  %s22693_s3 = inlined_call_operand.vmem [shape: f32[25,20,64], index: 3, kind: input, shape index: {}]   ;;  %s22694_s4 = inlined_call_operand.vmem [shape: f32[1,64], index: 4, kind: input, shape index: {}]   ;;  %s22695_s5 = inlined_call_operand.vmem [shape: f32[16,64,600], index: 5, kind: input, shape index: {}]   ;;  %s22696_s6 = inlined_call_operand.vmem [shape: f32[1,600], index: 6, kind: input, shape index: {}]   ;;  %s22697_s7 = inlined_call_operand.vmem [shape: f32[600,10], index: 7, kind: input, shape index: {}]   ;;  %s22698_s8 = inlined_call_operand.vmem [shape: f32[1,10], index: 8, kind: input, shape index: {}]   ;;  %s22699_s9 = inlined_call_operand.hbm [shape: f32[4,2,10], index: 9, kind: output, shape index: {}]  }
   0x1   :  { %16 = vsyncpa [#allocation7 + $0x1], 0  ;;  %s16888_s30 = smov 0   ;;  %s16890_s10 = smov 0  }
   0x2   :  { %s16892_s11 = smov 0   ;;  %s16894_s12 = smov 0  }
   0x3 LB: > { %s16909_s13 = sadd.s32 4294967295, %s16833_s12   ;;  %s13268_s14 = sadd.s32 4294967294, %s16833_s12   ;;  %s16833_s12 = sphi %s16894_s12, %s22948_s12   ;;  %s16829_s11 = sphi %s16892_s11, %s22947_s11   ;;  %s16825_s10 = sphi %s16890_s10, %s22946_s10   ;;  %s16821_s30 = sphi %s16888_s30, %s22945_s30  }
   0x4   : > { %s16913_s15 = sadd.s32 1, %s16833_s12   ;;  %s223_s16 = sadd.s32 1, %s16829_s11 }
   0x5   : > { %s220_s17 = ssub.s32 %s16833_s12, %s16913_s15  ;;  %p233_p0 = scmp.ne.s32.totalorder %s16829_s11, %s16825_s10 }
   0x6   : > { %p221_p1 = scmp.eq.s32.totalorder %s220_s17, 0  ;;  %p234_p2 = scmp.eq.s32.totalorder %s16909_s13, 3 }
   0x7   : > { %p239_p3 = scmp.ne.s32.totalorder %s16825_s10, %s16821_s30  ;;  %p240_p4 = scmp.eq.s32.totalorder %s13268_s14, 3 }
   0x8   : > { %s16924_s18 = scalar_select %p221_p1, %s16829_s11, %s223_s16  }
   0x9   : > { %p16926_p5 = por %p234_p2, %p233_p0  ;;  %p16930_p6 = por %p240_p4, %p239_p3 }
   0xa   : > { %p13271_p7 = scmp.ge.s32.totalorder %s16833_s12, 1  ;;  %p291_p8 = scmp.lt.s32.totalorder %s16833_s12, 5 }
   0xc   : > { %p292_p9 = pnand %p13271_p7, %p291_p8 }
   0xe   : > { %295 = sbr.rel (%p292_p9) target bundleno = 2043 (0x7fb), region = 56 }
  0x13   : > { %v480_v0 = vld [vmem:[%s22691_s1 + $0x18] sm:$0x1]  ;;  %vm921_vm0 = vcmask 1040384   ;;  %v479_v1 = vld [vmem:[%s22691_s1 + $0x10] sm:$0xff]  ;;  %s327_s25 = smul.u32 144, %s16909_s13  ;;  %v478_v2 = vld [vmem:[%s22691_s1 + $0x8] sm:$0xff] }
  0x14   : > { %15421 = vmatprep.subr.msk.mxu0 %vm921_vm0, %v480_v0  ;;  %v477_v3 = vld [vmem:[%s22691_s1] sm:$0xff]  ;;  %vm488_vm1 = vcmask 203776   ;;  %vm2758_vm2 = vcmask 1043456   ;;  %vm1854_vm3 = vcmask 162816   ;;  %vm2481_vm4 = vcmask 158720   ;;  %s324_s28 = sand.u32 1, %s16825_s10  }
  0x15   : > { %15422 = vmatpush3.msk.msra.mxu0 %vm921_vm0, %v480_v0  ;;  %p328_p10 = scmp.lt.s32.totalorder %s327_s25, 575  ;;  %vm8482_vm5 = vcmask 523264   ;;  %vm8578_vm6 = vcmask 519168   ;;  %vm8699_vm7 = vcmask 1041409   ;;  %vm16836_vm8 = vmmov 0   ;;  %s13272_s29 = sshll.u32 %s324_s28, 1 }
  0x16   : > { %15423 = vmatprep.subr.mxu0 %v479_v1  ;;  %vm12979_vm9 = vcmask 719872   ;;  %s14569_s17 = sshll.u32 %s16909_s13, 5  ;;  %vm13193_vm10 = vcmask 74752   ;;  %s13196_s26 = scalar_lea.sflag [#allocation7], %s324_s28 }
  0x17   : > { %15424 = vmatpush3.msra.mxu0 %v479_v1  ;;  %s22950_s25 = smov (!%p328_p10, %s327_s25), 575 }
  0x18   : > { %15425 = vmatprep.subr.mxu0 %v478_v2  ;;  %s13273_s14 = sshll.u32 %s22950_s25, 3  ;;  %s13207_s25 = scalar_lea.hbm %s22699_s9, %s14569_s17 }
  0x19   : > { %15426 = vmatpush3.msra.mxu0 %v478_v2  ;;  %s16952_s21 = scalar_lea.vmem %s22690_s0, %s13273_s14  ;;  %s16837_s14 = smov [#allocation6]  }
  0x1a   : > { %15427 = vmatprep.subr.mxu0 %v477_v3  ;;  %v333_v4 = vld [vmem:[%s16952_s21] sm:$0xff]  ;;  %v334_v5 = vld [vmem:[%s16952_s21 + $0x8] sm:$0xff]  ;;  %v335_v6 = vld [vmem:[%s16952_s21 + $0x10] sm:$0xff]  ;;  %s16777_s13 = sshll.u32 %s16837_s14, 4  ;;  %s16778_s13 = int_to_ptr.vmem [resolvable:$false] %s16777_s13 }
  0x1b   : > { %15428 = vmatpush3.msra.mxu0 %v477_v3  ;;  %15429 = vmatprep.mubr.msk.f32.mxu0 %vm488_vm1, %v333_v4  ;;  %v336_v7 = vld [vmem:[%s16952_s21 + $0x18] sm:$0xff]  ;;  %v337_v8 = vld [vmem:[%s16952_s21 + $0x20] sm:$0xff]  ;;  %v338_v9 = vld [vmem:[%s16952_s21 + $0x28] sm:$0xff] }
  0x1c   : > { %15430 = vmatmul.mubr.msk.f32.vlgmr.msra.gmra.mxu0 %vm488_vm1, %v334_v5  ;;  %v339_v10 = vld [vmem:[%s16952_s21 + $0x30] sm:$0xff]  ;;  %v340_v11 = vld [vmem:[%s16952_s21 + $0x38] sm:$0xff]  ;;  %v341_v12 = vld [vmem:[%s16952_s21 + $0x40] sm:$0xff] }
  0x1d   : > { %15432 = vmatprep.mubr.msk.f32.mxu0 %vm488_vm1, %v335_v6  ;;  %v342_v13 = vld [vmem:[%s16952_s21 + $0x48] sm:$0xff]  ;;  %v343_v14 = vld [vmem:[%s16952_s21 + $0x50] sm:$0xff]  ;;  %v344_v15 = vld [vmem:[%s16952_s21 + $0x58] sm:$0xff] }
  0x1e   : > { %v345_v16 = vld [vmem:[%s16952_s21 + $0x60] sm:$0xff]  ;;  %v346_v17 = vld [vmem:[%s16952_s21 + $0x68] sm:$0xff]  ;;  %v347_v18 = vld [vmem:[%s16952_s21 + $0x70] sm:$0xff] }
  0x1f   : > { %v348_v19 = vld [vmem:[%s16952_s21 + $0x78] sm:$0xff]  ;;  %v349_v20 = vld [vmem:[%s16952_s21 + $0x80] sm:$0xff]  ;;  %v350_v21 = vld [vmem:[%s16952_s21 + $0x88] sm:$0xff] }
  0x20   : > { %15433 = vmatmul.mubr.msk.f32.gmra.mxu0 %vm488_vm1, %v336_v7  ;;  %v351_v22 = vld [vmem:[%s16952_s21 + $0x90] sm:$0xff]  ;;  %v352_v23 = vld [vmem:[%s16952_s21 + $0x98] sm:$0xff]  ;;  %v353_v24 = vld [vmem:[%s16952_s21 + $0xa0] sm:$0xff] }
  0x21   : > { %15435 = vmatprep.mubr.msk.f32.mxu0 %vm488_vm1, %v337_v8  ;;  %v354_v25 = vld [vmem:[%s16952_s21 + $0xa8] sm:$0xff]  ;;  %v355_v26 = vld [vmem:[%s16952_s21 + $0xb0] sm:$0xff]  ;;  %v356_v27 = vld [vmem:[%s16952_s21 + $0xb8] sm:$0xff] }
  0x22   : > { %v357_v28 = vld [vmem:[%s16952_s21 + $0xc0] sm:$0xff]  ;;  %v358_v29 = vld [vmem:[%s16952_s21 + $0xc8] sm:$0xff]  ;;  %v359_v30 = vld [vmem:[%s16952_s21 + $0xd0] sm:$0xff] }
  0x23   : > { %v360_v31 = vld [vmem:[%s16952_s21 + $0xd8] sm:$0xff]  ;;  %v361_v32 = vld [vmem:[%s16952_s21 + $0xe0] sm:$0xff]  ;;  %v362_v33 = vld [vmem:[%s16952_s21 + $0xe8] sm:$0xff] }
  0x24   : > { %15436 = vmatmul.mubr.msk.f32.gmra.mxu0 %vm488_vm1, %v338_v9  ;;  %v363_v34 = vld [vmem:[%s16952_s21 + $0xf0] sm:$0xff]  ;;  %v364_v35 = vld [vmem:[%s16952_s21 + $0xf8] sm:$0xff]  ;;  %v365_v36 = vld [vmem:[%s16952_s21 + $0x100] sm:$0xff] }
  0x25   : > { %15438 = vmatprep.mubr.msk.f32.mxu0 %vm488_vm1, %v339_v10  ;;  %v366_v37 = vld [vmem:[%s16952_s21 + $0x108] sm:$0xff]  ;;  %v367_v38 = vld [vmem:[%s16952_s21 + $0x110] sm:$0xff]  ;;  %v368_v39 = vld [vmem:[%s16952_s21 + $0x118] sm:$0xff] }
  0x26   : > { %v369_v40 = vld [vmem:[%s16952_s21 + $0x120] sm:$0xff]  ;;  %v370_v41 = vld [vmem:[%s16952_s21 + $0x128] sm:$0xff]  ;;  %v371_v42 = vld [vmem:[%s16952_s21 + $0x130] sm:$0xff] }
  0x27   : > { %v372_v43 = vld [vmem:[%s16952_s21 + $0x138] sm:$0xff]  ;;  %v373_v44 = vld [vmem:[%s16952_s21 + $0x140] sm:$0xff]  ;;  %v374_v45 = vld [vmem:[%s16952_s21 + $0x148] sm:$0xff] }
  0x28   : > { %15439 = vmatmul.mubr.msk.f32.gmra.mxu0 %vm488_vm1, %v340_v11  ;;  %v375_v46 = vld [vmem:[%s16952_s21 + $0x150] sm:$0xff]  ;;  %v376_v47 = vld [vmem:[%s16952_s21 + $0x158] sm:$0xff]  ;;  %v377_v48 = vld [vmem:[%s16952_s21 + $0x160] sm:$0xff] }
  0x29   : > { %15441 = vmatprep.mubr.msk.f32.mxu0 %vm488_vm1, %v341_v12  ;;  %v378_v49 = vld [vmem:[%s16952_s21 + $0x168] sm:$0xff]  ;;  %v379_v50 = vld [vmem:[%s16952_s21 + $0x170] sm:$0xff]  ;;  %v380_v51 = vld [vmem:[%s16952_s21 + $0x178] sm:$0xff] }
  0x2a   : > { %v381_v52 = vld [vmem:[%s16952_s21 + $0x180] sm:$0xff]  ;;  %v382_v53 = vld [vmem:[%s16952_s21 + $0x188] sm:$0xff]  ;;  %v383_v54 = vld [vmem:[%s16952_s21 + $0x190] sm:$0xff] }
  0x2b   : > { %v384_v55 = vld [vmem:[%s16952_s21 + $0x198] sm:$0xff]  ;;  %v385_v56 = vld [vmem:[%s16952_s21 + $0x1a0] sm:$0xff]  ;;  %v386_v57 = vld [vmem:[%s16952_s21 + $0x1a8] sm:$0xff] }
  0x2c   : > { %15442 = vmatmul.mubr.msk.f32.gmra.mxu0 %vm488_vm1, %v342_v13  ;;  %v387_v58 = vld [vmem:[%s16952_s21 + $0x1b0] sm:$0xff]  ;;  %v388_v59 = vld [vmem:[%s16952_s21 + $0x1b8] sm:$0xff]  ;;  %v389_v60 = vld [vmem:[%s16952_s21 + $0x1c0] sm:$0xff] }
  0x2d   : > { %15444 = vmatprep.mubr.msk.f32.mxu0 %vm488_vm1, %v343_v14  ;;  %v390_v61 = vld [vmem:[%s16952_s21 + $0x1c8] sm:$0xff]  ;;  %v391_v62 = vld [vmem:[%s16952_s21 + $0x1d0] sm:$0xff]  ;;  %v392_v63 = vld [vmem:[%s16952_s21 + $0x1d8] sm:$0xff] }
  0x2e   : > { %v393_v0 = vld [vmem:[%s16952_s21 + $0x1e0] sm:$0xff]  ;;  %v394_v1 = vld [vmem:[%s16952_s21 + $0x1e8] sm:$0xff]  ;;  %v395_v2 = vld [vmem:[%s16952_s21 + $0x1f0] sm:$0xff] }
  0x2f   : > { %v396_v3 = vld [vmem:[%s16952_s21 + $0x1f8] sm:$0xff]  ;;  %v397_v4 = vld [vmem:[%s16952_s21 + $0x200] sm:$0xff]  ;;  %v398_v5 = vld [vmem:[%s16952_s21 + $0x208] sm:$0xff] }
  0x30   : > { %15445 = vmatmul.mubr.msk.f32.gmra.mxu0 %vm488_vm1, %v344_v15  ;;  %v399_v6 = vld [vmem:[%s16952_s21 + $0x210] sm:$0xff]  ;;  %v400_v7 = vld [vmem:[%s16952_s21 + $0x218] sm:$0xff]  ;;  %v401_v8 = vld [vmem:[%s16952_s21 + $0x220] sm:$0xff] }
  0x31   : > { %15447 = vmatprep.mubr.msk.f32.mxu0 %vm488_vm1, %v345_v16  ;;  %v402_v9 = vld [vmem:[%s16952_s21 + $0x228] sm:$0xff]  ;;  %v403_v10 = vld [vmem:[%s16952_s21 + $0x230] sm:$0xff]  ;;  %v404_v11 = vld [vmem:[%s16952_s21 + $0x238] sm:$0xff] }
  0x32   : > { %v405_v12 = vld [vmem:[%s16952_s21 + $0x240] sm:$0xff]  ;;  %v406_v13 = vld [vmem:[%s16952_s21 + $0x248] sm:$0xff]  ;;  %v407_v14 = vld [vmem:[%s16952_s21 + $0x250] sm:$0xff] }
  0x33   : > { %v408_v15 = vld [vmem:[%s16952_s21 + $0x258] sm:$0xff]  ;;  %v409_v16 = vld [vmem:[%s16952_s21 + $0x260] sm:$0xff] }
  0x34   : > { %15448 = vmatmul.mubr.msk.f32.gmra.mxu0 %vm488_vm1, %v346_v17  ;;  %v410_v17 = vld [vmem:[%s16952_s21 + $0x268] sm:$0xff] }
  0x35   : > { %15450 = vmatprep.mubr.msk.f32.mxu0 %vm488_vm1, %v347_v18  ;;  %v411_v18 = vld [vmem:[%s16952_s21 + $0x270] sm:$0xff] }
  0x38   : > { %15451 = vmatmul.mubr.msk.f32.gmra.mxu0 %vm488_vm1, %v348_v19  ;;  %v412_v19 = vld [vmem:[%s16952_s21 + $0x278] sm:$0xff] }
  0x39   : > { %15453 = vmatprep.mubr.msk.f32.mxu0 %vm488_vm1, %v349_v20  ;;  %v13422_v20 = vld [vmem:[%s22693_s3 + $0x28] sm:$0xf] }
  0x3a   : > { %15645 = vmatprep.subr.msk.mxu0 %vm2758_vm2, %v13422_v20  ;;  %16724 = vmatprep.subr.msk.mxu1 %vm2758_vm2, %v13422_v20 }
  0x3b   : > { %15646 = vmatpush3.msk.msra.mxu0 %vm2758_vm2, %v13422_v20  ;;  %16727 = vmatpush3.msk.msra.mxu1 %vm2758_vm2, %v13422_v20 }
  0x3c   : > { %15454 = vmatmul.mubr.msk.f32.gmra.mxu0 %vm488_vm1, %v350_v21  ;;  %v413_v21 = vld [vmem:[%s16952_s21 + $0x280] sm:$0xff] }
  0x3d   : > { %15456 = vmatprep.mubr.msk.f32.mxu0 %vm488_vm1, %v351_v22  ;;  %v13421_v22 = vld [vmem:[%s22693_s3 + $0x20] sm:$0xff] }
  0x3e   : > { %15647 = vmatprep.subr.mxu0 %v13421_v22  ;;  %16725 = vmatprep.subr.mxu1 %v13421_v22 }
  0x3f   : > { %15648 = vmatpush3.msra.mxu0 %v13421_v22  ;;  %16728 = vmatpush3.msra.mxu1 %v13421_v22 }
  0x40   : > { %15457 = vmatmul.mubr.msk.f32.gmra.mxu0 %vm488_vm1, %v352_v23  ;;  %v414_v23 = vld [vmem:[%s16952_s21 + $0x288] sm:$0xff] }
  0x41   : > { %15459 = vmatprep.mubr.msk.f32.mxu0 %vm488_vm1, %v353_v24  ;;  %v13420_v24 = vld [vmem:[%s22693_s3 + $0x18] sm:$0xff] }
  0x42   : > { %15649 = vmatprep.subr.mxu0 %v13420_v24  ;;  %16726 = vmatprep.subr.mxu1 %v13420_v24 }
  0x43   : > { %16729 = vmatpush3.msra.mxu1 %v13420_v24  ;;  %15650 = vmatpush3.msra.mxu0 %v13420_v24 }
  0x44   : > { %15460 = vmatmul.mubr.msk.f32.gmra.mxu0 %vm488_vm1, %v354_v25  ;;  %v415_v25 = vld [vmem:[%s16952_s21 + $0x290] sm:$0xff] }
  0x45   : > { %15462 = vmatprep.mubr.msk.f32.mxu0 %vm488_vm1, %v355_v26  ;;  %v416_v26 = vld [vmem:[%s16952_s21 + $0x298] sm:$0xff] }
  0x48   : > { %15463 = vmatmul.mubr.msk.f32.gmra.mxu0 %vm488_vm1, %v356_v27  ;;  %v17137_v27 = vld [vmem:[%s22693_s3 + $0x100] sm:$0xf] }
  0x49   : > { %15465 = vmatprep.mubr.msk.f32.mxu0 %vm488_vm1, %v357_v28  ;;  %v417_v28 = vld [vmem:[%s16952_s21 + $0x2a0] sm:$0xff]  ;;  %15945 = vmatprep.subr.msk.mxu0 %vm2758_vm2, %v17137_v27 }
  0x4c   : > { %15466 = vmatmul.mubr.msk.f32.gmra.mxu0 %vm488_vm1, %v358_v29  ;;  %v418_v29 = vld [vmem:[%s16952_s21 + $0x2a8] sm:$0xff] }
  0x4d   : > { %15468 = vmatprep.mubr.msk.f32.mxu0 %vm488_vm1, %v359_v30  ;;  %v419_v30 = vld [vmem:[%s16952_s21 + $0x2b0] sm:$0xff] }
  0x50   : > { %15469 = vmatmul.mubr.msk.f32.gmra.mxu0 %vm488_vm1, %v360_v31  ;;  %v420_v31 = vld [vmem:[%s16952_s21 + $0x2b8] sm:$0xff] }
  0x51   : > { %15471 = vmatprep.mubr.msk.f32.mxu0 %vm488_vm1, %v361_v32  ;;  %v421_v32 = vld [vmem:[%s16952_s21 + $0x2c0] sm:$0xff] }
  0x54   : > { %15472 = vmatmul.mubr.msk.f32.gmra.mxu0 %vm488_vm1, %v362_v33  ;;  %v422_v33 = vld [vmem:[%s16952_s21 + $0x2c8] sm:$0xff] }
  0x55   : > { %15474 = vmatprep.mubr.msk.f32.mxu0 %vm488_vm1, %v363_v34  ;;  %v423_v34 = vld [vmem:[%s16952_s21 + $0x2d0] sm:$0xff] }
  0x58   : > { %15475 = vmatmul.mubr.msk.f32.gmra.mxu0 %vm488_vm1, %v364_v35  ;;  %v424_v35 = vld [vmem:[%s16952_s21 + $0x2d8] sm:$0xff] }
  0x59   : > { %15477 = vmatprep.mubr.msk.f32.mxu0 %vm488_vm1, %v365_v36  ;;  %v425_v36 = vld [vmem:[%s16952_s21 + $0x2e0] sm:$0xff] }
  0x5c   : > { %15478 = vmatmul.mubr.msk.f32.gmra.mxu0 %vm488_vm1, %v366_v37  ;;  %v426_v37 = vld [vmem:[%s16952_s21 + $0x2e8] sm:$0xff] }
  0x5d   : > { %15480 = vmatprep.mubr.msk.f32.mxu0 %vm488_vm1, %v367_v38  ;;  %v427_v38 = vld [vmem:[%s16952_s21 + $0x2f0] sm:$0xff] }
  0x60   : > { %15481 = vmatmul.mubr.msk.f32.gmra.mxu0 %vm488_vm1, %v368_v39  ;;  %v428_v39 = vld [vmem:[%s16952_s21 + $0x2f8] sm:$0xff] }
  0x61   : > { %15483 = vmatprep.mubr.msk.f32.mxu0 %vm488_vm1, %v369_v40  ;;  %v429_v40 = vld [vmem:[%s16952_s21 + $0x300] sm:$0xff] }
  0x64   : > { %15484 = vmatmul.mubr.msk.f32.gmra.mxu0 %vm488_vm1, %v370_v41  ;;  %v430_v41 = vld [vmem:[%s16952_s21 + $0x308] sm:$0xff] }
  0x65   : > { %15486 = vmatprep.mubr.msk.f32.mxu0 %vm488_vm1, %v371_v42  ;;  %v17172_v42 = vld [vmem:[%s22692_s2] ss:$0 sm:$0xff] }
  0x68   : > { %15487 = vmatmul.mubr.msk.f32.gmra.mxu0 %vm488_vm1, %v372_v43  ;;  %v431_v43 = vld [vmem:[%s16952_s21 + $0x310] sm:$0xff] }
  0x69   : > { %15489 = vmatprep.mubr.msk.f32.mxu0 %vm488_vm1, %v373_v44 }
  0x6c   : > { %15490 = vmatmul.mubr.msk.f32.gmra.mxu0 %vm488_vm1, %v374_v45 }
  0x6d   : > { %15492 = vmatprep.mubr.msk.f32.mxu0 %vm488_vm1, %v375_v46  ;;  %v432_v46 = vld [vmem:[%s16952_s21 + $0x318] sm:$0xff] }
  0x70   : > { %15493 = vmatmul.mubr.msk.f32.gmra.mxu0 %vm488_vm1, %v376_v47 }
  0x71   : > { %15495 = vmatprep.mubr.msk.f32.mxu0 %vm488_vm1, %v377_v48  ;;  %v433_v48 = vld [vmem:[%s16952_s21 + $0x320] sm:$0xff] }
  0x74   : > { %15496 = vmatmul.mubr.msk.f32.gmra.mxu0 %vm488_vm1, %v378_v49 }
  0x75   : > { %15498 = vmatprep.mubr.msk.f32.mxu0 %vm488_vm1, %v379_v50 }
  0x78   : > { %15499 = vmatmul.mubr.msk.f32.gmra.mxu0 %vm488_vm1, %v380_v51 }
  0x79   : > { %15501 = vmatprep.mubr.msk.f32.mxu0 %vm488_vm1, %v381_v52 }
  0x7c   : > { %15502 = vmatmul.mubr.msk.f32.gmra.mxu0 %vm488_vm1, %v382_v53 }
  0x7d   : > { %15504 = vmatprep.mubr.msk.f32.mxu0 %vm488_vm1, %v383_v54  ;;  %v434_v54 = vld [vmem:[%s16952_s21 + $0x328] sm:$0xff] }
  0x80   : > { %15505 = vmatmul.mubr.msk.f32.gmra.mxu0 %vm488_vm1, %v384_v55 }
  0x81   : > { %15507 = vmatprep.mubr.msk.f32.mxu0 %vm488_vm1, %v385_v56  ;;  %v435_v56 = vld [vmem:[%s16952_s21 + $0x330] sm:$0xff] }
  0x84   : > { %15508 = vmatmul.mubr.msk.f32.gmra.mxu0 %vm488_vm1, %v386_v57 }
  0x85   : > { %15510 = vmatprep.mubr.msk.f32.mxu0 %vm488_vm1, %v387_v58 }
  0x88   : > { %15511 = vmatmul.mubr.msk.f32.gmra.mxu0 %vm488_vm1, %v388_v59 }
  0x89   : > { %15513 = vmatprep.mubr.msk.f32.mxu0 %vm488_vm1, %v389_v60 }
  0x8c   : > { %15514 = vmatmul.mubr.msk.f32.gmra.mxu0 %vm488_vm1, %v390_v61 }
  0x8d   : > { %15516 = vmatprep.mubr.msk.f32.mxu0 %vm488_vm1, %v391_v62  ;;  %v436_v62 = vld [vmem:[%s16952_s21 + $0x338] sm:$0xff] }
  0x90   : > { %15517 = vmatmul.mubr.msk.f32.gmra.mxu0 %vm488_vm1, %v392_v63 }
  0x91   : > { %15519 = vmatprep.mubr.msk.f32.mxu0 %vm488_vm1, %v393_v0  ;;  %v437_v0 = vld [vmem:[%s16952_s21 + $0x340] sm:$0xff] }
  0x94   : > { %15520 = vmatmul.mubr.msk.f32.gmra.mxu0 %vm488_vm1, %v394_v1 }
  0x95   : > { %15522 = vmatprep.mubr.msk.f32.mxu0 %vm488_vm1, %v395_v2 }
  0x98   : > { %15523 = vmatmul.mubr.msk.f32.gmra.mxu0 %vm488_vm1, %v396_v3 }
  0x99   : > { %15525 = vmatprep.mubr.msk.f32.mxu0 %vm488_vm1, %v397_v4 }
  0x9c   : > { %15526 = vmatmul.mubr.msk.f32.gmra.mxu0 %vm488_vm1, %v398_v5 }
  0x9d   : > { %15528 = vmatprep.mubr.msk.f32.mxu0 %vm488_vm1, %v399_v6  ;;  %v438_v6 = vld [vmem:[%s16952_s21 + $0x348] sm:$0xff] }
  0xa0   : > { %15529 = vmatmul.mubr.msk.f32.gmra.mxu0 %vm488_vm1, %v400_v7 }
  0xa1   : > { %15531 = vmatprep.mubr.msk.f32.mxu0 %vm488_vm1, %v401_v8  ;;  %v439_v8 = vld [vmem:[%s16952_s21 + $0x350] sm:$0xff] }
  0xa4   : > { %15532 = vmatmul.mubr.msk.f32.gmra.mxu0 %vm488_vm1, %v402_v9 }
  0xa5   : > { %15534 = vmatprep.mubr.msk.f32.mxu0 %vm488_vm1, %v403_v10 }
  0xa8   : > { %15535 = vmatmul.mubr.msk.f32.gmra.mxu0 %vm488_vm1, %v404_v11 }
  0xa9   : > { %15537 = vmatprep.mubr.msk.f32.mxu0 %vm488_vm1, %v405_v12  ;;  %v440_v12 = vld [vmem:[%s16952_s21 + $0x358] sm:$0xff] }
  0xac   : > { %15538 = vmatmul.mubr.msk.f32.gmra.mxu0 %vm488_vm1, %v406_v13 }
  0xad   : > { %15540 = vmatprep.mubr.msk.f32.mxu0 %vm488_vm1, %v407_v14 }
  0xb0   : > { %15541 = vmatmul.mubr.msk.f32.gmra.mxu0 %vm488_vm1, %v408_v15 }
  0xb1   : > { %15543 = vmatprep.mubr.msk.f32.mxu0 %vm488_vm1, %v409_v16 }
  0xb4   : > { %15544 = vmatmul.mubr.msk.f32.gmra.mxu0 %vm488_vm1, %v410_v17  ;;  %v441_v17 = vld [vmem:[%s16952_s21 + $0x360] sm:$0xff] }
  0xb5   : > { %15546 = vmatprep.mubr.msk.f32.mxu0 %vm488_vm1, %v411_v18 }
  0xb8   : > { %15547 = vmatmul.mubr.msk.f32.gmra.mxu0 %vm488_vm1, %v412_v19 }
  0xb9   : > { %15549 = vmatprep.mubr.msk.f32.mxu0 %vm488_vm1, %v413_v21 }
  0xbc   : > { %15550 = vmatmul.mubr.msk.f32.gmra.mxu0 %vm488_vm1, %v414_v23 }
  0xbd   : > { %15552 = vmatprep.mubr.msk.f32.mxu0 %vm488_vm1, %v415_v25 }
  0xc0   : > { %15553 = vmatmul.mubr.msk.f32.gmra.mxu0 %vm488_vm1, %v416_v26 }
  0xc1   : > { %15555 = vmatprep.mubr.msk.f32.mxu0 %vm488_vm1, %v417_v28 }
  0xc4   : > { %15556 = vmatmul.mubr.msk.f32.gmra.mxu0 %vm488_vm1, %v418_v29 }
  0xc5   : > { %15558 = vmatprep.mubr.msk.f32.mxu0 %vm488_vm1, %v419_v30 }
  0xc8   : > { %15559 = vmatmul.mubr.msk.f32.gmra.mxu0 %vm488_vm1, %v420_v31 }
  0xc9   : > { %15561 = vmatprep.mubr.msk.f32.mxu0 %vm488_vm1, %v421_v32  ;;  %v442_v32 = vld [vmem:[%s16952_s21 + $0x368] sm:$0xff] }
  0xcc   : > { %15562 = vmatmul.mubr.msk.f32.gmra.mxu0 %vm488_vm1, %v422_v33 }
  0xcd   : > { %15564 = vmatprep.mubr.msk.f32.mxu0 %vm488_vm1, %v423_v34 }
  0xd0   : > { %15565 = vmatmul.mubr.msk.f32.gmra.mxu0 %vm488_vm1, %v424_v35 }
  0xd1   : > { %15567 = vmatprep.mubr.msk.f32.mxu0 %vm488_vm1, %v425_v36  ;;  %v443_v36 = vld [vmem:[%s16952_s21 + $0x370] sm:$0xff] }
  0xd4   : > { %15568 = vmatmul.mubr.msk.f32.gmra.mxu0 %vm488_vm1, %v426_v37 }
  0xd5   : > { %15570 = vmatprep.mubr.msk.f32.mxu0 %vm488_vm1, %v427_v38 }
  0xd8   : > { %15571 = vmatmul.mubr.msk.f32.gmra.mxu0 %vm488_vm1, %v428_v39 }
  0xd9   : > { %15573 = vmatprep.mubr.msk.f32.mxu0 %vm488_vm1, %v429_v40 }
  0xdc   : > { %v15431_v44 = vpop.f32.mrf.mxu0  ;;  %15574 = vmatmul.mubr.msk.f32.gmra.mxu0 %vm488_vm1, %v430_v41 }
  0xdd   : > { %v997_v45 = vadd.f32 %v15431_v44, %v17172_v42  ;;  %15576 = vmatprep.mubr.msk.f32.mxu0 %vm488_vm1, %v431_v43 }
  0xde   : > { %v991_v47 = vpop.f32.mrf.mxu0 }
  0xdf   : > { %v1711_v49 = vmax.f32 %v997_v45, 0.0  ;;  %v992_v50 = vadd.f32 %v17172_v42, %v991_v47  ;;  %v444_v47 = vld [vmem:[%s16952_s21 + $0x378] sm:$0xff] }
  0xe0   : > { %v15434_v51 = vpop.f32.mrf.mxu0  ;;  %15577 = vmatmul.mubr.msk.f32.gmra.mxu0 %vm488_vm1, %v432_v46 }
  0xe1   : > { %1856 = vst.msk [vmem:[#allocation2 + $0x8] sm:$0xff] %vm1854_vm3, %v1711_v49  ;;  %v1710_v52 = vmax.f32 %v992_v50, 0.0  ;;  %v1007_v53 = vadd.f32 %v15434_v51, %v17172_v42  ;;  %15579 = vmatprep.mubr.msk.f32.mxu0 %vm488_vm1, %v433_v48  ;;  %v445_v51 = vld [vmem:[%s16952_s21 + $0x380] sm:$0xff] }
  0xe2   : > { %v1001_v55 = vpop.f32.mrf.mxu0 }
  0xe3   : > { %1855 = vst.msk [vmem:[#allocation2] sm:$0xff] %vm1854_vm3, %v1710_v52  ;;  %v1713_v57 = vmax.f32 %v1007_v53, 0.0  ;;  %v1002_v58 = vadd.f32 %v17172_v42, %v1001_v55 }
  0xe4   : > { %v15437_v59 = vpop.f32.mrf.mxu0  ;;  %15580 = vmatmul.mubr.msk.f32.gmra.mxu0 %vm488_vm1, %v434_v54 }
  0xe5   : > { %1858 = vst.msk [vmem:[#allocation2 + $0x18] sm:$0xff] %vm1854_vm3, %v1713_v57  ;;  %v1712_v60 = vmax.f32 %v1002_v58, 0.0  ;;  %v1017_v61 = vadd.f32 %v15437_v59, %v17172_v42  ;;  %15582 = vmatprep.mubr.msk.f32.mxu0 %vm488_vm1, %v435_v56  ;;  %v446_v56 = vld [vmem:[%s16952_s21 + $0x388] sm:$0xff] }
  0xe6   : > { %v1011_v63 = vpop.f32.mrf.mxu0 }
  0xe7   : > { %1857 = vst.msk [vmem:[#allocation2 + $0x10] sm:$0xff] %vm1854_vm3, %v1712_v60  ;;  %v1715_v1 = vmax.f32 %v1017_v61, 0.0  ;;  %v1012_v2 = vadd.f32 %v17172_v42, %v1011_v63  ;;  %v447_v61 = vld [vmem:[%s16952_s21 + $0x390] sm:$0xff] }
  0xe8   : > { %v15440_v3 = vpop.f32.mrf.mxu0  ;;  %15583 = vmatmul.mubr.msk.f32.gmra.mxu0 %vm488_vm1, %v436_v62 }
  0xe9   : > { %1860 = vst.msk [vmem:[#allocation2 + $0x28] sm:$0xff] %vm1854_vm3, %v1715_v1  ;;  %v1714_v4 = vmax.f32 %v1012_v2, 0.0  ;;  %v1027_v5 = vadd.f32 %v15440_v3, %v17172_v42  ;;  %15585 = vmatprep.mubr.msk.f32.mxu0 %vm488_vm1, %v437_v0 }
  0xea   : > { %v1021_v7 = vpop.f32.mrf.mxu0  ;;  %v1999_v13 = vld [vmem:[#allocation2] ss:$2 sm:$0xff]  ;;  %v2191_v14 = vld [vmem:[#allocation2 + $0x1] ss:$2 sm:$0xff] }
  0xeb   : > { %1859 = vst.msk [vmem:[#allocation2 + $0x20] sm:$0xff] %vm1854_vm3, %v1714_v4  ;;  %v1717_v9 = vmax.f32 %v1027_v5, 0.0  ;;  %v1022_v10 = vadd.f32 %v17172_v42, %v1021_v7  ;;  %v2382_v28 = vmax.f32 %v1999_v13, %v2191_v14 }
  0xec   : > { %v15443_v11 = vpop.f32.mrf.mxu0  ;;  %15586 = vmatmul.mubr.msk.f32.gmra.mxu0 %vm488_vm1, %v438_v6 }
  0xed   : > { %1862 = vst.msk [vmem:[#allocation2 + $0x38] sm:$0xff] %vm1854_vm3, %v1717_v9  ;;  %v1716_v15 = vmax.f32 %v1022_v10, 0.0  ;;  %v1037_v16 = vadd.f32 %v15443_v11, %v17172_v42  ;;  %15588 = vmatprep.mubr.msk.f32.mxu0 %vm488_vm1, %v439_v8  ;;  %v2478_v48 = vsel %vm1854_vm3, %v2382_v28, -inf  ;;  %v448_v11 = vld [vmem:[%s16952_s21 + $0x398] sm:$0xff]  ;;  %v450_v28 = vld [vmem:[%s16952_s21 + $0x3a8] sm:$0xff] }
  0xee   : > { %v2001_v18 = vld [vmem:[#allocation2 + $0x10] ss:$2 sm:$0xf]  ;;  %v2193_v19 = vld [vmem:[#allocation2 + $0x11] ss:$2 sm:$0xf]  ;;  %v1031_v20 = vpop.f32.mrf.mxu0 }
  0xef   : > { %v2383_v21 = vmax.f32 %v2001_v18, %v2193_v19  ;;  %1861 = vst.msk [vmem:[#allocation2 + $0x30] sm:$0xff] %vm1854_vm3, %v1716_v15  ;;  %v1719_v22 = vmax.f32 %v1037_v16, 0.0  ;;  %v1032_v23 = vadd.f32 %v17172_v42, %v1031_v20  ;;  %v449_v16 = vld [vmem:[%s16952_s21 + $0x3a0] sm:$0xff] }
  0xf0   : > { %v2005_v24 = vld [vmem:[#allocation2 + $0x28] ss:$2 sm:$0xf]  ;;  %v2197_v25 = vld [vmem:[#allocation2 + $0x29] ss:$2 sm:$0xf]  ;;  %v15446_v26 = vpop.f32.mrf.mxu0  ;;  %15589 = vmatmul.mubr.msk.f32.gmra.mxu0 %vm488_vm1, %v440_v12 }
  0xf1   : > { %v2385_v29 = vmax.f32 %v2005_v24, %v2197_v25  ;;  %1864 = vst.msk [vmem:[#allocation2 + $0x48] sm:$0xff] %vm1854_vm3, %v1719_v22  ;;  %v1718_v30 = vmax.f32 %v1032_v23, 0.0  ;;  %v1047_v31 = vadd.f32 %v15446_v26, %v17172_v42  ;;  %15591 = vmatprep.mubr.msk.f32.mxu0 %vm488_vm1, %v441_v17  ;;  %v2482_v37 = vsel %vm2481_vm4, %v2383_v21, -inf }
  0xf2   : > { %v2003_v33 = vld [vmem:[#allocation2 + $0x18] ss:$2 sm:$0xff]  ;;  %v2195_v34 = vld [vmem:[#allocation2 + $0x19] ss:$2 sm:$0xff]  ;;  %v1041_v35 = vpop.f32.mrf.mxu0 }
  0xf3   : > { %v2483_v38 = vsel %vm2481_vm4, %v2385_v29, -inf  ;;  %v2384_v39 = vmax.f32 %v2003_v33, %v2195_v34  ;;  %1863 = vst.msk [vmem:[#allocation2 + $0x40] sm:$0xff] %vm1854_vm3, %v1718_v30  ;;  %v1721_v40 = vmax.f32 %v1047_v31, 0.0  ;;  %v1042_v41 = vadd.f32 %v17172_v42, %v1041_v35  ;;  %v451_v31 = vld [vmem:[%s16952_s21 + $0x3b0] sm:$0xff]  ;;  %v452_v35 = vld [vmem:[%s16952_s21 + $0x3b8] sm:$0xff] }
  0xf4   : > { %v15449_v43 = vpop.f32.mrf.mxu0  ;;  %15592 = vmatmul.mubr.msk.f32.gmra.mxu0 %vm488_vm1, %v442_v32  ;;  %v2484_v44 = vmax.f32 %v2482_v37, %v2483_v38 }
  0xf5   : > { %1866 = vst.msk [vmem:[#allocation2 + $0x58] sm:$0xff] %vm1854_vm3, %v1721_v40  ;;  %v1720_v45 = vmax.f32 %v1042_v41, 0.0  ;;  %v1057_v46 = vadd.f32 %v15449_v43, %v17172_v42  ;;  %15594 = vmatprep.mubr.msk.f32.mxu0 %vm488_vm1, %v443_v36  ;;  %v2479_v49 = vsel %vm1854_vm3, %v2384_v39, -inf  ;;  %v453_v40 = vld [vmem:[%s16952_s21 + $0x3c0] sm:$0xff] }
  0xf6   : > { %v1051_v50 = vpop.f32.mrf.mxu0  ;;  %v2480_v52 = vmax.f32 %v2478_v48, %v2479_v49  ;;  %2624 = vst.msk [vmem:[#allocation3 + $0x8] sm:$0xf] %vm2481_vm4, %v2484_v44  ;;  %v2007_v57 = vld [vmem:[#allocation2 + $0x30] ss:$2 sm:$0xff]  ;;  %v2199_v58 = vld [vmem:[#allocation2 + $0x31] ss:$2 sm:$0xff] }
  0xf7   : > { %1865 = vst.msk [vmem:[#allocation2 + $0x50] sm:$0xff] %vm1854_vm3, %v1720_v45  ;;  %v1723_v53 = vmax.f32 %v1057_v46, 0.0  ;;  %v1052_v54 = vadd.f32 %v17172_v42, %v1051_v50  ;;  %v2386_v7 = vmax.f32 %v2007_v57, %v2199_v58 }
  0xf8   : > { %v15452_v55 = vpop.f32.mrf.mxu0  ;;  %15595 = vmatmul.mubr.msk.f32.gmra.mxu0 %vm488_vm1, %v444_v47  ;;  %2623 = vst.msk [vmem:[#allocation3] sm:$0xff] %vm1854_vm3, %v2480_v52 }
  0xf9   : > { %1868 = vst.msk [vmem:[#allocation2 + $0x68] sm:$0xff] %vm1854_vm3, %v1723_v53  ;;  %v1722_v59 = vmax.f32 %v1052_v54, 0.0  ;;  %v1067_v60 = vadd.f32 %v15452_v55, %v17172_v42  ;;  %15597 = vmatprep.mubr.msk.f32.mxu0 %vm488_vm1, %v445_v51  ;;  %v2485_v23 = vsel %vm1854_vm3, %v2386_v7, -inf  ;;  %v454_v55 = vld [vmem:[%s16952_s21 + $0x3c8] sm:$0xff] }
  0xfa   : > { %v2009_v62 = vld [vmem:[#allocation2 + $0x40] ss:$2 sm:$0xf]  ;;  %v2201_v63 = vld [vmem:[#allocation2 + $0x41] ss:$2 sm:$0xf]  ;;  %v1061_v0 = vpop.f32.mrf.mxu0 }
  0xfb   : > { %v2387_v1 = vmax.f32 %v2009_v62, %v2201_v63  ;;  %1867 = vst.msk [vmem:[#allocation2 + $0x60] sm:$0xff] %vm1854_vm3, %v1722_v59  ;;  %v1725_v2 = vmax.f32 %v1067_v60, 0.0  ;;  %v1062_v3 = vadd.f32 %v17172_v42, %v1061_v0  ;;  %v455_v59 = vld [vmem:[%s16952_s21 + $0x3d0] sm:$0xff] }
  0xfc   : > { %v2013_v4 = vld [vmem:[#allocation2 + $0x58] ss:$2 sm:$0xf]  ;;  %v2205_v5 = vld [vmem:[#allocation2 + $0x59] ss:$2 sm:$0xf]  ;;  %v15455_v6 = vpop.f32.mrf.mxu0  ;;  %15598 = vmatmul.mubr.msk.f32.gmra.mxu0 %vm488_vm1, %v446_v56 }
  0xfd   : > { %v2389_v8 = vmax.f32 %v2013_v4, %v2205_v5  ;;  %1870 = vst.msk [vmem:[#allocation2 + $0x78] sm:$0xff] %vm1854_vm3, %v1725_v2  ;;  %v1724_v9 = vmax.f32 %v1062_v3, 0.0  ;;  %v1077_v10 = vadd.f32 %v15455_v6, %v17172_v42  ;;  %15600 = vmatprep.mubr.msk.f32.mxu0 %vm488_vm1, %v447_v61  ;;  %v2488_v12 = vsel %vm2481_vm4, %v2387_v1, -inf  ;;  %v456_v5 = vld [vmem:[%s16952_s21 + $0x3d8] sm:$0xff] }
  0xfe   : > { %v2011_v13 = vld [vmem:[#allocation2 + $0x48] ss:$2 sm:$0xff]  ;;  %v2203_v14 = vld [vmem:[#allocation2 + $0x49] ss:$2 sm:$0xff]  ;;  %v1071_v15 = vpop.f32.mrf.mxu0 }
  0xff   : > { %v2489_v17 = vsel %vm2481_vm4, %v2389_v8, -inf  ;;  %v2388_v18 = vmax.f32 %v2011_v13, %v2203_v14  ;;  %1869 = vst.msk [vmem:[#allocation2 + $0x70] sm:$0xff] %vm1854_vm3, %v1724_v9  ;;  %v1727_v19 = vmax.f32 %v1077_v10, 0.0  ;;  %v1072_v20 = vadd.f32 %v17172_v42, %v1071_v15  ;;  %v457_v9 = vld [vmem:[%s16952_s21 + $0x3e0] sm:$0xff]  ;;  %v458_v14 = vld [vmem:[%s16952_s21 + $0x3e8] sm:$0xff] }
 0x100   : > { %v2490_v21 = vmax.f32 %v2488_v12, %v2489_v17  ;;  %v15458_v22 = vpop.f32.mrf.mxu0  ;;  %15601 = vmatmul.mubr.msk.f32.gmra.mxu0 %vm488_vm1, %v448_v11 }
 0x101   : > { %v2486_v24 = vsel %vm1854_vm3, %v2388_v18, -inf  ;;  %1872 = vst.msk [vmem:[#allocation2 + $0x88] sm:$0xff] %vm1854_vm3, %v1727_v19  ;;  %v1726_v25 = vmax.f32 %v1072_v20, 0.0  ;;  %v1087_v26 = vadd.f32 %v15458_v22, %v17172_v42  ;;  %15603 = vmatprep.mubr.msk.f32.mxu0 %vm488_vm1, %v449_v16  ;;  %v459_v19 = vld [vmem:[%s16952_s21 + $0x3f0] sm:$0xff] }
 0x102   : > { %2626 = vst.msk [vmem:[#allocation3 + $0x18] sm:$0xf] %vm2481_vm4, %v2490_v21  ;;  %v2487_v29 = vmax.f32 %v2485_v23, %v2486_v24  ;;  %v1081_v30 = vpop.f32.mrf.mxu0  ;;  %v2015_v36 = vld [vmem:[#allocation2 + $0x60] ss:$2 sm:$0xff]  ;;  %v2207_v37 = vld [vmem:[#allocation2 + $0x61] ss:$2 sm:$0xff] }
 0x103   : > { %1871 = vst.msk [vmem:[#allocation2 + $0x80] sm:$0xff] %vm1854_vm3, %v1726_v25  ;;  %v1729_v32 = vmax.f32 %v1087_v26, 0.0  ;;  %v1082_v33 = vadd.f32 %v17172_v42, %v1081_v30  ;;  %v2390_v51 = vmax.f32 %v2015_v36, %v2207_v37 }
 0x104   : > { %2625 = vst.msk [vmem:[#allocation3 + $0x10] sm:$0xff] %vm1854_vm3, %v2487_v29  ;;  %v15461_v34 = vpop.f32.mrf.mxu0  ;;  %15604 = vmatmul.mubr.msk.f32.gmra.mxu0 %vm488_vm1, %v450_v28 }
 0x105   : > { %1874 = vst.msk [vmem:[#allocation2 + $0x98] sm:$0xff] %vm1854_vm3, %v1729_v32  ;;  %v1728_v38 = vmax.f32 %v1082_v33, 0.0  ;;  %v1097_v39 = vadd.f32 %v15461_v34, %v17172_v42  ;;  %15606 = vmatprep.mubr.msk.f32.mxu0 %vm488_vm1, %v451_v31  ;;  %v2491_v6 = vsel %vm1854_vm3, %v2390_v51, -inf  ;;  %v460_v34 = vld [vmem:[%s16952_s21 + $0x3f8] sm:$0xff]  ;;  %v462_v51 = vld [vmem:[%s16952_s21 + $0x408] sm:$0xff] }
 0x106   : > { %v2017_v41 = vld [vmem:[#allocation2 + $0x70] ss:$2 sm:$0xf]  ;;  %v2209_v43 = vld [vmem:[#allocation2 + $0x71] ss:$2 sm:$0xf]  ;;  %v1091_v44 = vpop.f32.mrf.mxu0 }
 0x107   : > { %v2391_v45 = vmax.f32 %v2017_v41, %v2209_v43  ;;  %1873 = vst.msk [vmem:[#allocation2 + $0x90] sm:$0xff] %vm1854_vm3, %v1728_v38  ;;  %v1731_v46 = vmax.f32 %v1097_v39, 0.0  ;;  %v1092_v47 = vadd.f32 %v17172_v42, %v1091_v44  ;;  %v461_v39 = vld [vmem:[%s16952_s21 + $0x400] sm:$0xff] }
 0x108   : > { %v2021_v48 = vld [vmem:[#allocation2 + $0x88] ss:$2 sm:$0xf]  ;;  %v2213_v49 = vld [vmem:[#allocation2 + $0x89] ss:$2 sm:$0xf]  ;;  %v15464_v50 = vpop.f32.mrf.mxu0  ;;  %15607 = vmatmul.mubr.msk.f32.gmra.mxu0 %vm488_vm1, %v452_v35 }
 0x109   : > { %v2393_v52 = vmax.f32 %v2021_v48, %v2213_v49  ;;  %1876 = vst.msk [vmem:[#allocation2 + $0xa8] sm:$0xff] %vm1854_vm3, %v1731_v46  ;;  %v1730_v53 = vmax.f32 %v1092_v47, 0.0  ;;  %v1107_v54 = vadd.f32 %v15464_v50, %v17172_v42  ;;  %15609 = vmatprep.mubr.msk.f32.mxu0 %vm488_vm1, %v453_v40  ;;  %v2494_v60 = vsel %vm2481_vm4, %v2391_v45, -inf }
 0x10a   : > { %v2019_v56 = vld [vmem:[#allocation2 + $0x78] ss:$2 sm:$0xff]  ;;  %v2211_v57 = vld [vmem:[#allocation2 + $0x79] ss:$2 sm:$0xff]  ;;  %v1101_v58 = vpop.f32.mrf.mxu0 }
 0x10b   : > { %v2495_v61 = vsel %vm2481_vm4, %v2393_v52, -inf  ;;  %v2392_v62 = vmax.f32 %v2019_v56, %v2211_v57  ;;  %1875 = vst.msk [vmem:[#allocation2 + $0xa0] sm:$0xff] %vm1854_vm3, %v1730_v53  ;;  %v1733_v63 = vmax.f32 %v1107_v54, 0.0  ;;  %v1102_v0 = vadd.f32 %v17172_v42, %v1101_v58  ;;  %v463_v53 = vld [vmem:[%s16952_s21 + $0x410] sm:$0xff]  ;;  %v464_v58 = vld [vmem:[%s16952_s21 + $0x418] sm:$0xff] }
 0x10c   : > { %v15467_v1 = vpop.f32.mrf.mxu0  ;;  %15610 = vmatmul.mubr.msk.f32.gmra.mxu0 %vm488_vm1, %v454_v55  ;;  %v2496_v2 = vmax.f32 %v2494_v60, %v2495_v61 }
 0x10d   : > { %1878 = vst.msk [vmem:[#allocation2 + $0xb8] sm:$0xff] %vm1854_vm3, %v1733_v63  ;;  %v1732_v3 = vmax.f32 %v1102_v0, 0.0  ;;  %v1117_v4 = vadd.f32 %v15467_v1, %v17172_v42  ;;  %15612 = vmatprep.mubr.msk.f32.mxu0 %vm488_vm1, %v455_v59  ;;  %v2492_v7 = vsel %vm1854_vm3, %v2392_v62, -inf  ;;  %v465_v63 = vld [vmem:[%s16952_s21 + $0x420] sm:$0xff] }
 0x10e   : > { %v1111_v8 = vpop.f32.mrf.mxu0  ;;  %v2493_v10 = vmax.f32 %v2491_v6, %v2492_v7  ;;  %2628 = vst.msk [vmem:[#allocation3 + $0x28] sm:$0xf] %vm2481_vm4, %v2496_v2  ;;  %v2023_v15 = vld [vmem:[#allocation2 + $0x90] ss:$2 sm:$0xff]  ;;  %v2215_v16 = vld [vmem:[#allocation2 + $0x91] ss:$2 sm:$0xff] }
 0x10f   : > { %1877 = vst.msk [vmem:[#allocation2 + $0xb0] sm:$0xff] %vm1854_vm3, %v1732_v3  ;;  %v1735_v11 = vmax.f32 %v1117_v4, 0.0  ;;  %v1112_v12 = vadd.f32 %v17172_v42, %v1111_v8  ;;  %v2394_v30 = vmax.f32 %v2023_v15, %v2215_v16 }
 0x110   : > { %v15470_v13 = vpop.f32.mrf.mxu0  ;;  %15613 = vmatmul.mubr.msk.f32.gmra.mxu0 %vm488_vm1, %v456_v5  ;;  %2627 = vst.msk [vmem:[#allocation3 + $0x20] sm:$0xff] %vm1854_vm3, %v2493_v10 }
 0x111   : > { %1880 = vst.msk [vmem:[#allocation2 + $0xc8] sm:$0xff] %vm1854_vm3, %v1735_v11  ;;  %v1734_v17 = vmax.f32 %v1112_v12, 0.0  ;;  %v1127_v18 = vadd.f32 %v15470_v13, %v17172_v42  ;;  %15615 = vmatprep.mubr.msk.f32.mxu0 %vm488_vm1, %v457_v9  ;;  %v2497_v47 = vsel %vm1854_vm3, %v2394_v30, -inf  ;;  %v466_v13 = vld [vmem:[%s16952_s21 + $0x428] sm:$0xff] }
 0x112   : > { %v2025_v20 = vld [vmem:[#allocation2 + $0xa0] ss:$2 sm:$0xf]  ;;  %v2217_v21 = vld [vmem:[#allocation2 + $0xa1] ss:$2 sm:$0xf]  ;;  %v1121_v22 = vpop.f32.mrf.mxu0 }
 0x113   : > { %v2395_v23 = vmax.f32 %v2025_v20, %v2217_v21  ;;  %1879 = vst.msk [vmem:[#allocation2 + $0xc0] sm:$0xff] %vm1854_vm3, %v1734_v17  ;;  %v1737_v24 = vmax.f32 %v1127_v18, 0.0  ;;  %v1122_v25 = vadd.f32 %v17172_v42, %v1121_v22  ;;  %v467_v17 = vld [vmem:[%s16952_s21 + $0x430] sm:$0xff] }
 0x114   : > { %v2029_v26 = vld [vmem:[#allocation2 + $0xb8] ss:$2 sm:$0xf]  ;;  %v2221_v28 = vld [vmem:[#allocation2 + $0xb9] ss:$2 sm:$0xf]  ;;  %v15473_v29 = vpop.f32.mrf.mxu0  ;;  %15616 = vmatmul.mubr.msk.f32.gmra.mxu0 %vm488_vm1, %v458_v14 }
 0x115   : > { %v2397_v31 = vmax.f32 %v2029_v26, %v2221_v28  ;;  %1882 = vst.msk [vmem:[#allocation2 + $0xd8] sm:$0xff] %vm1854_vm3, %v1737_v24  ;;  %v1736_v32 = vmax.f32 %v1122_v25, 0.0  ;;  %v1137_v33 = vadd.f32 %v15473_v29, %v17172_v42  ;;  %15618 = vmatprep.mubr.msk.f32.mxu0 %vm488_vm1, %v459_v19  ;;  %v2500_v35 = vsel %vm2481_vm4, %v2395_v23, -inf  ;;  %v468_v28 = vld [vmem:[%s16952_s21 + $0x438] sm:$0xff] }
 0x116   : > { %v2027_v36 = vld [vmem:[#allocation2 + $0xa8] ss:$2 sm:$0xff]  ;;  %v2219_v37 = vld [vmem:[#allocation2 + $0xa9] ss:$2 sm:$0xff]  ;;  %v1131_v38 = vpop.f32.mrf.mxu0 }
 0x117   : > { %v2501_v40 = vsel %vm2481_vm4, %v2397_v31, -inf  ;;  %v2396_v41 = vmax.f32 %v2027_v36, %v2219_v37  ;;  %1881 = vst.msk [vmem:[#allocation2 + $0xd0] sm:$0xff] %vm1854_vm3, %v1736_v32  ;;  %v1739_v43 = vmax.f32 %v1137_v33, 0.0  ;;  %v1132_v44 = vadd.f32 %v17172_v42, %v1131_v38  ;;  %v469_v32 = vld [vmem:[%s16952_s21 + $0x440] sm:$0xff]  ;;  %v470_v37 = vld [vmem:[%s16952_s21 + $0x448] sm:$0xff] }
 0x118   : > { %v2502_v45 = vmax.f32 %v2500_v35, %v2501_v40  ;;  %v15476_v46 = vpop.f32.mrf.mxu0  ;;  %15619 = vmatmul.mubr.msk.f32.gmra.mxu0 %vm488_vm1, %v460_v34 }
 0x119   : > { %v2498_v48 = vsel %vm1854_vm3, %v2396_v41, -inf  ;;  %1884 = vst.msk [vmem:[#allocation2 + $0xe8] sm:$0xff] %vm1854_vm3, %v1739_v43  ;;  %v1738_v49 = vmax.f32 %v1132_v44, 0.0  ;;  %v1147_v50 = vadd.f32 %v15476_v46, %v17172_v42  ;;  %15621 = vmatprep.mubr.msk.f32.mxu0 %vm488_vm1, %v461_v39  ;;  %v471_v43 = vld [vmem:[%s16952_s21 + $0x450] sm:$0xff] }
 0x11a   : > { %2630 = vst.msk [vmem:[#allocation3 + $0x38] sm:$0xf] %vm2481_vm4, %v2502_v45  ;;  %v1141_v52 = vpop.f32.mrf.mxu0  ;;  %v2499_v54 = vmax.f32 %v2497_v47, %v2498_v48  ;;  %v2031_v59 = vld [vmem:[#allocation2 + $0xc0] ss:$2 sm:$0xff]  ;;  %v2223_v60 = vld [vmem:[#allocation2 + $0xc1] ss:$2 sm:$0xff] }
 0x11b   : > { %1883 = vst.msk [vmem:[#allocation2 + $0xe0] sm:$0xff] %vm1854_vm3, %v1738_v49  ;;  %v1741_v55 = vmax.f32 %v1147_v50, 0.0  ;;  %v1142_v56 = vadd.f32 %v17172_v42, %v1141_v52  ;;  %v2398_v9 = vmax.f32 %v2031_v59, %v2223_v60 }
 0x11c   : > { %v15479_v57 = vpop.f32.mrf.mxu0  ;;  %15622 = vmatmul.mubr.msk.f32.gmra.mxu0 %vm488_vm1, %v462_v51  ;;  %2629 = vst.msk [vmem:[#allocation3 + $0x30] sm:$0xff] %vm1854_vm3, %v2499_v54 }
 0x11d   : > { %1886 = vst.msk [vmem:[#allocation2 + $0xf8] sm:$0xff] %vm1854_vm3, %v1741_v55  ;;  %v1740_v61 = vmax.f32 %v1142_v56, 0.0  ;;  %v1157_v62 = vadd.f32 %v15479_v57, %v17172_v42  ;;  %15624 = vmatprep.mubr.msk.f32.mxu0 %vm488_vm1, %v463_v53  ;;  %v2503_v29 = vsel %vm1854_vm3, %v2398_v9, -inf  ;;  %v472_v57 = vld [vmem:[%s16952_s21 + $0x458] sm:$0xff] }
 0x11e   : > { %v2033_v0 = vld [vmem:[#allocation2 + $0xd0] ss:$2 sm:$0xf]  ;;  %v2225_v1 = vld [vmem:[#allocation2 + $0xd1] ss:$2 sm:$0xf]  ;;  %v1151_v2 = vpop.f32.mrf.mxu0 }
 0x11f   : > { %v2399_v3 = vmax.f32 %v2033_v0, %v2225_v1  ;;  %1885 = vst.msk [vmem:[#allocation2 + $0xf0] sm:$0xff] %vm1854_vm3, %v1740_v61  ;;  %v1743_v4 = vmax.f32 %v1157_v62, 0.0  ;;  %v1152_v5 = vadd.f32 %v17172_v42, %v1151_v2  ;;  %v473_v61 = vld [vmem:[%s16952_s21 + $0x460] sm:$0xff] }
 0x120   : > { %v2037_v6 = vld [vmem:[#allocation2 + $0xe8] ss:$2 sm:$0xf]  ;;  %v2229_v7 = vld [vmem:[#allocation2 + $0xe9] ss:$2 sm:$0xf]  ;;  %v15482_v8 = vpop.f32.mrf.mxu0  ;;  %15625 = vmatmul.mubr.msk.f32.gmra.mxu0 %vm488_vm1, %v464_v58 }
 0x121   : > { %v2401_v10 = vmax.f32 %v2037_v6, %v2229_v7  ;;  %1888 = vst.msk [vmem:[#allocation2 + $0x108] sm:$0xff] %vm1854_vm3, %v1743_v4  ;;  %v1742_v11 = vmax.f32 %v1152_v5, 0.0  ;;  %v1167_v12 = vadd.f32 %v15482_v8, %v17172_v42  ;;  %15627 = vmatprep.mubr.msk.f32.mxu0 %vm488_vm1, %v465_v63  ;;  %v2506_v18 = vsel %vm2481_vm4, %v2399_v3, -inf  ;;  %v474_v8 = vld [vmem:[%s16952_s21 + $0x468] sm:$0xff] }
 0x122   : > { %v2035_v14 = vld [vmem:[#allocation2 + $0xd8] ss:$2 sm:$0xff]  ;;  %v2227_v15 = vld [vmem:[#allocation2 + $0xd9] ss:$2 sm:$0xff]  ;;  %v1161_v16 = vpop.f32.mrf.mxu0 }
 0x123   : > { %v2400_v19 = vmax.f32 %v2035_v14, %v2227_v15  ;;  %1887 = vst.msk [vmem:[#allocation2 + $0x100] sm:$0xff] %vm1854_vm3, %v1742_v11  ;;  %v1745_v20 = vmax.f32 %v1167_v12, 0.0  ;;  %v1162_v21 = vadd.f32 %v17172_v42, %v1161_v16  ;;  %v2507_v22 = vsel %vm2481_vm4, %v2401_v10, -inf  ;;  %v475_v12 = vld [vmem:[%s16952_s21 + $0x470] sm:$0xff] }
 0x124   : > { %v15485_v23 = vpop.f32.mrf.mxu0  ;;  %15628 = vmatmul.mubr.msk.f32.gmra.mxu0 %vm488_vm1, %v466_v13  ;;  %v2508_v24 = vmax.f32 %v2506_v18, %v2507_v22 }
 0x125   : > { %1890 = vst.msk [vmem:[#allocation2 + $0x118] sm:$0xff] %vm1854_vm3, %v1745_v20  ;;  %v1744_v25 = vmax.f32 %v1162_v21, 0.0  ;;  %v1177_v26 = vadd.f32 %v15485_v23, %v17172_v42  ;;  %15630 = vmatprep.mubr.msk.f32.mxu0 %vm488_vm1, %v467_v17  ;;  %v2504_v30 = vsel %vm1854_vm3, %v2400_v19, -inf  ;;  %v476_v21 = vld [vmem:[%s16952_s21 + $0x478] sm:$0xff]  ;;  %s326_s21 = scalar_lea.vmem [#allocation6], %s13272_s29  ;;  %s16779_s29 = scalar_lea.vmem %s16778_s13, 64 }
 0x126   : > { %v1171_v31 = vpop.f32.mrf.mxu0  ;;  %v2505_v33 = vmax.f32 %v2503_v29, %v2504_v30  ;;  %2632 = vst.msk [vmem:[#allocation3 + $0x48] sm:$0xf] %vm2481_vm4, %v2508_v24  ;;  %v2039_v38 = vld [vmem:[#allocation2 + $0xf0] ss:$2 sm:$0xff]  ;;  %v2231_v39 = vld [vmem:[#allocation2 + $0xf1] ss:$2 sm:$0xff] }
 0x127   : > { %1889 = vst.msk [vmem:[#allocation2 + $0x110] sm:$0xff] %vm1854_vm3, %v1744_v25  ;;  %v1747_v34 = vmax.f32 %v1177_v26, 0.0  ;;  %v1172_v35 = vadd.f32 %v17172_v42, %v1171_v31  ;;  %v2402_v53 = vmax.f32 %v2039_v38, %v2231_v39  ;;  %v2690_v29 = vld [vmem:[#allocation3 + $0x1] sm:$0xff]  ;;  %s13209_s22 = sshll.u32 %s326_s21, 4  ;;  %s13210_s22 = int_to_ptr.vmem [resolvable:$true] %s13209_s22 }
 0x128   : > { %v15488_v36 = vpop.f32.mrf.mxu0  ;;  %15631 = vmatmul.mubr.msk.f32.gmra.mxu0 %vm488_vm1, %v468_v28  ;;  %2631 = vst.msk [vmem:[#allocation3 + $0x40] sm:$0xff] %vm1854_vm3, %v2505_v33  ;;  %s16773_s27 = scalar_lea.vmem %s13210_s22, 32  ;;  %p16780_p0 = scmp.lt.s32.totalorder %s13210_s22, %s16778_s13 }
 0x129   : > { %1892 = vst.msk [vmem:[#allocation2 + $0x128] sm:$0xff] %vm1854_vm3, %v1747_v34  ;;  %v1746_v40 = vmax.f32 %v1172_v35, 0.0  ;;  %v1187_v41 = vadd.f32 %v15488_v36, %v17172_v42  ;;  %15633 = vmatprep.mubr.msk.f32.mxu0 %vm488_vm1, %v469_v32  ;;  %v2509_v9 = vsel %vm1854_vm3, %v2402_v53, -inf  ;;  %p16774_p11 = scmp.ne.s32.totalorder %s13210_s22, %s16773_s27  ;;  %p16781_p1 = scmp.lt.s32.totalorder %s16779_s29, %s16773_s27 }
 0x12a   : > { %v2041_v44 = vld [vmem:[#allocation2 + $0x100] ss:$2 sm:$0xf]  ;;  %v2233_v45 = vld [vmem:[#allocation2 + $0x101] ss:$2 sm:$0xf]  ;;  %v1181_v46 = vpop.f32.mrf.mxu0 }
 0x12b   : > { %v2403_v47 = vmax.f32 %v2041_v44, %v2233_v45  ;;  %1891 = vst.msk [vmem:[#allocation2 + $0x120] sm:$0xff] %vm1854_vm3, %v1746_v40  ;;  %v1749_v48 = vmax.f32 %v1187_v41, 0.0  ;;  %v1182_v49 = vadd.f32 %v17172_v42, %v1181_v46  ;;  %v2691_v46 = vld [vmem:[#allocation3 + $0x11] sm:$0xff]  ;;  %p16775_p12 = pnand %p16774_p11, %p16926_p5  ;;  %p16782_p2 = por %p16781_p1, %p16780_p0 }
 0x12c   : > { %v2045_v50 = vld [vmem:[#allocation2 + $0x118] ss:$2 sm:$0xf]  ;;  %v2237_v51 = vld [vmem:[#allocation2 + $0x119] ss:$2 sm:$0xf]  ;;  %v15491_v52 = vpop.f32.mrf.mxu0  ;;  %15634 = vmatmul.mubr.msk.f32.gmra.mxu0 %vm488_vm1, %v470_v37 }
 0x12d   : > { %v2405_v54 = vmax.f32 %v2045_v50, %v2237_v51  ;;  %1894 = vst.msk [vmem:[#allocation2 + $0x138] sm:$0xff] %vm1854_vm3, %v1749_v48  ;;  %v1748_v55 = vmax.f32 %v1182_v49, 0.0  ;;  %v1197_v56 = vadd.f32 %v15491_v52, %v17172_v42  ;;  %15636 = vmatprep.mubr.msk.f32.mxu0 %vm488_vm1, %v471_v43  ;;  %v2512_v62 = vsel %vm2481_vm4, %v2403_v47, -inf  ;;  %v13618_v48 = vld [vmem:[%s22693_s3 + $0xf8] sm:$0xff]  ;;  %v2692_v50 = vld [vmem:[#allocation3 + $0x21] sm:$0xff]  ;;  %p16776_p13 = pneg %p16775_p12 }
 0x12e   : > { %v2043_v58 = vld [vmem:[#allocation2 + $0x108] ss:$2 sm:$0xff]  ;;  %v2235_v59 = vld [vmem:[#allocation2 + $0x109] ss:$2 sm:$0xff]  ;;  %v1191_v60 = vpop.f32.mrf.mxu0 }
 0x12f   : > { %v2513_v63 = vsel %vm2481_vm4, %v2405_v54, -inf  ;;  %v2404_v0 = vmax.f32 %v2043_v58, %v2235_v59  ;;  %1893 = vst.msk [vmem:[#allocation2 + $0x130] sm:$0xff] %vm1854_vm3, %v1748_v55  ;;  %v1751_v1 = vmax.f32 %v1197_v56, 0.0  ;;  %v1192_v2 = vadd.f32 %v17172_v42, %v1191_v60  ;;  %v2694_v3 = vld [vmem:[#allocation3 + $0x41] sm:$0xff]  ;;  %v13617_v54 = vld [vmem:[%s22693_s3 + $0xf0] sm:$0xff]  ;;  %p16783_p3 = pnand %p16782_p2, %p16776_p13 }
 0x130   : > { %v15494_v4 = vpop.f32.mrf.mxu0  ;;  %15637 = vmatmul.mubr.msk.f32.gmra.mxu0 %vm488_vm1, %v472_v57  ;;  %15657 = vmatprep.mubr.msk.f32.mxu1 %vm1854_vm3, %v2694_v3  ;;  %v2514_v5 = vmax.f32 %v2512_v62, %v2513_v63  ;;  %v4961_v62 = vld [vmem:[#allocation3 + $0x20] sm:$0xff] }
 0x131   : > { %1896 = vst.msk [vmem:[#allocation2 + $0x148] sm:$0xff] %vm1854_vm3, %v1751_v1  ;;  %v1750_v6 = vmax.f32 %v1192_v2, 0.0  ;;  %v1207_v7 = vadd.f32 %v15494_v4, %v17172_v42  ;;  %15639 = vmatprep.mubr.msk.f32.mxu0 %vm488_vm1, %v473_v61  ;;  %v2510_v10 = vsel %vm1854_vm3, %v2404_v0, -inf  ;;  %v2693_v61 = vld [vmem:[#allocation3 + $0x31] sm:$0xff] }
 0x132   : > { %v1201_v11 = vpop.f32.mrf.mxu0  ;;  %v2511_v13 = vmax.f32 %v2509_v9, %v2510_v10  ;;  %2634 = vst.msk [vmem:[#allocation3 + $0x58] sm:$0xf] %vm2481_vm4, %v2514_v5  ;;  %v2047_v17 = vld [vmem:[#allocation2 + $0x120] ss:$2 sm:$0xff]  ;;  %v2239_v18 = vld [vmem:[#allocation2 + $0x121] ss:$2 sm:$0xff] }
 0x133   : > { %1895 = vst.msk [vmem:[#allocation2 + $0x140] sm:$0xff] %vm1854_vm3, %v1750_v6  ;;  %v1753_v14 = vmax.f32 %v1207_v7, 0.0  ;;  %v1202_v15 = vadd.f32 %v17172_v42, %v1201_v11  ;;  %v2406_v33 = vmax.f32 %v2047_v17, %v2239_v18  ;;  %v4962_v9 = vld [vmem:[#allocation3 + $0x30] sm:$0xff]  ;;  %v4963_v10 = vld [vmem:[#allocation3 + $0x40] sm:$0xff] }
 0x134   : > { %v15497_v16 = vpop.f32.mrf.mxu0  ;;  %15640 = vmatmul.mubr.msk.f32.gmra.mxu0 %vm488_vm1, %v474_v8  ;;  %2633 = vst.msk [vmem:[#allocation3 + $0x50] sm:$0xff] %vm1854_vm3, %v2511_v13 }
 0x135   : > { %1898 = vst.msk [vmem:[#allocation2 + $0x158] sm:$0xff] %vm1854_vm3, %v1753_v14  ;;  %v1752_v19 = vmax.f32 %v1202_v15, 0.0  ;;  %v1217_v20 = vadd.f32 %v15497_v16, %v17172_v42  ;;  %15642 = vmatprep.mubr.msk.f32.mxu0 %vm488_vm1, %v475_v12  ;;  %v2515_v55 = vsel %vm1854_vm3, %v2406_v33, -inf }
 0x136   : > { %v2049_v22 = vld [vmem:[#allocation2 + $0x130] ss:$2 sm:$0xf]  ;;  %v2241_v23 = vld [vmem:[#allocation2 + $0x131] ss:$2 sm:$0xf]  ;;  %v1211_v24 = vpop.f32.mrf.mxu0 }
 0x137   : > { %v2407_v25 = vmax.f32 %v2049_v22, %v2241_v23  ;;  %1897 = vst.msk [vmem:[#allocation2 + $0x150] sm:$0xff] %vm1854_vm3, %v1752_v19  ;;  %v1755_v26 = vmax.f32 %v1217_v20, 0.0  ;;  %v1212_v28 = vadd.f32 %v17172_v42, %v1211_v24 }
 0x138   : > { %v2053_v30 = vld [vmem:[#allocation2 + $0x148] ss:$2 sm:$0xf]  ;;  %v2245_v31 = vld [vmem:[#allocation2 + $0x149] ss:$2 sm:$0xf]  ;;  %v15500_v32 = vpop.f32.mrf.mxu0  ;;  %15643 = vmatmul.mubr.msk.f32.gmra.mxu0 %vm488_vm1, %v476_v21 }
 0x139   : > { %v2409_v34 = vmax.f32 %v2053_v30, %v2245_v31  ;;  %1900 = vst.msk [vmem:[#allocation2 + $0x168] sm:$0xff] %vm1854_vm3, %v1755_v26  ;;  %v1754_v35 = vmax.f32 %v1212_v28, 0.0  ;;  %v1227_v36 = vadd.f32 %v15500_v32, %v17172_v42  ;;  %15651 = vmatprep.mubr.msk.f32.mxu0 %vm1854_vm3, %v2690_v29  ;;  %v2518_v40 = vsel %vm2481_vm4, %v2407_v25, -inf }
 0x13a   : > { %v2051_v37 = vld [vmem:[#allocation2 + $0x138] ss:$2 sm:$0xff]  ;;  %v2243_v38 = vld [vmem:[#allocation2 + $0x139] ss:$2 sm:$0xff]  ;;  %v1221_v39 = vpop.f32.mrf.mxu0 }
 0x13b   : > { %v2519_v41 = vsel %vm2481_vm4, %v2409_v34, -inf  ;;  %v2408_v43 = vmax.f32 %v2051_v37, %v2243_v38  ;;  %1899 = vst.msk [vmem:[#allocation2 + $0x160] sm:$0xff] %vm1854_vm3, %v1754_v35  ;;  %v1757_v44 = vmax.f32 %v1227_v36, 0.0  ;;  %v1222_v45 = vadd.f32 %v17172_v42, %v1221_v39  ;;  %v2695_v47 = vld [vmem:[#allocation3 + $0x51] sm:$0xff] }
 0x13c   : > { %v15503_v49 = vpop.f32.mrf.mxu0  ;;  %15652 = vmatmul.mubr.msk.f32.vlgmr.msra.gmra.mxu0 %vm1854_vm3, %v2691_v46  ;;  %15658 = vmatmul.mubr.msk.f32.vlgmr.msra.gmra.mxu1 %vm1854_vm3, %v2695_v47  ;;  %v2520_v51 = vmax.f32 %v2518_v40, %v2519_v41  ;;  %v4964_v28 = vld [vmem:[#allocation3 + $0x50] sm:$0xff] }
 0x13d   : > { %1902 = vst.msk [vmem:[#allocation2 + $0x178] sm:$0xff] %vm1854_vm3, %v1757_v44  ;;  %v1756_v52 = vmax.f32 %v1222_v45, 0.0  ;;  %v1237_v53 = vadd.f32 %v15503_v49, %v17172_v42  ;;  %15654 = vmatprep.mubr.msk.f32.mxu0 %vm1854_vm3, %v2692_v50  ;;  %15946 = vmatpush3.msk.msra.mxu0 %vm2758_vm2, %v17137_v27  ;;  %v2516_v56 = vsel %vm1854_vm3, %v2408_v43, -inf  ;;  %v17449_v45 = vld [vmem:[%s22692_s2] ss:$0 sm:$0xff] }
 0x13e   : > { %v1231_v57 = vpop.f32.mrf.mxu0  ;;  %15947 = vmatprep.subr.mxu0 %v13618_v48  ;;  %v2517_v58 = vmax.f32 %v2515_v55, %v2516_v56  ;;  %2636 = vst.msk [vmem:[#allocation3 + $0x68] sm:$0xf] %vm2481_vm4, %v2520_v51  ;;  %v2055_v63 = vld [vmem:[#allocation2 + $0x150] ss:$2 sm:$0xff]  ;;  %v2247_v0 = vld [vmem:[#allocation2 + $0x151] ss:$2 sm:$0xff] }
 0x13f   : > { %1901 = vst.msk [vmem:[#allocation2 + $0x170] sm:$0xff] %vm1854_vm3, %v1756_v52  ;;  %v1759_v59 = vmax.f32 %v1237_v53, 0.0  ;;  %v1232_v60 = vadd.f32 %v17172_v42, %v1231_v57  ;;  %15948 = vmatpush3.msra.mxu0 %v13618_v48  ;;  %v2410_v14 = vmax.f32 %v2055_v63, %v2247_v0 }
 0x140   : > { %v15506_v27 = vpop.f32.mrf.mxu0  ;;  %15655 = vmatmul.mubr.msk.f32.gmra.mxu0 %vm1854_vm3, %v2693_v61  ;;  %15949 = vmatprep.subr.mxu0 %v13617_v54  ;;  %2635 = vst.msk [vmem:[#allocation3 + $0x60] sm:$0xff] %vm1854_vm3, %v2517_v58 }
 0x141   : > { %1904 = vst.msk [vmem:[#allocation2 + $0x188] sm:$0xff] %vm1854_vm3, %v1759_v59  ;;  %v1758_v1 = vmax.f32 %v1232_v60, 0.0  ;;  %v1247_v2 = vadd.f32 %v15506_v27, %v17172_v42  ;;  %15951 = vmatprep.mubr.msk.f32.mxu0 %vm1854_vm3, %v4961_v62  ;;  %15950 = vmatpush3.msra.mxu0 %v13617_v54  ;;  %v2521_v34 = vsel %vm1854_vm3, %v2410_v14, -inf }
 0x142   : > { %v2057_v3 = vld [vmem:[#allocation2 + $0x160] ss:$2 sm:$0xf]  ;;  %v2249_v4 = vld [vmem:[#allocation2 + $0x161] ss:$2 sm:$0xf]  ;;  %v1241_v5 = vpop.f32.mrf.mxu0 }
 0x143   : > { %v2411_v6 = vmax.f32 %v2057_v3, %v2249_v4  ;;  %1903 = vst.msk [vmem:[#allocation2 + $0x180] sm:$0xff] %vm1854_vm3, %v1758_v1  ;;  %v1761_v7 = vmax.f32 %v1247_v2, 0.0  ;;  %v1242_v8 = vadd.f32 %v17172_v42, %v1241_v5 }
 0x144   : > { %v2061_v11 = vld [vmem:[#allocation2 + $0x178] ss:$2 sm:$0xf]  ;;  %v2253_v12 = vld [vmem:[#allocation2 + $0x179] ss:$2 sm:$0xf]  ;;  %v15509_v13 = vpop.f32.mrf.mxu0  ;;  %15952 = vmatmul.mubr.msk.f32.vlgmr.msra.gmra.mxu0 %vm1854_vm3, %v4962_v9 }
 0x145   : > { %v2413_v15 = vmax.f32 %v2061_v11, %v2253_v12  ;;  %1906 = vst.msk [vmem:[#allocation2 + $0x198] sm:$0xff] %vm1854_vm3, %v1761_v7  ;;  %v1760_v16 = vmax.f32 %v1242_v8, 0.0  ;;  %v1257_v17 = vadd.f32 %v15509_v13, %v17172_v42  ;;  %15954 = vmatprep.mubr.msk.f32.mxu0 %vm1854_vm3, %v4963_v10  ;;  %v2524_v21 = vsel %vm2481_vm4, %v2411_v6, -inf }
 0x146   : > { %v2059_v18 = vld [vmem:[#allocation2 + $0x168] ss:$2 sm:$0xff]  ;;  %v2251_v19 = vld [vmem:[#allocation2 + $0x169] ss:$2 sm:$0xff]  ;;  %v1251_v20 = vpop.f32.mrf.mxu0 }
 0x147   : > { %v2525_v22 = vsel %vm2481_vm4, %v2413_v15, -inf  ;;  %v2412_v23 = vmax.f32 %v2059_v18, %v2251_v19  ;;  %1905 = vst.msk [vmem:[#allocation2 + $0x190] sm:$0xff] %vm1854_vm3, %v1760_v16  ;;  %v1763_v24 = vmax.f32 %v1257_v17, 0.0  ;;  %v1252_v25 = vadd.f32 %v17172_v42, %v1251_v20  ;;  %v2696_v26 = vld [vmem:[#allocation3 + $0x61] sm:$0xff] }
 0x148   : > { %v4965_v29 = vld [vmem:[#allocation3 + $0x60] sm:$0xff]  ;;  %v15512_v30 = vpop.f32.mrf.mxu0  ;;  %15660 = vmatprep.mubr.msk.f32.mxu1 %vm1854_vm3, %v2696_v26  ;;  %15955 = vmatmul.mubr.msk.f32.gmra.mxu0 %vm1854_vm3, %v4964_v28  ;;  %v2526_v31 = vmax.f32 %v2524_v21, %v2525_v22 }
 0x149   : > { %1908 = vst.msk [vmem:[#allocation2 + $0x1a8] sm:$0xff] %vm1854_vm3, %v1763_v24  ;;  %v1762_v32 = vmax.f32 %v1252_v25, 0.0  ;;  %v1267_v33 = vadd.f32 %v15512_v30, %v17172_v42  ;;  %15957 = vmatprep.mubr.msk.f32.mxu0 %vm1854_vm3, %v4965_v29  ;;  %v2522_v35 = vsel %vm1854_vm3, %v2412_v23, -inf  ;;  %v2689_v25 = vld [vmem:[%s22693_s3 + $0x10] sm:$0xf] }
 0x14a   : > { %v1261_v36 = vpop.f32.mrf.mxu0  ;;  %v2523_v37 = vmax.f32 %v2521_v34, %v2522_v35  ;;  %2638 = vst.msk [vmem:[#allocation3 + $0x78] sm:$0xf] %vm2481_vm4, %v2526_v31  ;;  %v2063_v41 = vld [vmem:[#allocation2 + $0x180] ss:$2 sm:$0xff]  ;;  %v2255_v43 = vld [vmem:[#allocation2 + $0x181] ss:$2 sm:$0xff]  ;;  %15675 = vmatprep.subr.msk.mxu1 %vm2758_vm2, %v2689_v25 }
 0x14b   : > { %1907 = vst.msk [vmem:[#allocation2 + $0x1a0] sm:$0xff] %vm1854_vm3, %v1762_v32  ;;  %v1765_v38 = vmax.f32 %v1267_v33, 0.0  ;;  %v1262_v39 = vadd.f32 %v17172_v42, %v1261_v36  ;;  %v2414_v55 = vmax.f32 %v2063_v41, %v2255_v43  ;;  %15676 = vmatpush3.msk.msra.mxu1 %vm2758_vm2, %v2689_v25 }
 0x14c   : > { %v15515_v40 = vpop.f32.mrf.mxu0  ;;  %2637 = vst.msk [vmem:[#allocation3 + $0x70] sm:$0xff] %vm1854_vm3, %v2523_v37 }
 0x14d   : > { %1910 = vst.msk [vmem:[#allocation2 + $0x1b8] sm:$0xff] %vm1854_vm3, %v1765_v38  ;;  %v1764_v44 = vmax.f32 %v1262_v39, 0.0  ;;  %v1277_v46 = vadd.f32 %v17449_v45, %v15515_v40  ;;  %v2527_v8 = vsel %vm1854_vm3, %v2414_v55, -inf }
 0x14e   : > { %v2065_v47 = vld [vmem:[#allocation2 + $0x190] ss:$2 sm:$0xf]  ;;  %v2257_v48 = vld [vmem:[#allocation2 + $0x191] ss:$2 sm:$0xf]  ;;  %v1271_v49 = vpop.f32.mrf.mxu0 }
 0x14f   : > { %v2415_v50 = vmax.f32 %v2065_v47, %v2257_v48  ;;  %1909 = vst.msk [vmem:[#allocation2 + $0x1b0] sm:$0xff] %vm1854_vm3, %v1764_v44  ;;  %v1767_v42 = vmax.f32 %v1277_v46, 0.0  ;;  %v1272_v51 = vadd.f32 %v17449_v45, %v1271_v49 }
 0x150   : > { %v2069_v52 = vld [vmem:[#allocation2 + $0x1a8] ss:$2 sm:$0xf]  ;;  %v2261_v53 = vld [vmem:[#allocation2 + $0x1a9] ss:$2 sm:$0xf]  ;;  %v15518_v54 = vpop.f32.mrf.mxu0 }
 0x151   : > { %v2417_v56 = vmax.f32 %v2069_v52, %v2261_v53  ;;  %1912 = vst.msk [vmem:[#allocation2 + $0x1c8] sm:$0xff] %vm1854_vm3, %v1767_v42  ;;  %v1766_v57 = vmax.f32 %v1272_v51, 0.0  ;;  %v1287_v58 = vadd.f32 %v17449_v45, %v15518_v54  ;;  %v2530_v27 = vsel %vm2481_vm4, %v2415_v50, -inf  ;;  %v2688_v54 = vld [vmem:[%s22693_s3 + $0x8] sm:$0xff] }
 0x152   : > { %v2067_v59 = vld [vmem:[#allocation2 + $0x198] ss:$2 sm:$0xff]  ;;  %v2259_v60 = vld [vmem:[#allocation2 + $0x199] ss:$2 sm:$0xff]  ;;  %v1281_v61 = vpop.f32.mrf.mxu0  ;;  %15677 = vmatprep.subr.mxu1 %v2688_v54 }
 0x153   : > { %v2531_v62 = vsel %vm2481_vm4, %v2417_v56, -inf  ;;  %v2416_v63 = vmax.f32 %v2067_v59, %v2259_v60  ;;  %1911 = vst.msk [vmem:[#allocation2 + $0x1c0] sm:$0xff] %vm1854_vm3, %v1766_v57  ;;  %v1769_v0 = vmax.f32 %v1287_v58, 0.0  ;;  %v1282_v1 = vadd.f32 %v17449_v45, %v1281_v61  ;;  %v2697_v2 = vld [vmem:[#allocation3 + $0x71] sm:$0xff]  ;;  %15678 = vmatpush3.msra.mxu1 %v2688_v54  ;;  %v2687_v60 = vld [vmem:[%s22693_s3] sm:$0xff] }
 0x154   : > { %v4966_v3 = vld [vmem:[#allocation3 + $0x70] sm:$0xff]  ;;  %v15521_v4 = vpop.f32.mrf.mxu0  ;;  %15661 = vmatmul.mubr.msk.f32.gmra.mxu1 %vm1854_vm3, %v2697_v2  ;;  %v2532_v5 = vmax.f32 %v2530_v27, %v2531_v62  ;;  %15679 = vmatprep.subr.mxu1 %v2687_v60 }
 0x155   : > { %15958 = vmatmul.mubr.msk.f32.gmra.mxu0 %vm1854_vm3, %v4966_v3  ;;  %1914 = vst.msk [vmem:[#allocation2 + $0x1d8] sm:$0xff] %vm1854_vm3, %v1769_v0  ;;  %v1768_v6 = vmax.f32 %v1282_v1, 0.0  ;;  %v1297_v7 = vadd.f32 %v17449_v45, %v15521_v4  ;;  %v2528_v9 = vsel %vm1854_vm3, %v2416_v63, -inf  ;;  %15680 = vmatpush3.msra.mxu1 %v2687_v60 }
 0x156   : > { %v1291_v10 = vpop.f32.mrf.mxu0  ;;  %v2529_v11 = vmax.f32 %v2527_v8, %v2528_v9  ;;  %2640 = vst.msk [vmem:[#allocation3 + $0x88] sm:$0xf] %vm2481_vm4, %v2532_v5  ;;  %v2071_v15 = vld [vmem:[#allocation2 + $0x1b0] ss:$2 sm:$0xff]  ;;  %v2263_v16 = vld [vmem:[#allocation2 + $0x1b1] ss:$2 sm:$0xff] }
 0x157   : > { %1913 = vst.msk [vmem:[#allocation2 + $0x1d0] sm:$0xff] %vm1854_vm3, %v1768_v6  ;;  %v1771_v12 = vmax.f32 %v1297_v7, 0.0  ;;  %v1292_v13 = vadd.f32 %v17449_v45, %v1291_v10  ;;  %v2418_v30 = vmax.f32 %v2071_v15, %v2263_v16 }
 0x158   : > { %v15524_v14 = vpop.f32.mrf.mxu0  ;;  %2639 = vst.msk [vmem:[#allocation3 + $0x80] sm:$0xff] %vm1854_vm3, %v2529_v11 }
 0x159   : > { %1916 = vst.msk [vmem:[#allocation2 + $0x1e8] sm:$0xff] %vm1854_vm3, %v1771_v12  ;;  %v1770_v17 = vmax.f32 %v1292_v13, 0.0  ;;  %v1307_v18 = vadd.f32 %v17449_v45, %v15524_v14  ;;  %v2533_v47 = vsel %vm1854_vm3, %v2418_v30, -inf }
 0x15a   : > { %v2073_v19 = vld [vmem:[#allocation2 + $0x1c0] ss:$2 sm:$0xf]  ;;  %v2265_v20 = vld [vmem:[#allocation2 + $0x1c1] ss:$2 sm:$0xf]  ;;  %v1301_v21 = vpop.f32.mrf.mxu0 }
 0x15b   : > { %v2419_v22 = vmax.f32 %v2073_v19, %v2265_v20  ;;  %1915 = vst.msk [vmem:[#allocation2 + $0x1e0] sm:$0xff] %vm1854_vm3, %v1770_v17  ;;  %v1773_v23 = vmax.f32 %v1307_v18, 0.0  ;;  %v1302_v24 = vadd.f32 %v17449_v45, %v1301_v21 }
 0x15c   : > { %v2077_v26 = vld [vmem:[#allocation2 + $0x1d8] ss:$2 sm:$0xf]  ;;  %v2269_v28 = vld [vmem:[#allocation2 + $0x1d9] ss:$2 sm:$0xf]  ;;  %v15527_v29 = vpop.f32.mrf.mxu0 }
 0x15d   : > { %v2421_v31 = vmax.f32 %v2077_v26, %v2269_v28  ;;  %1918 = vst.msk [vmem:[#allocation2 + $0x1f8] sm:$0xff] %vm1854_vm3, %v1773_v23  ;;  %v1772_v32 = vmax.f32 %v1302_v24, 0.0  ;;  %v1317_v33 = vadd.f32 %v17449_v45, %v15527_v29  ;;  %v2536_v34 = vsel %vm2481_vm4, %v2419_v22, -inf }
 0x15e   : > { %v2075_v35 = vld [vmem:[#allocation2 + $0x1c8] ss:$2 sm:$0xff]  ;;  %v2267_v36 = vld [vmem:[#allocation2 + $0x1c9] ss:$2 sm:$0xff]  ;;  %v1311_v37 = vpop.f32.mrf.mxu0 }
 0x15f   : > { %v2537_v38 = vsel %vm2481_vm4, %v2421_v31, -inf  ;;  %v2420_v39 = vmax.f32 %v2075_v35, %v2267_v36  ;;  %1917 = vst.msk [vmem:[#allocation2 + $0x1f0] sm:$0xff] %vm1854_vm3, %v1772_v32  ;;  %v1775_v40 = vmax.f32 %v1317_v33, 0.0  ;;  %v1312_v41 = vadd.f32 %v17449_v45, %v1311_v37  ;;  %v4967_v43 = vld [vmem:[#allocation3 + $0x80] sm:$0xff] }
 0x160   : > { %v2538_v44 = vmax.f32 %v2536_v34, %v2537_v38  ;;  %v15530_v46 = vpop.f32.mrf.mxu0  ;;  %15960 = vmatprep.mubr.msk.f32.mxu0 %vm1854_vm3, %v4967_v43 }
 0x161   : > { %v2534_v48 = vsel %vm1854_vm3, %v2420_v39, -inf  ;;  %1920 = vst.msk [vmem:[#allocation2 + $0x208] sm:$0xff] %vm1854_vm3, %v1775_v40  ;;  %v1774_v49 = vmax.f32 %v1312_v41, 0.0  ;;  %v1327_v50 = vadd.f32 %v17449_v45, %v15530_v46 }
 0x162   : > { %2642 = vst.msk [vmem:[#allocation3 + $0x98] sm:$0xf] %vm2481_vm4, %v2538_v44  ;;  %v1321_v42 = vpop.f32.mrf.mxu0  ;;  %v2535_v51 = vmax.f32 %v2533_v47, %v2534_v48  ;;  %v2079_v56 = vld [vmem:[#allocation2 + $0x1e0] ss:$2 sm:$0xff]  ;;  %v2271_v57 = vld [vmem:[#allocation2 + $0x1e1] ss:$2 sm:$0xff] }
 0x163   : > { %1919 = vst.msk [vmem:[#allocation2 + $0x200] sm:$0xff] %vm1854_vm3, %v1774_v49  ;;  %v1777_v52 = vmax.f32 %v1327_v50, 0.0  ;;  %v1322_v53 = vadd.f32 %v17449_v45, %v1321_v42  ;;  %v2422_v5 = vmax.f32 %v2079_v56, %v2271_v57  ;;  %v17528_v49 = vld [vmem:[%s22693_s3 + $0x40] sm:$0xf] }
 0x164   : > { %v15533_v55 = vpop.f32.mrf.mxu0  ;;  %2641 = vst.msk [vmem:[#allocation3 + $0x90] sm:$0xff] %vm1854_vm3, %v2535_v51  ;;  %15705 = vmatprep.subr.msk.mxu1 %vm2758_vm2, %v17528_v49 }
 0x165   : > { %1922 = vst.msk [vmem:[#allocation2 + $0x218] sm:$0xff] %vm1854_vm3, %v1777_v52  ;;  %v1776_v58 = vmax.f32 %v1322_v53, 0.0  ;;  %v1337_v59 = vadd.f32 %v17449_v45, %v15533_v55  ;;  %v2539_v20 = vsel %vm1854_vm3, %v2422_v5, -inf }
 0x166   : > { %v2081_v61 = vld [vmem:[#allocation2 + $0x1f0] ss:$2 sm:$0xf]  ;;  %v2273_v27 = vld [vmem:[#allocation2 + $0x1f1] ss:$2 sm:$0xf]  ;;  %v1331_v62 = vpop.f32.mrf.mxu0 }
 0x167   : > { %v2423_v63 = vmax.f32 %v2081_v61, %v2273_v27  ;;  %1921 = vst.msk [vmem:[#allocation2 + $0x210] sm:$0xff] %vm1854_vm3, %v1776_v58  ;;  %v1779_v0 = vmax.f32 %v1337_v59, 0.0  ;;  %v1332_v1 = vadd.f32 %v17449_v45, %v1331_v62  ;;  %v13659_v62 = vld [vmem:[%s22693_s3 + $0x130] sm:$0xf] }
 0x168   : > { %v2085_v2 = vld [vmem:[#allocation2 + $0x208] ss:$2 sm:$0xf]  ;;  %v2277_v3 = vld [vmem:[#allocation2 + $0x209] ss:$2 sm:$0xf]  ;;  %v15536_v4 = vpop.f32.mrf.mxu0  ;;  %16005 = vmatprep.subr.msk.mxu0 %vm2758_vm2, %v13659_v62 }
 0x169   : > { %v2425_v6 = vmax.f32 %v2085_v2, %v2277_v3  ;;  %1924 = vst.msk [vmem:[#allocation2 + $0x228] sm:$0xff] %vm1854_vm3, %v1779_v0  ;;  %v1778_v7 = vmax.f32 %v1332_v1, 0.0  ;;  %v1347_v8 = vadd.f32 %v17449_v45, %v15536_v4  ;;  %v2542_v9 = vsel %vm2481_vm4, %v2423_v63, -inf  ;;  %16006 = vmatpush3.msk.msra.mxu0 %vm2758_vm2, %v13659_v62  ;;  %v13658_v3 = vld [vmem:[%s22693_s3 + $0x128] sm:$0xff] }
 0x16a   : > { %v2083_v10 = vld [vmem:[#allocation2 + $0x1f8] ss:$2 sm:$0xff]  ;;  %v2275_v11 = vld [vmem:[#allocation2 + $0x1f9] ss:$2 sm:$0xff]  ;;  %v1341_v12 = vpop.f32.mrf.mxu0  ;;  %16007 = vmatprep.subr.mxu0 %v13658_v3 }
 0x16b   : > { %v2543_v13 = vsel %vm2481_vm4, %v2425_v6, -inf  ;;  %v2424_v14 = vmax.f32 %v2083_v10, %v2275_v11  ;;  %1923 = vst.msk [vmem:[#allocation2 + $0x220] sm:$0xff] %vm1854_vm3, %v1778_v7  ;;  %v1781_v15 = vmax.f32 %v1347_v8, 0.0  ;;  %v1342_v16 = vadd.f32 %v17449_v45, %v1341_v12  ;;  %v4968_v17 = vld [vmem:[#allocation3 + $0x90] sm:$0xff]  ;;  %16008 = vmatpush3.msra.mxu0 %v13658_v3 }
 0x16c   : > { %v2544_v18 = vmax.f32 %v2542_v9, %v2543_v13  ;;  %v15539_v19 = vpop.f32.mrf.mxu0  ;;  %15961 = vmatmul.mubr.msk.f32.gmra.mxu0 %vm1854_vm3, %v4968_v17 }
 0x16d   : > { %v2540_v21 = vsel %vm1854_vm3, %v2424_v14, -inf  ;;  %1926 = vst.msk [vmem:[#allocation2 + $0x238] sm:$0xff] %vm1854_vm3, %v1781_v15  ;;  %v1780_v22 = vmax.f32 %v1342_v16, 0.0  ;;  %v1357_v23 = vadd.f32 %v17449_v45, %v15539_v19  ;;  %v13657_v15 = vld [vmem:[%s22693_s3 + $0x120] sm:$0xff] }
 0x16e   : > { %2644 = vst.msk [vmem:[#allocation3 + $0xa8] sm:$0xf] %vm2481_vm4, %v2544_v18  ;;  %v1351_v24 = vpop.f32.mrf.mxu0  ;;  %v2541_v25 = vmax.f32 %v2539_v20, %v2540_v21  ;;  %v2087_v30 = vld [vmem:[#allocation2 + $0x210] ss:$2 sm:$0xff]  ;;  %v2279_v31 = vld [vmem:[#allocation2 + $0x211] ss:$2 sm:$0xff]  ;;  %16009 = vmatprep.subr.mxu0 %v13657_v15 }
 0x16f   : > { %1925 = vst.msk [vmem:[#allocation2 + $0x230] sm:$0xff] %vm1854_vm3, %v1780_v22  ;;  %v1783_v26 = vmax.f32 %v1357_v23, 0.0  ;;  %v1352_v28 = vadd.f32 %v17449_v45, %v1351_v24  ;;  %v2426_v44 = vmax.f32 %v2087_v30, %v2279_v31  ;;  %16010 = vmatpush3.msra.mxu0 %v13657_v15 }
 0x170   : > { %v15542_v29 = vpop.f32.mrf.mxu0  ;;  %2643 = vst.msk [vmem:[#allocation3 + $0xa0] sm:$0xff] %vm1854_vm3, %v2541_v25 }
 0x171   : > { %1928 = vst.msk [vmem:[#allocation2 + $0x248] sm:$0xff] %vm1854_vm3, %v1783_v26  ;;  %v1782_v32 = vmax.f32 %v1352_v28, 0.0  ;;  %v1367_v33 = vadd.f32 %v17449_v45, %v15542_v29  ;;  %v2545_v59 = vsel %vm1854_vm3, %v2426_v44, -inf }
 0x172   : > { %v2089_v34 = vld [vmem:[#allocation2 + $0x220] ss:$2 sm:$0xf]  ;;  %v2281_v35 = vld [vmem:[#allocation2 + $0x221] ss:$2 sm:$0xf]  ;;  %v1361_v36 = vpop.f32.mrf.mxu0 }
 0x173   : > { %v2427_v37 = vmax.f32 %v2089_v34, %v2281_v35  ;;  %1927 = vst.msk [vmem:[#allocation2 + $0x240] sm:$0xff] %vm1854_vm3, %v1782_v32  ;;  %v1785_v38 = vmax.f32 %v1367_v33, 0.0  ;;  %v1362_v39 = vadd.f32 %v17449_v45, %v1361_v36 }
 0x174   : > { %v2093_v40 = vld [vmem:[#allocation2 + $0x238] ss:$2 sm:$0xf]  ;;  %v2285_v41 = vld [vmem:[#allocation2 + $0x239] ss:$2 sm:$0xf]  ;;  %v15545_v43 = vpop.f32.mrf.mxu0 }
 0x175   : > { %v2429_v46 = vmax.f32 %v2093_v40, %v2285_v41  ;;  %1930 = vst.msk [vmem:[#allocation2 + $0x258] sm:$0xff] %vm1854_vm3, %v1785_v38  ;;  %v1784_v47 = vmax.f32 %v1362_v39, 0.0  ;;  %v1377_v48 = vadd.f32 %v17449_v45, %v15545_v43  ;;  %v2548_v50 = vsel %vm2481_vm4, %v2427_v37, -inf }
 0x176   : > { %v2091_v42 = vld [vmem:[#allocation2 + $0x228] ss:$2 sm:$0xff]  ;;  %v2283_v51 = vld [vmem:[#allocation2 + $0x229] ss:$2 sm:$0xff]  ;;  %v1371_v52 = vpop.f32.mrf.mxu0 }
 0x177   : > { %v2549_v53 = vsel %vm2481_vm4, %v2429_v46, -inf  ;;  %v2428_v54 = vmax.f32 %v2091_v42, %v2283_v51  ;;  %1929 = vst.msk [vmem:[#allocation2 + $0x250] sm:$0xff] %vm1854_vm3, %v1784_v47  ;;  %v1787_v55 = vmax.f32 %v1377_v48, 0.0  ;;  %v1372_v56 = vadd.f32 %v17449_v45, %v1371_v52 }
 0x178   : > { %v2550_v57 = vmax.f32 %v2548_v50, %v2549_v53  ;;  %v15548_v58 = vpop.f32.mrf.mxu0 }
 0x179   : > { %v2546_v60 = vsel %vm1854_vm3, %v2428_v54, -inf  ;;  %1932 = vst.msk [vmem:[#allocation2 + $0x268] sm:$0xff] %vm1854_vm3, %v1787_v55  ;;  %v1786_v61 = vmax.f32 %v1372_v56, 0.0  ;;  %v1387_v27 = vadd.f32 %v17449_v45, %v15548_v58 }
 0x17a   : > { %2646 = vst.msk [vmem:[#allocation3 + $0xb8] sm:$0xf] %vm2481_vm4, %v2550_v57  ;;  %v1381_v63 = vpop.f32.mrf.mxu0  ;;  %v2547_v0 = vmax.f32 %v2545_v59, %v2546_v60  ;;  %v2095_v5 = vld [vmem:[#allocation2 + $0x240] ss:$2 sm:$0xff]  ;;  %v2287_v6 = vld [vmem:[#allocation2 + $0x241] ss:$2 sm:$0xff] }
 0x17b   : > { %1931 = vst.msk [vmem:[#allocation2 + $0x260] sm:$0xff] %vm1854_vm3, %v1786_v61  ;;  %v1789_v1 = vmax.f32 %v1387_v27, 0.0  ;;  %v1382_v2 = vadd.f32 %v17449_v45, %v1381_v63  ;;  %v2430_v19 = vmax.f32 %v2095_v5, %v2287_v6 }
 0x17c   : > { %v15551_v4 = vpop.f32.mrf.mxu0  ;;  %2645 = vst.msk [vmem:[#allocation3 + $0xb0] sm:$0xff] %vm1854_vm3, %v2547_v0 }
 0x17d   : > { %1934 = vst.msk [vmem:[#allocation2 + $0x278] sm:$0xff] %vm1854_vm3, %v1789_v1  ;;  %v1788_v7 = vmax.f32 %v1382_v2, 0.0  ;;  %v1397_v8 = vadd.f32 %v17449_v45, %v15551_v4  ;;  %v2551_v36 = vsel %vm1854_vm3, %v2430_v19, -inf }
 0x17e   : > { %v2097_v9 = vld [vmem:[#allocation2 + $0x250] ss:$2 sm:$0xf]  ;;  %v2289_v10 = vld [vmem:[#allocation2 + $0x251] ss:$2 sm:$0xf]  ;;  %v1391_v11 = vpop.f32.mrf.mxu0 }
 0x17f   : > { %v2431_v12 = vmax.f32 %v2097_v9, %v2289_v10  ;;  %1933 = vst.msk [vmem:[#allocation2 + $0x270] sm:$0xff] %vm1854_vm3, %v1788_v7  ;;  %v1791_v13 = vmax.f32 %v1397_v8, 0.0  ;;  %v1392_v14 = vadd.f32 %v17449_v45, %v1391_v11 }
 0x180   : > { %v2101_v16 = vld [vmem:[#allocation2 + $0x268] ss:$2 sm:$0xf]  ;;  %v2293_v17 = vld [vmem:[#allocation2 + $0x269] ss:$2 sm:$0xf]  ;;  %v15554_v18 = vpop.f32.mrf.mxu0 }
 0x181   : > { %v2433_v20 = vmax.f32 %v2101_v16, %v2293_v17  ;;  %1936 = vst.msk [vmem:[#allocation2 + $0x288] sm:$0xff] %vm1854_vm3, %v1791_v13  ;;  %v1790_v21 = vmax.f32 %v1392_v14, 0.0  ;;  %v1407_v22 = vadd.f32 %v17449_v45, %v15554_v18  ;;  %v2554_v26 = vsel %vm2481_vm4, %v2431_v12, -inf }
 0x182   : > { %v2099_v23 = vld [vmem:[#allocation2 + $0x258] ss:$2 sm:$0xff]  ;;  %v2291_v24 = vld [vmem:[#allocation2 + $0x259] ss:$2 sm:$0xff]  ;;  %v1401_v25 = vpop.f32.mrf.mxu0 }
 0x183   : > { %v2555_v28 = vsel %vm2481_vm4, %v2433_v20, -inf  ;;  %v2432_v29 = vmax.f32 %v2099_v23, %v2291_v24  ;;  %1935 = vst.msk [vmem:[#allocation2 + $0x280] sm:$0xff] %vm1854_vm3, %v1790_v21  ;;  %v1793_v30 = vmax.f32 %v1407_v22, 0.0  ;;  %v1402_v31 = vadd.f32 %v17449_v45, %v1401_v25 }
 0x184   : > { %v15557_v32 = vpop.f32.mrf.mxu0  ;;  %v2556_v33 = vmax.f32 %v2554_v26, %v2555_v28 }
 0x185   : > { %1938 = vst.msk [vmem:[#allocation2 + $0x298] sm:$0xff] %vm1854_vm3, %v1793_v30  ;;  %v1792_v34 = vmax.f32 %v1402_v31, 0.0  ;;  %v1417_v35 = vadd.f32 %v17449_v45, %v15557_v32  ;;  %v2552_v37 = vsel %vm1854_vm3, %v2432_v29, -inf }
 0x186   : > { %v1411_v38 = vpop.f32.mrf.mxu0  ;;  %v2553_v39 = vmax.f32 %v2551_v36, %v2552_v37  ;;  %2648 = vst.msk [vmem:[#allocation3 + $0xc8] sm:$0xf] %vm2481_vm4, %v2556_v33  ;;  %v2103_v44 = vld [vmem:[#allocation2 + $0x270] ss:$2 sm:$0xff]  ;;  %v2295_v46 = vld [vmem:[#allocation2 + $0x271] ss:$2 sm:$0xff] }
 0x187   : > { %1937 = vst.msk [vmem:[#allocation2 + $0x290] sm:$0xff] %vm1854_vm3, %v1792_v34  ;;  %v1795_v40 = vmax.f32 %v1417_v35, 0.0  ;;  %v1412_v41 = vadd.f32 %v17449_v45, %v1411_v38  ;;  %v2434_v58 = vmax.f32 %v2103_v44, %v2295_v46  ;;  %v17601_v35 = vld [vmem:[%s22693_s3 + $0x160] sm:$0xf] }
 0x188   : > { %v15560_v43 = vpop.f32.mrf.mxu0  ;;  %2647 = vst.msk [vmem:[#allocation3 + $0xc0] sm:$0xff] %vm1854_vm3, %v2553_v39  ;;  %16065 = vmatprep.subr.msk.mxu0 %vm2758_vm2, %v17601_v35 }
 0x189   : > { %1940 = vst.msk [vmem:[#allocation2 + $0x2a8] sm:$0xff] %vm1854_vm3, %v1795_v40  ;;  %v1794_v47 = vmax.f32 %v1412_v41, 0.0  ;;  %v1427_v48 = vadd.f32 %v17449_v45, %v15560_v43  ;;  %v2557_v10 = vsel %vm1854_vm3, %v2434_v58, -inf }
 0x18a   : > { %v2105_v50 = vld [vmem:[#allocation2 + $0x280] ss:$2 sm:$0xf]  ;;  %v2297_v42 = vld [vmem:[#allocation2 + $0x281] ss:$2 sm:$0xf]  ;;  %v1421_v51 = vpop.f32.mrf.mxu0 }
 0x18b   : > { %v2435_v52 = vmax.f32 %v2105_v50, %v2297_v42  ;;  %1939 = vst.msk [vmem:[#allocation2 + $0x2a0] sm:$0xff] %vm1854_vm3, %v1794_v47  ;;  %v1797_v53 = vmax.f32 %v1427_v48, 0.0  ;;  %v1422_v54 = vadd.f32 %v17449_v45, %v1421_v51 }
 0x18c   : > { %v2109_v55 = vld [vmem:[#allocation2 + $0x298] ss:$2 sm:$0xf]  ;;  %v2301_v56 = vld [vmem:[#allocation2 + $0x299] ss:$2 sm:$0xf]  ;;  %v15563_v57 = vpop.f32.mrf.mxu0 }
 0x18d   : > { %v2437_v59 = vmax.f32 %v2109_v55, %v2301_v56  ;;  %1942 = vst.msk [vmem:[#allocation2 + $0x2b8] sm:$0xff] %vm1854_vm3, %v1797_v53  ;;  %v1796_v60 = vmax.f32 %v1422_v54, 0.0  ;;  %v1437_v61 = vadd.f32 %v17449_v45, %v15563_v57  ;;  %v2560_v0 = vsel %vm2481_vm4, %v2435_v52, -inf }
 0x18e   : > { %v2107_v27 = vld [vmem:[#allocation2 + $0x288] ss:$2 sm:$0xff]  ;;  %v2299_v62 = vld [vmem:[#allocation2 + $0x289] ss:$2 sm:$0xff]  ;;  %v1431_v63 = vpop.f32.mrf.mxu0 }
 0x18f   : > { %v2561_v1 = vsel %vm2481_vm4, %v2437_v59, -inf  ;;  %v2436_v2 = vmax.f32 %v2107_v27, %v2299_v62  ;;  %1941 = vst.msk [vmem:[#allocation2 + $0x2b0] sm:$0xff] %vm1854_vm3, %v1796_v60  ;;  %v1799_v3 = vmax.f32 %v1437_v61, 0.0  ;;  %v1432_v4 = vadd.f32 %v17449_v45, %v1431_v63  ;;  %v2698_v5 = vld [vmem:[#allocation3 + $0xc1] sm:$0xff] }
 0x190   : > { %v15566_v6 = vpop.f32.mrf.mxu0  ;;  %15663 = vmatprep.mubr.msk.f32.mxu1 %vm1854_vm3, %v2698_v5  ;;  %v2562_v7 = vmax.f32 %v2560_v0, %v2561_v1 }
 0x191   : > { %1944 = vst.msk [vmem:[#allocation2 + $0x2c8] sm:$0xff] %vm1854_vm3, %v1799_v3  ;;  %v1798_v8 = vmax.f32 %v1432_v4, 0.0  ;;  %v1447_v9 = vadd.f32 %v17449_v45, %v15566_v6  ;;  %v2558_v11 = vsel %vm1854_vm3, %v2436_v2, -inf }
 0x192   : > { %v1441_v12 = vpop.f32.mrf.mxu0  ;;  %v2559_v13 = vmax.f32 %v2557_v10, %v2558_v11  ;;  %2650 = vst.msk [vmem:[#allocation3 + $0xd8] sm:$0xf] %vm2481_vm4, %v2562_v7  ;;  %v2111_v17 = vld [vmem:[#allocation2 + $0x2a0] ss:$2 sm:$0xff]  ;;  %v2303_v18 = vld [vmem:[#allocation2 + $0x2a1] ss:$2 sm:$0xff] }
 0x193   : > { %1943 = vst.msk [vmem:[#allocation2 + $0x2c0] sm:$0xff] %vm1854_vm3, %v1798_v8  ;;  %v1801_v14 = vmax.f32 %v1447_v9, 0.0  ;;  %v1442_v15 = vadd.f32 %v17449_v45, %v1441_v12  ;;  %v2438_v31 = vmax.f32 %v2111_v17, %v2303_v18 }
 0x194   : > { %v15569_v16 = vpop.f32.mrf.mxu0  ;;  %2649 = vst.msk [vmem:[#allocation3 + $0xd0] sm:$0xff] %vm1854_vm3, %v2559_v13 }
 0x195   : > { %1946 = vst.msk [vmem:[#allocation2 + $0x2d8] sm:$0xff] %vm1854_vm3, %v1801_v14  ;;  %v1800_v19 = vmax.f32 %v1442_v15, 0.0  ;;  %v1457_v20 = vadd.f32 %v17449_v45, %v15569_v16  ;;  %v2563_v51 = vsel %vm1854_vm3, %v2438_v31, -inf }
 0x196   : > { %v2113_v21 = vld [vmem:[#allocation2 + $0x2b0] ss:$2 sm:$0xf]  ;;  %v2305_v22 = vld [vmem:[#allocation2 + $0x2b1] ss:$2 sm:$0xf]  ;;  %v1451_v23 = vpop.f32.mrf.mxu0 }
 0x197   : > { %v2439_v24 = vmax.f32 %v2113_v21, %v2305_v22  ;;  %1945 = vst.msk [vmem:[#allocation2 + $0x2d0] sm:$0xff] %vm1854_vm3, %v1800_v19  ;;  %v1803_v25 = vmax.f32 %v1457_v20, 0.0  ;;  %v1452_v26 = vadd.f32 %v17449_v45, %v1451_v23 }
 0x198   : > { %v2117_v28 = vld [vmem:[#allocation2 + $0x2c8] ss:$2 sm:$0xf]  ;;  %v2309_v29 = vld [vmem:[#allocation2 + $0x2c9] ss:$2 sm:$0xf]  ;;  %v15572_v30 = vpop.f32.mrf.mxu0 }
 0x199   : > { %v2441_v32 = vmax.f32 %v2117_v28, %v2309_v29  ;;  %1948 = vst.msk [vmem:[#allocation2 + $0x2e8] sm:$0xff] %vm1854_vm3, %v1803_v25  ;;  %v1802_v33 = vmax.f32 %v1452_v26, 0.0  ;;  %v1467_v34 = vadd.f32 %v17449_v45, %v15572_v30  ;;  %v2566_v39 = vsel %vm2481_vm4, %v2439_v24, -inf }
 0x19a   : > { %v2115_v36 = vld [vmem:[#allocation2 + $0x2b8] ss:$2 sm:$0xff]  ;;  %v2307_v37 = vld [vmem:[#allocation2 + $0x2b9] ss:$2 sm:$0xff]  ;;  %v1461_v38 = vpop.f32.mrf.mxu0 }
 0x19b   : > { %v2567_v40 = vsel %vm2481_vm4, %v2441_v32, -inf  ;;  %v2440_v41 = vmax.f32 %v2115_v36, %v2307_v37  ;;  %1947 = vst.msk [vmem:[#allocation2 + $0x2e0] sm:$0xff] %vm1854_vm3, %v1802_v33  ;;  %v1805_v43 = vmax.f32 %v1467_v34, 0.0  ;;  %v1462_v44 = vadd.f32 %v17449_v45, %v1461_v38  ;;  %v2699_v46 = vld [vmem:[#allocation3 + $0xd1] sm:$0xff] }
 0x19c   : > { %v15575_v47 = vpop.f32.mrf.mxu0  ;;  %15664 = vmatmul.mubr.msk.f32.gmra.mxu1 %vm1854_vm3, %v2699_v46  ;;  %v2568_v48 = vmax.f32 %v2566_v39, %v2567_v40 }
 0x19d   : > { %1950 = vst.msk [vmem:[#allocation2 + $0x2f8] sm:$0xff] %vm1854_vm3, %v1805_v43  ;;  %v1804_v50 = vmax.f32 %v1462_v44, 0.0  ;;  %v1477_v42 = vadd.f32 %v17449_v45, %v15575_v47  ;;  %v2564_v52 = vsel %vm1854_vm3, %v2440_v41, -inf }
 0x19e   : > { %v1471_v53 = vpop.f32.mrf.mxu0  ;;  %v2565_v54 = vmax.f32 %v2563_v51, %v2564_v52  ;;  %2652 = vst.msk [vmem:[#allocation3 + $0xe8] sm:$0xf] %vm2481_vm4, %v2568_v48  ;;  %v2119_v58 = vld [vmem:[#allocation2 + $0x2d0] ss:$2 sm:$0xff]  ;;  %v2311_v59 = vld [vmem:[#allocation2 + $0x2d1] ss:$2 sm:$0xff] }
 0x19f   : > { %1949 = vst.msk [vmem:[#allocation2 + $0x2f0] sm:$0xff] %vm1854_vm3, %v1804_v50  ;;  %v1807_v55 = vmax.f32 %v1477_v42, 0.0  ;;  %v1472_v56 = vadd.f32 %v17449_v45, %v1471_v53  ;;  %v2442_v6 = vmax.f32 %v2119_v58, %v2311_v59 }
 0x1a0   : > { %v15578_v57 = vpop.f32.mrf.mxu0  ;;  %2651 = vst.msk [vmem:[#allocation3 + $0xe0] sm:$0xff] %vm1854_vm3, %v2565_v54 }
 0x1a1   : > { %1952 = vst.msk [vmem:[#allocation2 + $0x308] sm:$0xff] %vm1854_vm3, %v1807_v55  ;;  %v1806_v60 = vmax.f32 %v1472_v56, 0.0  ;;  %v1487_v61 = vadd.f32 %v17449_v45, %v15578_v57  ;;  %v2569_v24 = vsel %vm1854_vm3, %v2442_v6, -inf }
 0x1a2   : > { %v2121_v27 = vld [vmem:[#allocation2 + $0x2e0] ss:$2 sm:$0xf]  ;;  %v2313_v62 = vld [vmem:[#allocation2 + $0x2e1] ss:$2 sm:$0xf]  ;;  %v1481_v63 = vpop.f32.mrf.mxu0 }
 0x1a3   : > { %v2443_v0 = vmax.f32 %v2121_v27, %v2313_v62  ;;  %1951 = vst.msk [vmem:[#allocation2 + $0x300] sm:$0xff] %vm1854_vm3, %v1806_v60  ;;  %v1809_v1 = vmax.f32 %v1487_v61, 0.0  ;;  %v1482_v2 = vadd.f32 %v17449_v45, %v1481_v63 }
 0x1a4   : > { %v2125_v3 = vld [vmem:[#allocation2 + $0x2f8] ss:$2 sm:$0xf]  ;;  %v2317_v4 = vld [vmem:[#allocation2 + $0x2f9] ss:$2 sm:$0xf]  ;;  %v15581_v5 = vpop.f32.mrf.mxu0 }
 0x1a5   : > { %v2445_v7 = vmax.f32 %v2125_v3, %v2317_v4  ;;  %1954 = vst.msk [vmem:[#allocation2 + $0x318] sm:$0xff] %vm1854_vm3, %v1809_v1  ;;  %v1808_v8 = vmax.f32 %v1482_v2, 0.0  ;;  %v1497_v9 = vadd.f32 %v17449_v45, %v15581_v5  ;;  %v2572_v13 = vsel %vm2481_vm4, %v2443_v0, -inf }
 0x1a6   : > { %v2123_v10 = vld [vmem:[#allocation2 + $0x2e8] ss:$2 sm:$0xff]  ;;  %v2315_v11 = vld [vmem:[#allocation2 + $0x2e9] ss:$2 sm:$0xff]  ;;  %v1491_v12 = vpop.f32.mrf.mxu0 }
 0x1a7   : > { %v2573_v14 = vsel %vm2481_vm4, %v2445_v7, -inf  ;;  %v2444_v15 = vmax.f32 %v2123_v10, %v2315_v11  ;;  %1953 = vst.msk [vmem:[#allocation2 + $0x310] sm:$0xff] %vm1854_vm3, %v1808_v8  ;;  %v1811_v16 = vmax.f32 %v1497_v9, 0.0  ;;  %v1492_v17 = vadd.f32 %v17449_v45, %v1491_v12  ;;  %v2700_v18 = vld [vmem:[#allocation3 + $0xe1] sm:$0xff] }
 0x1a8   : > { %v17628_v19 = vld [vmem:[#allocation3 + $0xe0] sm:$0xff]  ;;  %v15584_v20 = vpop.f32.mrf.mxu0  ;;  %15666 = vmatprep.mubr.msk.f32.mxu1 %vm1854_vm3, %v2700_v18  ;;  %v2574_v21 = vmax.f32 %v2572_v13, %v2573_v14 }
 0x1a9   : > { %15963 = vmatprep.mubr.msk.f32.mxu0 %vm1854_vm3, %v17628_v19  ;;  %1956 = vst.msk [vmem:[#allocation2 + $0x328] sm:$0xff] %vm1854_vm3, %v1811_v16  ;;  %v1810_v22 = vmax.f32 %v1492_v17, 0.0  ;;  %v1507_v23 = vadd.f32 %v17449_v45, %v15584_v20  ;;  %v2570_v25 = vsel %vm1854_vm3, %v2444_v15, -inf }
 0x1aa   : > { %v1501_v26 = vpop.f32.mrf.mxu0  ;;  %v2571_v28 = vmax.f32 %v2569_v24, %v2570_v25  ;;  %2654 = vst.msk [vmem:[#allocation3 + $0xf8] sm:$0xf] %vm2481_vm4, %v2574_v21  ;;  %v2127_v32 = vld [vmem:[#allocation2 + $0x300] ss:$2 sm:$0xff]  ;;  %v2319_v33 = vld [vmem:[#allocation2 + $0x301] ss:$2 sm:$0xff] }
 0x1ab   : > { %1955 = vst.msk [vmem:[#allocation2 + $0x320] sm:$0xff] %vm1854_vm3, %v1810_v22  ;;  %v1813_v29 = vmax.f32 %v1507_v23, 0.0  ;;  %v1502_v30 = vadd.f32 %v17449_v45, %v1501_v26  ;;  %v2446_v48 = vmax.f32 %v2127_v32, %v2319_v33 }
 0x1ac   : > { %v15587_v31 = vpop.f32.mrf.mxu0  ;;  %2653 = vst.msk [vmem:[#allocation3 + $0xf0] sm:$0xff] %vm1854_vm3, %v2571_v28 }
 0x1ad   : > { %1958 = vst.msk [vmem:[#allocation2 + $0x338] sm:$0xff] %vm1854_vm3, %v1813_v29  ;;  %v1812_v34 = vmax.f32 %v1502_v30, 0.0  ;;  %v1517_v36 = vadd.f32 %v17449_v45, %v15587_v31  ;;  %v2575_v1 = vsel %vm1854_vm3, %v2446_v48, -inf }
 0x1ae   : > { %v2129_v37 = vld [vmem:[#allocation2 + $0x310] ss:$2 sm:$0xf]  ;;  %v2321_v38 = vld [vmem:[#allocation2 + $0x311] ss:$2 sm:$0xf]  ;;  %v1511_v39 = vpop.f32.mrf.mxu0 }
 0x1af   : > { %v2447_v40 = vmax.f32 %v2129_v37, %v2321_v38  ;;  %1957 = vst.msk [vmem:[#allocation2 + $0x330] sm:$0xff] %vm1854_vm3, %v1812_v34  ;;  %v1815_v41 = vmax.f32 %v1517_v36, 0.0  ;;  %v1512_v43 = vadd.f32 %v17449_v45, %v1511_v39 }
 0x1b0   : > { %v2133_v44 = vld [vmem:[#allocation2 + $0x328] ss:$2 sm:$0xf]  ;;  %v2325_v46 = vld [vmem:[#allocation2 + $0x329] ss:$2 sm:$0xf]  ;;  %v15590_v47 = vpop.f32.mrf.mxu0 }
 0x1b1   : > { %v2449_v50 = vmax.f32 %v2133_v44, %v2325_v46  ;;  %1960 = vst.msk [vmem:[#allocation2 + $0x348] sm:$0xff] %vm1854_vm3, %v1815_v41  ;;  %v1814_v42 = vmax.f32 %v1512_v43, 0.0  ;;  %v1527_v51 = vadd.f32 %v17449_v45, %v15590_v47  ;;  %v2578_v55 = vsel %vm2481_vm4, %v2447_v40, -inf }
 0x1b2   : > { %v2131_v52 = vld [vmem:[#allocation2 + $0x318] ss:$2 sm:$0xff]  ;;  %v2323_v53 = vld [vmem:[#allocation2 + $0x319] ss:$2 sm:$0xff]  ;;  %v1521_v54 = vpop.f32.mrf.mxu0 }
 0x1b3   : > { %v2579_v56 = vsel %vm2481_vm4, %v2449_v50, -inf  ;;  %v2448_v57 = vmax.f32 %v2131_v52, %v2323_v53  ;;  %1959 = vst.msk [vmem:[#allocation2 + $0x340] sm:$0xff] %vm1854_vm3, %v1814_v42  ;;  %v1817_v58 = vmax.f32 %v1527_v51, 0.0  ;;  %v1522_v59 = vadd.f32 %v17449_v45, %v1521_v54  ;;  %v2701_v60 = vld [vmem:[#allocation3 + $0xf1] sm:$0xff] }
 0x1b4   : > { %v17651_v61 = vld [vmem:[#allocation3 + $0xf0] sm:$0xff]  ;;  %v15593_v27 = vpop.f32.mrf.mxu0  ;;  %15667 = vmatmul.mubr.msk.f32.gmra.mxu1 %vm1854_vm3, %v2701_v60  ;;  %v2580_v62 = vmax.f32 %v2578_v55, %v2579_v56 }
 0x1b5   : > { %15964 = vmatmul.mubr.msk.f32.gmra.mxu0 %vm1854_vm3, %v17651_v61  ;;  %1962 = vst.msk [vmem:[#allocation2 + $0x358] sm:$0xff] %vm1854_vm3, %v1817_v58  ;;  %v1816_v63 = vmax.f32 %v1522_v59, 0.0  ;;  %v1537_v0 = vadd.f32 %v17449_v45, %v15593_v27  ;;  %v2576_v2 = vsel %vm1854_vm3, %v2448_v57, -inf }
 0x1b6   : > { %v1531_v3 = vpop.f32.mrf.mxu0  ;;  %v2577_v4 = vmax.f32 %v2575_v1, %v2576_v2  ;;  %2656 = vst.msk [vmem:[#allocation3 + $0x108] sm:$0xf] %vm2481_vm4, %v2580_v62  ;;  %v2135_v8 = vld [vmem:[#allocation2 + $0x330] ss:$2 sm:$0xff]  ;;  %v2327_v9 = vld [vmem:[#allocation2 + $0x331] ss:$2 sm:$0xff] }
 0x1b7   : > { %1961 = vst.msk [vmem:[#allocation2 + $0x350] sm:$0xff] %vm1854_vm3, %v1816_v63  ;;  %v1819_v5 = vmax.f32 %v1537_v0, 0.0  ;;  %v1532_v6 = vadd.f32 %v17449_v45, %v1531_v3  ;;  %v2450_v22 = vmax.f32 %v2135_v8, %v2327_v9 }
 0x1b8   : > { %v15596_v7 = vpop.f32.mrf.mxu0  ;;  %2655 = vst.msk [vmem:[#allocation3 + $0x100] sm:$0xff] %vm1854_vm3, %v2577_v4 }
 0x1b9   : > { %1964 = vst.msk [vmem:[#allocation2 + $0x368] sm:$0xff] %vm1854_vm3, %v1819_v5  ;;  %v1818_v10 = vmax.f32 %v1532_v6, 0.0  ;;  %v1547_v11 = vadd.f32 %v17449_v45, %v15596_v7  ;;  %v2581_v43 = vsel %vm1854_vm3, %v2450_v22, -inf }
 0x1ba   : > { %v2137_v12 = vld [vmem:[#allocation2 + $0x340] ss:$2 sm:$0xf]  ;;  %v2329_v13 = vld [vmem:[#allocation2 + $0x341] ss:$2 sm:$0xf]  ;;  %v1541_v14 = vpop.f32.mrf.mxu0 }
 0x1bb   : > { %v2451_v15 = vmax.f32 %v2137_v12, %v2329_v13  ;;  %1963 = vst.msk [vmem:[#allocation2 + $0x360] sm:$0xff] %vm1854_vm3, %v1818_v10  ;;  %v1821_v16 = vmax.f32 %v1547_v11, 0.0  ;;  %v1542_v17 = vadd.f32 %v17449_v45, %v1541_v14 }
 0x1bc   : > { %v2141_v18 = vld [vmem:[#allocation2 + $0x358] ss:$2 sm:$0xf]  ;;  %v2333_v20 = vld [vmem:[#allocation2 + $0x359] ss:$2 sm:$0xf]  ;;  %v15599_v21 = vpop.f32.mrf.mxu0 }
 0x1bd   : > { %v2453_v23 = vmax.f32 %v2141_v18, %v2333_v20  ;;  %1966 = vst.msk [vmem:[#allocation2 + $0x378] sm:$0xff] %vm1854_vm3, %v1821_v16  ;;  %v1820_v24 = vmax.f32 %v1542_v17, 0.0  ;;  %v1557_v25 = vadd.f32 %v17449_v45, %v15599_v21  ;;  %v2584_v30 = vsel %vm2481_vm4, %v2451_v15, -inf  ;;  %v17709_v17 = vld [vmem:[%s22692_s2] ss:$0 sm:$0xff] }
 0x1be   : > { %v2139_v26 = vld [vmem:[#allocation2 + $0x348] ss:$2 sm:$0xff]  ;;  %v2331_v28 = vld [vmem:[#allocation2 + $0x349] ss:$2 sm:$0xff]  ;;  %v1551_v29 = vpop.f32.mrf.mxu0 }
 0x1bf   : > { %v2585_v31 = vsel %vm2481_vm4, %v2453_v23, -inf  ;;  %v2452_v32 = vmax.f32 %v2139_v26, %v2331_v28  ;;  %1965 = vst.msk [vmem:[#allocation2 + $0x370] sm:$0xff] %vm1854_vm3, %v1820_v24  ;;  %v1823_v33 = vmax.f32 %v1557_v25, 0.0  ;;  %v1552_v34 = vadd.f32 %v17449_v45, %v1551_v29  ;;  %v2702_v36 = vld [vmem:[#allocation3 + $0x101] sm:$0xff] }
 0x1c0   : > { %v17674_v37 = vld [vmem:[#allocation3 + $0x100] sm:$0xff]  ;;  %v15602_v38 = vpop.f32.mrf.mxu0  ;;  %15669 = vmatprep.mubr.msk.f32.mxu1 %vm1854_vm3, %v2702_v36  ;;  %v2586_v39 = vmax.f32 %v2584_v30, %v2585_v31 }
 0x1c1   : > { %15966 = vmatprep.mubr.msk.f32.mxu0 %vm1854_vm3, %v17674_v37  ;;  %1968 = vst.msk [vmem:[#allocation2 + $0x388] sm:$0xff] %vm1854_vm3, %v1823_v33  ;;  %v1822_v40 = vmax.f32 %v1552_v34, 0.0  ;;  %v1567_v41 = vadd.f32 %v17449_v45, %v15602_v38  ;;  %v2582_v44 = vsel %vm1854_vm3, %v2452_v32, -inf }
 0x1c2   : > { %v1561_v46 = vpop.f32.mrf.mxu0  ;;  %v2583_v47 = vmax.f32 %v2581_v43, %v2582_v44  ;;  %2658 = vst.msk [vmem:[#allocation3 + $0x118] sm:$0xf] %vm2481_vm4, %v2586_v39  ;;  %v2143_v51 = vld [vmem:[#allocation2 + $0x360] ss:$2 sm:$0xff]  ;;  %v2335_v52 = vld [vmem:[#allocation2 + $0x361] ss:$2 sm:$0xff] }
 0x1c3   : > { %1967 = vst.msk [vmem:[#allocation2 + $0x380] sm:$0xff] %vm1854_vm3, %v1822_v40  ;;  %v1825_v48 = vmax.f32 %v1567_v41, 0.0  ;;  %v1562_v50 = vadd.f32 %v17449_v45, %v1561_v46  ;;  %v2454_v0 = vmax.f32 %v2143_v51, %v2335_v52 }
 0x1c4   : > { %v15605_v42 = vpop.f32.mrf.mxu0  ;;  %2657 = vst.msk [vmem:[#allocation3 + $0x110] sm:$0xff] %vm1854_vm3, %v2583_v47 }
 0x1c5   : > { %1970 = vst.msk [vmem:[#allocation2 + $0x398] sm:$0xff] %vm1854_vm3, %v1825_v48  ;;  %v1824_v53 = vmax.f32 %v1562_v50, 0.0  ;;  %v1577_v54 = vadd.f32 %v17449_v45, %v15605_v42  ;;  %v2587_v18 = vsel %vm1854_vm3, %v2454_v0, -inf }
 0x1c6   : > { %v2145_v55 = vld [vmem:[#allocation2 + $0x370] ss:$2 sm:$0xf]  ;;  %v2337_v56 = vld [vmem:[#allocation2 + $0x371] ss:$2 sm:$0xf]  ;;  %v1571_v57 = vpop.f32.mrf.mxu0 }
 0x1c7   : > { %v2455_v58 = vmax.f32 %v2145_v55, %v2337_v56  ;;  %1969 = vst.msk [vmem:[#allocation2 + $0x390] sm:$0xff] %vm1854_vm3, %v1824_v53  ;;  %v1827_v59 = vmax.f32 %v1577_v54, 0.0  ;;  %v1572_v60 = vadd.f32 %v17449_v45, %v1571_v57 }
 0x1c8   : > { %v2149_v27 = vld [vmem:[#allocation2 + $0x388] ss:$2 sm:$0xf]  ;;  %v2341_v62 = vld [vmem:[#allocation2 + $0x389] ss:$2 sm:$0xf]  ;;  %v15608_v63 = vpop.f32.mrf.mxu0 }
 0x1c9   : > { %v2457_v1 = vmax.f32 %v2149_v27, %v2341_v62  ;;  %1972 = vst.msk [vmem:[#allocation2 + $0x3a8] sm:$0xff] %vm1854_vm3, %v1827_v59  ;;  %v1826_v2 = vmax.f32 %v1572_v60, 0.0  ;;  %v1587_v3 = vadd.f32 %v17449_v45, %v15608_v63  ;;  %v2590_v7 = vsel %vm2481_vm4, %v2455_v58, -inf }
 0x1ca   : > { %v2147_v4 = vld [vmem:[#allocation2 + $0x378] ss:$2 sm:$0xff]  ;;  %v2339_v5 = vld [vmem:[#allocation2 + $0x379] ss:$2 sm:$0xff]  ;;  %v1581_v6 = vpop.f32.mrf.mxu0 }
 0x1cb   : > { %v2591_v8 = vsel %vm2481_vm4, %v2457_v1, -inf  ;;  %v2456_v9 = vmax.f32 %v2147_v4, %v2339_v5  ;;  %1971 = vst.msk [vmem:[#allocation2 + $0x3a0] sm:$0xff] %vm1854_vm3, %v1826_v2  ;;  %v1829_v10 = vmax.f32 %v1587_v3, 0.0  ;;  %v1582_v11 = vadd.f32 %v17449_v45, %v1581_v6  ;;  %v17697_v12 = vld [vmem:[#allocation3 + $0x111] sm:$0xff] }
 0x1cc   : > { %v17699_v13 = vld [vmem:[#allocation3 + $0x110] sm:$0xff]  ;;  %v15611_v14 = vpop.f32.mrf.mxu0  ;;  %15670 = vmatmul.mubr.msk.f32.gmra.mxu1 %vm1854_vm3, %v17697_v12  ;;  %v2592_v15 = vmax.f32 %v2590_v7, %v2591_v8 }
 0x1cd   : > { %15967 = vmatmul.mubr.msk.f32.gmra.mxu0 %vm1854_vm3, %v17699_v13  ;;  %1974 = vst.msk [vmem:[#allocation2 + $0x3b8] sm:$0xff] %vm1854_vm3, %v1829_v10  ;;  %v1828_v16 = vmax.f32 %v1582_v11, 0.0  ;;  %v1597_v45 = vadd.f32 %v17709_v17, %v15611_v14  ;;  %v2588_v20 = vsel %vm1854_vm3, %v2456_v9, -inf }
 0x1ce   : > { %v1591_v21 = vpop.f32.mrf.mxu0  ;;  %v2589_v22 = vmax.f32 %v2587_v18, %v2588_v20  ;;  %2660 = vst.msk [vmem:[#allocation3 + $0x128] sm:$0xf] %vm2481_vm4, %v2592_v15  ;;  %v2151_v26 = vld [vmem:[#allocation2 + $0x390] ss:$2 sm:$0xff]  ;;  %v2343_v28 = vld [vmem:[#allocation2 + $0x391] ss:$2 sm:$0xff] }
 0x1cf   : > { %1973 = vst.msk [vmem:[#allocation2 + $0x3b0] sm:$0xff] %vm1854_vm3, %v1828_v16  ;;  %v1831_v23 = vmax.f32 %v1597_v45, 0.0  ;;  %v1592_v24 = vadd.f32 %v17709_v17, %v1591_v21  ;;  %v2458_v43 = vmax.f32 %v2151_v26, %v2343_v28 }
 0x1d0   : > { %v15614_v25 = vpop.f32.mrf.mxu0  ;;  %2659 = vst.msk [vmem:[#allocation3 + $0x120] sm:$0xff] %vm1854_vm3, %v2589_v22 }
 0x1d1   : > { %1976 = vst.msk [vmem:[#allocation2 + $0x3c8] sm:$0xff] %vm1854_vm3, %v1831_v23  ;;  %v1830_v29 = vmax.f32 %v1592_v24, 0.0  ;;  %v1607_v30 = vadd.f32 %v17709_v17, %v15614_v25  ;;  %v2593_v62 = vsel %vm1854_vm3, %v2458_v43, -inf }
 0x1d2   : > { %v2153_v31 = vld [vmem:[#allocation2 + $0x3a0] ss:$2 sm:$0xf]  ;;  %v2345_v32 = vld [vmem:[#allocation2 + $0x3a1] ss:$2 sm:$0xf]  ;;  %v1601_v33 = vpop.f32.mrf.mxu0 }
 0x1d3   : > { %v2459_v34 = vmax.f32 %v2153_v31, %v2345_v32  ;;  %1975 = vst.msk [vmem:[#allocation2 + $0x3c0] sm:$0xff] %vm1854_vm3, %v1830_v29  ;;  %v1833_v36 = vmax.f32 %v1607_v30, 0.0  ;;  %v1602_v38 = vadd.f32 %v17709_v17, %v1601_v33 }
 0x1d4   : > { %v2157_v39 = vld [vmem:[#allocation2 + $0x3b8] ss:$2 sm:$0xf]  ;;  %v2349_v40 = vld [vmem:[#allocation2 + $0x3b9] ss:$2 sm:$0xf]  ;;  %v15617_v41 = vpop.f32.mrf.mxu0 }
 0x1d5   : > { %v2461_v44 = vmax.f32 %v2157_v39, %v2349_v40  ;;  %1978 = vst.msk [vmem:[#allocation2 + $0x3d8] sm:$0xff] %vm1854_vm3, %v1833_v36  ;;  %v1832_v46 = vmax.f32 %v1602_v38, 0.0  ;;  %v1617_v47 = vadd.f32 %v17709_v17, %v15617_v41  ;;  %v2596_v51 = vsel %vm2481_vm4, %v2459_v34, -inf  ;;  %v2671_v40 = vld [vmem:[#allocation3] sm:$0xff] }
 0x1d6   : > { %v2155_v48 = vld [vmem:[#allocation2 + $0x3a8] ss:$2 sm:$0xff]  ;;  %v2347_v50 = vld [vmem:[#allocation2 + $0x3a9] ss:$2 sm:$0xff]  ;;  %v1611_v42 = vpop.f32.mrf.mxu0 }
 0x1d7   : > { %v2597_v52 = vsel %vm2481_vm4, %v2461_v44, -inf  ;;  %v2460_v53 = vmax.f32 %v2155_v48, %v2347_v50  ;;  %1977 = vst.msk [vmem:[#allocation2 + $0x3d0] sm:$0xff] %vm1854_vm3, %v1832_v46  ;;  %v1835_v54 = vmax.f32 %v1617_v47, 0.0  ;;  %v1612_v55 = vadd.f32 %v17709_v17, %v1611_v42  ;;  %v17728_v56 = vld [vmem:[#allocation3 + $0x121] sm:$0xff]  ;;  %v17767_v48 = vld [vmem:[#allocation3 + $0x10] sm:$0xff] }
 0x1d8   : > { %v17730_v57 = vld [vmem:[#allocation3 + $0x120] sm:$0xff]  ;;  %v15620_v58 = vpop.f32.mrf.mxu0  ;;  %15672 = vmatprep.mubr.msk.f32.mxu1 %vm1854_vm3, %v17728_v56  ;;  %v2598_v59 = vmax.f32 %v2596_v51, %v2597_v52 }
 0x1d9   : > { %15969 = vmatprep.mubr.msk.f32.mxu0 %vm1854_vm3, %v17730_v57  ;;  %1980 = vst.msk [vmem:[#allocation2 + $0x3e8] sm:$0xff] %vm1854_vm3, %v1835_v54  ;;  %v1834_v60 = vmax.f32 %v1612_v55, 0.0  ;;  %v1627_v27 = vadd.f32 %v17709_v17, %v15620_v58  ;;  %v2594_v63 = vsel %vm1854_vm3, %v2460_v53, -inf  ;;  %v13458_v54 = vld [vmem:[%s22693_s3 + $0x38] sm:$0xff]  ;;  %v17777_v58 = vld [vmem:[#allocation3 + $0x20] sm:$0xff] }
 0x1da   : > { %v1621_v0 = vpop.f32.mrf.mxu0  ;;  %v2595_v1 = vmax.f32 %v2593_v62, %v2594_v63  ;;  %2662 = vst.msk [vmem:[#allocation3 + $0x138] sm:$0xf] %vm2481_vm4, %v2598_v59  ;;  %v2159_v2 = vld [vmem:[#allocation2 + $0x3c0] ss:$2 sm:$0xff]  ;;  %v2351_v3 = vld [vmem:[#allocation2 + $0x3c1] ss:$2 sm:$0xff] }
 0x1db   : > { %1979 = vst.msk [vmem:[#allocation2 + $0x3e0] sm:$0xff] %vm1854_vm3, %v1834_v60  ;;  %v1837_v4 = vmax.f32 %v1627_v27, 0.0  ;;  %v1622_v5 = vadd.f32 %v17709_v17, %v1621_v0  ;;  %v2462_v9 = vmax.f32 %v2159_v2, %v2351_v3  ;;  %v13457_v27 = vld [vmem:[%s22693_s3 + $0x30] sm:$0xff] }
 0x1dc   : > { %v15623_v6 = vpop.f32.mrf.mxu0  ;;  %2661 = vst.msk [vmem:[#allocation3 + $0x130] sm:$0xff] %vm1854_vm3, %v2595_v1 }
 0x1dd   : > { %1982 = vst.msk [vmem:[#allocation2 + $0x3f8] sm:$0xff] %vm1854_vm3, %v1837_v4  ;;  %v1836_v7 = vmax.f32 %v1622_v5, 0.0  ;;  %v1637_v8 = vadd.f32 %v17709_v17, %v15623_v6  ;;  %v2599_v30 = vsel %vm1854_vm3, %v2462_v9, -inf  ;;  %v17791_v5 = vld [vmem:[#allocation3 + $0x30] sm:$0xff]  ;;  %v17798_v6 = vld [vmem:[%s22693_s3 + $0x58] sm:$0xf] }
 0x1de   : > { %v2161_v10 = vld [vmem:[#allocation2 + $0x3d0] ss:$2 sm:$0xf]  ;;  %v2353_v11 = vld [vmem:[#allocation2 + $0x3d1] ss:$2 sm:$0xf]  ;;  %v1631_v14 = vpop.f32.mrf.mxu0 }
 0x1df   : > { %v2463_v15 = vmax.f32 %v2161_v10, %v2353_v11  ;;  %1981 = vst.msk [vmem:[#allocation2 + $0x3f0] sm:$0xff] %vm1854_vm3, %v1836_v7  ;;  %v1839_v16 = vmax.f32 %v1637_v8, 0.0  ;;  %v1632_v45 = vadd.f32 %v17709_v17, %v1631_v14 }
 0x1e0   : > { %v2165_v18 = vld [vmem:[#allocation2 + $0x3e8] ss:$2 sm:$0xf]  ;;  %v2357_v20 = vld [vmem:[#allocation2 + $0x3e9] ss:$2 sm:$0xf]  ;;  %v15626_v21 = vpop.f32.mrf.mxu0 }
 0x1e1   : > { %v2465_v22 = vmax.f32 %v2165_v18, %v2357_v20  ;;  %1984 = vst.msk [vmem:[#allocation2 + $0x408] sm:$0xff] %vm1854_vm3, %v1839_v16  ;;  %v1838_v23 = vmax.f32 %v1632_v45, 0.0  ;;  %v1647_v24 = vadd.f32 %v17709_v17, %v15626_v21  ;;  %v2602_v25 = vsel %vm2481_vm4, %v2463_v15, -inf }
 0x1e2   : > { %v2163_v26 = vld [vmem:[#allocation2 + $0x3d8] ss:$2 sm:$0xff]  ;;  %v2355_v28 = vld [vmem:[#allocation2 + $0x3d9] ss:$2 sm:$0xff]  ;;  %v1641_v29 = vpop.f32.mrf.mxu0 }
 0x1e3   : > { %v2603_v31 = vsel %vm2481_vm4, %v2465_v22, -inf  ;;  %v2464_v32 = vmax.f32 %v2163_v26, %v2355_v28  ;;  %1983 = vst.msk [vmem:[#allocation2 + $0x400] sm:$0xff] %vm1854_vm3, %v1838_v23  ;;  %v1841_v33 = vmax.f32 %v1647_v24, 0.0  ;;  %v1642_v34 = vadd.f32 %v17709_v17, %v1641_v29  ;;  %v17755_v36 = vld [vmem:[#allocation3 + $0x131] sm:$0xff] }
 0x1e4   : > { %v17757_v38 = vld [vmem:[#allocation3 + $0x130] sm:$0xff]  ;;  %v15629_v39 = vpop.f32.mrf.mxu0  ;;  %15673 = vmatmul.mubr.msk.f32.gmra.mxu1 %vm1854_vm3, %v17755_v36  ;;  %v2604_v41 = vmax.f32 %v2602_v25, %v2603_v31 }
 0x1e5   : > { %15970 = vmatmul.mubr.msk.f32.gmra.mxu0 %vm1854_vm3, %v17757_v38  ;;  %1986 = vst.msk [vmem:[#allocation2 + $0x418] sm:$0xff] %vm1854_vm3, %v1841_v33  ;;  %v1840_v43 = vmax.f32 %v1642_v34, 0.0  ;;  %v1657_v44 = vadd.f32 %v17709_v17, %v15629_v39  ;;  %15681 = vmatprep.mubr.msk.f32.mxu1 %vm1854_vm3, %v2671_v40  ;;  %v2600_v46 = vsel %vm1854_vm3, %v2464_v32, -inf  ;;  %v17813_v25 = vld [vmem:[#allocation3 + $0x50] sm:$0xff] }
 0x1e6   : > { %v1651_v47 = vpop.f32.mrf.mxu0  ;;  %v2601_v50 = vmax.f32 %v2599_v30, %v2600_v46  ;;  %2664 = vst.msk [vmem:[#allocation3 + $0x148] sm:$0xf] %vm2481_vm4, %v2604_v41  ;;  %v2167_v42 = vld [vmem:[#allocation2 + $0x3f0] ss:$2 sm:$0xff]  ;;  %v2359_v51 = vld [vmem:[#allocation2 + $0x3f1] ss:$2 sm:$0xff] }
 0x1e7   : > { %1985 = vst.msk [vmem:[#allocation2 + $0x410] sm:$0xff] %vm1854_vm3, %v1840_v43  ;;  %v1843_v52 = vmax.f32 %v1657_v44, 0.0  ;;  %v1652_v53 = vadd.f32 %v17709_v17, %v1651_v47  ;;  %v2466_v62 = vmax.f32 %v2167_v42, %v2359_v51  ;;  %v17819_v30 = vld [vmem:[#allocation3 + $0x60] sm:$0xff]  ;;  %v17831_v46 = vld [vmem:[#allocation3 + $0x70] sm:$0xff] }
 0x1e8   : > { %v15632_v55 = vpop.f32.mrf.mxu0  ;;  %15682 = vmatmul.mubr.msk.f32.vlgmr.msra.gmra.mxu1 %vm1854_vm3, %v17767_v48  ;;  %2663 = vst.msk [vmem:[#allocation3 + $0x140] sm:$0xff] %vm1854_vm3, %v2601_v50  ;;  %v2679_v50 = vld [vmem:[#allocation3 + $0xc0] sm:$0xff] }
 0x1e9   : > { %1988 = vst.msk [vmem:[#allocation2 + $0x428] sm:$0xff] %vm1854_vm3, %v1843_v52  ;;  %v1842_v59 = vmax.f32 %v1652_v53, 0.0  ;;  %v1667_v60 = vadd.f32 %v17709_v17, %v15632_v55  ;;  %15706 = vmatpush3.msk.msra.mxu1 %vm2758_vm2, %v17528_v49  ;;  %15684 = vmatprep.mubr.msk.f32.mxu1 %vm1854_vm3, %v17777_v58  ;;  %v17793_v49 = vld [vmem:[#allocation3 + $0x40] sm:$0xff]  ;;  %v2605_v16 = vsel %vm1854_vm3, %v2466_v62, -inf  ;;  %v17841_v62 = vld [vmem:[#allocation3 + $0xd0] sm:$0xff] }
 0x1ea   : > { %v2169_v63 = vld [vmem:[#allocation2 + $0x400] ss:$2 sm:$0xf]  ;;  %v2361_v0 = vld [vmem:[#allocation2 + $0x401] ss:$2 sm:$0xf]  ;;  %v1661_v1 = vpop.f32.mrf.mxu0  ;;  %15707 = vmatprep.subr.mxu1 %v13458_v54 }
 0x1eb   : > { %v2467_v2 = vmax.f32 %v2169_v63, %v2361_v0  ;;  %1987 = vst.msk [vmem:[#allocation2 + $0x420] sm:$0xff] %vm1854_vm3, %v1842_v59  ;;  %v1845_v3 = vmax.f32 %v1667_v60, 0.0  ;;  %v1662_v4 = vadd.f32 %v17709_v17, %v1661_v1  ;;  %15708 = vmatpush3.msra.mxu1 %v13458_v54 }
 0x1ec   : > { %v2173_v7 = vld [vmem:[#allocation2 + $0x418] ss:$2 sm:$0xf]  ;;  %v2365_v8 = vld [vmem:[#allocation2 + $0x419] ss:$2 sm:$0xf]  ;;  %v15635_v9 = vpop.f32.mrf.mxu0  ;;  %15685 = vmatmul.mubr.msk.f32.gmra.mxu1 %vm1854_vm3, %v17791_v5  ;;  %15709 = vmatprep.subr.mxu1 %v13457_v27 }
 0x1ed   : > { %v2608_v10 = vsel %vm2481_vm4, %v2467_v2, -inf  ;;  %v2469_v11 = vmax.f32 %v2173_v7, %v2365_v8  ;;  %1990 = vst.msk [vmem:[#allocation2 + $0x438] sm:$0xff] %vm1854_vm3, %v1845_v3  ;;  %v1844_v14 = vmax.f32 %v1662_v4, 0.0  ;;  %v1677_v15 = vadd.f32 %v17709_v17, %v15635_v9  ;;  %15687 = vmatprep.mubr.msk.f32.mxu1 %vm1854_vm3, %v17793_v49  ;;  %15710 = vmatpush3.msra.mxu1 %v13457_v27 }
 0x1ee   : > { %v2171_v45 = vld [vmem:[#allocation2 + $0x408] ss:$2 sm:$0xff]  ;;  %v2363_v18 = vld [vmem:[#allocation2 + $0x409] ss:$2 sm:$0xff]  ;;  %v1671_v20 = vpop.f32.mrf.mxu0  ;;  %15735 = vmatprep.subr.msk.mxu1 %vm2758_vm2, %v17798_v6 }
 0x1ef   : > { %v2609_v21 = vsel %vm2481_vm4, %v2469_v11, -inf  ;;  %v2468_v22 = vmax.f32 %v2171_v45, %v2363_v18  ;;  %1989 = vst.msk [vmem:[#allocation2 + $0x430] sm:$0xff] %vm1854_vm3, %v1844_v14  ;;  %v1847_v23 = vmax.f32 %v1677_v15, 0.0  ;;  %v1672_v24 = vadd.f32 %v17709_v17, %v1671_v20  ;;  %v17815_v26 = vld [vmem:[#allocation3 + $0x140] sm:$0xff] }
 0x1f0   : > { %v2610_v28 = vmax.f32 %v2608_v10, %v2609_v21  ;;  %v15638_v29 = vpop.f32.mrf.mxu0  ;;  %15688 = vmatmul.mubr.msk.f32.gmra.mxu1 %vm1854_vm3, %v17813_v25  ;;  %15972 = vmatprep.mubr.msk.f32.mxu0 %vm1854_vm3, %v17815_v26 }
 0x1f1   : > { %v2606_v31 = vsel %vm1854_vm3, %v2468_v22, -inf  ;;  %1992 = vst.msk [vmem:[#allocation2 + $0x448] sm:$0xff] %vm1854_vm3, %v1847_v23  ;;  %v1846_v32 = vmax.f32 %v1672_v24, 0.0  ;;  %v1687_v33 = vadd.f32 %v17709_v17, %v15638_v29  ;;  %15690 = vmatprep.mubr.msk.f32.mxu1 %vm1854_vm3, %v17819_v30  ;;  %v17876_v23 = vld [vmem:[#allocation3 + $0x42] sm:$0xff] }
 0x1f2   : > { %2666 = vst.msk [vmem:[#allocation3 + $0x158] sm:$0xf] %vm2481_vm4, %v2610_v28  ;;  %v1681_v34 = vpop.f32.mrf.mxu0  ;;  %v2607_v39 = vmax.f32 %v2605_v16, %v2606_v31  ;;  %v2175_v40 = vld [vmem:[#allocation2 + $0x420] ss:$2 sm:$0xff]  ;;  %v2367_v41 = vld [vmem:[#allocation2 + $0x421] ss:$2 sm:$0xff] }
 0x1f3   : > { %1991 = vst.msk [vmem:[#allocation2 + $0x440] sm:$0xff] %vm1854_vm3, %v1846_v32  ;;  %v1849_v43 = vmax.f32 %v1687_v33, 0.0  ;;  %v1682_v44 = vadd.f32 %v17709_v17, %v1681_v34  ;;  %v2470_v52 = vmax.f32 %v2175_v40, %v2367_v41  ;;  %v17888_v31 = vld [vmem:[#allocation3 + $0x52] sm:$0xff]  ;;  %v17890_v32 = vld [vmem:[#allocation3 + $0x62] sm:$0xff] }
 0x1f4   : > { %v15641_v47 = vpop.f32.mrf.mxu0  ;;  %15691 = vmatmul.mubr.msk.f32.gmra.mxu1 %vm1854_vm3, %v17831_v46  ;;  %2665 = vst.msk [vmem:[#allocation3 + $0x150] sm:$0xff] %vm1854_vm3, %v2607_v39  ;;  %v13697_v33 = vld [vmem:[%s22693_s3 + $0x150] sm:$0xff] }
 0x1f5   : > { %1994 = vst.msk [vmem:[#allocation2 + $0x458] sm:$0xff] %vm1854_vm3, %v1849_v43  ;;  %v1848_v42 = vmax.f32 %v1682_v44, 0.0  ;;  %v1697_v51 = vadd.f32 %v17709_v17, %v15641_v47  ;;  %15693 = vmatprep.mubr.msk.f32.mxu1 %vm1854_vm3, %v2679_v50  ;;  %v2611_v8 = vsel %vm1854_vm3, %v2470_v52, -inf  ;;  %v17904_v41 = vld [vmem:[#allocation3 + $0x12] sm:$0xff] }
 0x1f6   : > { %v2177_v53 = vld [vmem:[#allocation2 + $0x430] ss:$2 sm:$0xf]  ;;  %v2369_v54 = vld [vmem:[#allocation2 + $0x431] ss:$2 sm:$0xf]  ;;  %v1691_v55 = vpop.f32.mrf.mxu0 }
 0x1f7   : > { %v2471_v59 = vmax.f32 %v2177_v53, %v2369_v54  ;;  %1993 = vst.msk [vmem:[#allocation2 + $0x450] sm:$0xff] %vm1854_vm3, %v1848_v42  ;;  %v1851_v60 = vmax.f32 %v1697_v51, 0.0  ;;  %v1692_v27 = vadd.f32 %v17709_v17, %v1691_v55  ;;  %v17906_v43 = vld [vmem:[#allocation3 + $0x72] sm:$0xff]  ;;  %v17919_v42 = vld [vmem:[#allocation3 + $0x82] sm:$0xff] }
 0x1f8   : > { %v2181_v63 = vld [vmem:[#allocation2 + $0x448] ss:$2 sm:$0xf]  ;;  %v2373_v0 = vld [vmem:[#allocation2 + $0x449] ss:$2 sm:$0xf]  ;;  %v15644_v1 = vpop.f32.mrf.mxu0  ;;  %15694 = vmatmul.mubr.msk.f32.gmra.mxu1 %vm1854_vm3, %v17841_v62 }
 0x1f9   : > { %v2614_v2 = vsel %vm2481_vm4, %v2471_v59, -inf  ;;  %v2473_v3 = vmax.f32 %v2181_v63, %v2373_v0  ;;  %1996 = vst.msk [vmem:[#allocation2 + $0x468] sm:$0xff] %vm1854_vm3, %v1851_v60  ;;  %v1850_v4 = vmax.f32 %v1692_v27, 0.0  ;;  %v1707_v7 = vadd.f32 %v17709_v17, %v15644_v1  ;;  %15696 = vmatprep.mubr.msk.f32.mxu1 %vm1854_vm3, %v17628_v19  ;;  %v17860_v19 = vld [vmem:[#allocation3 + $0x22] sm:$0xff]  ;;  %v13478_v44 = vld [vmem:[%s22693_s3 + $0x50] sm:$0xff] }
 0x1fa   : > { %v2179_v9 = vld [vmem:[#allocation2 + $0x438] ss:$2 sm:$0xff]  ;;  %v2371_v10 = vld [vmem:[#allocation2 + $0x439] ss:$2 sm:$0xff]  ;;  %v1701_v11 = vpop.f32.mrf.mxu0  ;;  %v13739_v55 = vld [vmem:[%s22693_s3 + $0x190] sm:$0xf] }
 0x1fb   : > { %v2615_v14 = vsel %vm2481_vm4, %v2473_v3, -inf  ;;  %v2472_v15 = vmax.f32 %v2179_v9, %v2371_v10  ;;  %1995 = vst.msk [vmem:[#allocation2 + $0x460] sm:$0xff] %vm1854_vm3, %v1850_v4  ;;  %v1853_v16 = vmax.f32 %v1707_v7, 0.0  ;;  %v1702_v45 = vadd.f32 %v17709_v17, %v1701_v11  ;;  %v17854_v18 = vld [vmem:[#allocation3 + $0x150] sm:$0xff]  ;;  %v17936_v59 = vld [vmem:[#allocation3 + $0xe2] sm:$0xff] }
 0x1fc   : > { %v2616_v20 = vmax.f32 %v2614_v2, %v2615_v14  ;;  %15697 = vmatmul.mubr.msk.f32.gmra.mxu1 %vm1854_vm3, %v17651_v61  ;;  %15973 = vmatmul.mubr.msk.f32.gmra.mxu0 %vm1854_vm3, %v17854_v18  ;;  %v17870_v61 = vld [vmem:[#allocation3 + $0x32] sm:$0xff]  ;;  %22720 = vst [vmem:[#allocation9_spill] sm:$0xff] %v17936_v59  ;;  %v17952_v1 = vld [vmem:[#allocation3 + $0x102] sm:$0xff] }
 0x1fd   : > { %v2612_v21 = vsel %vm1854_vm3, %v2472_v15, -inf  ;;  %1998 = vst.msk [vmem:[#allocation2 + $0x478] sm:$0xff] %vm1854_vm3, %v1853_v16  ;;  %v1852_v22 = vmax.f32 %v1702_v45, 0.0  ;;  %15699 = vmatprep.mubr.msk.f32.mxu1 %vm1854_vm3, %v17674_v37  ;;  %16011 = vmatprep.mubr.msk.f32.mxu0 %vm1854_vm3, %v17860_v19  ;;  %v13698_v37 = vld [vmem:[%s22693_s3 + $0x158] sm:$0xff]  ;;  %v13499_v0 = vld [vmem:[%s22693_s3 + $0x70] sm:$0xf] }
 0x1fe   : > { %2668 = vst.msk [vmem:[#allocation3 + $0x168] sm:$0xf] %vm2481_vm4, %v2616_v20  ;;  %v2613_v17 = vmax.f32 %v2611_v8, %v2612_v21  ;;  %v2183_v50 = vld [vmem:[#allocation2 + $0x450] ss:$2 sm:$0xff]  ;;  %v2375_v51 = vld [vmem:[#allocation2 + $0x451] ss:$2 sm:$0xff] }
 0x1ff   : > { %1997 = vst.msk [vmem:[#allocation2 + $0x470] sm:$0xff] %vm1854_vm3, %v1852_v22  ;;  %v17924_v54 = vld [vmem:[#allocation3 + $0x92] sm:$0xff]  ;;  %v2474_v60 = vmax.f32 %v2183_v50, %v2375_v51  ;;  %v3111_v7 = vld [vmem:[#allocation3 + $0xc2] sm:$0xff] }
 0x200   : > { %15700 = vmatmul.mubr.msk.f32.gmra.mxu1 %vm1854_vm3, %v17699_v13  ;;  %16012 = vmatmul.mubr.msk.f32.vlgmr.msra.gmra.mxu0 %vm1854_vm3, %v17870_v61  ;;  %2667 = vst.msk [vmem:[#allocation3 + $0x160] sm:$0xff] %vm1854_vm3, %v2613_v17  ;;  %v3103_v13 = vld [vmem:[#allocation3 + $0x2] sm:$0xff]  ;;  %v17943_v63 = vld [vmem:[#allocation3 + $0xf2] sm:$0xff] }
 0x201   : > { %15702 = vmatprep.mubr.msk.f32.mxu1 %vm1854_vm3, %v17730_v57  ;;  %16014 = vmatprep.mubr.msk.f32.mxu0 %vm1854_vm3, %v17876_v23  ;;  %22721 = vst [vmem:[#allocation10_spill] sm:$0xff] %v17943_v63  ;;  %v2617_v2 = vsel %vm1854_vm3, %v2474_v60, -inf  ;;  %v17961_v4 = vld [vmem:[#allocation3 + $0x112] sm:$0xff]  ;;  %v17967_v8 = vld [vmem:[#allocation3 + $0x122] sm:$0xff] }
 0x202   : > { %v2185_v24 = vld [vmem:[#allocation2 + $0x460] ss:$2 sm:$0xf]  ;;  %v2377_v28 = vld [vmem:[#allocation2 + $0x461] ss:$2 sm:$0xf]  ;;  %16066 = vmatpush3.msk.msra.mxu0 %vm2758_vm2, %v17601_v35 }
 0x203   : > { %v2475_v29 = vmax.f32 %v2185_v24, %v2377_v28  ;;  %16067 = vmatprep.subr.mxu0 %v13698_v37  ;;  %v17972_v10 = vld [vmem:[#allocation3 + $0x142] sm:$0xff]  ;;  %v17975_v11 = vld [vmem:[#allocation3 + $0xd2] sm:$0xff] }
 0x204   : > { %v2189_v57 = vld [vmem:[#allocation2 + $0x478] ss:$2 sm:$0xf]  ;;  %v2381_v34 = vld [vmem:[#allocation2 + $0x479] ss:$2 sm:$0xf]  ;;  %15703 = vmatmul.mubr.msk.f32.gmra.mxu1 %vm1854_vm3, %v17757_v38  ;;  %16015 = vmatmul.mubr.msk.f32.gmra.mxu0 %vm1854_vm3, %v17888_v31 }
 0x205   : > { %v2620_v35 = vsel %vm2481_vm4, %v2475_v29, -inf  ;;  %v2477_v39 = vmax.f32 %v2189_v57, %v2381_v34  ;;  %15711 = vmatprep.mubr.msk.f32.mxu1 %vm1854_vm3, %v3103_v13  ;;  %16017 = vmatprep.mubr.msk.f32.mxu0 %vm1854_vm3, %v17890_v32  ;;  %v17977_v14 = vld [vmem:[#allocation3 + $0x132] sm:$0xff]  ;;  %v17993_v16 = vld [vmem:[#allocation3 + $0x24] sm:$0xff] }
 0x206   : > { %16068 = vmatpush3.msra.mxu0 %v13698_v37  ;;  %v2187_v52 = vld [vmem:[#allocation2 + $0x468] ss:$2 sm:$0xff]  ;;  %v2379_v53 = vld [vmem:[#allocation2 + $0x469] ss:$2 sm:$0xff]  ;;  %v13737_v24 = vld [vmem:[%s22693_s3 + $0x180] sm:$0xff] }
 0x207   : > { %v2621_v40 = vsel %vm2481_vm4, %v2477_v39, -inf  ;;  %16069 = vmatprep.subr.mxu0 %v13697_v33  ;;  %v2476_v27 = vmax.f32 %v2187_v52, %v2379_v53  ;;  %v17987_v15 = vld [vmem:[#allocation3 + $0x152] sm:$0xff]  ;;  %v18005_v20 = vld [vmem:[#allocation3 + $0x44] sm:$0xff] }
 0x208   : > { %v2622_v47 = vmax.f32 %v2620_v35, %v2621_v40  ;;  %15712 = vmatmul.mubr.msk.f32.vlgmr.msra.gmra.mxu1 %vm1854_vm3, %v17904_v41  ;;  %16018 = vmatmul.mubr.msk.f32.gmra.mxu0 %vm1854_vm3, %v17906_v43  ;;  %22722 = vst [vmem:[#allocation11_spill] sm:$0xff] %v17987_v15  ;;  %v17999_v45 = vld [vmem:[#allocation3 + $0x34] sm:$0xff]  ;;  %v13738_v21 = vld [vmem:[%s22693_s3 + $0x188] sm:$0xff]  ;;  %v13497_v39 = vld [vmem:[%s22693_s3 + $0x60] sm:$0xff] }
 0x209   : > { %15736 = vmatpush3.msk.msra.mxu1 %vm2758_vm2, %v17798_v6  ;;  %15714 = vmatprep.mubr.msk.f32.mxu1 %vm1854_vm3, %v17860_v19  ;;  %v13477_v6 = vld [vmem:[%s22693_s3 + $0x48] sm:$0xff]  ;;  %v2618_v3 = vsel %vm1854_vm3, %v2476_v27, -inf  ;;  %v18015_v22 = vld [vmem:[#allocation3 + $0x54] sm:$0xff]  ;;  %v13779_v40 = vld [vmem:[%s22693_s3 + $0x1c0] sm:$0xf] }
 0x20a   : > { %2670 = vst.msk [vmem:[#allocation3 + $0x178] sm:$0xf] %vm2481_vm4, %v2622_v47  ;;  %16020 = vmatprep.mubr.msk.f32.mxu0 %vm1854_vm3, %v17919_v42  ;;  %15737 = vmatprep.subr.mxu1 %v13478_v44  ;;  %v2619_v9 = vmax.f32 %v2617_v2, %v2618_v3  ;;  %v3335_v17 = vld [vmem:[#allocation3 + $0x3] sm:$0xff]  ;;  %v18029_v28 = vld [vmem:[#allocation3 + $0x13] sm:$0xff] }
 0x20b   : > { %15738 = vmatpush3.msra.mxu1 %v13478_v44  ;;  %16070 = vmatpush3.msra.mxu0 %v13697_v33  ;;  %v18021_v37 = vld [vmem:[#allocation3 + $0x64] sm:$0xff]  ;;  %22723 = vst [vmem:[#allocation12_spill] sm:$0xff] %v18029_v28  ;;  %v18031_v13 = vld [vmem:[#allocation3 + $0x74] sm:$0xff] }
 0x20c   : > { %15715 = vmatmul.mubr.msk.f32.gmra.mxu1 %vm1854_vm3, %v17870_v61  ;;  %16021 = vmatmul.mubr.msk.f32.gmra.mxu0 %vm1854_vm3, %v17924_v54  ;;  %2669 = vst.msk [vmem:[#allocation3 + $0x170] sm:$0xff] %vm1854_vm3, %v2619_v9  ;;  %v13498_v29 = vld [vmem:[%s22693_s3 + $0x68] sm:$0xff]  ;;  %v18049_v34 = vld [vmem:[#allocation3 + $0x33] sm:$0xff] }
 0x20d   : > { %15717 = vmatprep.mubr.msk.f32.mxu1 %vm1854_vm3, %v17876_v23  ;;  %16023 = vmatprep.mubr.msk.f32.mxu0 %vm1854_vm3, %v17936_v59  ;;  %v18040_v33 = vld [vmem:[#allocation3 + $0x23] sm:$0xff]  ;;  %v18051_v35 = vld [vmem:[#allocation3 + $0x94] sm:$0xff] }
 0x20e   : > { %15739 = vmatprep.subr.mxu1 %v13477_v6  ;;  %16125 = vmatprep.subr.msk.mxu0 %vm2758_vm2, %v13739_v55  ;;  %22724 = vst [vmem:[#allocation13_spill] sm:$0xff] %v18040_v33  ;;  %v18045_v57 = vld [vmem:[#allocation3 + $0x84] sm:$0xff]  ;;  %22726 = vst [vmem:[#allocation15_spill] sm:$0xff] %v18051_v35  ;;  %v18072_v50 = vld [vmem:[#allocation3 + $0x53] sm:$0xff] }
 0x20f   : > { %15740 = vmatpush3.msra.mxu1 %v13477_v6  ;;  %22725 = vst [vmem:[#allocation14_spill] sm:$0xff] %v18045_v57  ;;  %v18063_v44 = vld [vmem:[#allocation3 + $0x43] sm:$0xff]  ;;  %v18074_v51 = vld [vmem:[#allocation3 + $0xf4] sm:$0xff] }
 0x210   : > { %15718 = vmatmul.mubr.msk.f32.gmra.mxu1 %vm1854_vm3, %v17888_v31  ;;  %16024 = vmatmul.mubr.msk.f32.gmra.mxu0 %vm1854_vm3, %v17943_v63  ;;  %v18065_v47 = vld [vmem:[#allocation3 + $0xe4] sm:$0xff]  ;;  %v18094_v60 = vld [vmem:[#allocation3 + $0x114] sm:$0xff] }
 0x211   : > { %15720 = vmatprep.mubr.msk.f32.mxu1 %vm1854_vm3, %v17890_v32  ;;  %16026 = vmatprep.mubr.msk.f32.mxu0 %vm1854_vm3, %v17952_v1  ;;  %v13519_v52 = vld [vmem:[%s22693_s3 + $0x88] sm:$0xf]  ;;  %v18107_v3 = vld [vmem:[#allocation3 + $0xd3] sm:$0xff] }
 0x212   : > { %15765 = vmatprep.subr.msk.mxu1 %vm2758_vm2, %v13499_v0  ;;  %v18083_v53 = vld [vmem:[#allocation3 + $0x63] sm:$0xff]  ;;  %22728 = vst [vmem:[#allocation17_spill] sm:$0xff] %v18107_v3 }
 0x213   : > { %v18085_v6 = vld [vmem:[#allocation3 + $0x104] sm:$0xff] }
 0x214   : > { %15721 = vmatmul.mubr.msk.f32.gmra.mxu1 %vm1854_vm3, %v17906_v43  ;;  %16027 = vmatmul.mubr.msk.f32.gmra.mxu0 %vm1854_vm3, %v17961_v4  ;;  %v3343_v27 = vld [vmem:[#allocation3 + $0xc3] sm:$0xff] }
 0x215   : > { %15723 = vmatprep.mubr.msk.f32.mxu1 %vm1854_vm3, %v3111_v7  ;;  %16029 = vmatprep.mubr.msk.f32.mxu0 %vm1854_vm3, %v17967_v8  ;;  %v18105_v2 = vld [vmem:[#allocation3 + $0x144] sm:$0xff]  ;;  %v18109_v7 = vld [vmem:[#allocation3 + $0x134] sm:$0xff] }
 0x216   : > { %22727 = vst [vmem:[#allocation16_spill] sm:$0xff] %v18105_v2  ;;  %v18115_v9 = vld [vmem:[#allocation3 + $0xe3] sm:$0xff] }
 0x217   : > { %22729 = vst [vmem:[#allocation18_spill] sm:$0xff] %v18115_v9 }
 0x218   : > { %15724 = vmatmul.mubr.msk.f32.gmra.mxu1 %vm1854_vm3, %v17975_v11  ;;  %16030 = vmatmul.mubr.msk.f32.gmra.mxu0 %vm1854_vm3, %v17977_v14 }
 0x219   : > { %15726 = vmatprep.mubr.msk.f32.mxu1 %vm1854_vm3, %v17936_v59  ;;  %16032 = vmatprep.mubr.msk.f32.mxu0 %vm1854_vm3, %v17972_v10  ;;  %v13517_v59 = vld [vmem:[%s22693_s3 + $0x78] sm:$0xff] }
 0x21c   : > { %15727 = vmatmul.mubr.msk.f32.gmra.mxu1 %vm1854_vm3, %v17943_v63  ;;  %16033 = vmatmul.mubr.msk.f32.gmra.mxu0 %vm1854_vm3, %v17987_v15  ;;  %v18172_v63 = vld [vmem:[#allocation3 + $0x81] sm:$0xff] }
 0x21d   : > { %15729 = vmatprep.mubr.msk.f32.mxu1 %vm1854_vm3, %v17952_v1  ;;  %16071 = vmatprep.mubr.msk.f32.mxu0 %vm1854_vm3, %v17993_v16  ;;  %v13518_v15 = vld [vmem:[%s22693_s3 + $0x80] sm:$0xff] }
 0x220   : > { %15730 = vmatmul.mubr.msk.f32.gmra.mxu1 %vm1854_vm3, %v17961_v4  ;;  %16072 = vmatmul.mubr.msk.f32.vlgmr.msra.gmra.mxu0 %vm1854_vm3, %v17999_v45 }
 0x221   : > { %15732 = vmatprep.mubr.msk.f32.mxu1 %vm1854_vm3, %v17967_v8  ;;  %16074 = vmatprep.mubr.msk.f32.mxu0 %vm1854_vm3, %v18005_v20 }
 0x222   : > { %16126 = vmatpush3.msk.msra.mxu0 %vm2758_vm2, %v13739_v55  ;;  %v18092_v55 = vld [vmem:[#allocation3 + $0x73] sm:$0xff] }
 0x223   : > { %16127 = vmatprep.subr.mxu0 %v13738_v21 }
 0x224   : > { %15733 = vmatmul.mubr.msk.f32.gmra.mxu1 %vm1854_vm3, %v17977_v14  ;;  %16075 = vmatmul.mubr.msk.f32.gmra.mxu0 %vm1854_vm3, %v18015_v22 }
 0x225   : > { %15741 = vmatprep.mubr.msk.f32.mxu1 %vm1854_vm3, %v3335_v17  ;;  %16077 = vmatprep.mubr.msk.f32.mxu0 %vm1854_vm3, %v18021_v37  ;;  %v18121_v17 = vld [vmem:[#allocation3 + $0xf3] sm:$0xff] }
 0x226   : > { %16128 = vmatpush3.msra.mxu0 %v13738_v21  ;;  %v5904_v21 = vld [vmem:[#allocation3 + $0x154] sm:$0xff] }
 0x227   : > { %16129 = vmatprep.subr.mxu0 %v13737_v24 }
 0x228   : > { %15742 = vmatmul.mubr.msk.f32.vlgmr.msra.gmra.mxu1 %vm1854_vm3, %v18029_v28  ;;  %16078 = vmatmul.mubr.msk.f32.gmra.mxu0 %vm1854_vm3, %v18031_v13  ;;  %v13777_v28 = vld [vmem:[%s22693_s3 + $0x1b0] sm:$0xff] }
 0x229   : > { %15766 = vmatpush3.msk.msra.mxu1 %vm2758_vm2, %v13499_v0  ;;  %15744 = vmatprep.mubr.msk.f32.mxu1 %vm1854_vm3, %v18040_v33  ;;  %v18100_v0 = vld [vmem:[#allocation3 + $0x124] sm:$0xff] }
 0x22a   : > { %16080 = vmatprep.mubr.msk.f32.mxu0 %vm1854_vm3, %v18045_v57  ;;  %15767 = vmatprep.subr.mxu1 %v13498_v29  ;;  %v3567_v33 = vld [vmem:[#allocation3 + $0x4] sm:$0xff]  ;;  %v18162_v57 = vld [vmem:[#allocation3 + $0x71] sm:$0xff] }
 0x22b   : > { %15768 = vmatpush3.msra.mxu1 %v13498_v29  ;;  %16130 = vmatpush3.msra.mxu0 %v13737_v24  ;;  %v18126_v24 = vld [vmem:[#allocation3 + $0x103] sm:$0xff]  ;;  %v18128_v29 = vld [vmem:[#allocation3 + $0x31] sm:$0xff] }
 0x22c   : > { %15745 = vmatmul.mubr.msk.f32.gmra.mxu1 %vm1854_vm3, %v18049_v34  ;;  %16081 = vmatmul.mubr.msk.f32.gmra.mxu0 %vm1854_vm3, %v18051_v35  ;;  %v18156_v35 = vld [vmem:[#allocation3 + $0x61] sm:$0xff] }
 0x22d   : > { %15747 = vmatprep.mubr.msk.f32.mxu1 %vm1854_vm3, %v18063_v44  ;;  %16083 = vmatprep.mubr.msk.f32.mxu0 %vm1854_vm3, %v18065_v47 }
 0x22e   : > { %15769 = vmatprep.subr.mxu1 %v13497_v39  ;;  %16185 = vmatprep.subr.msk.mxu0 %vm2758_vm2, %v13779_v40 }
 0x22f   : > { %15770 = vmatpush3.msra.mxu1 %v13497_v39  ;;  %v18134_v39 = vld [vmem:[#allocation3 + $0x113] sm:$0xff] }
 0x230   : > { %15748 = vmatmul.mubr.msk.f32.gmra.mxu1 %vm1854_vm3, %v18072_v50  ;;  %16084 = vmatmul.mubr.msk.f32.gmra.mxu0 %vm1854_vm3, %v18074_v51 }
 0x231   : > { %15750 = vmatprep.mubr.msk.f32.mxu1 %vm1854_vm3, %v18083_v53  ;;  %16086 = vmatprep.mubr.msk.f32.mxu0 %vm1854_vm3, %v18085_v6 }
 0x232   : > { %15795 = vmatprep.subr.msk.mxu1 %vm2758_vm2, %v13519_v52 }
 0x234   : > { %15751 = vmatmul.mubr.msk.f32.gmra.mxu1 %vm1854_vm3, %v18092_v55  ;;  %16087 = vmatmul.mubr.msk.f32.gmra.mxu0 %vm1854_vm3, %v18094_v60 }
 0x235   : > { %15753 = vmatprep.mubr.msk.f32.mxu1 %vm1854_vm3, %v3343_v27  ;;  %16089 = vmatprep.mubr.msk.f32.mxu0 %vm1854_vm3, %v18100_v0  ;;  %v18136_v27 = vld [vmem:[#allocation3 + $0x41] sm:$0xff] }
 0x238   : > { %15754 = vmatmul.mubr.msk.f32.gmra.mxu1 %vm1854_vm3, %v18107_v3  ;;  %16090 = vmatmul.mubr.msk.f32.gmra.mxu0 %vm1854_vm3, %v18109_v7  ;;  %v18154_v3 = vld [vmem:[#allocation3 + $0x133] sm:$0xff] }
 0x239   : > { %15756 = vmatprep.mubr.msk.f32.mxu1 %vm1854_vm3, %v18115_v9  ;;  %16092 = vmatprep.mubr.msk.f32.mxu0 %vm1854_vm3, %v18105_v2  ;;  %v18144_v9 = vld [vmem:[#allocation3 + $0x51] sm:$0xff] }
 0x23a   : > { %v13778_v2 = vld [vmem:[%s22693_s3 + $0x1b8] sm:$0xff] }
 0x23c   : > { %15757 = vmatmul.mubr.msk.f32.gmra.mxu1 %vm1854_vm3, %v18121_v17  ;;  %16093 = vmatmul.mubr.msk.f32.gmra.mxu0 %vm1854_vm3, %v5904_v21  ;;  %v18142_v21 = vld [vmem:[#allocation3 + $0x123] sm:$0xff] }
 0x23d   : > { %15759 = vmatprep.mubr.msk.f32.mxu1 %vm1854_vm3, %v18126_v24  ;;  %16131 = vmatprep.mubr.msk.f32.mxu0 %vm1854_vm3, %v18128_v29 }
 0x240   : > { %15760 = vmatmul.mubr.msk.f32.gmra.mxu1 %vm1854_vm3, %v18134_v39  ;;  %16132 = vmatmul.mubr.msk.f32.vlgmr.msra.gmra.mxu0 %vm1854_vm3, %v18136_v27 }
 0x241   : > { %15762 = vmatprep.mubr.msk.f32.mxu1 %vm1854_vm3, %v18142_v21  ;;  %16134 = vmatprep.mubr.msk.f32.mxu0 %vm1854_vm3, %v18144_v9 }
 0x242   : > { %16186 = vmatpush3.msk.msra.mxu0 %vm2758_vm2, %v13779_v40  ;;  %v18170_v40 = vld [vmem:[#allocation3 + $0x14] sm:$0xff] }
 0x243   : > { %16187 = vmatprep.subr.mxu0 %v13778_v2  ;;  %22730 = vst [vmem:[#allocation19_spill] sm:$0xff] %v18170_v40 }
 0x244   : > { %15763 = vmatmul.mubr.msk.f32.gmra.mxu1 %vm1854_vm3, %v18154_v3  ;;  %16135 = vmatmul.mubr.msk.f32.gmra.mxu0 %vm1854_vm3, %v18156_v35 }
 0x245   : > { %15771 = vmatprep.mubr.msk.f32.mxu1 %vm1854_vm3, %v3567_v33  ;;  %16137 = vmatprep.mubr.msk.f32.mxu0 %vm1854_vm3, %v18162_v57  ;;  %v6360_v33 = vld [vmem:[#allocation3 + $0x91] sm:$0xff] }
 0x246   : > { %16188 = vmatpush3.msra.mxu0 %v13778_v2  ;;  %v6361_v2 = vld [vmem:[#allocation3 + $0xa1] sm:$0xff] }
 0x247   : > { %16189 = vmatprep.subr.mxu0 %v13777_v28 }
 0x248   : > { %15772 = vmatmul.mubr.msk.f32.vlgmr.msra.gmra.mxu1 %vm1854_vm3, %v18170_v40  ;;  %16138 = vmatmul.mubr.msk.f32.gmra.mxu0 %vm1854_vm3, %v18172_v63  ;;  %v13819_v40 = vld [vmem:[%s22693_s3 + $0x1f0] sm:$0xf] }
 0x249   : > { %15796 = vmatpush3.msk.msra.mxu1 %vm2758_vm2, %v13519_v52  ;;  %15774 = vmatprep.mubr.msk.f32.mxu1 %vm1854_vm3, %v17993_v16  ;;  %v18194_v16 = vld [vmem:[#allocation3 + $0xf1] sm:$0xff] }
 0x24a   : > { %16140 = vmatprep.mubr.msk.f32.mxu0 %vm1854_vm3, %v6360_v33  ;;  %15797 = vmatprep.subr.mxu1 %v13518_v15  ;;  %v6368_v52 = vld [vmem:[#allocation3 + $0x151] sm:$0xff] }
 0x24b   : > { %15798 = vmatpush3.msra.mxu1 %v13518_v15  ;;  %16190 = vmatpush3.msra.mxu0 %v13777_v28  ;;  %v18201_v15 = vld [vmem:[#allocation3 + $0x101] sm:$0xff]  ;;  %v18224_v33 = vld [vmem:[#allocation3 + $0xd4] sm:$0xff] }
 0x24c   : > { %15775 = vmatmul.mubr.msk.f32.gmra.mxu1 %vm1854_vm3, %v17999_v45  ;;  %16141 = vmatmul.mubr.msk.f32.gmra.mxu0 %vm1854_vm3, %v6361_v2  ;;  %v13539_v45 = vld [vmem:[%s22693_s3 + $0xa0] sm:$0xf]  ;;  %v13537_v2 = vld [vmem:[%s22693_s3 + $0x90] sm:$0xff] }
 0x24d   : > { %15777 = vmatprep.mubr.msk.f32.mxu1 %vm1854_vm3, %v18005_v20  ;;  %16143 = vmatprep.mubr.msk.f32.mxu0 %vm1854_vm3, %v18194_v16  ;;  %v18222_v28 = vld [vmem:[#allocation3 + $0x141] sm:$0xff] }
 0x24e   : > { %15799 = vmatprep.subr.mxu1 %v13517_v59  ;;  %16245 = vmatprep.subr.msk.mxu0 %vm2758_vm2, %v13819_v40 }
 0x24f   : > { %15800 = vmatpush3.msra.mxu1 %v13517_v59  ;;  %v3575_v59 = vld [vmem:[#allocation3 + $0xc4] sm:$0xff] }
 0x250   : > { %15778 = vmatmul.mubr.msk.f32.gmra.mxu1 %vm1854_vm3, %v18015_v22  ;;  %16144 = vmatmul.mubr.msk.f32.gmra.mxu0 %vm1854_vm3, %v18201_v15 }
 0x251   : > { %15780 = vmatprep.mubr.msk.f32.mxu1 %vm1854_vm3, %v18021_v37  ;;  %16146 = vmatprep.mubr.msk.f32.mxu0 %vm1854_vm3, %v17697_v12  ;;  %v6369_v12 = vld [vmem:[#allocation3 + $0x161] sm:$0xff] }
 0x252   : > { %15825 = vmatprep.subr.msk.mxu1 %vm2758_vm2, %v13539_v45 }
 0x254   : > { %15781 = vmatmul.mubr.msk.f32.gmra.mxu1 %vm1854_vm3, %v18031_v13  ;;  %16147 = vmatmul.mubr.msk.f32.gmra.mxu0 %vm1854_vm3, %v17728_v56  ;;  %v13818_v56 = vld [vmem:[%s22693_s3 + $0x1e8] sm:$0xff] }
 0x255   : > { %15783 = vmatprep.mubr.msk.f32.mxu1 %vm1854_vm3, %v3575_v59  ;;  %16149 = vmatprep.mubr.msk.f32.mxu0 %vm1854_vm3, %v17755_v36  ;;  %v13817_v36 = vld [vmem:[%s22693_s3 + $0x1e0] sm:$0xff] }
 0x256   : > { %v18309_v59 = vld [vmem:[#allocation3 + $0x143] sm:$0xff] }
 0x258   : > { %15784 = vmatmul.mubr.msk.f32.gmra.mxu1 %vm1854_vm3, %v18224_v33  ;;  %16150 = vmatmul.mubr.msk.f32.gmra.mxu0 %vm1854_vm3, %v18222_v28 }
 0x259   : > { %15786 = vmatprep.mubr.msk.f32.mxu1 %vm1854_vm3, %v18065_v47  ;;  %16152 = vmatprep.mubr.msk.f32.mxu0 %vm1854_vm3, %v6368_v52  ;;  %v18263_v47 = vld [vmem:[#allocation3 + $0x83] sm:$0xff]  ;;  %v6832_v52 = vld [vmem:[#allocation3 + $0x153] sm:$0xff] }
 0x25c   : > { %15787 = vmatmul.mubr.msk.f32.gmra.mxu1 %vm1854_vm3, %v18074_v51  ;;  %16153 = vmatmul.mubr.msk.f32.gmra.mxu0 %vm1854_vm3, %v6369_v12  ;;  %v13538_v51 = vld [vmem:[%s22693_s3 + $0x98] sm:$0xff]  ;;  %v3809_v12 = vld [vmem:[#allocation3 + $0xe0] sm:$0xff] }
 0x25d   : > { %15789 = vmatprep.mubr.msk.f32.mxu1 %vm1854_vm3, %v18085_v6  ;;  %16191 = vmatprep.mubr.msk.f32.mxu0 %vm1854_vm3, %v18049_v34 }
 0x260   : > { %15790 = vmatmul.mubr.msk.f32.gmra.mxu1 %vm1854_vm3, %v18094_v60  ;;  %16192 = vmatmul.mubr.msk.f32.vlgmr.msra.gmra.mxu0 %vm1854_vm3, %v18063_v44 }
 0x261   : > { %15792 = vmatprep.mubr.msk.f32.mxu1 %vm1854_vm3, %v18100_v0  ;;  %16194 = vmatprep.mubr.msk.f32.mxu0 %vm1854_vm3, %v18072_v50 }
 0x262   : > { %16246 = vmatpush3.msk.msra.mxu0 %vm2758_vm2, %v13819_v40  ;;  %v6825_v40 = vld [vmem:[#allocation3 + $0xa3] sm:$0xff] }
 0x263   : > { %16247 = vmatprep.subr.mxu0 %v13818_v56 }
 0x264   : > { %15793 = vmatmul.mubr.msk.f32.gmra.mxu1 %vm1854_vm3, %v18109_v7  ;;  %16195 = vmatmul.mubr.msk.f32.gmra.mxu0 %vm1854_vm3, %v18083_v53 }
 0x265   : > { %15801 = vmatprep.mubr.msk.f32.mxu1 %vm1854_vm3, %v17767_v48  ;;  %16197 = vmatprep.mubr.msk.f32.mxu0 %vm1854_vm3, %v18092_v55  ;;  %v6824_v48 = vld [vmem:[#allocation3 + $0x93] sm:$0xff] }
 0x266   : > { %16248 = vmatpush3.msra.mxu0 %v13818_v56  ;;  %v3810_v56 = vld [vmem:[#allocation3 + $0xf0] sm:$0xff] }
 0x267   : > { %16249 = vmatprep.subr.mxu0 %v13817_v36 }
 0x268   : > { %15802 = vmatmul.mubr.msk.f32.vlgmr.msra.gmra.mxu1 %vm1854_vm3, %v17777_v58  ;;  %16198 = vmatmul.mubr.msk.f32.gmra.mxu0 %vm1854_vm3, %v18263_v47  ;;  %v13859_v58 = vld [vmem:[%s22693_s3 + $0x220] sm:$0xf] }
 0x269   : > { %15826 = vmatpush3.msk.msra.mxu1 %vm2758_vm2, %v13539_v45  ;;  %15804 = vmatprep.mubr.msk.f32.mxu1 %vm1854_vm3, %v17791_v5  ;;  %v13559_v5 = vld [vmem:[%s22693_s3 + $0xb8] sm:$0xf]  ;;  %v3807_v45 = vld [vmem:[#allocation3 + $0x80] sm:$0xff] }
 0x26a   : > { %16200 = vmatprep.mubr.msk.f32.mxu0 %vm1854_vm3, %v6824_v48  ;;  %15827 = vmatprep.subr.mxu1 %v13538_v51  ;;  %v3813_v48 = vld [vmem:[#allocation3 + $0x120] sm:$0xff] }
 0x26b   : > { %15828 = vmatpush3.msra.mxu1 %v13538_v51  ;;  %16250 = vmatpush3.msra.mxu0 %v13817_v36  ;;  %v6833_v36 = vld [vmem:[#allocation3 + $0x163] sm:$0xff] }
 0x26c   : > { %15805 = vmatmul.mubr.msk.f32.gmra.mxu1 %vm1854_vm3, %v17793_v49  ;;  %16201 = vmatmul.mubr.msk.f32.gmra.mxu0 %vm1854_vm3, %v6825_v40  ;;  %v3811_v51 = vld [vmem:[#allocation3 + $0x100] sm:$0xff]  ;;  %v13858_v40 = vld [vmem:[%s22693_s3 + $0x218] sm:$0xff] }
 0x26d   : > { %15807 = vmatprep.mubr.msk.f32.mxu1 %vm1854_vm3, %v17813_v25  ;;  %16203 = vmatprep.mubr.msk.f32.mxu0 %vm1854_vm3, %v18121_v17 }
 0x26e   : > { %15829 = vmatprep.subr.mxu1 %v13537_v2  ;;  %16305 = vmatprep.subr.msk.mxu0 %vm2758_vm2, %v13859_v58 }
 0x26f   : > { %15830 = vmatpush3.msra.mxu1 %v13537_v2  ;;  %v7288_v2 = vld [vmem:[#allocation3 + $0x90] sm:$0xff] }
 0x270   : > { %15808 = vmatmul.mubr.msk.f32.gmra.mxu1 %vm1854_vm3, %v17819_v30  ;;  %16204 = vmatmul.mubr.msk.f32.gmra.mxu0 %vm1854_vm3, %v18126_v24 }
 0x271   : > { %15810 = vmatprep.mubr.msk.f32.mxu1 %vm1854_vm3, %v17831_v46  ;;  %16206 = vmatprep.mubr.msk.f32.mxu0 %vm1854_vm3, %v18134_v39 }
 0x272   : > { %15855 = vmatprep.subr.msk.mxu1 %vm2758_vm2, %v13559_v5 }
 0x274   : > { %15811 = vmatmul.mubr.msk.f32.gmra.mxu1 %vm1854_vm3, %v3807_v45  ;;  %16207 = vmatmul.mubr.msk.f32.gmra.mxu0 %vm1854_vm3, %v18142_v21 }
 0x275   : > { %15813 = vmatprep.mubr.msk.f32.mxu1 %vm1854_vm3, %v17841_v62  ;;  %16209 = vmatprep.mubr.msk.f32.mxu0 %vm1854_vm3, %v18154_v3  ;;  %v3812_v62 = vld [vmem:[#allocation3 + $0x110] sm:$0xff] }
 0x278   : > { %15814 = vmatmul.mubr.msk.f32.gmra.mxu1 %vm1854_vm3, %v3809_v12  ;;  %16210 = vmatmul.mubr.msk.f32.gmra.mxu0 %vm1854_vm3, %v18309_v59  ;;  %v13557_v12 = vld [vmem:[%s22693_s3 + $0xa8] sm:$0xff] }
 0x279   : > { %15816 = vmatprep.mubr.msk.f32.mxu1 %vm1854_vm3, %v3810_v56  ;;  %16212 = vmatprep.mubr.msk.f32.mxu0 %vm1854_vm3, %v6832_v52  ;;  %v7290_v52 = vld [vmem:[#allocation3 + $0xb0] sm:$0xff] }
 0x27c   : > { %15817 = vmatmul.mubr.msk.f32.gmra.mxu1 %vm1854_vm3, %v3811_v51  ;;  %16213 = vmatmul.mubr.msk.f32.gmra.mxu0 %vm1854_vm3, %v6833_v36 }
 0x27d   : > { %15819 = vmatprep.mubr.msk.f32.mxu1 %vm1854_vm3, %v3812_v62  ;;  %16251 = vmatprep.mubr.msk.f32.mxu0 %vm1854_vm3, %v17793_v49  ;;  %v4032_v49 = vld [vmem:[#allocation3 + $0x11] sm:$0xff] }
 0x280   : > { %15820 = vmatmul.mubr.msk.f32.gmra.mxu1 %vm1854_vm3, %v3813_v48  ;;  %16252 = vmatmul.mubr.msk.f32.vlgmr.msra.gmra.mxu0 %vm1854_vm3, %v17813_v25  ;;  %v13857_v25 = vld [vmem:[%s22693_s3 + $0x210] sm:$0xff] }
 0x281   : > { %15822 = vmatprep.mubr.msk.f32.mxu1 %vm1854_vm3, %v17757_v38  ;;  %16254 = vmatprep.mubr.msk.f32.mxu0 %vm1854_vm3, %v17819_v30  ;;  %v18341_v38 = vpop.f32.mrf.mxu1  ;;  %v18343_v30 = vld [vmem:[#allocation3 + $0x21] sm:$0xff] }
 0x282   : > { %16306 = vmatpush3.msk.msra.mxu0 %vm2758_vm2, %v13859_v58  ;;  %v13558_v58 = vld [vmem:[%s22693_s3 + $0xb0] sm:$0xff] }
 0x283   : > { %16307 = vmatprep.subr.mxu0 %v13858_v40 }
 0x284   : > { %15823 = vmatmul.mubr.msk.f32.gmra.mxu1 %vm1854_vm3, %v17815_v26  ;;  %16255 = vmatmul.mubr.msk.f32.gmra.mxu0 %vm1854_vm3, %v17831_v46  ;;  %v7289_v46 = vld [vmem:[#allocation3 + $0xa0] sm:$0xff] }
 0x285   : > { %15831 = vmatprep.mubr.msk.f32.mxu1 %vm1854_vm3, %v4032_v49  ;;  %16257 = vmatprep.mubr.msk.f32.mxu0 %vm1854_vm3, %v3807_v45  ;;  %v18354_v45 = vpop.f32.mrf.mxu1  ;;  %v18420_v49 = vld [vmem:[#allocation3 + $0x121] sm:$0xff] }
 0x286   : > { %16308 = vmatpush3.msra.mxu0 %v13858_v40  ;;  %v18410_v40 = vld [vmem:[#allocation3 + $0x111] sm:$0xff]  ;;  %22731 = vst [vmem:[#allocation20_spill] sm:$0xff] %v18420_v49 }
 0x287   : > { %16309 = vmatprep.subr.mxu0 %v13857_v25  ;;  %v18363_v56 = vpop.f32.mrf.mxu1 }
 0x288   : > { %15832 = vmatmul.mubr.msk.f32.vlgmr.msra.gmra.mxu1 %vm1854_vm3, %v18343_v30  ;;  %16258 = vmatmul.mubr.msk.f32.gmra.mxu0 %vm1854_vm3, %v7288_v2 }
 0x289   : > { %15856 = vmatpush3.msk.msra.mxu1 %vm2758_vm2, %v13559_v5  ;;  %15834 = vmatprep.mubr.msk.f32.mxu1 %vm1854_vm3, %v18128_v29  ;;  %v13899_v5 = vld [vmem:[%s22693_s3 + $0x250] sm:$0xf]  ;;  %v18375_v36 = vpop.f32.mrf.mxu1 }
 0x28a   : > { %16260 = vmatprep.mubr.msk.f32.mxu0 %vm1854_vm3, %v7289_v46  ;;  %15857 = vmatprep.subr.mxu1 %v13558_v58  ;;  %v13579_v29 = vld [vmem:[%s22693_s3 + $0xd0] sm:$0xf] }
 0x28b   : > { %15858 = vmatpush3.msra.mxu1 %v13558_v58  ;;  %16310 = vmatpush3.msra.mxu0 %v13857_v25  ;;  %v13898_v25 = vld [vmem:[%s22693_s3 + $0x248] sm:$0xff] }
 0x28c   : > { %15835 = vmatmul.mubr.msk.f32.gmra.mxu1 %vm1854_vm3, %v18136_v27  ;;  %16261 = vmatmul.mubr.msk.f32.gmra.mxu0 %vm1854_vm3, %v7290_v52  ;;  %v7294_v27 = vld [vmem:[#allocation3 + $0x130] sm:$0xff]  ;;  %v13897_v52 = vld [vmem:[%s22693_s3 + $0x240] sm:$0xff] }
 0x28d   : > { %15837 = vmatprep.mubr.msk.f32.mxu1 %vm1854_vm3, %v18144_v9  ;;  %16263 = vmatprep.mubr.msk.f32.mxu0 %vm1854_vm3, %v3811_v51  ;;  %v18383_v9 = vpop.f32.mrf.mxu1  ;;  %v4040_v51 = vld [vmem:[#allocation3 + $0xd1] sm:$0xff] }
 0x28e   : > { %15859 = vmatprep.subr.mxu1 %v13557_v12  ;;  %16365 = vmatprep.subr.msk.mxu0 %vm2758_vm2, %v13899_v5 }
 0x28f   : > { %15860 = vmatpush3.msra.mxu1 %v13557_v12 }
 0x290   : > { %15838 = vmatmul.mubr.msk.f32.gmra.mxu1 %vm1854_vm3, %v18156_v35  ;;  %16264 = vmatmul.mubr.msk.f32.gmra.mxu0 %vm1854_vm3, %v3812_v62  ;;  %v18392_v35 = vpop.f32.mrf.mxu1  ;;  %v18394_v62 = vld [vmem:[#allocation3 + $0xe1] sm:$0xff] }
 0x291   : > { %15840 = vmatprep.mubr.msk.f32.mxu1 %vm1854_vm3, %v18162_v57  ;;  %16266 = vmatprep.mubr.msk.f32.mxu0 %vm1854_vm3, %v3813_v48  ;;  %v7297_v57 = vld [vmem:[#allocation3 + $0x160] sm:$0xff] }
 0x292   : > { %15885 = vmatprep.subr.msk.mxu1 %vm2758_vm2, %v13579_v29  ;;  %v18396_v48 = vpop.f32.mrf.mxu1 }
 0x294   : > { %15841 = vmatmul.mubr.msk.f32.gmra.mxu1 %vm1854_vm3, %v18172_v63  ;;  %16267 = vmatmul.mubr.msk.f32.gmra.mxu0 %vm1854_vm3, %v7294_v27  ;;  %v7298_v63 = vld [vmem:[#allocation3 + $0x170] sm:$0xff] }
 0x295   : > { %15843 = vmatprep.mubr.msk.f32.mxu1 %vm1854_vm3, %v4040_v51  ;;  %16269 = vmatprep.mubr.msk.f32.mxu0 %vm1854_vm3, %v17815_v26  ;;  %v18405_v26 = vpop.f32.mrf.mxu1 }
 0x298   : > { %15844 = vmatmul.mubr.msk.f32.gmra.mxu1 %vm1854_vm3, %v18394_v62  ;;  %16270 = vmatmul.mubr.msk.f32.gmra.mxu0 %vm1854_vm3, %v17854_v18  ;;  %v18416_v18 = vpop.f32.mrf.mxu0 }
 0x299   : > { %15846 = vmatprep.mubr.msk.f32.mxu1 %vm1854_vm3, %v18194_v16  ;;  %16272 = vmatprep.mubr.msk.f32.mxu0 %vm1854_vm3, %v7297_v57  ;;  %v18418_v16 = vpop.f32.mrf.mxu1 }
 0x29a   : > { %v18435_v2 = vpop.f32.mrf.mxu0 }
 0x29b   : > { %v18437_v58 = vpop.f32.mrf.mxu1 }
 0x29c   : > { %15847 = vmatmul.mubr.msk.f32.gmra.mxu1 %vm1854_vm3, %v18201_v15  ;;  %16273 = vmatmul.mubr.msk.f32.gmra.mxu0 %vm1854_vm3, %v7298_v63  ;;  %v18426_v15 = vld [vmem:[#allocation3 + $0x131] sm:$0xff]  ;;  %v18453_v12 = vpop.f32.mrf.mxu0 }
 0x29d   : > { %15849 = vmatprep.mubr.msk.f32.mxu1 %vm1854_vm3, %v18410_v40  ;;  %16311 = vmatprep.mubr.msk.f32.mxu0 %vm1854_vm3, %v17876_v23  ;;  %22732 = vst [vmem:[#allocation21_spill] sm:$0xff] %v18426_v15  ;;  %v7754_v63 = vld [vmem:[#allocation3 + $0xb2] sm:$0xff] }
 0x29e   : > { %v18469_v51 = vpop.f32.mrf.mxu0 }
 0x2a0   : > { %15850 = vmatmul.mubr.msk.f32.gmra.mxu1 %vm1854_vm3, %v18420_v49  ;;  %16312 = vmatmul.mubr.msk.f32.vlgmr.msra.gmra.mxu0 %vm1854_vm3, %v17888_v31 }
 0x2a1   : > { %15852 = vmatprep.mubr.msk.f32.mxu1 %vm1854_vm3, %v18426_v15  ;;  %16314 = vmatprep.mubr.msk.f32.mxu0 %vm1854_vm3, %v17890_v32 }
 0x2a2   : > { %16366 = vmatpush3.msk.msra.mxu0 %vm2758_vm2, %v13899_v5 }
 0x2a3   : > { %16367 = vmatprep.subr.mxu0 %v13898_v25 }
 0x2a4   : > { %v18440_v46 = vpop.f32.mrf.mxu1  ;;  %15853 = vmatmul.mubr.msk.f32.gmra.mxu1 %vm1854_vm3, %v18222_v28  ;;  %16315 = vmatmul.mubr.msk.f32.gmra.mxu0 %vm1854_vm3, %v17906_v43  ;;  %v13578_v28 = vld [vmem:[%s22693_s3 + $0xc8] sm:$0xff] }
 0x2a5   : > { %15861 = vmatprep.mubr.msk.f32.mxu1 %vm1854_vm3, %v17904_v41  ;;  %16317 = vmatprep.mubr.msk.f32.mxu0 %vm1854_vm3, %v17919_v42  ;;  %v7753_v41 = vld [vmem:[#allocation3 + $0xa2] sm:$0xff] }
 0x2a6   : > { %v18455_v5 = vpop.f32.mrf.mxu1  ;;  %16368 = vmatpush3.msra.mxu0 %v13898_v25  ;;  %v13599_v25 = vld [vmem:[%s22693_s3 + $0xe8] sm:$0xf] }
 0x2a7   : > { %16369 = vmatprep.subr.mxu0 %v13897_v52 }
 0x2a8   : > { %v18460_v27 = vpop.f32.mrf.mxu1  ;;  %15862 = vmatmul.mubr.msk.f32.vlgmr.msra.gmra.mxu1 %vm1854_vm3, %v17860_v19  ;;  %16318 = vmatmul.mubr.msk.f32.gmra.mxu0 %vm1854_vm3, %v17924_v54  ;;  %v13577_v19 = vld [vmem:[%s22693_s3 + $0xc0] sm:$0xff] }
 0x2a9   : > { %15886 = vmatpush3.msk.msra.mxu1 %vm2758_vm2, %v13579_v29  ;;  %15864 = vmatprep.mubr.msk.f32.mxu1 %vm1854_vm3, %v17870_v61  ;;  %v18486_v61 = vpop.f32.mrf.mxu0 }
 0x2aa   : > { %16320 = vmatprep.mubr.msk.f32.mxu0 %vm1854_vm3, %v7753_v41  ;;  %v18472_v57 = vpop.f32.mrf.mxu1  ;;  %15887 = vmatprep.subr.mxu1 %v13578_v28  ;;  %22733 = vst [vmem:[#allocation22_spill] sm:$0xff] %v18486_v61  ;;  %v7761_v41 = vld [vmem:[#allocation3 + $0x162] sm:$0xff] }
 0x2ab   : > { %15888 = vmatpush3.msra.mxu1 %v13578_v28  ;;  %16370 = vmatpush3.msra.mxu0 %v13897_v52 }
 0x2ac   : > { %v18477_v54 = vpop.f32.mrf.mxu1  ;;  %15865 = vmatmul.mubr.msk.f32.gmra.mxu1 %vm1854_vm3, %v17876_v23  ;;  %16321 = vmatmul.mubr.msk.f32.gmra.mxu0 %vm1854_vm3, %v7754_v63  ;;  %v18503_v23 = vpop.f32.mrf.mxu0 }
 0x2ad   : > { %15867 = vmatprep.mubr.msk.f32.mxu1 %vm1854_vm3, %v17888_v31  ;;  %16323 = vmatprep.mubr.msk.f32.mxu0 %vm1854_vm3, %v17952_v1  ;;  %22734 = vst [vmem:[#allocation23_spill] sm:$0xff] %v18503_v23  ;;  %v22738_v23 = vld [vmem:[#allocation10_spill] sm:$0xff] }
 0x2ae   : > { %v18488_v29 = vpop.f32.mrf.mxu1  ;;  %15889 = vmatprep.subr.mxu1 %v13577_v19 }
 0x2af   : > { %15890 = vmatpush3.msra.mxu1 %v13577_v19  ;;  %v22736_v19 = vld [vmem:[#allocation9_spill] sm:$0xff] }
 0x2b0   : > { %v18493_v52 = vpop.f32.mrf.mxu1  ;;  %15868 = vmatmul.mubr.msk.f32.gmra.mxu1 %vm1854_vm3, %v17890_v32  ;;  %16324 = vmatmul.mubr.msk.f32.gmra.mxu0 %vm1854_vm3, %v17961_v4  ;;  %v18518_v32 = vpop.f32.mrf.mxu0 }
 0x2b1   : > { %15870 = vmatprep.mubr.msk.f32.mxu1 %vm1854_vm3, %v17906_v43  ;;  %16326 = vmatprep.mubr.msk.f32.mxu0 %vm1854_vm3, %v17967_v8  ;;  %22735 = vst [vmem:[#allocation24_spill] sm:$0xff] %v18518_v32 }
 0x2b2   : > { %v18505_v31 = vpop.f32.mrf.mxu1  ;;  %15915 = vmatprep.subr.msk.mxu1 %vm2758_vm2, %v13599_v25  ;;  %v18531_v61 = vpop.f32.mrf.mxu0 }
 0x2b3   : > { %22739 = vst [vmem:[#allocation9_spill] sm:$0xff] %v18531_v61 }
 0x2b4   : > { %v18508_v28 = vpop.f32.mrf.mxu1  ;;  %15871 = vmatmul.mubr.msk.f32.gmra.mxu1 %vm1854_vm3, %v17919_v42  ;;  %16327 = vmatmul.mubr.msk.f32.gmra.mxu0 %vm1854_vm3, %v17977_v14  ;;  %v22737_v42 = vld [vmem:[#allocation11_spill] sm:$0xff]  ;;  %v18535_v15 = vpop.f32.mrf.mxu0 }
 0x2b5   : > { %15873 = vmatprep.mubr.msk.f32.mxu1 %vm1854_vm3, %v17975_v11  ;;  %16329 = vmatprep.mubr.msk.f32.mxu0 %vm1854_vm3, %v17972_v10  ;;  %v7762_v11 = vld [vmem:[#allocation3 + $0x172] sm:$0xff] }
 0x2b6   : > { %v18520_v43 = vpop.f32.mrf.mxu1 }
 0x2b8   : > { %v18522_v63 = vpop.f32.mrf.mxu1  ;;  %15874 = vmatmul.mubr.msk.f32.gmra.mxu1 %vm1854_vm3, %v22736_v19  ;;  %16330 = vmatmul.mubr.msk.f32.gmra.mxu0 %vm1854_vm3, %v22737_v42  ;;  %v18549_v19 = vpop.f32.mrf.mxu0 }
 0x2b9   : > { %15876 = vmatprep.mubr.msk.f32.mxu1 %vm1854_vm3, %v22738_v23  ;;  %16332 = vmatprep.mubr.msk.f32.mxu0 %vm1854_vm3, %v7761_v41  ;;  %22740 = vst [vmem:[#allocation11_spill] sm:$0xff] %v18549_v19  ;;  %v19022_v19 = vld [vmem:[#allocation3 + $0x73] sm:$0xff] }
 0x2ba   : > { %v18533_v32 = vpop.f32.mrf.mxu1 }
 0x2bc   : > { %v18537_v49 = vpop.f32.mrf.mxu1  ;;  %15877 = vmatmul.mubr.msk.f32.gmra.mxu1 %vm1854_vm3, %v17952_v1  ;;  %16333 = vmatmul.mubr.msk.f32.gmra.mxu0 %vm1854_vm3, %v7762_v11 }
 0x2bd   : > { %15879 = vmatprep.mubr.msk.f32.mxu1 %vm1854_vm3, %v17961_v4  ;;  %16371 = vmatprep.mubr.msk.f32.mxu0 %vm1854_vm3, %v18005_v20  ;;  %v18562_v4 = vpop.f32.mrf.mxu0 }
 0x2be   : > { %v3074_v23 = vpop.f32.mrf.mxu1 }
 0x2bf   : > { %v18547_v41 = vadd.f32 %v3074_v23, %v18405_v26 }
 0x2c0   : > { %v15701_v42 = vpop.f32.mrf.mxu1  ;;  %15880 = vmatmul.mubr.msk.f32.gmra.mxu1 %vm1854_vm3, %v17967_v8  ;;  %16372 = vmatmul.mubr.msk.f32.vlgmr.msra.gmra.mxu0 %vm1854_vm3, %v18015_v22  ;;  %v22742_v22 = vld [vmem:[#allocation14_spill] sm:$0xff] }
 0x2c1   : > { %v18556_v1 = vadd.f32 %v15701_v42, %v18418_v16  ;;  %15882 = vmatprep.mubr.msk.f32.mxu1 %vm1854_vm3, %v17977_v14  ;;  %16374 = vmatprep.mubr.msk.f32.mxu0 %vm1854_vm3, %v18021_v37  ;;  %v22741_v14 = vld [vmem:[#allocation12_spill] sm:$0xff]  ;;  %v18578_v37 = vpop.f32.mrf.mxu0  ;;  %v22744_v42 = vld [vmem:[#allocation13_spill] sm:$0xff] }
 0x2c2   : > { %v3084_v20 = vpop.f32.mrf.mxu1  ;;  %22743 = vst [vmem:[#allocation10_spill] sm:$0xff] %v18578_v37  ;;  %v18982_v37 = vld [vmem:[#allocation3 + $0x43] sm:$0xff] }
 0x2c3   : > { %v18565_v26 = vadd.f32 %v3084_v20, %v18437_v58  ;;  %v3030_v58 = vadd.f32 %v18460_v27, %v18416_v18  ;;  %v22745_v20 = vld [vmem:[#allocation15_spill] sm:$0xff] }
 0x2c4   : > { %v15704_v11 = vpop.f32.mrf.mxu1  ;;  %15883 = vmatmul.mubr.msk.f32.gmra.mxu1 %vm1854_vm3, %v17972_v10  ;;  %16375 = vmatmul.mubr.msk.f32.gmra.mxu0 %vm1854_vm3, %v18031_v13  ;;  %v13598_v13 = vld [vmem:[%s22693_s3 + $0xe0] sm:$0xff] }
 0x2c5   : > { %v18572_v8 = vadd.f32 %v15704_v11, %v18440_v46  ;;  %15891 = vmatprep.mubr.msk.f32.mxu1 %vm1854_vm3, %v22741_v14  ;;  %16377 = vmatprep.mubr.msk.f32.mxu0 %vm1854_vm3, %v22742_v22  ;;  %v18588_v46 = vpop.f32.mrf.mxu0  ;;  %v3025_v11 = vadd.f32 %v18472_v57, %v18435_v2  ;;  %v3040_v14 = vadd.f32 %v18477_v54, %v18453_v12  ;;  %v13597_v2 = vld [vmem:[%s22693_s3 + $0xd8] sm:$0xff] }
 0x2c6   : > { %v3094_v16 = vpop.f32.mrf.mxu1 }
 0x2c7   : > { %v18583_v10 = vadd.f32 %v3094_v16, %v18455_v5  ;;  %v8217_v5 = vld [vmem:[#allocation3 + $0xa4] sm:$0xff]  ;;  %v8218_v16 = vld [vmem:[#allocation3 + $0xb4] sm:$0xff]  ;;  %v18609_v57 = vpop.f32.mrf.mxu0 }
 0x2c8   : > { %v15713_v23 = vpop.f32.mrf.mxu1  ;;  %15892 = vmatmul.mubr.msk.f32.vlgmr.msra.gmra.mxu1 %vm1854_vm3, %v22744_v42  ;;  %16378 = vmatmul.mubr.msk.f32.gmra.mxu0 %vm1854_vm3, %v22745_v20  ;;  %22746 = vst [vmem:[#allocation12_spill] sm:$0xff] %v18609_v57  ;;  %v18953_v57 = vld [vmem:[#allocation3 + $0x141] sm:$0xff] }
 0x2c9   : > { %v18596_v18 = vadd.f32 %v15713_v23, %v3030_v58  ;;  %15916 = vmatpush3.msk.msra.mxu1 %vm2758_vm2, %v13599_v25  ;;  %15894 = vmatprep.mubr.msk.f32.mxu1 %vm1854_vm3, %v18049_v34  ;;  %v3035_v34 = vadd.f32 %v18488_v29, %v18469_v51  ;;  %v18622_v54 = vpop.f32.mrf.mxu0  ;;  %v13639_v51 = vld [vmem:[%s22693_s3 + $0x118] sm:$0xf] }
 0x2ca   : > { %16380 = vmatprep.mubr.msk.f32.mxu0 %vm1854_vm3, %v8217_v5  ;;  %v3240_v27 = vpop.f32.mrf.mxu1  ;;  %15917 = vmatprep.subr.mxu1 %v13598_v13 }
 0x2cb   : > { %v18604_v22 = vadd.f32 %v3240_v27, %v3025_v11  ;;  %15918 = vmatpush3.msra.mxu1 %v13598_v13 }
 0x2cc   : > { %v15716_v25 = vpop.f32.mrf.mxu1  ;;  %15895 = vmatmul.mubr.msk.f32.gmra.mxu1 %vm1854_vm3, %v18063_v44  ;;  %16381 = vmatmul.mubr.msk.f32.gmra.mxu0 %vm1854_vm3, %v8218_v16  ;;  %v3050_v44 = vadd.f32 %v18493_v52, %v18341_v38  ;;  %v18643_v38 = vpop.f32.mrf.mxu0 }
 0x2cd   : > { %v18616_v12 = vadd.f32 %v15716_v25, %v3040_v14  ;;  %15897 = vmatprep.mubr.msk.f32.mxu1 %vm1854_vm3, %v18072_v50  ;;  %16383 = vmatprep.mubr.msk.f32.mxu0 %vm1854_vm3, %v18085_v6  ;;  %v3045_v50 = vadd.f32 %v18505_v31, %v18354_v45  ;;  %22747 = vst [vmem:[#allocation14_spill] sm:$0xff] %v18643_v38  ;;  %v22749_v31 = vld [vmem:[#allocation17_spill] sm:$0xff] }
 0x2ce   : > { %v3250_v58 = vpop.f32.mrf.mxu1  ;;  %15919 = vmatprep.subr.mxu1 %v13597_v2  ;;  %v18650_v23 = vpop.f32.mrf.mxu0  ;;  %v18686_v14 = vld [vmem:[#allocation3 + $0x164] sm:$0xff] }
 0x2cf   : > { %v18626_v13 = vadd.f32 %v3250_v58, %v3035_v34  ;;  %15920 = vmatpush3.msra.mxu1 %v13597_v2  ;;  %22748 = vst [vmem:[#allocation13_spill] sm:$0xff] %v18650_v23  ;;  %v4729_v34 = vld [vmem:[#allocation3 + $0x24] sm:$0xff]  ;;  %v18723_v58 = vld [vmem:[#allocation3 + $0x34] sm:$0xff] }
 0x2d0   : > { %v15719_v29 = vpop.f32.mrf.mxu1  ;;  %15898 = vmatmul.mubr.msk.f32.gmra.mxu1 %vm1854_vm3, %v18083_v53  ;;  %16384 = vmatmul.mubr.msk.f32.gmra.mxu0 %vm1854_vm3, %v18094_v60  ;;  %v3060_v53 = vadd.f32 %v18508_v28, %v18363_v56  ;;  %v22750_v56 = vld [vmem:[#allocation16_spill] sm:$0xff]  ;;  %v18664_v28 = vld [vmem:[#allocation3 + $0x154] sm:$0xff] }
 0x2d1   : > { %v18637_v6 = vadd.f32 %v15719_v29, %v3050_v44  ;;  %15900 = vmatprep.mubr.msk.f32.mxu1 %vm1854_vm3, %v18092_v55  ;;  %16386 = vmatprep.mubr.msk.f32.mxu0 %vm1854_vm3, %v18100_v0  ;;  %v3055_v55 = vadd.f32 %v18520_v43, %v18375_v36  ;;  %v22752_v36 = vld [vmem:[#allocation18_spill] sm:$0xff]  ;;  %v3065_v43 = vadd.f32 %v18533_v32, %v18392_v35 }
 0x2d2   : > { %v3260_v52 = vpop.f32.mrf.mxu1  ;;  %15975 = vmatprep.subr.msk.mxu1 %vm2758_vm2, %v13639_v51 }
 0x2d3   : > { %v18648_v60 = vadd.f32 %v3260_v52, %v3045_v50  ;;  %v18739_v50 = vld [vmem:[#allocation3 + $0x44] sm:$0xff]  ;;  %v18748_v52 = vld [vmem:[#allocation3 + $0x54] sm:$0xff] }
 0x2d4   : > { %v15722_v45 = vpop.f32.mrf.mxu1  ;;  %15901 = vmatmul.mubr.msk.f32.gmra.mxu1 %vm1854_vm3, %v18263_v47  ;;  %16387 = vmatmul.mubr.msk.f32.gmra.mxu0 %vm1854_vm3, %v18109_v7  ;;  %v3070_v47 = vadd.f32 %v18522_v63, %v18383_v9  ;;  %v18670_v7 = vpop.f32.mrf.mxu0  ;;  %v3080_v63 = vadd.f32 %v18537_v49, %v18396_v48 }
 0x2d5   : > { %v18658_v0 = vadd.f32 %v15722_v45, %v3060_v53  ;;  %15903 = vmatprep.mubr.msk.f32.mxu1 %vm1854_vm3, %v22749_v31  ;;  %16389 = vmatprep.mubr.msk.f32.mxu0 %vm1854_vm3, %v22750_v56  ;;  %22751 = vst [vmem:[#allocation15_spill] sm:$0xff] %v18670_v7  ;;  %v18762_v31 = vld [vmem:[#allocation3 + $0x64] sm:$0xff] }
 0x2d6   : > { %v3270_v42 = vpop.f32.mrf.mxu1  ;;  %v18926_v7 = vld [vmem:[#allocation3 + $0x101] sm:$0xff] }
 0x2d7   : > { %v18668_v20 = vadd.f32 %v3270_v42, %v3055_v55  ;;  %v18766_v42 = vld [vmem:[#allocation3 + $0x74] sm:$0xff] }
 0x2d8   : > { %v15725_v11 = vpop.f32.mrf.mxu1  ;;  %15904 = vmatmul.mubr.msk.f32.gmra.mxu1 %vm1854_vm3, %v22752_v36  ;;  %16390 = vmatmul.mubr.msk.f32.gmra.mxu0 %vm1854_vm3, %v18664_v28  ;;  %v18778_v36 = vld [vmem:[#allocation3 + $0x84] sm:$0xff] }
 0x2d9   : > { %v18678_v5 = vadd.f32 %v15725_v11, %v3070_v47  ;;  %15906 = vmatprep.mubr.msk.f32.mxu1 %vm1854_vm3, %v18121_v17  ;;  %16392 = vmatprep.mubr.msk.f32.mxu0 %vm1854_vm3, %v18686_v14 }
 0x2da   : > { %v3280_v9 = vpop.f32.mrf.mxu1 }
 0x2db   : > { %v18684_v27 = vadd.f32 %v3280_v9, %v3065_v43 }
 0x2dc   : > { %v15728_v16 = vpop.f32.mrf.mxu1  ;;  %15907 = vmatmul.mubr.msk.f32.gmra.mxu1 %vm1854_vm3, %v18126_v24 }
 0x2dd   : > { %v18692_v35 = vadd.f32 %v15728_v16, %v3080_v63  ;;  %15909 = vmatprep.mubr.msk.f32.mxu1 %vm1854_vm3, %v18134_v39 }
 0x2de   : > { %v3290_v17 = vpop.f32.mrf.mxu1 }
 0x2df   : > { %v18697_v32 = vadd.f32 %v3290_v17, %v18547_v41  ;;  %v22753_v41 = vld [vmem:[#allocation19_spill] sm:$0xff] }
 0x2e0   : > { %v15731_v48 = vpop.f32.mrf.mxu1  ;;  %15910 = vmatmul.mubr.msk.f32.gmra.mxu1 %vm1854_vm3, %v18142_v21 }
 0x2e1   : > { %v18702_v49 = vadd.f32 %v15731_v48, %v18556_v1  ;;  %15912 = vmatprep.mubr.msk.f32.mxu1 %vm1854_vm3, %v18154_v3  ;;  %v13638_v3 = vld [vmem:[%s22693_s3 + $0x110] sm:$0xff] }
 0x2e2   : > { %v3300_v24 = vpop.f32.mrf.mxu1  ;;  %v18793_v48 = vld [vmem:[#allocation3 + $0xf4] sm:$0xff] }
 0x2e3   : > { %v18707_v2 = vadd.f32 %v3300_v24, %v18565_v26 }
 0x2e4   : > { %v15734_v25 = vpop.f32.mrf.mxu1  ;;  %15913 = vmatmul.mubr.msk.f32.gmra.mxu1 %vm1854_vm3, %v18309_v59  ;;  %v18725_v59 = vpop.f32.mrf.mxu0 }
 0x2e5   : > { %v18712_v39 = vadd.f32 %v15734_v25, %v18572_v8  ;;  %15921 = vmatprep.mubr.msk.f32.mxu1 %vm1854_vm3, %v22753_v41  ;;  %22754 = vst [vmem:[#allocation17_spill] sm:$0xff] %v18725_v59  ;;  %v6122_v59 = vld [vmem:[#allocation3 + $0x30] sm:$0xff] }
 0x2e6   : > { %v3310_v21 = vpop.f32.mrf.mxu1  ;;  %v18750_v53 = vpop.f32.mrf.mxu0 }
 0x2e7   : > { %v18717_v1 = vadd.f32 %v3310_v21, %v18583_v10  ;;  %v13637_v10 = vld [vmem:[%s22693_s3 + $0x108] sm:$0xff]  ;;  %22755 = vst [vmem:[#allocation16_spill] sm:$0xff] %v18750_v53  ;;  %v18809_v21 = vld [vmem:[#allocation3 + $0x114] sm:$0xff] }
 0x2e8   : > { %v15743_v26 = vpop.f32.mrf.mxu1  ;;  %15922 = vmatmul.mubr.msk.f32.vlgmr.msra.gmra.mxu1 %vm1854_vm3, %v4729_v34 }
 0x2e9   : > { %v18728_v8 = vadd.f32 %v15743_v26, %v18596_v18  ;;  %15976 = vmatpush3.msk.msra.mxu1 %vm2758_vm2, %v13639_v51  ;;  %15924 = vmatprep.mubr.msk.f32.mxu1 %vm1854_vm3, %v18723_v58  ;;  %v18744_v18 = vld [vmem:[%s22693_s3 + $0x148] sm:$0xf] }
 0x2ea   : > { %v3472_v44 = vpop.f32.mrf.mxu1  ;;  %15977 = vmatprep.subr.mxu1 %v13638_v3  ;;  %v18821_v26 = vld [vmem:[#allocation3 + $0x124] sm:$0xff] }
 0x2eb   : > { %v18737_v29 = vadd.f32 %v3472_v44, %v18604_v22  ;;  %15978 = vmatpush3.msra.mxu1 %v13638_v3  ;;  %v18825_v44 = vld [vmem:[#allocation3 + $0x134] sm:$0xff] }
 0x2ec   : > { %v15746_v51 = vpop.f32.mrf.mxu1  ;;  %15925 = vmatmul.mubr.msk.f32.gmra.mxu1 %vm1854_vm3, %v18739_v50  ;;  %15979 = vmatprep.subr.mxu1 %v13637_v10 }
 0x2ed   : > { %v18753_v22 = vadd.f32 %v15746_v51, %v18616_v12  ;;  %15927 = vmatprep.mubr.msk.f32.mxu1 %vm1854_vm3, %v18748_v52  ;;  %15980 = vmatpush3.msra.mxu1 %v13637_v10  ;;  %v18768_v12 = vpop.f32.mrf.mxu0 }
 0x2ee   : > { %v3482_v45 = vpop.f32.mrf.mxu1  ;;  %16035 = vmatprep.subr.msk.mxu1 %vm2758_vm2, %v18744_v18  ;;  %22756 = vst [vmem:[#allocation18_spill] sm:$0xff] %v18768_v12 }
 0x2ef   : > { %v18760_v55 = vadd.f32 %v3482_v45, %v18626_v13  ;;  %v18782_v9 = vpop.f32.mrf.mxu0 }
 0x2f0   : > { %v15749_v56 = vpop.f32.mrf.mxu1  ;;  %15928 = vmatmul.mubr.msk.f32.gmra.mxu1 %vm1854_vm3, %v18762_v31  ;;  %22757 = vst [vmem:[#allocation19_spill] sm:$0xff] %v18782_v9 }
 0x2f1   : > { %v18771_v47 = vadd.f32 %v15749_v56, %v18637_v6  ;;  %15930 = vmatprep.mubr.msk.f32.mxu1 %vm1854_vm3, %v18766_v42  ;;  %v18795_v24 = vpop.f32.mrf.mxu0  ;;  %v18837_v56 = vld [vmem:[#allocation3 + $0x144] sm:$0xff] }
 0x2f2   : > { %v3492_v11 = vpop.f32.mrf.mxu1  ;;  %22758 = vst [vmem:[#allocation25_spill] sm:$0xff] %v18795_v24 }
 0x2f3   : > { %v18776_v13 = vadd.f32 %v3492_v11, %v18648_v60  ;;  %v4737_v60 = vld [vmem:[#allocation3 + $0xe4] sm:$0xff]  ;;  %v18811_v34 = vpop.f32.mrf.mxu0 }
 0x2f4   : > { %v15752_v43 = vpop.f32.mrf.mxu1  ;;  %15931 = vmatmul.mubr.msk.f32.gmra.mxu1 %vm1854_vm3, %v18778_v36  ;;  %22759 = vst [vmem:[#allocation26_spill] sm:$0xff] %v18811_v34  ;;  %v18899_v34 = vld [vmem:[#allocation3 + $0x81] sm:$0xff] }
 0x2f5   : > { %v18785_v63 = vadd.f32 %v15752_v43, %v18658_v0  ;;  %15933 = vmatprep.mubr.msk.f32.mxu1 %vm1854_vm3, %v18224_v33  ;;  %v18827_v51 = vpop.f32.mrf.mxu0 }
 0x2f6   : > { %v3502_v6 = vpop.f32.mrf.mxu1  ;;  %22760 = vst [vmem:[#allocation27_spill] sm:$0xff] %v18827_v51 }
 0x2f7   : > { %v18790_v16 = vadd.f32 %v3502_v6, %v18668_v20  ;;  %v18805_v20 = vld [vmem:[#allocation3 + $0x104] sm:$0xff]  ;;  %v18841_v43 = vpop.f32.mrf.mxu0 }
 0x2f8   : > { %v15755_v17 = vpop.f32.mrf.mxu1  ;;  %15934 = vmatmul.mubr.msk.f32.gmra.mxu1 %vm1854_vm3, %v4737_v60  ;;  %22761 = vst [vmem:[#allocation28_spill] sm:$0xff] %v18841_v43 }
 0x2f9   : > { %v18798_v25 = vadd.f32 %v15755_v17, %v18678_v5  ;;  %15936 = vmatprep.mubr.msk.f32.mxu1 %vm1854_vm3, %v18793_v48  ;;  %v13678_v17 = vld [vmem:[%s22693_s3 + $0x140] sm:$0xff] }
 0x2fa   : > { %v3512_v0 = vpop.f32.mrf.mxu1 }
 0x2fb   : > { %v18803_v33 = vadd.f32 %v3512_v0, %v18684_v27 }
 0x2fc   : > { %v15758_v41 = vpop.f32.mrf.mxu1  ;;  %15937 = vmatmul.mubr.msk.f32.gmra.mxu1 %vm1854_vm3, %v18805_v20 }
 0x2fd   : > { %v18814_v5 = vadd.f32 %v15758_v41, %v18692_v35  ;;  %15939 = vmatprep.mubr.msk.f32.mxu1 %vm1854_vm3, %v18809_v21  ;;  %v18855_v41 = vld [vmem:[#allocation3 + $0x41] sm:$0xff] }
 0x2fe   : > { %v3522_v3 = vpop.f32.mrf.mxu1 }
 0x2ff   : > { %v18819_v27 = vadd.f32 %v3522_v3, %v18697_v32  ;;  %v18857_v3 = vpop.f32.mrf.mxu0 }
 0x300   : > { %v15761_v10 = vpop.f32.mrf.mxu1  ;;  %15940 = vmatmul.mubr.msk.f32.gmra.mxu1 %vm1854_vm3, %v18821_v26  ;;  %22762 = vst [vmem:[#allocation29_spill] sm:$0xff] %v18857_v3  ;;  %v19052_v3 = vld [vmem:[#allocation3 + $0x103] sm:$0xff] }
 0x301   : > { %v18830_v35 = vadd.f32 %v15761_v10, %v18702_v49  ;;  %15942 = vmatprep.mubr.msk.f32.mxu1 %vm1854_vm3, %v18825_v44 }
 0x302   : > { %v3532_v45 = vpop.f32.mrf.mxu1 }
 0x303   : > { %v18835_v32 = vadd.f32 %v3532_v45, %v18707_v2  ;;  %v5194_v2 = vld [vmem:[#allocation3 + $0x31] sm:$0xff] }
 0x304   : > { %v15764_v11 = vpop.f32.mrf.mxu1  ;;  %15943 = vmatmul.mubr.msk.f32.gmra.mxu1 %vm1854_vm3, %v18837_v56  ;;  %v18872_v45 = vld [vmem:[#allocation3 + $0x51] sm:$0xff] }
 0x305   : > { %v18844_v6 = vadd.f32 %v15764_v11, %v18712_v39  ;;  %15981 = vmatprep.mubr.msk.f32.mxu1 %vm1854_vm3, %v18343_v30  ;;  %v13677_v30 = vld [vmem:[%s22693_s3 + $0x138] sm:$0xff]  ;;  %v18881_v11 = vld [vmem:[#allocation3 + $0x61] sm:$0xff] }
 0x306   : > { %v3542_v49 = vpop.f32.mrf.mxu1 }
 0x307   : > { %v18849_v60 = vadd.f32 %v3542_v49, %v18717_v1  ;;  %v18883_v49 = vpop.f32.mrf.mxu0 }
 0x308   : > { %v15773_v0 = vpop.f32.mrf.mxu1  ;;  %15982 = vmatmul.mubr.msk.f32.vlgmr.msra.gmra.mxu1 %vm1854_vm3, %v5194_v2  ;;  %22763 = vst [vmem:[#allocation30_spill] sm:$0xff] %v18883_v49 }
 0x309   : > { %v18860_v39 = vadd.f32 %v15773_v0, %v18728_v8  ;;  %16036 = vmatpush3.msk.msra.mxu1 %vm2758_vm2, %v18744_v18  ;;  %15984 = vmatprep.mubr.msk.f32.mxu1 %vm1854_vm3, %v18855_v41  ;;  %v18877_v8 = vld [vmem:[%s22693_s3 + $0x178] sm:$0xf] }
 0x30a   : > { %v3704_v1 = vpop.f32.mrf.mxu1  ;;  %16037 = vmatprep.subr.mxu1 %v13678_v17  ;;  %v18895_v0 = vld [vmem:[#allocation3 + $0x71] sm:$0xff] }
 0x30b   : > { %v18870_v10 = vadd.f32 %v3704_v1, %v18737_v29  ;;  %16038 = vmatpush3.msra.mxu1 %v13678_v17 }
 0x30c   : > { %v15776_v18 = vpop.f32.mrf.mxu1  ;;  %15985 = vmatmul.mubr.msk.f32.gmra.mxu1 %vm1854_vm3, %v18872_v45  ;;  %16039 = vmatprep.subr.mxu1 %v13677_v30 }
 0x30d   : > { %v18886_v29 = vadd.f32 %v15776_v18, %v18753_v22  ;;  %15987 = vmatprep.mubr.msk.f32.mxu1 %vm1854_vm3, %v18881_v11  ;;  %16040 = vmatpush3.msra.mxu1 %v13677_v30  ;;  %v18901_v22 = vpop.f32.mrf.mxu0 }
 0x30e   : > { %v3714_v2 = vpop.f32.mrf.mxu1  ;;  %16095 = vmatprep.subr.msk.mxu1 %vm2758_vm2, %v18877_v8  ;;  %22764 = vst [vmem:[#allocation31_spill] sm:$0xff] %v18901_v22 }
 0x30f   : > { %v18893_v17 = vadd.f32 %v3714_v2, %v18760_v55  ;;  %v18911_v2 = vld [vmem:[#allocation3 + $0x91] sm:$0xff]  ;;  %v18915_v61 = vpop.f32.mrf.mxu0 }
 0x310   : > { %v15779_v1 = vpop.f32.mrf.mxu1  ;;  %15988 = vmatmul.mubr.msk.f32.gmra.mxu1 %vm1854_vm3, %v18895_v0  ;;  %22765 = vst [vmem:[#allocation32_spill] sm:$0xff] %v18915_v61 }
 0x311   : > { %v18904_v18 = vadd.f32 %v15779_v1, %v18771_v47  ;;  %15990 = vmatprep.mubr.msk.f32.mxu1 %vm1854_vm3, %v18899_v34  ;;  %v18928_v38 = vpop.f32.mrf.mxu0 }
 0x312   : > { %v3724_v30 = vpop.f32.mrf.mxu1  ;;  %22766 = vst [vmem:[#allocation33_spill] sm:$0xff] %v18928_v38  ;;  %v5665_v38 = vld [vmem:[#allocation3 + $0xe3] sm:$0xff] }
 0x313   : > { %v18909_v55 = vadd.f32 %v3724_v30, %v18776_v13  ;;  %v5202_v13 = vld [vmem:[#allocation3 + $0xf1] sm:$0xff] }
 0x314   : > { %v15782_v9 = vpop.f32.mrf.mxu1  ;;  %15991 = vmatmul.mubr.msk.f32.gmra.mxu1 %vm1854_vm3, %v18911_v2 }
 0x315   : > { %v18918_v53 = vadd.f32 %v15782_v9, %v18785_v63  ;;  %15993 = vmatprep.mubr.msk.f32.mxu1 %vm1854_vm3, %v18394_v62  ;;  %v8226_v63 = vld [vmem:[#allocation3 + $0x174] sm:$0xff] }
 0x316   : > { %v3734_v47 = vpop.f32.mrf.mxu1  ;;  %16393 = vmatmul.mubr.msk.f32.gmra.mxu0 %vm1854_vm3, %v8226_v63 }
 0x317   : > { %v18923_v1 = vadd.f32 %v3734_v47, %v18790_v16  ;;  %v18941_v47 = vpop.f32.mrf.mxu0 }
 0x318   : > { %v15785_v30 = vpop.f32.mrf.mxu1  ;;  %15994 = vmatmul.mubr.msk.f32.gmra.mxu1 %vm1854_vm3, %v5202_v13  ;;  %22767 = vst [vmem:[#allocation34_spill] sm:$0xff] %v18941_v47 }
 0x319   : > { %v18931_v61 = vadd.f32 %v15785_v30, %v18798_v25  ;;  %15996 = vmatprep.mubr.msk.f32.mxu1 %vm1854_vm3, %v18926_v7  ;;  %v22768_v25 = vld [vmem:[#allocation20_spill] sm:$0xff] }
 0x31a   : > { %v3744_v9 = vpop.f32.mrf.mxu1 }
 0x31b   : > { %v18936_v62 = vadd.f32 %v3744_v9, %v18803_v33  ;;  %v22769_v9 = vld [vmem:[#allocation21_spill] sm:$0xff] }
 0x31c   : > { %v15788_v16 = vpop.f32.mrf.mxu1  ;;  %15997 = vmatmul.mubr.msk.f32.gmra.mxu1 %vm1854_vm3, %v18410_v40  ;;  %v18955_v40 = vpop.f32.mrf.mxu0 }
 0x31d   : > { %v18944_v13 = vadd.f32 %v15788_v16, %v18814_v5  ;;  %15999 = vmatprep.mubr.msk.f32.mxu1 %vm1854_vm3, %v22768_v25  ;;  %22770 = vst [vmem:[#allocation20_spill] sm:$0xff] %v18955_v40 }
 0x31e   : > { %v3754_v30 = vpop.f32.mrf.mxu1 }
 0x31f   : > { %v18949_v49 = vadd.f32 %v3754_v30, %v18819_v27  ;;  %v18965_v27 = vld [vmem:[#allocation3 + $0x151] sm:$0xff]  ;;  %v5657_v30 = vld [vmem:[#allocation3 + $0x23] sm:$0xff] }
 0x320   : > { %v15791_v33 = vpop.f32.mrf.mxu1  ;;  %16000 = vmatmul.mubr.msk.f32.gmra.mxu1 %vm1854_vm3, %v22769_v9  ;;  %v18969_v9 = vpop.f32.mrf.mxu0 }
 0x321   : > { %v18958_v63 = vadd.f32 %v15791_v33, %v18830_v35  ;;  %16002 = vmatprep.mubr.msk.f32.mxu1 %vm1854_vm3, %v18953_v57  ;;  %22771 = vst [vmem:[#allocation21_spill] sm:$0xff] %v18969_v9 }
 0x322   : > { %v3764_v5 = vpop.f32.mrf.mxu1  ;;  %v18984_v9 = vpop.f32.mrf.mxu0 }
 0x323   : > { %v18963_v16 = vadd.f32 %v3764_v5, %v18835_v32  ;;  %v5658_v32 = vld [vmem:[#allocation3 + $0x33] sm:$0xff]  ;;  %22772 = vst [vmem:[#allocation35_spill] sm:$0xff] %v18984_v9 }
 0x324   : > { %v15794_v25 = vpop.f32.mrf.mxu1  ;;  %16003 = vmatmul.mubr.msk.f32.gmra.mxu1 %vm1854_vm3, %v18965_v27  ;;  %v13718_v5 = vld [vmem:[%s22693_s3 + $0x170] sm:$0xff] }
 0x325   : > { %v18972_v47 = vadd.f32 %v15794_v25, %v18844_v6  ;;  %16041 = vmatprep.mubr.msk.f32.mxu1 %vm1854_vm3, %v5657_v30 }
 0x326   : > { %v3774_v35 = vpop.f32.mrf.mxu1 }
 0x327   : > { %v18976_v33 = vadd.f32 %v3774_v35, %v18849_v60  ;;  %v13717_v60 = vld [vmem:[%s22693_s3 + $0x168] sm:$0xff]  ;;  %v18999_v35 = vld [vmem:[#allocation3 + $0x53] sm:$0xff] }
 0x328   : > { %v15803_v43 = vpop.f32.mrf.mxu1  ;;  %16042 = vmatmul.mubr.msk.f32.vlgmr.msra.gmra.mxu1 %vm1854_vm3, %v5658_v32  ;;  %v19010_v32 = vpop.f32.mrf.mxu0 }
 0x329   : > { %v18987_v6 = vadd.f32 %v15803_v43, %v18860_v39  ;;  %16096 = vmatpush3.msk.msra.mxu1 %vm2758_vm2, %v18877_v8  ;;  %16044 = vmatprep.mubr.msk.f32.mxu1 %vm1854_vm3, %v18982_v37  ;;  %v19004_v43 = vld [vmem:[%s22693_s3 + $0x1a8] sm:$0xf]  ;;  %22773 = vst [vmem:[#allocation36_spill] sm:$0xff] %v19010_v32 }
 0x32a   : > { %v3937_v25 = vpop.f32.mrf.mxu1  ;;  %16097 = vmatprep.subr.mxu1 %v13718_v5  ;;  %v19008_v8 = vld [vmem:[#allocation3 + $0x63] sm:$0xff] }
 0x32b   : > { %v18997_v30 = vadd.f32 %v3937_v25, %v18870_v10  ;;  %16098 = vmatpush3.msra.mxu1 %v13718_v5  ;;  %v19026_v32 = vld [vmem:[#allocation3 + $0x83] sm:$0xff] }
 0x32c   : > { %v15806_v39 = vpop.f32.mrf.mxu1  ;;  %16045 = vmatmul.mubr.msk.f32.gmra.mxu1 %vm1854_vm3, %v18999_v35  ;;  %16099 = vmatprep.subr.mxu1 %v13717_v60 }
 0x32d   : > { %v19013_v10 = vadd.f32 %v15806_v39, %v18886_v29  ;;  %16047 = vmatprep.mubr.msk.f32.mxu1 %vm1854_vm3, %v19008_v8  ;;  %16100 = vmatpush3.msra.mxu1 %v13717_v60  ;;  %v19028_v29 = vpop.f32.mrf.mxu0 }
 0x32e   : > { %v3947_v5 = vpop.f32.mrf.mxu1  ;;  %16155 = vmatprep.subr.msk.mxu1 %vm2758_vm2, %v19004_v43  ;;  %22774 = vst [vmem:[#allocation37_spill] sm:$0xff] %v19028_v29 }
 0x32f   : > { %v19020_v25 = vadd.f32 %v3947_v5, %v18893_v17  ;;  %v19038_v5 = vld [vmem:[#allocation3 + $0x93] sm:$0xff]  ;;  %v19042_v22 = vpop.f32.mrf.mxu0 }
 0x330   : > { %v15809_v9 = vpop.f32.mrf.mxu1  ;;  %16048 = vmatmul.mubr.msk.f32.gmra.mxu1 %vm1854_vm3, %v19022_v19  ;;  %22775 = vst [vmem:[#allocation38_spill] sm:$0xff] %v19042_v22 }
 0x331   : > { %v19031_v39 = vadd.f32 %v15809_v9, %v18904_v18  ;;  %16050 = vmatprep.mubr.msk.f32.mxu1 %vm1854_vm3, %v19026_v32  ;;  %v19054_v51 = vpop.f32.mrf.mxu0 }
 0x332   : > { %v3957_v60 = vpop.f32.mrf.mxu1  ;;  %22776 = vst [vmem:[#allocation39_spill] sm:$0xff] %v19054_v51  ;;  %v19084_v51 = vld [vmem:[#allocation3 + $0x143] sm:$0xff] }
 0x333   : > { %v19036_v17 = vadd.f32 %v3957_v60, %v18909_v55  ;;  %v5666_v55 = vld [vmem:[#allocation3 + $0xf3] sm:$0xff]  ;;  %22779 = vst [vmem:[#allocation42_spill] sm:$0xff] %v19084_v51 }
 0x334   : > { %v15812_v40 = vpop.f32.mrf.mxu1  ;;  %16051 = vmatmul.mubr.msk.f32.gmra.mxu1 %vm1854_vm3, %v19038_v5 }
 0x335   : > { %v19045_v29 = vadd.f32 %v15812_v40, %v18918_v53  ;;  %16053 = vmatprep.mubr.msk.f32.mxu1 %vm1854_vm3, %v5665_v38 }
 0x336   : > { %v3967_v18 = vpop.f32.mrf.mxu1 }
 0x337   : > { %v19049_v9 = vadd.f32 %v3967_v18, %v18923_v1  ;;  %v19064_v1 = vld [vmem:[#allocation3 + $0x113] sm:$0xff]  ;;  %v19068_v18 = vld [vmem:[#allocation3 + $0x123] sm:$0xff] }
 0x338   : > { %v15815_v60 = vpop.f32.mrf.mxu1  ;;  %16054 = vmatmul.mubr.msk.f32.gmra.mxu1 %vm1854_vm3, %v5666_v55  ;;  %v19070_v55 = vpop.f32.mrf.mxu0 }
 0x339   : > { %v19057_v24 = vadd.f32 %v15815_v60, %v18931_v61  ;;  %16056 = vmatprep.mubr.msk.f32.mxu1 %vm1854_vm3, %v19052_v3  ;;  %22777 = vst [vmem:[#allocation40_spill] sm:$0xff] %v19070_v55 }
 0x33a   : > { %v3977_v53 = vpop.f32.mrf.mxu1  ;;  %v19086_v12 = vpop.f32.mrf.mxu0 }
 0x33b   : > { %v19062_v38 = vadd.f32 %v3977_v53, %v18936_v62  ;;  %v19080_v53 = vld [vmem:[#allocation3 + $0x133] sm:$0xff]  ;;  %22780 = vst [vmem:[#allocation43_spill] sm:$0xff] %v19086_v12 }
 0x33c   : > { %v15818_v40 = vpop.f32.mrf.mxu1  ;;  %16057 = vmatmul.mubr.msk.f32.gmra.mxu1 %vm1854_vm3, %v19064_v1  ;;  %22778 = vst [vmem:[#allocation41_spill] sm:$0xff] %v19080_v53  ;;  %v19100_v23 = vpop.f32.mrf.mxu0 }
 0x33d   : > { %v19073_v61 = vadd.f32 %v15818_v40, %v18944_v13  ;;  %16059 = vmatprep.mubr.msk.f32.mxu1 %vm1854_vm3, %v19068_v18  ;;  %22782 = vst [vmem:[#allocation45_spill] sm:$0xff] %v19100_v23 }
 0x33e   : > { %v3987_v60 = vpop.f32.mrf.mxu1 }
 0x33f   : > { %v19078_v62 = vadd.f32 %v3987_v60, %v18949_v49  ;;  %v19096_v60 = vld [vmem:[#allocation3 + $0x153] sm:$0xff] }
 0x340   : > { %v15821_v22 = vpop.f32.mrf.mxu1  ;;  %16060 = vmatmul.mubr.msk.f32.gmra.mxu1 %vm1854_vm3, %v19080_v53  ;;  %22781 = vst [vmem:[#allocation44_spill] sm:$0xff] %v19096_v60  ;;  %v19113_v53 = vpop.f32.mrf.mxu0 }
 0x341   : > { %v19089_v13 = vadd.f32 %v15821_v22, %v18958_v63  ;;  %16062 = vmatprep.mubr.msk.f32.mxu1 %vm1854_vm3, %v19084_v51  ;;  %22783 = vst [vmem:[#allocation46_spill] sm:$0xff] %v19113_v53 }
 0x342   : > { %v3997_v40 = vpop.f32.mrf.mxu1 }
 0x343   : > { %v19094_v49 = vadd.f32 %v3997_v40, %v18963_v16  ;;  %v6123_v16 = vld [vmem:[#allocation3 + $0x40] sm:$0xff] }
 0x344   : > { %v15824_v55 = vpop.f32.mrf.mxu1  ;;  %16063 = vmatmul.mubr.msk.f32.gmra.mxu1 %vm1854_vm3, %v19096_v60  ;;  %v13758_v40 = vld [vmem:[%s22693_s3 + $0x1a0] sm:$0xff]  ;;  %v6124_v60 = vld [vmem:[#allocation3 + $0x50] sm:$0xff] }
 0x345   : > { %v19103_v12 = vadd.f32 %v15824_v55, %v18972_v47  ;;  %16101 = vmatprep.mubr.msk.f32.mxu1 %vm1854_vm3, %v6122_v59  ;;  %v13757_v59 = vld [vmem:[%s22693_s3 + $0x198] sm:$0xff] }
 0x346   : > { %v4007_v22 = vpop.f32.mrf.mxu1 }
 0x347   : > { %v19107_v63 = vadd.f32 %v4007_v22, %v18976_v33  ;;  %v6125_v22 = vld [vmem:[#allocation3 + $0x60] sm:$0xff] }
 0x348   : > { %v15833_v51 = vpop.f32.mrf.mxu1  ;;  %16102 = vmatmul.mubr.msk.f32.vlgmr.msra.gmra.mxu1 %vm1854_vm3, %v6123_v16 }
 0x349   : > { %v19116_v47 = vadd.f32 %v15833_v51, %v18987_v6  ;;  %16156 = vmatpush3.msk.msra.mxu1 %vm2758_vm2, %v19004_v43  ;;  %16104 = vmatprep.mubr.msk.f32.mxu1 %vm1854_vm3, %v6124_v60  ;;  %v19130_v51 = vld [vmem:[%s22693_s3 + $0x1d8] sm:$0xf]  ;;  %v6126_v43 = vld [vmem:[#allocation3 + $0x70] sm:$0xff]  ;;  %v19133_v60 = vpop.f32.mrf.mxu0 }
 0x34a   : > { %v4169_v33 = vpop.f32.mrf.mxu1  ;;  %16157 = vmatprep.subr.mxu1 %v13758_v40  ;;  %22784 = vst [vmem:[#allocation47_spill] sm:$0xff] %v19133_v60 }
 0x34b   : > { %v19125_v55 = vadd.f32 %v4169_v33, %v18997_v30  ;;  %16158 = vmatpush3.msra.mxu1 %v13758_v40  ;;  %v6127_v33 = vld [vmem:[#allocation3 + $0x80] sm:$0xff]  ;;  %v19145_v53 = vpop.f32.mrf.mxu0 }
 0x34c   : > { %v15836_v6 = vpop.f32.mrf.mxu1  ;;  %16105 = vmatmul.mubr.msk.f32.gmra.mxu1 %vm1854_vm3, %v6125_v22  ;;  %16159 = vmatprep.subr.mxu1 %v13757_v59  ;;  %v6128_v22 = vld [vmem:[#allocation3 + $0x90] sm:$0xff]  ;;  %22785 = vst [vmem:[#allocation48_spill] sm:$0xff] %v19145_v53 }
 0x34d   : > { %v19136_v16 = vadd.f32 %v15836_v6, %v19013_v10  ;;  %16107 = vmatprep.mubr.msk.f32.mxu1 %vm1854_vm3, %v6126_v43  ;;  %16160 = vmatpush3.msra.mxu1 %v13757_v59  ;;  %v6129_v43 = vld [vmem:[#allocation3 + $0xa0] sm:$0xff] }
 0x34e   : > { %v4179_v30 = vpop.f32.mrf.mxu1  ;;  %16215 = vmatprep.subr.msk.mxu1 %vm2758_vm2, %v19130_v51 }
 0x34f   : > { %v19142_v40 = vadd.f32 %v4179_v30, %v19020_v25  ;;  %v6130_v25 = vld [vmem:[#allocation3 + $0xf0] sm:$0xff]  ;;  %v19155_v30 = vpop.f32.mrf.mxu0 }
 0x350   : > { %v15839_v23 = vpop.f32.mrf.mxu1  ;;  %16108 = vmatmul.mubr.msk.f32.gmra.mxu1 %vm1854_vm3, %v6127_v33  ;;  %22786 = vst [vmem:[#allocation49_spill] sm:$0xff] %v19155_v30 }
 0x351   : > { %v19148_v10 = vadd.f32 %v15839_v23, %v19031_v39  ;;  %16110 = vmatprep.mubr.msk.f32.mxu1 %vm1854_vm3, %v6128_v22  ;;  %v6131_v22 = vld [vmem:[#allocation3 + $0x100] sm:$0xff] }
 0x352   : > { %v4189_v59 = vpop.f32.mrf.mxu1 }
 0x353   : > { %v19152_v6 = vadd.f32 %v4189_v59, %v19036_v17  ;;  %v6132_v17 = vld [vmem:[#allocation3 + $0x110] sm:$0xff]  ;;  %v19165_v59 = vpop.f32.mrf.mxu0 }
 0x354   : > { %v15842_v60 = vpop.f32.mrf.mxu1  ;;  %16111 = vmatmul.mubr.msk.f32.gmra.mxu1 %vm1854_vm3, %v6129_v43  ;;  %22787 = vst [vmem:[#allocation50_spill] sm:$0xff] %v19165_v59 }
 0x355   : > { %v19158_v33 = vadd.f32 %v15842_v60, %v19045_v29  ;;  %16113 = vmatprep.mubr.msk.f32.mxu1 %vm1854_vm3, %v6130_v25  ;;  %v6133_v25 = vld [vmem:[#allocation3 + $0x120] sm:$0xff] }
 0x356   : > { %v4199_v23 = vpop.f32.mrf.mxu1 }
 0x357   : > { %v19162_v39 = vadd.f32 %v4199_v23, %v19049_v9  ;;  %v6134_v9 = vld [vmem:[#allocation3 + $0x130] sm:$0xff]  ;;  %v19175_v23 = vpop.f32.mrf.mxu0 }
 0x358   : > { %v15845_v53 = vpop.f32.mrf.mxu1  ;;  %16114 = vmatmul.mubr.msk.f32.gmra.mxu1 %vm1854_vm3, %v6131_v22  ;;  %22788 = vst [vmem:[#allocation51_spill] sm:$0xff] %v19175_v23 }
 0x359   : > { %v19168_v43 = vadd.f32 %v15845_v53, %v19057_v24  ;;  %16116 = vmatprep.mubr.msk.f32.mxu1 %vm1854_vm3, %v6132_v17  ;;  %v6135_v17 = vld [vmem:[#allocation3 + $0x140] sm:$0xff] }
 0x35a   : > { %v4209_v29 = vpop.f32.mrf.mxu1 }
 0x35b   : > { %v19172_v60 = vadd.f32 %v4209_v29, %v19062_v38  ;;  %v6136_v38 = vld [vmem:[#allocation3 + $0x150] sm:$0xff]  ;;  %v19185_v29 = vpop.f32.mrf.mxu0 }
 0x35c   : > { %v15848_v30 = vpop.f32.mrf.mxu1  ;;  %16117 = vmatmul.mubr.msk.f32.gmra.mxu1 %vm1854_vm3, %v6133_v25  ;;  %22789 = vst [vmem:[#allocation52_spill] sm:$0xff] %v19185_v29 }
 0x35d   : > { %v19178_v22 = vadd.f32 %v15848_v30, %v19073_v61  ;;  %16119 = vmatprep.mubr.msk.f32.mxu1 %vm1854_vm3, %v6134_v9  ;;  %v6137_v9 = vld [vmem:[#allocation3 + $0x160] sm:$0xff] }
 0x35e   : > { %v4219_v24 = vpop.f32.mrf.mxu1 }
 0x35f   : > { %v19182_v53 = vadd.f32 %v4219_v24, %v19078_v62  ;;  %v6586_v62 = vld [vmem:[#allocation3 + $0x32] sm:$0xff]  ;;  %v19195_v24 = vpop.f32.mrf.mxu0 }
 0x360   : > { %v15851_v59 = vpop.f32.mrf.mxu1  ;;  %16120 = vmatmul.mubr.msk.f32.gmra.mxu1 %vm1854_vm3, %v6135_v17  ;;  %22790 = vst [vmem:[#allocation53_spill] sm:$0xff] %v19195_v24 }
 0x361   : > { %v19188_v25 = vadd.f32 %v15851_v59, %v19089_v13  ;;  %16122 = vmatprep.mubr.msk.f32.mxu1 %vm1854_vm3, %v6136_v38  ;;  %v6587_v38 = vld [vmem:[#allocation3 + $0x42] sm:$0xff]  ;;  %v19208_v29 = vpop.f32.mrf.mxu0 }
 0x362   : > { %v4229_v61 = vpop.f32.mrf.mxu1  ;;  %22791 = vst [vmem:[#allocation54_spill] sm:$0xff] %v19208_v29 }
 0x363   : > { %v19192_v30 = vadd.f32 %v4229_v61, %v19094_v49  ;;  %v13798_v49 = vld [vmem:[%s22693_s3 + $0x1d0] sm:$0xff] }
 0x364   : > { %v15854_v23 = vpop.f32.mrf.mxu1  ;;  %16123 = vmatmul.mubr.msk.f32.gmra.mxu1 %vm1854_vm3, %v6137_v9  ;;  %v6588_v9 = vld [vmem:[#allocation3 + $0x52] sm:$0xff] }
 0x365   : > { %v19198_v17 = vadd.f32 %v15854_v23, %v19103_v12  ;;  %16161 = vmatprep.mubr.msk.f32.mxu1 %vm1854_vm3, %v6586_v62 }
 0x366   : > { %v4239_v13 = vpop.f32.mrf.mxu1 }
 0x367   : > { %v19202_v59 = vadd.f32 %v4239_v13, %v19107_v63  ;;  %v13797_v63 = vld [vmem:[%s22693_s3 + $0x1c8] sm:$0xff] }
 0x368   : > { %v15863_v61 = vpop.f32.mrf.mxu1  ;;  %16162 = vmatmul.mubr.msk.f32.vlgmr.msra.gmra.mxu1 %vm1854_vm3, %v6587_v38  ;;  %v6589_v13 = vld [vmem:[#allocation3 + $0x62] sm:$0xff] }
 0x369   : > { %v19211_v12 = vadd.f32 %v15863_v61, %v19116_v47  ;;  %16216 = vmatpush3.msk.msra.mxu1 %vm2758_vm2, %v19130_v51  ;;  %16164 = vmatprep.mubr.msk.f32.mxu1 %vm1854_vm3, %v6588_v9  ;;  %v19225_v47 = vld [vmem:[%s22693_s3 + $0x208] sm:$0xf]  ;;  %v6590_v51 = vld [vmem:[#allocation3 + $0x72] sm:$0xff]  ;;  %v19228_v61 = vpop.f32.mrf.mxu0 }
 0x36a   : > { %v4401_v23 = vpop.f32.mrf.mxu1  ;;  %16217 = vmatprep.subr.mxu1 %v13798_v49  ;;  %22792 = vst [vmem:[#allocation55_spill] sm:$0xff] %v19228_v61 }
 0x36b   : > { %v19220_v62 = vadd.f32 %v4401_v23, %v19125_v55  ;;  %16218 = vmatpush3.msra.mxu1 %v13798_v49  ;;  %v6591_v23 = vld [vmem:[#allocation3 + $0x82] sm:$0xff]  ;;  %v19240_v29 = vpop.f32.mrf.mxu0 }
 0x36c   : > { %v15866_v38 = vpop.f32.mrf.mxu1  ;;  %16165 = vmatmul.mubr.msk.f32.gmra.mxu1 %vm1854_vm3, %v6589_v13  ;;  %16219 = vmatprep.subr.mxu1 %v13797_v63  ;;  %v6592_v13 = vld [vmem:[#allocation3 + $0x92] sm:$0xff]  ;;  %22793 = vst [vmem:[#allocation56_spill] sm:$0xff] %v19240_v29 }
 0x36d   : > { %v19231_v9 = vadd.f32 %v15866_v38, %v19136_v16  ;;  %16167 = vmatprep.mubr.msk.f32.mxu1 %vm1854_vm3, %v6590_v51  ;;  %16220 = vmatpush3.msra.mxu1 %v13797_v63  ;;  %v6593_v51 = vld [vmem:[#allocation3 + $0xa2] sm:$0xff] }
 0x36e   : > { %v4411_v55 = vpop.f32.mrf.mxu1  ;;  %16275 = vmatprep.subr.msk.mxu1 %vm2758_vm2, %v19225_v47 }
 0x36f   : > { %v19237_v49 = vadd.f32 %v4411_v55, %v19142_v40  ;;  %v6594_v40 = vld [vmem:[#allocation3 + $0xf2] sm:$0xff]  ;;  %v19250_v55 = vpop.f32.mrf.mxu0 }
 0x370   : > { %v15869_v24 = vpop.f32.mrf.mxu1  ;;  %16168 = vmatmul.mubr.msk.f32.gmra.mxu1 %vm1854_vm3, %v6591_v23  ;;  %22794 = vst [vmem:[#allocation57_spill] sm:$0xff] %v19250_v55 }
 0x371   : > { %v19243_v16 = vadd.f32 %v15869_v24, %v19148_v10  ;;  %16170 = vmatprep.mubr.msk.f32.mxu1 %vm1854_vm3, %v6592_v13  ;;  %v6595_v13 = vld [vmem:[#allocation3 + $0x102] sm:$0xff] }
 0x372   : > { %v4421_v63 = vpop.f32.mrf.mxu1 }
 0x373   : > { %v19247_v38 = vadd.f32 %v4421_v63, %v19152_v6  ;;  %v6596_v6 = vld [vmem:[#allocation3 + $0x112] sm:$0xff]  ;;  %v19260_v63 = vpop.f32.mrf.mxu0 }
 0x374   : > { %v15872_v61 = vpop.f32.mrf.mxu1  ;;  %16171 = vmatmul.mubr.msk.f32.gmra.mxu1 %vm1854_vm3, %v6593_v51  ;;  %22795 = vst [vmem:[#allocation58_spill] sm:$0xff] %v19260_v63 }
 0x375   : > { %v19253_v23 = vadd.f32 %v15872_v61, %v19158_v33  ;;  %16173 = vmatprep.mubr.msk.f32.mxu1 %vm1854_vm3, %v6594_v40  ;;  %v6597_v40 = vld [vmem:[#allocation3 + $0x122] sm:$0xff] }
 0x376   : > { %v4431_v10 = vpop.f32.mrf.mxu1 }
 0x377   : > { %v19257_v24 = vadd.f32 %v4431_v10, %v19162_v39  ;;  %v6598_v39 = vld [vmem:[#allocation3 + $0x132] sm:$0xff]  ;;  %v19270_v10 = vpop.f32.mrf.mxu0 }
 0x378   : > { %v15875_v29 = vpop.f32.mrf.mxu1  ;;  %16174 = vmatmul.mubr.msk.f32.gmra.mxu1 %vm1854_vm3, %v6595_v13  ;;  %22796 = vst [vmem:[#allocation59_spill] sm:$0xff] %v19270_v10 }
 0x379   : > { %v19263_v51 = vadd.f32 %v15875_v29, %v19168_v43  ;;  %16176 = vmatprep.mubr.msk.f32.mxu1 %vm1854_vm3, %v6596_v6  ;;  %v6599_v6 = vld [vmem:[#allocation3 + $0x142] sm:$0xff] }
 0x37a   : > { %v4441_v33 = vpop.f32.mrf.mxu1 }
 0x37b   : > { %v19267_v61 = vadd.f32 %v4441_v33, %v19172_v60  ;;  %v6600_v60 = vld [vmem:[#allocation3 + $0x152] sm:$0xff]  ;;  %v19280_v33 = vpop.f32.mrf.mxu0 }
 0x37c   : > { %v15878_v55 = vpop.f32.mrf.mxu1  ;;  %16177 = vmatmul.mubr.msk.f32.gmra.mxu1 %vm1854_vm3, %v6597_v40 }
 0x37d   : > { %v19273_v13 = vadd.f32 %v15878_v55, %v19178_v22  ;;  %16179 = vmatprep.mubr.msk.f32.mxu1 %vm1854_vm3, %v6598_v39  ;;  %v6601_v39 = vld [vmem:[#allocation3 + $0x162] sm:$0xff] }
 0x37e   : > { %v4451_v43 = vpop.f32.mrf.mxu1 }
 0x37f   : > { %v19277_v29 = vadd.f32 %v4451_v43, %v19182_v53  ;;  %v19290_v53 = vpop.f32.mrf.mxu0 }
 0x380   : > { %v15881_v63 = vpop.f32.mrf.mxu1  ;;  %16180 = vmatmul.mubr.msk.f32.gmra.mxu1 %vm1854_vm3, %v6599_v6 }
 0x381   : > { %v19283_v40 = vadd.f32 %v15881_v63, %v19188_v25  ;;  %16182 = vmatprep.mubr.msk.f32.mxu1 %vm1854_vm3, %v6600_v60  ;;  %v19305_v60 = vpop.f32.mrf.mxu0 }
 0x382   : > { %v4461_v22 = vpop.f32.mrf.mxu1 }
 0x383   : > { %v19287_v55 = vadd.f32 %v4461_v22, %v19192_v30  ;;  %v13838_v30 = vld [vmem:[%s22693_s3 + $0x200] sm:$0xff] }
 0x384   : > { %v15884_v10 = vpop.f32.mrf.mxu1  ;;  %16183 = vmatmul.mubr.msk.f32.gmra.mxu1 %vm1854_vm3, %v6601_v39 }
 0x385   : > { %v19293_v43 = vadd.f32 %v15884_v10, %v19198_v17  ;;  %16221 = vmatprep.mubr.msk.f32.mxu1 %vm1854_vm3, %v18723_v58  ;;  %v13837_v58 = vld [vmem:[%s22693_s3 + $0x1f8] sm:$0xff] }
 0x386   : > { %v4471_v25 = vpop.f32.mrf.mxu1 }
 0x387   : > { %v19298_v63 = vadd.f32 %v4471_v25, %v19202_v59 }
 0x388   : > { %v15893_v6 = vpop.f32.mrf.mxu1  ;;  %16222 = vmatmul.mubr.msk.f32.vlgmr.msra.gmra.mxu1 %vm1854_vm3, %v18739_v50  ;;  %v13879_v50 = vld [vmem:[%s22693_s3 + $0x238] sm:$0xf] }
 0x389   : > { %v19308_v17 = vadd.f32 %v15893_v6, %v19211_v12  ;;  %16276 = vmatpush3.msk.msra.mxu1 %vm2758_vm2, %v19225_v47  ;;  %16224 = vmatprep.mubr.msk.f32.mxu1 %vm1854_vm3, %v18748_v52  ;;  %v19325_v52 = vpop.f32.mrf.mxu0  ;;  %v7057_v6 = vld [vmem:[#allocation3 + $0xa4] sm:$0xff] }
 0x38a   : > { %v4633_v59 = vpop.f32.mrf.mxu1  ;;  %16277 = vmatprep.subr.mxu1 %v13838_v30 }
 0x38b   : > { %v19318_v10 = vadd.f32 %v4633_v59, %v19220_v62  ;;  %16278 = vmatpush3.msra.mxu1 %v13838_v30  ;;  %v19338_v25 = vpop.f32.mrf.mxu0 }
 0x38c   : > { %v15896_v12 = vpop.f32.mrf.mxu1  ;;  %16225 = vmatmul.mubr.msk.f32.gmra.mxu1 %vm1854_vm3, %v18762_v31  ;;  %16279 = vmatprep.subr.mxu1 %v13837_v58  ;;  %v7056_v31 = vld [vmem:[#allocation3 + $0x94] sm:$0xff] }
 0x38d   : > { %v19328_v47 = vadd.f32 %v15896_v12, %v19231_v9  ;;  %16227 = vmatprep.mubr.msk.f32.mxu1 %vm1854_vm3, %v18766_v42  ;;  %16280 = vmatpush3.msra.mxu1 %v13837_v58 }
 0x38e   : > { %v4643_v62 = vpop.f32.mrf.mxu1  ;;  %16335 = vmatprep.subr.msk.mxu1 %vm2758_vm2, %v13879_v50 }
 0x38f   : > { %v19334_v22 = vadd.f32 %v4643_v62, %v19237_v49  ;;  %v19348_v49 = vpop.f32.mrf.mxu0 }
 0x390   : > { %v15899_v39 = vpop.f32.mrf.mxu1  ;;  %16228 = vmatmul.mubr.msk.f32.gmra.mxu1 %vm1854_vm3, %v18778_v36 }
 0x391   : > { %v19341_v9 = vadd.f32 %v15899_v39, %v19243_v16  ;;  %16230 = vmatprep.mubr.msk.f32.mxu1 %vm1854_vm3, %v7056_v31 }
 0x392   : > { %v4653_v42 = vpop.f32.mrf.mxu1 }
 0x393   : > { %v19345_v30 = vadd.f32 %v4653_v42, %v19247_v38  ;;  %v19360_v38 = vpop.f32.mrf.mxu0 }
 0x394   : > { %v15902_v58 = vpop.f32.mrf.mxu1  ;;  %16231 = vmatmul.mubr.msk.f32.gmra.mxu1 %vm1854_vm3, %v7057_v6 }
 0x395   : > { %v19351_v36 = vadd.f32 %v15902_v58, %v19253_v23  ;;  %16233 = vmatprep.mubr.msk.f32.mxu1 %vm1854_vm3, %v18793_v48 }
 0x396   : > { %v4663_v16 = vpop.f32.mrf.mxu1 }
 0x397   : > { %v19356_v59 = vadd.f32 %v4663_v16, %v19257_v24  ;;  %v19372_v24 = vpop.f32.mrf.mxu0 }
 0x398   : > { %v15905_v12 = vpop.f32.mrf.mxu1  ;;  %16234 = vmatmul.mubr.msk.f32.gmra.mxu1 %vm1854_vm3, %v18805_v20 }
 0x399   : > { %v19363_v62 = vadd.f32 %v15905_v12, %v19263_v51  ;;  %16236 = vmatprep.mubr.msk.f32.mxu1 %vm1854_vm3, %v18809_v21  ;;  %v7521_v12 = vld [vmem:[#allocation3 + $0xa1] sm:$0xff] }
 0x39a   : > { %v4673_v23 = vpop.f32.mrf.mxu1 }
 0x39b   : > { %v19368_v39 = vadd.f32 %v4673_v23, %v19267_v61  ;;  %v19384_v61 = vpop.f32.mrf.mxu0 }
 0x39c   : > { %v15908_v48 = vpop.f32.mrf.mxu1  ;;  %16237 = vmatmul.mubr.msk.f32.gmra.mxu1 %vm1854_vm3, %v18821_v26 }
 0x39d   : > { %v19375_v20 = vadd.f32 %v15908_v48, %v19273_v13  ;;  %16239 = vmatprep.mubr.msk.f32.mxu1 %vm1854_vm3, %v18825_v44 }
 0x39e   : > { %v4683_v51 = vpop.f32.mrf.mxu1 }
 0x39f   : > { %v19380_v31 = vadd.f32 %v4683_v51, %v19277_v29  ;;  %v19396_v29 = vpop.f32.mrf.mxu0 }
 0x3a0   : > { %v15911_v21 = vpop.f32.mrf.mxu1  ;;  %16240 = vmatmul.mubr.msk.f32.gmra.mxu1 %vm1854_vm3, %v18837_v56 }
 0x3a1   : > { %v19387_v26 = vadd.f32 %v15911_v21, %v19283_v40  ;;  %16242 = vmatprep.mubr.msk.f32.mxu1 %vm1854_vm3, %v18664_v28  ;;  %v13878_v28 = vld [vmem:[%s22693_s3 + $0x230] sm:$0xff] }
 0x3a2   : > { %v4693_v13 = vpop.f32.mrf.mxu1 }
 0x3a3   : > { %v19392_v42 = vadd.f32 %v4693_v13, %v19287_v55  ;;  %v7524_v13 = vld [vmem:[#allocation3 + $0x111] sm:$0xff] }
 0x3a4   : > { %v15914_v44 = vpop.f32.mrf.mxu1  ;;  %16243 = vmatmul.mubr.msk.f32.gmra.mxu1 %vm1854_vm3, %v18686_v14  ;;  %v19411_v14 = vpop.f32.mrf.mxu0 }
 0x3a5   : > { %v19399_v56 = vadd.f32 %v15914_v44, %v19293_v43  ;;  %16281 = vmatprep.mubr.msk.f32.mxu1 %vm1854_vm3, %v18855_v41  ;;  %v13877_v41 = vld [vmem:[%s22693_s3 + $0x228] sm:$0xff] }
 0x3a6   : > { %v4703_v40 = vpop.f32.mrf.mxu1 }
 0x3a7   : > { %v19404_v6 = vadd.f32 %v4703_v40, %v19298_v63 }
 0x3a8   : > { %v15923_v55 = vpop.f32.mrf.mxu1  ;;  %16282 = vmatmul.mubr.msk.f32.vlgmr.msra.gmra.mxu1 %vm1854_vm3, %v18872_v45 }
 0x3a9   : > { %v19414_v43 = vadd.f32 %v15923_v55, %v19308_v17  ;;  %16336 = vmatpush3.msk.msra.mxu1 %vm2758_vm2, %v13879_v50  ;;  %16284 = vmatprep.mubr.msk.f32.mxu1 %vm1854_vm3, %v18881_v11  ;;  %v19427_v17 = vpop.f32.mrf.mxu0 }
 0x3aa   : > { %v4865_v63 = vpop.f32.mrf.mxu1  ;;  %16337 = vmatprep.subr.mxu1 %v13878_v28 }
 0x3ab   : > { %v19423_v58 = vadd.f32 %v4865_v63, %v19318_v10  ;;  %16338 = vmatpush3.msra.mxu1 %v13878_v28  ;;  %v19437_v23 = vpop.f32.mrf.mxu0 }
 0x3ac   : > { %v15926_v45 = vpop.f32.mrf.mxu1  ;;  %16285 = vmatmul.mubr.msk.f32.gmra.mxu1 %vm1854_vm3, %v18895_v0  ;;  %16339 = vmatprep.subr.mxu1 %v13877_v41  ;;  %22797 = vst [vmem:[#allocation60_spill] sm:$0xff] %v19437_v23 }
 0x3ad   : > { %v4947_v50 = vadd.f32 %v15926_v45, %v19328_v47  ;;  %16287 = vmatprep.mubr.msk.f32.mxu1 %vm1854_vm3, %v18899_v34  ;;  %16340 = vmatpush3.msra.mxu1 %v13877_v41  ;;  %v7522_v34 = vld [vmem:[#allocation3 + $0xb1] sm:$0xff] }
 0x3ae   : > { %v4875_v11 = vpop.f32.mrf.mxu1 }
 0x3af   : > { %v19433_v16 = vadd.f32 %v4875_v11, %v19334_v22  ;;  %v19445_v22 = vpop.f32.mrf.mxu0 }
 0x3b0   : > { %v15929_v10 = vpop.f32.mrf.mxu1  ;;  %16288 = vmatmul.mubr.msk.f32.gmra.mxu1 %vm1854_vm3, %v18911_v2  ;;  %22798 = vst [vmem:[#allocation61_spill] sm:$0xff] %v19445_v22 }
 0x3b1   : > { %v4949_v0 = vadd.f32 %v15929_v10, %v19341_v9  ;;  %16290 = vmatprep.mubr.msk.f32.mxu1 %vm1854_vm3, %v7521_v12  ;;  %v19454_v40 = vpop.f32.mrf.mxu0 }
 0x3b2   : > { %v4885_v47 = vpop.f32.mrf.mxu1  ;;  %22799 = vst [vmem:[#allocation62_spill] sm:$0xff] %v19454_v40 }
 0x3b3   : > { %v19442_v48 = vadd.f32 %v4885_v47, %v19345_v30  ;;  %v7525_v30 = vld [vmem:[#allocation3 + $0x121] sm:$0xff] }
 0x3b4   : > { %v15932_v51 = vpop.f32.mrf.mxu1  ;;  %16291 = vmatmul.mubr.msk.f32.gmra.mxu1 %vm1854_vm3, %v7522_v34 }
 0x3b5   : > { %v4951_v21 = vadd.f32 %v15932_v51, %v19351_v36  ;;  %16293 = vmatprep.mubr.msk.f32.mxu1 %vm1854_vm3, %v18926_v7  ;;  %v7526_v7 = vld [vmem:[#allocation3 + $0x131] sm:$0xff] }
 0x3b6   : > { %v4895_v2 = vpop.f32.mrf.mxu1 }
 0x3b7   : > { %v19451_v9 = vadd.f32 %v4895_v2, %v19356_v59  ;;  %v19462_v59 = vpop.f32.mrf.mxu0  ;;  %v22803_v2 = vld [vmem:[#allocation22_spill] sm:$0xff] }
 0x3b8   : > { %v15935_v44 = vpop.f32.mrf.mxu1  ;;  %16294 = vmatmul.mubr.msk.f32.gmra.mxu1 %vm1854_vm3, %v7524_v13  ;;  %22800 = vst [vmem:[#allocation63_spill] sm:$0xff] %v19462_v59  ;;  %v5178_v13 = vadd.f32 %v22803_v2, %v19414_v43  ;;  %v22841_v59 = vld [vmem:[#allocation46_spill] sm:$0xff] }
 0x3b9   : > { %v4953_v28 = vadd.f32 %v15935_v44, %v19363_v62  ;;  %16296 = vmatprep.mubr.msk.f32.mxu1 %vm1854_vm3, %v7525_v30  ;;  %v19472_v10 = vpop.f32.mrf.mxu0 }
 0x3ba   : > { %v4905_v55 = vpop.f32.mrf.mxu1  ;;  %22801 = vst [vmem:[#allocation64_spill] sm:$0xff] %v19472_v10 }
 0x3bb   : > { %v19459_v36 = vadd.f32 %v4905_v55, %v19368_v39  ;;  %v7529_v39 = vld [vmem:[#allocation3 + $0x161] sm:$0xff] }
 0x3bc   : > { %v15938_v41 = vpop.f32.mrf.mxu1  ;;  %16297 = vmatmul.mubr.msk.f32.gmra.mxu1 %vm1854_vm3, %v7526_v7 }
 0x3bd   : > { %v4955_v63 = vadd.f32 %v15938_v41, %v19375_v20  ;;  %16299 = vmatprep.mubr.msk.f32.mxu1 %vm1854_vm3, %v18953_v57  ;;  %v7530_v57 = vld [vmem:[#allocation3 + $0x171] sm:$0xff]  ;;  %v5182_v41 = vadd.f32 %v18535_v15, %v4949_v0  ;;  %v5186_v0 = vadd.f32 %v18588_v46, %v4953_v28 }
 0x3be   : > { %v4915_v45 = vpop.f32.mrf.mxu1  ;;  %v22812_v28 = vld [vmem:[#allocation42_spill] sm:$0xff] }
 0x3bf   : > { %v19468_v62 = vadd.f32 %v4915_v45, %v19380_v31  ;;  %v19480_v31 = vpop.f32.mrf.mxu0  ;;  %v5188_v2 = vadd.f32 %v18622_v54, %v4955_v63 }
 0x3c0   : > { %v15941_v11 = vpop.f32.mrf.mxu1  ;;  %16300 = vmatmul.mubr.msk.f32.gmra.mxu1 %vm1854_vm3, %v18965_v27  ;;  %22802 = vst [vmem:[#allocation65_spill] sm:$0xff] %v19480_v31 }
 0x3c1   : > { %v4957_v12 = vadd.f32 %v15941_v11, %v19387_v26  ;;  %16302 = vmatprep.mubr.msk.f32.mxu1 %vm1854_vm3, %v7529_v39  ;;  %v19492_v44 = vpop.f32.mrf.mxu0  ;;  %v5184_v39 = vadd.f32 %v18562_v4, %v4951_v21 }
 0x3c2   : > { %v4925_v47 = vpop.f32.mrf.mxu1  ;;  %22804 = vst [vmem:[#allocation22_spill] sm:$0xff] %v19492_v44 }
 0x3c3   : > { %v19477_v20 = vadd.f32 %v4925_v47, %v19392_v42  ;;  %v7986_v47 = vld [vmem:[#allocation3 + $0xb3] sm:$0xff] }
 0x3c4   : > { %v15944_v34 = vpop.f32.mrf.mxu1  ;;  %16303 = vmatmul.mubr.msk.f32.gmra.mxu1 %vm1854_vm3, %v7530_v57 }
 0x3c5   : > { %v4959_v51 = vadd.f32 %v15944_v34, %v19399_v56  ;;  %16341 = vmatprep.mubr.msk.f32.mxu1 %vm1854_vm3, %v18982_v37  ;;  %v22805_v37 = vld [vmem:[#allocation24_spill] sm:$0xff] }
 0x3c6   : > { %v4935_v27 = vpop.f32.mrf.mxu1  ;;  %v5180_v55 = vadd.f32 %v22805_v37, %v4947_v50  ;;  %v22813_v37 = vld [vmem:[#allocation13_spill] sm:$0xff] }
 0x3c7   : > { %v19486_v26 = vadd.f32 %v4935_v27, %v19404_v6  ;;  %v19501_v6 = vpop.f32.mrf.mxu0 }
 0x3c8   : > { %v15983_v42 = vpop.f32.mrf.mxu1  ;;  %16342 = vmatmul.mubr.msk.f32.vlgmr.msra.gmra.mxu1 %vm1854_vm3, %v18999_v35  ;;  %22806 = vst [vmem:[#allocation24_spill] sm:$0xff] %v19501_v6  ;;  %v22830_v6 = vld [vmem:[#allocation20_spill] sm:$0xff] }
 0x3c9   : > { %v5410_v30 = vadd.f32 %v15983_v42, %v5178_v13  ;;  %16344 = vmatprep.mubr.msk.f32.mxu1 %vm1854_vm3, %v19008_v8  ;;  %v7985_v8 = vld [vmem:[#allocation3 + $0xa3] sm:$0xff]  ;;  %v19510_v50 = vpop.f32.mrf.mxu0 }
 0x3ca   : > { %v19496_v56 = vpop.f32.mrf.mxu1  ;;  %22807 = vst [vmem:[#allocation66_spill] sm:$0xff] %v19510_v50 }
 0x3cb   : > { %v19517_v57 = vpop.f32.mrf.mxu0 }
 0x3cc   : > { %v15986_v7 = vpop.f32.mrf.mxu1  ;;  %16345 = vmatmul.mubr.msk.f32.gmra.mxu1 %vm1854_vm3, %v19022_v19  ;;  %22808 = vst [vmem:[#allocation67_spill] sm:$0xff] %v19517_v57  ;;  %v22828_v57 = vld [vmem:[#allocation33_spill] sm:$0xff] }
 0x3cd   : > { %v5412_v43 = vadd.f32 %v15986_v7, %v5180_v55  ;;  %16347 = vmatprep.mubr.msk.f32.mxu1 %vm1854_vm3, %v19026_v32  ;;  %v19526_v27 = vpop.f32.mrf.mxu0  ;;  %v5190_v55 = vadd.f32 %v22813_v37, %v4957_v12 }
 0x3ce   : > { %v19505_v35 = vpop.f32.mrf.mxu1  ;;  %22809 = vst [vmem:[#allocation68_spill] sm:$0xff] %v19526_v27 }
 0x3cf   : > { %v19535_v42 = vpop.f32.mrf.mxu0 }
 0x3d0   : > { %v15989_v45 = vpop.f32.mrf.mxu1  ;;  %16348 = vmatmul.mubr.msk.f32.gmra.mxu1 %vm1854_vm3, %v19038_v5 }
 0x3d1   : > { %v5414_v11 = vadd.f32 %v15989_v45, %v5182_v41  ;;  %16350 = vmatprep.mubr.msk.f32.mxu1 %vm1854_vm3, %v7985_v8  ;;  %v7993_v41 = vld [vmem:[#allocation3 + $0x163] sm:$0xff]  ;;  %v19544_v54 = vpop.f32.mrf.mxu0 }
 0x3d2   : > { %v19513_v19 = vpop.f32.mrf.mxu1  ;;  %22815 = vst [vmem:[#allocation42_spill] sm:$0xff] %v19544_v54  ;;  %v22816_v8 = vld [vmem:[#allocation17_spill] sm:$0xff] }
 0x3d4   : > { %v15992_v32 = vpop.f32.mrf.mxu1  ;;  %16351 = vmatmul.mubr.msk.f32.gmra.mxu1 %vm1854_vm3, %v7986_v47  ;;  %v7994_v47 = vld [vmem:[#allocation3 + $0x173] sm:$0xff] }
 0x3d5   : > { %v5416_v15 = vadd.f32 %v15992_v32, %v5184_v39  ;;  %16353 = vmatprep.mubr.msk.f32.mxu1 %vm1854_vm3, %v19052_v3  ;;  %v22810_v3 = vld [vmem:[#allocation41_spill] sm:$0xff]  ;;  %v5192_v39 = vadd.f32 %v22816_v8, %v4959_v51 }
 0x3d6   : > { %v19521_v5 = vpop.f32.mrf.mxu1  ;;  %22811 = vst [vmem:[#allocation41_spill] sm:$0xff] %v19535_v42 }
 0x3d8   : > { %v15995_v34 = vpop.f32.mrf.mxu1  ;;  %16354 = vmatmul.mubr.msk.f32.gmra.mxu1 %vm1854_vm3, %v19064_v1 }
 0x3d9   : > { %v5418_v4 = vadd.f32 %v15995_v34, %v5186_v0  ;;  %16356 = vmatprep.mubr.msk.f32.mxu1 %vm1854_vm3, %v19068_v18  ;;  %v22814_v18 = vld [vmem:[#allocation44_spill] sm:$0xff]  ;;  %v19551_v0 = vpop.f32.mrf.mxu0 }
 0x3da   : > { %v19530_v21 = vpop.f32.mrf.mxu1  ;;  %22817 = vst [vmem:[#allocation13_spill] sm:$0xff] %v19551_v0  ;;  %v22822_v0 = vld [vmem:[#allocation27_spill] sm:$0xff] }
 0x3dc   : > { %v15998_v13 = vpop.f32.mrf.mxu1  ;;  %16357 = vmatmul.mubr.msk.f32.gmra.mxu1 %vm1854_vm3, %v22810_v3 }
 0x3dd   : > { %v5420_v46 = vadd.f32 %v15998_v13, %v5188_v2  ;;  %16359 = vmatprep.mubr.msk.f32.mxu1 %vm1854_vm3, %v22812_v28  ;;  %v22818_v2 = vld [vmem:[#allocation18_spill] sm:$0xff]  ;;  %v19556_v28 = vpop.f32.mrf.mxu0 }
 0x3de   : > { %v19539_v1 = vpop.f32.mrf.mxu1  ;;  %v5642_v13 = vadd.f32 %v22818_v2, %v5410_v30  ;;  %22819 = vst [vmem:[#allocation44_spill] sm:$0xff] %v19556_v28  ;;  %v22824_v28 = vld [vmem:[#allocation29_spill] sm:$0xff] }
 0x3e0   : > { %v16001_v7 = vpop.f32.mrf.mxu1  ;;  %16360 = vmatmul.mubr.msk.f32.gmra.mxu1 %vm1854_vm3, %v22814_v18 }
 0x3e1   : > { %v5422_v63 = vadd.f32 %v16001_v7, %v5190_v55  ;;  %16362 = vmatprep.mubr.msk.f32.mxu1 %vm1854_vm3, %v7993_v41  ;;  %v22820_v7 = vld [vmem:[#allocation25_spill] sm:$0xff]  ;;  %v19561_v41 = vpop.f32.mrf.mxu0 }
 0x3e2   : > { %v19547_v45 = vpop.f32.mrf.mxu1  ;;  %v5644_v18 = vadd.f32 %v22820_v7, %v5412_v43  ;;  %22821 = vst [vmem:[#allocation17_spill] sm:$0xff] %v19561_v41  ;;  %v22826_v41 = vld [vmem:[#allocation31_spill] sm:$0xff] }
 0x3e3   : > { %v19566_v54 = vpop.f32.mrf.mxu0 }
 0x3e4   : > { %v16004_v32 = vpop.f32.mrf.mxu1  ;;  %16363 = vmatmul.mubr.msk.f32.gmra.mxu1 %vm1854_vm3, %v7994_v47  ;;  %22823 = vst [vmem:[#allocation18_spill] sm:$0xff] %v19566_v54 }
 0x3e5   : > { %v5424_v12 = vadd.f32 %v16004_v32, %v5192_v39  ;;  %v5646_v39 = vadd.f32 %v22822_v0, %v5414_v11  ;;  %v19571_v42 = vpop.f32.mrf.mxu0 }
 0x3e6   : > { %v19553_v34 = vpop.f32.mrf.mxu1  ;;  %22825 = vst [vmem:[#allocation25_spill] sm:$0xff] %v19571_v42 }
 0x3e7   : > { %v19576_v27 = vpop.f32.mrf.mxu0 }
 0x3e8   : > { %v16043_v3 = vpop.f32.mrf.mxu1  ;;  %22827 = vst [vmem:[#allocation27_spill] sm:$0xff] %v19576_v27  ;;  %v22832_v27 = vld [vmem:[#allocation35_spill] sm:$0xff] }
 0x3e9   : > { %v5874_v37 = vadd.f32 %v16043_v3, %v5642_v13  ;;  %v5648_v13 = vadd.f32 %v22824_v28, %v5416_v15  ;;  %v19581_v50 = vpop.f32.mrf.mxu0 }
 0x3ea   : > { %v19558_v55 = vpop.f32.mrf.mxu1  ;;  %22829 = vst [vmem:[#allocation29_spill] sm:$0xff] %v19581_v50  ;;  %v22834_v50 = vld [vmem:[#allocation37_spill] sm:$0xff] }
 0x3eb   : > { %v19586_v44 = vpop.f32.mrf.mxu0 }
 0x3ec   : > { %v16046_v51 = vpop.f32.mrf.mxu1  ;;  %22831 = vst [vmem:[#allocation31_spill] sm:$0xff] %v19586_v44  ;;  %v22836_v44 = vld [vmem:[#allocation39_spill] sm:$0xff] }
 0x3ed   : > { %v5876_v8 = vadd.f32 %v16046_v51, %v5644_v18  ;;  %v5650_v18 = vadd.f32 %v22826_v41, %v5418_v4  ;;  %v19591_v31 = vpop.f32.mrf.mxu0 }
 0x3ee   : > { %v19563_v47 = vpop.f32.mrf.mxu1  ;;  %22833 = vst [vmem:[#allocation33_spill] sm:$0xff] %v19591_v31  ;;  %v22839_v31 = vld [vmem:[#allocation43_spill] sm:$0xff] }
 0x3ef   : > { %v19596_v42 = vpop.f32.mrf.mxu0 }
 0x3f0   : > { %v16049_v32 = vpop.f32.mrf.mxu1  ;;  %22835 = vst [vmem:[#allocation20_spill] sm:$0xff] %v19596_v42 }
 0x3f1   : > { %v5878_v30 = vadd.f32 %v16049_v32, %v5646_v39  ;;  %v5652_v39 = vadd.f32 %v22828_v57, %v5420_v46  ;;  %v19601_v10 = vpop.f32.mrf.mxu0 }
 0x3f2   : > { %v19568_v2 = vpop.f32.mrf.mxu1  ;;  %22837 = vst [vmem:[#allocation35_spill] sm:$0xff] %v19601_v10 }
 0x3f3   : > { %v19606_v54 = vpop.f32.mrf.mxu0 }
 0x3f4   : > { %v16052_v3 = vpop.f32.mrf.mxu1  ;;  %22840 = vst [vmem:[#allocation39_spill] sm:$0xff] %v19606_v54 }
 0x3f5   : > { %v5880_v43 = vadd.f32 %v16052_v3, %v5648_v13  ;;  %v5654_v13 = vadd.f32 %v22830_v6, %v5422_v63 }
 0x3f6   : > { %v19573_v7 = vpop.f32.mrf.mxu1 }
 0x3f7   : > { %v6112_v42 = vadd.f32 %v22841_v59, %v5880_v43 }
 0x3f8   : > { %v16055_v51 = vpop.f32.mrf.mxu1 }
 0x3f9   : > { %v5882_v11 = vadd.f32 %v16055_v51, %v5650_v18  ;;  %v5656_v18 = vadd.f32 %v22832_v27, %v5424_v12 }
 0x3fa   : > { %v19578_v0 = vpop.f32.mrf.mxu1 }
 0x3fc   : > { %v16058_v32 = vpop.f32.mrf.mxu1 }
 0x3fd   : > { %v5884_v15 = vadd.f32 %v16058_v32, %v5652_v39  ;;  %v6106_v39 = vadd.f32 %v22834_v50, %v5874_v37 }
 0x3fe   : > { %v19583_v28 = vpop.f32.mrf.mxu1 }
 0x400   : > { %v16061_v3 = vpop.f32.mrf.mxu1 }
 0x401   : > { %v5886_v4 = vadd.f32 %v16061_v3, %v5654_v13  ;;  %v6108_v13 = vadd.f32 %v22836_v44, %v5876_v8  ;;  %v22843_v8 = vld [vmem:[#allocation48_spill] sm:$0xff] }
 0x402   : > { %v19588_v41 = vpop.f32.mrf.mxu1 }
 0x404   : > { %v16064_v51 = vpop.f32.mrf.mxu1 }
 0x405   : > { %v5888_v57 = vadd.f32 %v16064_v51, %v5656_v18  ;;  %v6110_v18 = vadd.f32 %v22839_v31, %v5878_v30 }
 0x406   : > { %v19593_v46 = vpop.f32.mrf.mxu1 }
 0x408   : > { %v16103_v32 = vpop.f32.mrf.mxu1 }
 0x409   : > { %v6339_v6 = vadd.f32 %v16103_v32, %v6106_v39  ;;  %v19609_v32 = vpop.f32.mrf.mxu0 }
 0x40a   : > { %v19598_v63 = vpop.f32.mrf.mxu1  ;;  %22842 = vst [vmem:[#allocation43_spill] sm:$0xff] %v19609_v32 }
 0x40b   : > { %v19616_v10 = vpop.f32.mrf.mxu0 }
 0x40c   : > { %v16106_v3 = vpop.f32.mrf.mxu1  ;;  %22844 = vst [vmem:[#allocation46_spill] sm:$0xff] %v19616_v10 }
 0x40d   : > { %v6341_v27 = vadd.f32 %v16106_v3, %v6108_v13  ;;  %v6114_v13 = vadd.f32 %v22843_v8, %v5882_v11  ;;  %v19623_v59 = vpop.f32.mrf.mxu0  ;;  %v22848_v11 = vld [vmem:[#allocation52_spill] sm:$0xff] }
 0x40e   : > { %v19603_v12 = vpop.f32.mrf.mxu1  ;;  %22846 = vst [vmem:[#allocation48_spill] sm:$0xff] %v19623_v59  ;;  %v6118_v8 = vadd.f32 %v22848_v11, %v5886_v4  ;;  %v22853_v4 = vld [vmem:[#allocation28_spill] sm:$0xff] }
 0x40f   : > { %22838 = vst [vmem:[#allocation37_spill] sm:$0xff] %v19603_v12  ;;  %v19632_v10 = vpop.f32.mrf.mxu0 }
 0x410   : > { %v16109_v51 = vpop.f32.mrf.mxu1 }
 0x411   : > { %v6343_v50 = vadd.f32 %v16109_v51, %v6110_v18  ;;  %v22845_v18 = vld [vmem:[#allocation50_spill] sm:$0xff]  ;;  %v19642_v12 = vpop.f32.mrf.mxu0 }
 0x412   : > { %v6279_v37 = vpop.f32.mrf.mxu1  ;;  %v6116_v51 = vadd.f32 %v22845_v18, %v5884_v15  ;;  %22849 = vst [vmem:[#allocation50_spill] sm:$0xff] %v19632_v10  ;;  %v22850_v18 = vld [vmem:[#allocation10_spill] sm:$0xff]  ;;  %v22855_v10 = vld [vmem:[#allocation56_spill] sm:$0xff] }
 0x414   : > { %v16112_v39 = vpop.f32.mrf.mxu1 }
 0x415   : > { %v19611_v40 = vadd.f32 %v16112_v39, %v6112_v42  ;;  %v22847_v39 = vld [vmem:[#allocation11_spill] sm:$0xff] }
 0x416   : > { %v19613_v44 = vpop.f32.mrf.mxu1  ;;  %v5181_v32 = vadd.f32 %v22847_v39, %v19442_v48  ;;  %22852 = vst [vmem:[#allocation11_spill] sm:$0xff] %v19642_v12  ;;  %v22857_v12 = vld [vmem:[#allocation30_spill] sm:$0xff] }
 0x418   : > { %v16115_v3 = vpop.f32.mrf.mxu1 }
 0x419   : > { %v19618_v31 = vadd.f32 %v16115_v3, %v6114_v13  ;;  %v5413_v13 = vadd.f32 %v19513_v19, %v5181_v32  ;;  %v22854_v19 = vld [vmem:[#allocation12_spill] sm:$0xff] }
 0x41a   : > { %v19620_v30 = vpop.f32.mrf.mxu1 }
 0x41b   : > { %v5645_v39 = vadd.f32 %v22853_v4, %v5413_v13  ;;  %v22859_v4 = vld [vmem:[#allocation45_spill] sm:$0xff] }
 0x41c   : > { %v16118_v54 = vpop.f32.mrf.mxu1 }
 0x41d   : > { %v19625_v43 = vadd.f32 %v16118_v54, %v6116_v51  ;;  %v5183_v54 = vadd.f32 %v22850_v18, %v19451_v9  ;;  %v22851_v51 = vld [vmem:[#allocation54_spill] sm:$0xff]  ;;  %v6571_v9 = vadd.f32 %v22855_v10, %v6339_v6  ;;  %v22861_v6 = vld [vmem:[#allocation32_spill] sm:$0xff] }
 0x41e   : > { %v19627_v42 = vpop.f32.mrf.mxu1  ;;  %v6120_v59 = vadd.f32 %v22851_v51, %v5888_v57  ;;  %v19655_v51 = vpop.f32.mrf.mxu0 }
 0x41f   : > { %v5415_v48 = vadd.f32 %v19521_v5, %v5183_v54  ;;  %22856 = vst [vmem:[#allocation52_spill] sm:$0xff] %v19655_v51 }
 0x420   : > { %v16121_v22 = vpop.f32.mrf.mxu1  ;;  %v19669_v51 = vpop.f32.mrf.mxu0 }
 0x421   : > { %v19635_v3 = vadd.f32 %v16121_v22, %v6118_v8  ;;  %v5185_v22 = vadd.f32 %v22854_v19, %v19459_v36  ;;  %v5877_v8 = vadd.f32 %v19568_v2, %v5645_v39  ;;  %v5647_v5 = vadd.f32 %v22857_v12, %v5415_v48  ;;  %v22860_v39 = vld [vmem:[#allocation58_spill] sm:$0xff]  ;;  %22862 = vst [vmem:[#allocation10_spill] sm:$0xff] %v19669_v51 }
 0x422   : > { %v19637_v15 = vpop.f32.mrf.mxu1  ;;  %v6573_v10 = vadd.f32 %v22860_v39, %v6341_v27  ;;  %v22863_v27 = vld [vmem:[#allocation15_spill] sm:$0xff] }
 0x423   : > { %v5417_v57 = vadd.f32 %v19530_v21, %v5185_v22  ;;  %v5879_v36 = vadd.f32 %v19573_v7, %v5647_v5  ;;  %v6109_v2 = vadd.f32 %v22859_v4, %v5877_v8  ;;  %v13956_v7 = vld [vmem:[%s22695_s5 + $0x270] sm:$0xff]  ;;  %v5189_v8 = vadd.f32 %v22863_v27, %v19477_v20  ;;  %v13949_v20 = vld [vmem:[%s22695_s5 + $0x238] sm:$0xff] }
 0x424   : > { %v16124_v23 = vpop.f32.mrf.mxu1  ;;  %8790 = vmatprep.subr.mxu0 %v13956_v7  ;;  %v22865_v4 = vld [vmem:[#allocation34_spill] sm:$0xff]  ;;  %v22867_v7 = vld [vmem:[#allocation49_spill] sm:$0xff] }
 0x425   : > { %v19646_v11 = vadd.f32 %v16124_v23, %v6120_v59  ;;  %v22858_v23 = vld [vmem:[#allocation14_spill] sm:$0xff]  ;;  %v5649_v19 = vadd.f32 %v22861_v6, %v5417_v57  ;;  %v6342_v12 = vadd.f32 %v6279_v37, %v6109_v2  ;;  %v13953_v37 = vld [vmem:[%s22695_s5 + $0x258] sm:$0xff] }
 0x426   : > { %v19650_v32 = vpop.f32.mrf.mxu1  ;;  %v5187_v59 = vadd.f32 %v22858_v23, %v19468_v62  ;;  %v13954_v62 = vld [vmem:[%s22695_s5 + $0x260] sm:$0xff]  ;;  %v13955_v57 = vld [vmem:[%s22695_s5 + $0x268] sm:$0xff]  ;;  %v6575_v23 = vadd.f32 %v19280_v33, %v6343_v50  ;;  %v13948_v33 = vld [vmem:[%s22695_s5 + $0x230] sm:$0xff] }
 0x427   : > { %8719 = vmatprep.subr.mxu1 %v13954_v62  ;;  %8791 = vmatpush1.msra.mxu0 %v13955_v57  ;;  %v13950_v50 = vld [vmem:[%s22695_s5 + $0x240] sm:$0xff]  ;;  %v13941_v57 = vld [vmem:[%s22695_s5 + $0x1f8] sm:$0xff] }
 0x428   : > { %v16163_v18 = vpop.f32.mrf.mxu1  ;;  %v5419_v21 = vadd.f32 %v19539_v1, %v5187_v59  ;;  %v5881_v1 = vadd.f32 %v19578_v0, %v5649_v19  ;;  %8720 = vmatpush1.msra.mxu1 %v13953_v37  ;;  %v13951_v0 = vld [vmem:[%s22695_s5 + $0x248] sm:$0xff]  ;;  %v5421_v59 = vadd.f32 %v19547_v45, %v5189_v8  ;;  %v6574_v45 = vadd.f32 %v19290_v53, %v6342_v12  ;;  %v13946_v19 = vld [vmem:[%s22695_s5 + $0x220] sm:$0xff]  ;;  %v13945_v12 = vld [vmem:[%s22695_s5 + $0x218] sm:$0xff] }
 0x429   : > { %v19658_v54 = vadd.f32 %v16163_v18, %v6571_v9  ;;  %v22864_v18 = vld [vmem:[#allocation47_spill] sm:$0xff]  ;;  %8721 = vmatprep.subr.mxu1 %v13949_v20  ;;  %8792 = vmatprep.subr.mxu0 %v13951_v0  ;;  %v13943_v53 = vld [vmem:[%s22695_s5 + $0x208] sm:$0xff] }
 0x42a   : > { %v19662_v13 = vpop.f32.mrf.mxu1  ;;  %v6111_v5 = vadd.f32 %v22864_v18, %v5879_v36  ;;  %v5651_v2 = vadd.f32 %v22865_v4, %v5419_v21  ;;  %v19706_v36 = vpop.f32.mrf.mxu0  ;;  %8722 = vmatpush1.msra.mxu1 %v13948_v33  ;;  %8793 = vmatpush1.msra.mxu0 %v13950_v50  ;;  %v13944_v21 = vld [vmem:[%s22695_s5 + $0x210] sm:$0xff]  ;;  %v6113_v27 = vadd.f32 %v22867_v7, %v5881_v1  ;;  %v13939_v1 = vld [vmem:[%s22695_s5 + $0x1e8] sm:$0xff] }
 0x42b   : > { %8723 = vmatprep.subr.mxu1 %v13944_v21  ;;  %8794 = vmatprep.subr.mxu0 %v13946_v19  ;;  %v22869_v50 = vld [vmem:[#allocation51_spill] sm:$0xff]  ;;  %v6579_v21 = vadd.f32 %v19338_v25, %v19618_v31  ;;  %v13931_v19 = vld [vmem:[%s22695_s5 + $0x1a8] sm:$0xff]  ;;  %v13930_v25 = vld [vmem:[%s22695_s5 + $0x1a0] sm:$0xff] }
 0x42c   : > { %v16166_v22 = vpop.f32.mrf.mxu1  ;;  %v5883_v8 = vadd.f32 %v19583_v28, %v5651_v2  ;;  %8724 = vmatpush1.msra.mxu1 %v13943_v53  ;;  %8795 = vmatpush1.msra.mxu0 %v13945_v12  ;;  %v19746_v20 = vpop.f32.mrf.mxu0  ;;  %v6346_v0 = vadd.f32 %v19620_v30, %v6113_v27  ;;  %v13936_v2 = vld [vmem:[%s22695_s5 + $0x1d0] sm:$0xff]  ;;  %v13933_v30 = vld [vmem:[%s22695_s5 + $0x1b8] sm:$0xff] }
 0x42d   : > { %v19671_v48 = vadd.f32 %v16166_v22, %v6573_v10  ;;  %v6344_v10 = vadd.f32 %v19613_v44, %v6111_v5  ;;  %v22866_v22 = vld [vmem:[#allocation16_spill] sm:$0xff]  ;;  %v22868_v5 = vld [vmem:[#allocation21_spill] sm:$0xff]  ;;  %8725 = vmatprep.subr.mxu1 %v13939_v1  ;;  %8796 = vmatprep.subr.mxu0 %v13941_v57  ;;  %v13928_v27 = vld [vmem:[%s22695_s5 + $0x190] sm:$0xff] }
 0x42e   : > { %v19682_v9 = vpop.f32.mrf.mxu1  ;;  %v5191_v62 = vadd.f32 %v22866_v22, %v19486_v26  ;;  %v6577_v26 = vadd.f32 %v19305_v60, %v19611_v40  ;;  %v13938_v60 = vld [vmem:[%s22695_s5 + $0x1e0] sm:$0xff]  ;;  %v13940_v40 = vld [vmem:[%s22695_s5 + $0x1f0] sm:$0xff]  ;;  %v19783_v31 = vpop.f32.mrf.mxu0  ;;  %v6578_v12 = vadd.f32 %v19348_v49, %v6346_v0  ;;  %v13925_v49 = vld [vmem:[%s22695_s5 + $0x178] sm:$0xff] }
 0x42f   : > { %8726 = vmatpush1.msra.mxu1 %v13938_v60  ;;  %8797 = vmatpush1.msra.mxu0 %v13940_v40  ;;  %v22870_v22 = vld [vmem:[#allocation36_spill] sm:$0xff]  ;;  %v22871_v1 = vld [vmem:[#allocation53_spill] sm:$0xff] }
 0x430   : > { %v16169_v39 = vpop.f32.mrf.mxu1  ;;  %v5423_v18 = vadd.f32 %v19553_v34, %v5191_v62  ;;  %v6576_v34 = vadd.f32 %v19325_v52, %v6344_v10  ;;  %8798 = vmatprep.subr.mxu0 %v13936_v2  ;;  %v13935_v52 = vld [vmem:[%s22695_s5 + $0x1c8] sm:$0xff]  ;;  %v6115_v10 = vadd.f32 %v22869_v50, %v5883_v8  ;;  %v13924_v8 = vld [vmem:[%s22695_s5 + $0x170] sm:$0xff]  ;;  %v13921_v40 = vld [vmem:[%s22695_s5 + $0x158] sm:$0xff] }
 0x431   : > { %v19709_v6 = vadd.f32 %v16169_v39, %v6575_v23  ;;  %v5653_v23 = vadd.f32 %v22868_v5, %v5421_v59  ;;  %v13934_v59 = vld [vmem:[%s22695_s5 + $0x1c0] sm:$0xff]  ;;  %8799 = vmatpush1.msra.mxu0 %v13935_v52  ;;  %v13919_v60 = vld [vmem:[%s22695_s5 + $0x148] sm:$0xff]  ;;  %v22872_v52 = vld [vmem:[#allocation55_spill] sm:$0xff] }
 0x432   : > { %v6743_v44 = vpop.f32.mrf.mxu1  ;;  %8727 = vmatprep.subr.mxu1 %v13934_v59  ;;  %v5655_v62 = vadd.f32 %v22870_v22, %v5423_v18  ;;  %8800 = vmatprep.subr.mxu0 %v13931_v19 }
 0x433   : > { %v19728_v37 = vadd.f32 %v6743_v44, %v6574_v45  ;;  %v5885_v39 = vadd.f32 %v19588_v41, %v5653_v23  ;;  %8728 = vmatpush1.msra.mxu1 %v13933_v30  ;;  %v13929_v41 = vld [vmem:[%s22695_s5 + $0x198] sm:$0xff]  ;;  %v6348_v44 = vadd.f32 %v19627_v42, %v6115_v10  ;;  %8801 = vmatpush1.msra.mxu0 %v13930_v25  ;;  %v13923_v42 = vld [vmem:[%s22695_s5 + $0x168] sm:$0xff]  ;;  %v22716_v30 = vmov 0.0  }
 0x434   : > { %v16172_v28 = vpop.f32.mrf.mxu1  ;;  %8729 = vmatprep.subr.mxu1 %v13929_v41  ;;  %v5887_v5 = vadd.f32 %v19593_v46, %v5655_v62  ;;  %v13918_v46 = vld [vmem:[%s22695_s5 + $0x140] sm:$0xff]  ;;  %8767 = vmatprep.mubr.f32.mxu1 %v22716_v30 }
 0x435   : > { %v19749_v4 = vadd.f32 %v16172_v28, %v6577_v26  ;;  %8730 = vmatpush1.msra.mxu1 %v13928_v27  ;;  %v13926_v26 = vld [vmem:[%s22695_s5 + $0x180] sm:$0xff]  ;;  %v6117_v57 = vadd.f32 %v22871_v1, %v5885_v39  ;;  %v6581_v28 = vadd.f32 %v19360_v38, %v19625_v43  ;;  %v13920_v38 = vld [vmem:[%s22695_s5 + $0x150] sm:$0xff]  ;;  %v19819_v43 = vpop.f32.mrf.mxu0  ;;  %v6580_v2 = vadd.f32 %v19372_v24, %v6348_v44 }
 0x436   : > { %v6753_v33 = vpop.f32.mrf.mxu1  ;;  %8731 = vmatprep.subr.mxu1 %v13924_v8  ;;  %8802 = vmatprep.subr.mxu0 %v13926_v26  ;;  %v8649_v39 = vld [vmem:[%s22695_s5 + $0x120] sm:$0xff]  ;;  %v6119_v50 = vadd.f32 %v22872_v52, %v5887_v5  ;;  %v6585_v27 = vadd.f32 %v19411_v14, %v19646_v11 }
 0x437   : > { %v19766_v45 = vadd.f32 %v6753_v33, %v6576_v34  ;;  %8732 = vmatpush1.msra.mxu1 %v13923_v42  ;;  %8803 = vmatpush1.msra.mxu0 %v13925_v49  ;;  %v6350_v34 = vadd.f32 %v19637_v15, %v6117_v57  ;;  %v6583_v15 = vadd.f32 %v19384_v61, %v19635_v3 }
 0x438   : > { %v16175_v7 = vpop.f32.mrf.mxu1  ;;  %8733 = vmatprep.subr.mxu1 %v13919_v60  ;;  %8804 = vmatprep.subr.mxu0 %v13921_v40  ;;  %v6352_v41 = vadd.f32 %v19650_v32, %v6119_v50  ;;  %v22882_v50 = vld [vmem:[#allocation23_spill] sm:$0xff] }
 0x439   : > { %v19786_v53 = vadd.f32 %v16175_v7, %v6579_v21  ;;  %8734 = vmatpush1.msra.mxu1 %v13918_v46  ;;  %8805 = vmatpush1.msra.mxu0 %v13920_v38  ;;  %v19836_v21 = vpop.f32.mrf.mxu0  ;;  %v6582_v22 = vadd.f32 %v19396_v29, %v6350_v34 }
 0x43a   : > { %v6763_v18 = vpop.f32.mrf.mxu1  ;;  %8838 = vmatprep.mubr.f32.mxu0 %v22716_v30  ;;  %16395 = vmatprep.subr.mxu1 %v22716_v30  ;;  %v6584_v44 = vadd.f32 %v19427_v17, %v6352_v41  ;;  %v22886_v30 = vld [vmem:[#allocation19_spill] sm:$0xff] }
 0x43b   : > { %v19803_v23 = vadd.f32 %v6763_v18, %v6578_v12  ;;  %8937 = vmatprep.subr.mxu0 %v8649_v39  ;;  %v19846_v61 = vpop.f32.mrf.mxu0 }
 0x43c   : > { %v16178_v0 = vpop.f32.mrf.mxu1 }
 0x43d   : > { %v19822_v59 = vadd.f32 %v16178_v0, %v6581_v28  ;;  %v19853_v26 = vpop.f32.mrf.mxu0 }
 0x43e   : > { %v6773_v33 = vpop.f32.mrf.mxu1  ;;  %22873 = vst [vmem:[#allocation54_spill] sm:$0xff] %v19853_v26 }
 0x43f   : > { %v19831_v10 = vadd.f32 %v6773_v33, %v6580_v2  ;;  %v19855_v57 = vpop.f32.mrf.mxu0 }
 0x440   : > { %v16181_v24 = vpop.f32.mrf.mxu1  ;;  %22874 = vst [vmem:[#allocation28_spill] sm:$0xff] %v19855_v57 }
 0x441   : > { %v19839_v19 = vadd.f32 %v16181_v24, %v6583_v15  ;;  %v19861_v11 = vpop.f32.mrf.mxu0  ;;  %v5177_v15 = vadd.f32 %v22882_v50, %v19423_v58 }
 0x442   : > { %v6783_v62 = vpop.f32.mrf.mxu1  ;;  %22875 = vst [vmem:[#allocation12_spill] sm:$0xff] %v19861_v11 }
 0x443   : > { %v19842_v7 = vadd.f32 %v6783_v62, %v6582_v22  ;;  %v19867_v17 = vpop.f32.mrf.mxu0  ;;  %v5409_v41 = vadd.f32 %v19496_v56, %v5177_v15 }
 0x444   : > { %v16184_v25 = vpop.f32.mrf.mxu1  ;;  %22876 = vst [vmem:[#allocation56_spill] sm:$0xff] %v19867_v17  ;;  %v22892_v17 = vld [vmem:[#allocation57_spill] sm:$0xff] }
 0x445   : > { %v19848_v3 = vadd.f32 %v16184_v25, %v6585_v27  ;;  %v19873_v60 = vpop.f32.mrf.mxu0  ;;  %v22885_v27 = vld [vmem:[#allocation9_spill] sm:$0xff] }
 0x446   : > { %v6793_v12 = vpop.f32.mrf.mxu1  ;;  %22877 = vst [vmem:[#allocation30_spill] sm:$0xff] %v19873_v60  ;;  %v5179_v25 = vadd.f32 %v22885_v27, %v19433_v16  ;;  %v22889_v27 = vld [vmem:[#allocation38_spill] sm:$0xff] }
 0x447   : > { %v19851_v8 = vadd.f32 %v6793_v12, %v6584_v44  ;;  %v19879_v46 = vpop.f32.mrf.mxu0 }
 0x448   : > { %v16223_v32 = vpop.f32.mrf.mxu1  ;;  %22878 = vst [vmem:[#allocation14_spill] sm:$0xff] %v19879_v46  ;;  %v5411_v12 = vadd.f32 %v19505_v35, %v5179_v25  ;;  %v22888_v46 = vld [vmem:[#allocation26_spill] sm:$0xff] }
 0x449   : > { %v19885_v2 = vpop.f32.mrf.mxu0 }
 0x44a   : > { %v7187_v29 = vpop.f32.mrf.mxu1  ;;  %22879 = vst [vmem:[#allocation45_spill] sm:$0xff] %v19885_v2  ;;  %v5641_v2 = vadd.f32 %v22886_v30, %v5409_v41  ;;  %v5643_v56 = vadd.f32 %v22888_v46, %v5411_v12  ;;  %v22891_v46 = vld [vmem:[#allocation37_spill] sm:$0xff] }
 0x44b   : > { %v19891_v52 = vpop.f32.mrf.mxu0 }
 0x44c   : > { %v16226_v1 = vpop.f32.mrf.mxu1  ;;  %22881 = vst [vmem:[#allocation32_spill] sm:$0xff] %v19891_v52  ;;  %v5873_v58 = vadd.f32 %v19558_v55, %v5641_v2  ;;  %v5875_v16 = vadd.f32 %v19563_v47, %v5643_v56  ;;  %v22890_v55 = vld [vmem:[#allocation40_spill] sm:$0xff] }
 0x44d   : > { %v19898_v62 = vpop.f32.mrf.mxu0 }
 0x44e   : > { %v19857_v18 = vpop.f32.mrf.mxu1  ;;  %22884 = vst [vmem:[#allocation47_spill] sm:$0xff] %v19898_v62  ;;  %v6105_v60 = vadd.f32 %v22889_v27, %v5873_v58  ;;  %v6107_v2 = vadd.f32 %v22890_v55, %v5875_v16  ;;  %v22896_v27 = vld [vmem:[#allocation60_spill] sm:$0xff] }
 0x44f   : > { %v19904_v52 = vpop.f32.mrf.mxu0  ;;  %v7035_v57 = vadd.f32 %v22896_v27, %v19658_v54 }
 0x450   : > { %v19859_v14 = vpop.f32.mrf.mxu1  ;;  %22887 = vst [vmem:[#allocation34_spill] sm:$0xff] %v19904_v52  ;;  %v6338_v30 = vadd.f32 %v19598_v63, %v6105_v60  ;;  %v6340_v12 = vadd.f32 %v22891_v46, %v6107_v2  ;;  %v22895_v63 = vld [vmem:[#allocation59_spill] sm:$0xff] }
 0x451   : > { %v19912_v62 = vpop.f32.mrf.mxu0 }
 0x452   : > { %v19863_v42 = vpop.f32.mrf.mxu1  ;;  %v6570_v11 = vadd.f32 %v22892_v17, %v6338_v30  ;;  %v6572_v60 = vadd.f32 %v22895_v63, %v6340_v12  ;;  %v7267_v17 = vadd.f32 %v16223_v32, %v7035_v57  ;;  %v22898_v30 = vld [vmem:[#allocation61_spill] sm:$0xff]  ;;  %v22900_v63 = vld [vmem:[#allocation63_spill] sm:$0xff] }
 0x453   : > { %v19921_v25 = vpop.f32.mrf.mxu0 }
 0x454   : > { %v19865_v49 = vpop.f32.mrf.mxu1  ;;  %v6802_v58 = vadd.f32 %v19662_v13, %v6570_v11  ;;  %v6804_v2 = vadd.f32 %v19682_v9, %v6572_v60  ;;  %v22899_v13 = vld [vmem:[#allocation62_spill] sm:$0xff]  ;;  %v22902_v9 = vld [vmem:[#allocation64_spill] sm:$0xff]  ;;  %v22903_v60 = vld [vmem:[#allocation25_spill] sm:$0xff] }
 0x455   : > { %v19930_v47 = vpop.f32.mrf.mxu0  ;;  %v7037_v11 = vadd.f32 %v22899_v13, %v19671_v48  ;;  %v7039_v32 = vadd.f32 %v22902_v9, %v19709_v6  ;;  %v22906_v6 = vld [vmem:[#allocation24_spill] sm:$0xff] }
 0x456   : > { %v19869_v5 = vpop.f32.mrf.mxu1  ;;  %v7034_v46 = vadd.f32 %v22898_v30, %v6802_v58  ;;  %v7036_v27 = vadd.f32 %v22900_v63, %v6804_v2  ;;  %v22910_v9 = vld [vmem:[#allocation68_spill] sm:$0xff] }
 0x457   : > { %v19940_v55 = vpop.f32.mrf.mxu0  ;;  %v7269_v54 = vadd.f32 %v16226_v1, %v7037_v11  ;;  %v7271_v48 = vadd.f32 %v19859_v14, %v7039_v32  ;;  %v7040_v11 = vadd.f32 %v22906_v6, %v19766_v45  ;;  %v22908_v14 = vld [vmem:[#allocation66_spill] sm:$0xff]  ;;  %v7045_v32 = vadd.f32 %v22910_v9, %v19822_v59 }
 0x458   : > { %v19871_v28 = vpop.f32.mrf.mxu1  ;;  %v7268_v58 = vadd.f32 %v19857_v18, %v7036_v27  ;;  %v22907_v18 = vld [vmem:[#allocation27_spill] sm:$0xff] }
 0x459   : > { %v19950_v12 = vpop.f32.mrf.mxu0 }
 0x45a   : > { %v19875_v40 = vpop.f32.mrf.mxu1 }
 0x45b   : > { %v19965_v2 = vpop.f32.mrf.mxu0 }
 0x45c   : > { %v19877_v0 = vpop.f32.mrf.mxu1 }
 0x45e   : > { %v19881_v38 = vpop.f32.mrf.mxu1 }
 0x460   : > { %v19883_v34 = vpop.f32.mrf.mxu1 }
 0x462   : > { %v19887_v39 = vpop.f32.mrf.mxu1 }
 0x464   : > { %v19889_v33 = vpop.f32.mrf.mxu1 }
 0x465   : > { %22880 = vst [vmem:[#allocation58_spill] sm:$0xff] %v19889_v33  ;;  %v7266_v33 = vadd.f32 %v7187_v29, %v7034_v46  ;;  %v22904_v46 = vld [vmem:[#allocation65_spill] sm:$0xff] }
 0x466   : > { %v19895_v24 = vpop.f32.mrf.mxu1  ;;  %v7038_v13 = vadd.f32 %v22904_v46, %v19728_v37  ;;  %v22909_v37 = vld [vmem:[#allocation67_spill] sm:$0xff] }
 0x467   : > { %22883 = vst [vmem:[#allocation15_spill] sm:$0xff] %v19895_v24  ;;  %v7499_v30 = vadd.f32 %v22903_v60, %v7266_v33  ;;  %v7042_v27 = vadd.f32 %v22909_v37, %v19803_v23  ;;  %v22913_v23 = vld [vmem:[#allocation42_spill] sm:$0xff]  ;;  %v22920_v37 = vld [vmem:[#allocation35_spill] sm:$0xff] }
 0x468   : > { %v16283_v22 = vpop.f32.mrf.mxu1  ;;  %v7270_v33 = vadd.f32 %v19863_v42, %v7038_v13  ;;  %v7047_v13 = vadd.f32 %v22913_v23, %v19839_v19 }
 0x46a   : > { %v7652_v44 = vpop.f32.mrf.mxu1 }
 0x46b   : > { %v7731_v63 = vadd.f32 %v7652_v44, %v7499_v30  ;;  %v22912_v30 = vld [vmem:[#allocation29_spill] sm:$0xff] }
 0x46c   : > { %v16286_v51 = vpop.f32.mrf.mxu1 }
 0x46e   : > { %v19907_v50 = vpop.f32.mrf.mxu1 }
 0x470   : > { %v19910_v15 = vpop.f32.mrf.mxu1 }
 0x472   : > { %v19916_v35 = vpop.f32.mrf.mxu1 }
 0x474   : > { %v19919_v41 = vpop.f32.mrf.mxu1 }
 0x476   : > { %v19924_v52 = vpop.f32.mrf.mxu1 }
 0x478   : > { %v19928_v24 = vpop.f32.mrf.mxu1 }
 0x479   : > { %22893 = vst [vmem:[#allocation16_spill] sm:$0xff] %v19928_v24 }
 0x47a   : > { %v19933_v56 = vpop.f32.mrf.mxu1 }
 0x47b   : > { %22894 = vst [vmem:[#allocation49_spill] sm:$0xff] %v19933_v56 }
 0x47c   : > { %v19938_v16 = vpop.f32.mrf.mxu1 }
 0x47d   : > { %22897 = vst [vmem:[#allocation21_spill] sm:$0xff] %v19938_v16  ;;  %v22901_v16 = vld [vmem:[#allocation18_spill] sm:$0xff] }
 0x47e   : > { %v19944_v24 = vpop.f32.mrf.mxu1  ;;  %v7500_v26 = vadd.f32 %v22901_v16, %v7267_v17  ;;  %v22905_v16 = vld [vmem:[#allocation22_spill] sm:$0xff] }
 0x47f   : > { %v7041_v17 = vadd.f32 %v22905_v16, %v19749_v4  ;;  %v22911_v4 = vld [vmem:[#allocation41_spill] sm:$0xff]  ;;  %v22914_v16 = vld [vmem:[#allocation31_spill] sm:$0xff] }
 0x480   : > { %v19948_v56 = vpop.f32.mrf.mxu1  ;;  %v7732_v29 = vadd.f32 %v16283_v22, %v7500_v26  ;;  %v7502_v26 = vadd.f32 %v22907_v18, %v7269_v54  ;;  %v7043_v22 = vadd.f32 %v22908_v14, %v19786_v53  ;;  %v7044_v45 = vadd.f32 %v22911_v4, %v19831_v10  ;;  %v19990_v18 = vpop.f32.mrf.mxu0  ;;  %v22915_v14 = vld [vmem:[#allocation13_spill] sm:$0xff] }
 0x481   : > { %v7501_v54 = vadd.f32 %v22912_v30, %v7268_v58  ;;  %v7273_v46 = vadd.f32 %v19865_v49, %v7041_v17  ;;  %v7272_v53 = vadd.f32 %v19869_v5, %v7040_v11  ;;  %v7504_v59 = vadd.f32 %v22914_v16, %v7271_v48  ;;  %v22916_v5 = vld [vmem:[#allocation44_spill] sm:$0xff]  ;;  %v22917_v17 = vld [vmem:[#allocation33_spill] sm:$0xff] }
 0x482   : > { %v19956_v57 = vpop.f32.mrf.mxu1  ;;  %v7734_v44 = vadd.f32 %v16286_v51, %v7502_v26  ;;  %v7964_v42 = vadd.f32 %v19706_v36, %v7732_v29  ;;  %v7046_v10 = vadd.f32 %v22915_v14, %v19842_v7  ;;  %v7963_v36 = vadd.f32 %v19746_v20, %v7731_v63  ;;  %v20004_v11 = vld [vmem:[%s22694_s4] ss:$0 sm:$0xff]  ;;  %v20016_v30 = vpop.f32.mrf.mxu0 }
 0x483   : > { %v7733_v51 = vadd.f32 %v19907_v50, %v7501_v54  ;;  %v7275_v49 = vadd.f32 %v19871_v28, %v7043_v22  ;;  %v7049_v29 = vadd.f32 %v22916_v5, %v19848_v3  ;;  %v7736_v19 = vadd.f32 %v19910_v15, %v7504_v59  ;;  %v22918_v50 = vld [vmem:[#allocation17_spill] sm:$0xff]  ;;  %v22924_v5 = vld [vmem:[#allocation54_spill] sm:$0xff] }
 0x484   : > { %v19963_v1 = vpop.f32.mrf.mxu1  ;;  %v7503_v48 = vadd.f32 %v22917_v17, %v7270_v33  ;;  %v20008_v26 = vadd.f32 %v22918_v50, %v19851_v8  ;;  %v7966_v63 = vadd.f32 %v19783_v31, %v7734_v44  ;;  %v7274_v3 = vadd.f32 %v19875_v40, %v7042_v27  ;;  %v22919_v33 = vld [vmem:[#allocation20_spill] sm:$0xff]  ;;  %v22921_v27 = vld [vmem:[#allocation39_spill] sm:$0xff]  ;;  %v22925_v50 = vld [vmem:[#allocation58_spill] sm:$0xff] }
 0x485   : > { %v7506_v22 = vadd.f32 %v22919_v33, %v7273_v46  ;;  %v7505_v9 = vadd.f32 %v22920_v37, %v7272_v53  ;;  %v7277_v31 = vadd.f32 %v19877_v0, %v7045_v32  ;;  %v7968_v46 = vadd.f32 %v19836_v21, %v7736_v19  ;;  %v20031_v32 = vpop.f32.mrf.mxu0 }
 0x486   : > { %v19979_v60 = vpop.f32.mrf.mxu1  ;;  %v7735_v15 = vadd.f32 %v19916_v35, %v7503_v48  ;;  %v7508_v35 = vadd.f32 %v22921_v27, %v7275_v49 }
 0x487   : > { %v7738_v40 = vadd.f32 %v19919_v41, %v7506_v22 }
 0x488   : > { %v16343_v6 = vpop.f32.mrf.mxu1  ;;  %v7967_v41 = vadd.f32 %v19846_v61, %v7735_v15 }
 0x489   : > { %v8196_v58 = vadd.f32 %v16343_v6, %v7964_v42  ;;  %v7737_v6 = vadd.f32 %v19924_v52, %v7505_v9  ;;  %v7278_v52 = vadd.f32 %v19887_v39, %v7046_v10  ;;  %v7970_v19 = vadd.f32 %v22924_v5, %v7738_v40  ;;  %v22928_v10 = vld [vmem:[#allocation28_spill] sm:$0xff] }
 0x48a   : > { %v8116_v7 = vpop.f32.mrf.mxu1 }
 0x48b   : > { %v8428_v20 = vadd.f32 %v19912_v62, %v8196_v58  ;;  %v8195_v28 = vadd.f32 %v8116_v7, %v7963_v36  ;;  %v7965_v62 = vadd.f32 %v19819_v43, %v7733_v51  ;;  %v22922_v43 = vld [vmem:[#allocation43_spill] sm:$0xff] }
 0x48c   : > { %v16346_v4 = vpop.f32.mrf.mxu1  ;;  %v7507_v14 = vadd.f32 %v22922_v43, %v7274_v3  ;;  %v8388_v3 = vpop.f32.mrf.mxu0 }
 0x48d   : > { %v8451_v54 = vadd.f32 %v20004_v11, %v8428_v20  ;;  %v8427_v8 = vadd.f32 %v19921_v25, %v8195_v28  ;;  %v8198_v42 = vadd.f32 %v16346_v4, %v7966_v63  ;;  %v7276_v25 = vadd.f32 %v19881_v38, %v7044_v45  ;;  %v22923_v45 = vld [vmem:[#allocation46_spill] sm:$0xff]  ;;  %v22926_v20 = vld [vmem:[#allocation16_spill] sm:$0xff]  ;;  %v22930_v4 = vld [vmem:[#allocation21_spill] sm:$0xff] }
 0x48e   : > { %v8126_v44 = vpop.f32.mrf.mxu1  ;;  %v7279_v38 = vadd.f32 %v19883_v34, %v7047_v13  ;;  %v7510_v36 = vadd.f32 %v22923_v45, %v7277_v31  ;;  %v7740_v28 = vadd.f32 %v22926_v20, %v7508_v35  ;;  %v22927_v34 = vld [vmem:[#allocation48_spill] sm:$0xff]  ;;  %v7969_v63 = vadd.f32 %v22928_v10, %v7737_v6  ;;  %v22938_v20 = vld [vmem:[#allocation14_spill] sm:$0xff] }
 0x48f   : > { %v8467_v53 = vmax.f32 %v8451_v54, 0.0  ;;  %v8450_v23 = vadd.f32 %v20004_v11, %v8427_v8  ;;  %v8430_v16 = vadd.f32 %v19930_v47, %v8198_v42  ;;  %v8197_v59 = vadd.f32 %v8126_v44, %v7965_v62  ;;  %v22931_v54 = vld [vmem:[#allocation50_spill] sm:$0xff]  ;;  %v22932_v42 = vld [vmem:[#allocation11_spill] sm:$0xff]  ;;  %v22935_v6 = vld [vmem:[#allocation12_spill] sm:$0xff] }
 0x490   : > { %v16349_v0 = vpop.f32.mrf.mxu1  ;;  %v7509_v13 = vadd.f32 %v22927_v34, %v7276_v25  ;;  %v7512_v8 = vadd.f32 %v22931_v54, %v7279_v38  ;;  %v7511_v62 = vadd.f32 %v22932_v42, %v7278_v52  ;;  %v7972_v43 = vadd.f32 %v22935_v6, %v7740_v28  ;;  %v22936_v38 = vld [vmem:[#allocation56_spill] sm:$0xff]  ;;  %v22939_v42 = vld [vmem:[#allocation10_spill] sm:$0xff] }
 0x491   : > { %8484 = vst.msk [vmem:[#allocation4 + $0x8] sm:$0xff] %vm8482_vm5, %v8467_v53  ;;  %v8466_v21 = vmax.f32 %v8450_v23, 0.0  ;;  %v8453_v51 = vadd.f32 %v20004_v11, %v8430_v16  ;;  %v8429_v47 = vadd.f32 %v19940_v55, %v8197_v59  ;;  %v8200_v58 = vadd.f32 %v16349_v0, %v7968_v46  ;;  %v22934_v23 = vld [vmem:[#allocation52_spill] sm:$0xff]  ;;  %v16388_v0 = vpop.f32.mrf.mxu0 }
 0x492   : > { %v8136_v49 = vpop.f32.mrf.mxu1  ;;  %v7281_v55 = vadd.f32 %v22925_v50, %v7049_v29  ;;  %v7742_v29 = vadd.f32 %v22930_v4, %v7510_v36  ;;  %v7741_v53 = vadd.f32 %v19944_v24, %v7509_v13  ;;  %v22937_v36 = vld [vmem:[#allocation30_spill] sm:$0xff] }
 0x493   : > { %8483 = vst.msk [vmem:[#allocation4] sm:$0xff] %vm8482_vm5, %v8466_v21  ;;  %v8469_v61 = vmax.f32 %v8453_v51, 0.0  ;;  %v8452_v17 = vadd.f32 %v20004_v11, %v8429_v47  ;;  %v8432_v48 = vadd.f32 %v19950_v12, %v8200_v58  ;;  %v8199_v7 = vadd.f32 %v8136_v49, %v7967_v41  ;;  %v22929_v12 = vld [vmem:[#allocation49_spill] sm:$0xff]  ;;  %v8398_v34 = vpop.f32.mrf.mxu0 }
 0x494   : > { %v16352_v39 = vpop.f32.mrf.mxu1  ;;  %v7739_v9 = vadd.f32 %v22929_v12, %v7507_v14  ;;  %v7514_v16 = vadd.f32 %v22934_v23, %v7281_v55  ;;  %v7974_v49 = vadd.f32 %v22937_v36, %v7742_v29  ;;  %v7973_v28 = vadd.f32 %v22938_v20, %v7741_v53 }
 0x495   : > { %8486 = vst.msk [vmem:[#allocation4 + $0x18] sm:$0xff] %vm8482_vm5, %v8469_v61  ;;  %v8468_v15 = vmax.f32 %v8452_v17, 0.0  ;;  %v8455_v33 = vadd.f32 %v20004_v11, %v8432_v48  ;;  %v8431_v22 = vadd.f32 %v19965_v2, %v8199_v7  ;;  %v8202_v37 = vadd.f32 %v16352_v39, %v7970_v19  ;;  %v22933_v2 = vld [vmem:[#allocation15_spill] sm:$0xff] }
 0x496   : > { %v8146_v31 = vpop.f32.mrf.mxu1  ;;  %v7280_v46 = vadd.f32 %v22933_v2, %v20008_v26  ;;  %v7744_v26 = vadd.f32 %v19948_v56, %v7512_v8  ;;  %v7971_v52 = vadd.f32 %v22936_v38, %v7739_v9  ;;  %v16391_v9 = vpop.f32.mrf.mxu0 }
 0x497   : > { %8485 = vst.msk [vmem:[#allocation4 + $0x10] sm:$0xff] %vm8482_vm5, %v8468_v15  ;;  %v8471_v40 = vmax.f32 %v8455_v33, 0.0  ;;  %v8454_v27 = vadd.f32 %v20004_v11, %v8431_v22  ;;  %v8434_v35 = vadd.f32 %v19990_v18, %v8202_v37  ;;  %v8201_v44 = vadd.f32 %v8146_v31, %v7969_v63 }
 0x498   : > { %v8501_v59 = vld [vmem:[#allocation4 + $0x8] ss:$2 sm:$0xf]  ;;  %v8533_v25 = vld [vmem:[#allocation4 + $0x9] ss:$2 sm:$0xf]  ;;  %v16355_v14 = vpop.f32.mrf.mxu1  ;;  %v7746_v15 = vadd.f32 %v19963_v1, %v7514_v16 }
 0x499   : > { %v8563_v41 = vmax.f32 %v8501_v59, %v8533_v25  ;;  %8488 = vst.msk [vmem:[#allocation4 + $0x28] sm:$0xff] %vm8482_vm5, %v8471_v40  ;;  %v8470_v21 = vmax.f32 %v8454_v27, 0.0  ;;  %v8457_v18 = vadd.f32 %v20004_v11, %v8434_v35  ;;  %v8433_v51 = vadd.f32 %v20016_v30, %v8201_v44  ;;  %v22940_v27 = vld [vmem:[#allocation45_spill] sm:$0xff]  ;;  %v22941_v44 = vld [vmem:[#allocation32_spill] sm:$0xff] }
 0x49a   : > { %v8499_v47 = vld [vmem:[#allocation4] ss:$2 sm:$0xf]  ;;  %v8531_v24 = vld [vmem:[#allocation4 + $0x1] ss:$2 sm:$0xf]  ;;  %v8204_v58 = vadd.f32 %v16355_v14, %v7972_v43  ;;  %v8156_v45 = vpop.f32.mrf.mxu1  ;;  %v7743_v30 = vadd.f32 %v19956_v57, %v7511_v62  ;;  %v7513_v62 = vadd.f32 %v22939_v42, %v7280_v46  ;;  %v7976_v35 = vadd.f32 %v22940_v27, %v7744_v26 }
 0x49b   : > { %v8580_v5 = vsel %vm8578_vm6, %v8563_v41, -inf  ;;  %v8562_v19 = vmax.f32 %v8499_v47, %v8531_v24  ;;  %8487 = vst.msk [vmem:[#allocation4 + $0x20] sm:$0xff] %vm8482_vm5, %v8470_v21  ;;  %v8473_v61 = vmax.f32 %v8457_v18, 0.0  ;;  %v8456_v17 = vadd.f32 %v20004_v11, %v8433_v51  ;;  %v8408_v21 = vpop.f32.mrf.mxu0  ;;  %v22942_v47 = vld [vmem:[#allocation47_spill] sm:$0xff] }
 0x49c   : > { %v8505_v48 = vld [vmem:[#allocation4 + $0x18] ss:$2 sm:$0xf]  ;;  %v8537_v56 = vld [vmem:[#allocation4 + $0x19] ss:$2 sm:$0xf]  ;;  %v8436_v7 = vadd.f32 %v20031_v32, %v8204_v58  ;;  %v8203_v50 = vadd.f32 %v8156_v45, %v7971_v52  ;;  %v16358_v55 = vpop.f32.mrf.mxu1  ;;  %v7975_v2 = vadd.f32 %v22941_v44, %v7743_v30  ;;  %v7745_v25 = vadd.f32 %v19979_v60, %v7513_v62 }
 0x49d   : > { %v8579_v13 = vsel %vm8578_vm6, %v8562_v19, -inf  ;;  %v8565_v39 = vmax.f32 %v8505_v48, %v8537_v56  ;;  %8490 = vst.msk [vmem:[#allocation4 + $0x38] sm:$0xff] %vm8482_vm5, %v8473_v61  ;;  %v8472_v10 = vmax.f32 %v8456_v17, 0.0  ;;  %v8206_v63 = vadd.f32 %v16358_v55, %v7974_v49  ;;  %v16394_v49 = vpop.f32.mrf.mxu0  ;;  %v22943_v55 = vld [vmem:[#allocation34_spill] sm:$0xff] }
 0x49e   : > { %v8581_v33 = vmax.f32 %v8579_v13, %v8580_v5  ;;  %v8503_v57 = vld [vmem:[#allocation4 + $0x10] ss:$2 sm:$0xf]  ;;  %v8535_v22 = vld [vmem:[#allocation4 + $0x11] ss:$2 sm:$0xf]  ;;  %v8459_v37 = vadd.f32 %v20004_v11, %v8436_v7  ;;  %v8435_v32 = vadd.f32 %v8388_v3, %v8203_v50  ;;  %v8166_v12 = vpop.f32.mrf.mxu1  ;;  %v7978_v24 = vadd.f32 %v22942_v47, %v7746_v15 }
 0x49f   : > { %v8583_v4 = vsel %vm8578_vm6, %v8565_v39, -inf  ;;  %v8564_v29 = vmax.f32 %v8503_v57, %v8535_v22  ;;  %8489 = vst.msk [vmem:[#allocation4 + $0x30] sm:$0xff] %vm8482_vm5, %v8472_v10  ;;  %v8438_v54 = vadd.f32 %v16388_v0, %v8206_v63  ;;  %v8205_v8 = vadd.f32 %v8166_v12, %v7973_v28 }
 0x4a0   : > { %8603 = vst.msk [vmem:[#allocation5] sm:$0xf] %vm8578_vm6, %v8581_v33  ;;  %v8509_v1 = vld [vmem:[#allocation4 + $0x28] ss:$2 sm:$0xf]  ;;  %v8458_v40 = vadd.f32 %v20004_v11, %v8435_v32  ;;  %v16361_v3 = vpop.f32.mrf.mxu1  ;;  %v8475_v16 = vmax.f32 %v8459_v37, 0.0  ;;  %v7977_v20 = vadd.f32 %v22943_v55, %v7745_v25  ;;  %v8418_v33 = vpop.f32.mrf.mxu0 }
 0x4a1   : > { %v8541_v31 = vld [vmem:[#allocation4 + $0x29] ss:$2 sm:$0xf]  ;;  %v8582_v53 = vsel %vm8578_vm6, %v8564_v29, -inf  ;;  %v8461_v59 = vadd.f32 %v20004_v11, %v8438_v54  ;;  %v8437_v14 = vadd.f32 %v8398_v34, %v8205_v8  ;;  %v8208_v0 = vadd.f32 %v16361_v3, %v7976_v35  ;;  %v8639_v55 = vld [vmem:[%s22695_s5 + $0xd0] sm:$0xff] }
 0x4a2   : > { %v8567_v23 = vmax.f32 %v8509_v1, %v8541_v31  ;;  %v8584_v46 = vmax.f32 %v8582_v53, %v8583_v4  ;;  %v8507_v6 = vld [vmem:[#allocation4 + $0x20] ss:$2 sm:$0xf]  ;;  %v8539_v43 = vld [vmem:[#allocation4 + $0x21] ss:$2 sm:$0xf]  ;;  %v8176_v41 = vpop.f32.mrf.mxu1 }
 0x4a3   : > { %v8566_v18 = vmax.f32 %v8507_v6, %v8539_v43  ;;  %8492 = vst.msk [vmem:[#allocation4 + $0x48] sm:$0xff] %vm8482_vm5, %v8475_v16  ;;  %v8474_v51 = vmax.f32 %v8458_v40, 0.0  ;;  %v8477_v26 = vmax.f32 %v8461_v59, 0.0  ;;  %v8460_v60 = vadd.f32 %v20004_v11, %v8437_v14 }
 0x4a4   : > { %8604 = vst.msk [vmem:[#allocation5 + $0x4] sm:$0xf] %vm8578_vm6, %v8584_v46  ;;  %v8513_v58 = vld [vmem:[#allocation4 + $0x38] ss:$2 sm:$0xf]  ;;  %v8440_v52 = vadd.f32 %v16391_v9, %v8208_v0  ;;  %v8207_v45 = vadd.f32 %v8176_v41, %v7975_v2  ;;  %v16364_v36 = vpop.f32.mrf.mxu1  ;;  %v8586_v5 = vsel %vm8578_vm6, %v8567_v23, -inf }
 0x4a5   : > { %v8545_v38 = vld [vmem:[#allocation4 + $0x39] ss:$2 sm:$0xf]  ;;  %v8585_v19 = vsel %vm8578_vm6, %v8566_v18, -inf  ;;  %8491 = vst.msk [vmem:[#allocation4 + $0x40] sm:$0xff] %vm8482_vm5, %v8474_v51  ;;  %8494 = vst.msk [vmem:[#allocation4 + $0x58] sm:$0xff] %vm8482_vm5, %v8477_v26  ;;  %v8210_v17 = vadd.f32 %v16364_v36, %v7978_v24 }
 0x4a6   : > { %v8569_v61 = vmax.f32 %v8513_v58, %v8545_v38  ;;  %v8587_v30 = vmax.f32 %v8585_v19, %v8586_v5  ;;  %v8511_v48 = vld [vmem:[#allocation4 + $0x30] ss:$2 sm:$0xf]  ;;  %v8543_v56 = vld [vmem:[#allocation4 + $0x31] ss:$2 sm:$0xf]  ;;  %v8463_v7 = vadd.f32 %v20004_v11, %v8440_v52  ;;  %v8439_v50 = vadd.f32 %v8408_v21, %v8207_v45  ;;  %v8186_v28 = vpop.f32.mrf.mxu1 }
 0x4a7   : > { %v8568_v34 = vmax.f32 %v8511_v48, %v8543_v56  ;;  %v8476_v13 = vmax.f32 %v8460_v60, 0.0  ;;  %v8442_v39 = vadd.f32 %v16394_v49, %v8210_v17  ;;  %v8209_v15 = vadd.f32 %v8186_v28, %v7977_v20  ;;  %v8653_v19 = vld [vmem:[#allocation5 + $0x1] sm:$0x1]  ;;  %v8648_v17 = vld [vmem:[%s22695_s5 + $0x118] sm:$0xff]  ;;  %v13947_v28 = vld [vmem:[%s22695_s5 + $0x228] sm:$0xff] }
 0x4a8   : > { %8605 = vst.msk [vmem:[#allocation5 + $0x8] sm:$0xf] %vm8578_vm6, %v8587_v30  ;;  %v8479_v10 = vmax.f32 %v8463_v7, 0.0  ;;  %v8462_v63 = vadd.f32 %v20004_v11, %v8439_v50  ;;  %v8589_v57 = vsel %vm8578_vm6, %v8569_v61, -inf  ;;  %v13957_v61 = vld [vmem:[%s22695_s5 + $0x278] sm:$0xff]  ;;  %v13952_v7 = vld [vmem:[%s22695_s5 + $0x250] sm:$0xff] }
 0x4a9   : > { %v8588_v22 = vsel %vm8578_vm6, %v8568_v34, -inf  ;;  %8493 = vst.msk [vmem:[#allocation4 + $0x50] sm:$0xff] %vm8482_vm5, %v8476_v13  ;;  %v8465_v37 = vadd.f32 %v20004_v11, %v8442_v39  ;;  %v8441_v4 = vadd.f32 %v8418_v33, %v8209_v15  ;;  %v8644_v56 = vld [vmem:[%s22695_s5 + $0xf8] sm:$0xff]  ;;  %v8643_v50 = vld [vmem:[%s22695_s5 + $0xf0] sm:$0xff]  ;;  %v22944_v20 = vmov 0.0   ;;  %v8638_v34 = vld [vmem:[%s22695_s5 + $0xc8] sm:$0xff] }
 0x4aa   : > { %v8590_v32 = vmax.f32 %v8588_v22, %v8589_v57  ;;  %v8517_v12 = vld [vmem:[#allocation4 + $0x48] ss:$2 sm:$0xf]  ;;  %v8549_v9 = vld [vmem:[#allocation4 + $0x49] ss:$2 sm:$0xf] }
 0x4ab   : > { %8496 = vst.msk [vmem:[#allocation4 + $0x68] sm:$0xff] %vm8482_vm5, %v8479_v10  ;;  %v8571_v29 = vmax.f32 %v8517_v12, %v8549_v9  ;;  %v8478_v54 = vmax.f32 %v8462_v63, 0.0  ;;  %v8481_v8 = vmax.f32 %v8465_v37, 0.0  ;;  %v8464_v1 = vadd.f32 %v20004_v11, %v8441_v4  ;;  %v8634_v13 = vld [vmem:[%s22695_s5 + $0xa8] sm:$0xff]  ;;  %v13942_v39 = vld [vmem:[%s22695_s5 + $0x200] sm:$0xff]  ;;  %v13937_v15 = vld [vmem:[%s22695_s5 + $0x1d8] sm:$0xff] }
 0x4ac   : > { %8606 = vst.msk [vmem:[#allocation5 + $0xc] sm:$0xf] %vm8578_vm6, %v8590_v32  ;;  %v8515_v42 = vld [vmem:[#allocation4 + $0x40] ss:$2 sm:$0xf]  ;;  %v8628_v33 = vld [vmem:[%s22695_s5 + $0x78] sm:$0xff] }
 0x4ad   : > { %v8547_v62 = vld [vmem:[#allocation4 + $0x41] ss:$2 sm:$0xf]  ;;  %v8521_v40 = vld [vmem:[#allocation4 + $0x58] ss:$2 sm:$0xf] }
 0x4ae   : > { %v8570_v31 = vmax.f32 %v8515_v42, %v8547_v62  ;;  %8495 = vst.msk [vmem:[#allocation4 + $0x60] sm:$0xff] %vm8482_vm5, %v8478_v54  ;;  %8498 = vst.msk [vmem:[#allocation4 + $0x78] sm:$0xff] %vm8482_vm5, %v8481_v8  ;;  %v8553_v27 = vld [vmem:[#allocation4 + $0x59] ss:$2 sm:$0xf]  ;;  %v8480_v35 = vmax.f32 %v8464_v1, 0.0 }
 0x4af   : > { %v8592_v3 = vsel %vm8578_vm6, %v8571_v29, -inf  ;;  %v8573_v2 = vmax.f32 %v8521_v40, %v8553_v27  ;;  %v8633_v10 = vld [vmem:[%s22695_s5 + $0xa0] sm:$0xff]  ;;  %v8624_v57 = vld [vmem:[%s22695_s5 + $0x58] sm:$0xff]  ;;  %v13932_v22 = vld [vmem:[%s22695_s5 + $0x1b0] sm:$0xff] }
 0x4b0   : > { %v8591_v44 = vsel %vm8578_vm6, %v8570_v31, -inf  ;;  %v8519_v23 = vld [vmem:[#allocation4 + $0x50] ss:$2 sm:$0xf]  ;;  %8497 = vst.msk [vmem:[#allocation4 + $0x70] sm:$0xff] %vm8482_vm5, %v8480_v35  ;;  %v8629_v63 = vld [vmem:[%s22695_s5 + $0x80] sm:$0xff] }
 0x4b1   : > { %v8593_v53 = vmax.f32 %v8591_v44, %v8592_v3  ;;  %v8551_v16 = vld [vmem:[#allocation4 + $0x51] ss:$2 sm:$0xf]  ;;  %v8595_v46 = vsel %vm8578_vm6, %v8573_v2, -inf  ;;  %v13927_v9 = vld [vmem:[%s22695_s5 + $0x188] sm:$0xff]  ;;  %v13922_v54 = vld [vmem:[%s22695_s5 + $0x160] sm:$0xff] }
 0x4b2   : > { %v8572_v59 = vmax.f32 %v8519_v23, %v8551_v16  ;;  %v8525_v11 = vld [vmem:[#allocation4 + $0x68] ss:$2 sm:$0xf]  ;;  %v8557_v25 = vld [vmem:[#allocation4 + $0x69] ss:$2 sm:$0xf] }
 0x4b3   : > { %8607 = vst.msk [vmem:[#allocation5 + $0x10] sm:$0xf] %vm8578_vm6, %v8593_v53  ;;  %v8575_v43 = vmax.f32 %v8525_v11, %v8557_v25  ;;  %v8623_v37 = vld [vmem:[%s22695_s5 + $0x50] sm:$0xff]  ;;  %v8618_v4 = vld [vmem:[%s22695_s5 + $0x28] sm:$0xff]  ;;  %v8613_v42 = vld [vmem:[%s22695_s5] sm:$0xff] }
 0x4b4   : > { %v8594_v6 = vsel %vm8578_vm6, %v8572_v59, -inf  ;;  %v8619_v32 = vld [vmem:[%s22695_s5 + $0x30] sm:$0xff]  ;;  %v8614_v29 = vld [vmem:[%s22695_s5 + $0x8] sm:$0xff]  ;;  %v8611_v62 = vld [vmem:[#allocation5] sm:$0x1] }
 0x4b5   : > { %v8596_v14 = vmax.f32 %v8594_v6, %v8595_v46  ;;  %v8523_v0 = vld [vmem:[#allocation4 + $0x60] ss:$2 sm:$0xf]  ;;  %v8555_v41 = vld [vmem:[#allocation4 + $0x61] ss:$2 sm:$0xf] }
 0x4b6   : > { %v8574_v21 = vmax.f32 %v8523_v0, %v8555_v41  ;;  %v8529_v18 = vld [vmem:[#allocation4 + $0x78] ss:$2 sm:$0xf]  ;;  %v8561_v51 = vld [vmem:[#allocation4 + $0x79] ss:$2 sm:$0xf] }
 0x4b7   : > { %8608 = vst.msk [vmem:[#allocation5 + $0x14] sm:$0xf] %vm8578_vm6, %v8596_v14  ;;  %v8598_v26 = vsel %vm8578_vm6, %v8575_v43, -inf  ;;  %v8577_v24 = vmax.f32 %v8529_v18, %v8561_v51  ;;  %v8527_v58 = vld [vmem:[#allocation4 + $0x70] ss:$2 sm:$0xf] }
 0x4b8   : > { %v8597_v47 = vsel %vm8578_vm6, %v8574_v21, -inf  ;;  %v8559_v60 = vld [vmem:[#allocation4 + $0x71] ss:$2 sm:$0xf]  ;;  %v8650_v40 = vld [vmem:[%s22695_s5 + $0x128] sm:$0xff]  ;;  %v8652_v27 = vld [vmem:[%s22695_s5 + $0x138] sm:$0xff] }
 0x4b9   : > { %v8599_v38 = vmax.f32 %v8597_v47, %v8598_v26  ;;  %v8576_v52 = vmax.f32 %v8527_v58, %v8559_v60  ;;  %v8601_v49 = vsel %vm8578_vm6, %v8577_v24, -inf  ;;  %v8651_v1 = vld [vmem:[%s22695_s5 + $0x130] sm:$0xff]  ;;  %v8646_v35 = vld [vmem:[%s22695_s5 + $0x108] sm:$0xff]  ;;  %v8645_v3 = vld [vmem:[%s22695_s5 + $0x100] sm:$0xff] }
 0x4ba   : > { %v8654_v45 = vld [vmem:[#allocation5 + $0x11] sm:$0x1]  ;;  %v8612_v12 = vld [vmem:[#allocation5 + $0x10] sm:$0x1]  ;;  %v8641_v2 = vld [vmem:[%s22695_s5 + $0xe0] sm:$0xff] }
 0x4bb   : > { %8609 = vst.msk [vmem:[#allocation5 + $0x18] sm:$0xf] %vm8578_vm6, %v8599_v38  ;;  %v8698_v36 = vrot.slane %v8654_v45, 7  ;;  %v8600_v5 = vsel %vm8578_vm6, %v8576_v52, -inf  ;;  %v8917_v8 = vrot.slane %v8612_v12, 7  ;;  %v8647_v44 = vld [vmem:[%s22695_s5 + $0x110] sm:$0xff] }
 0x4bc   : > { %v8602_v30 = vmax.f32 %v8600_v5, %v8601_v49  ;;  %v8640_v53 = vld [vmem:[%s22695_s5 + $0xd8] sm:$0xff]  ;;  %v8642_v23 = vld [vmem:[%s22695_s5 + $0xe8] sm:$0xff]  ;;  %v8635_v59 = vld [vmem:[%s22695_s5 + $0xb0] sm:$0xff] }
 0x4bd   : > { %v20128_v48 = vsel %vm8699_vm7, %v8698_v36, %v8653_v19  ;;  %v20212_v31 = vsel %vm8699_vm7, %v8917_v8, %v8611_v62  ;;  %v8636_v16 = vld [vmem:[%s22695_s5 + $0xb8] sm:$0xff]  ;;  %v8637_v11 = vld [vmem:[%s22695_s5 + $0xc0] sm:$0xff]  ;;  %v8631_v25 = vld [vmem:[%s22695_s5 + $0x90] sm:$0xff] }
 0x4be   : > { %13958 = vmatmul.mubr.msk.f32.vlgmr.msra.gmra.mxu1 %vm8482_vm5, %v20128_v48  ;;  %13959 = vmatmul.mubr.msk.f32.vlgmr.msra.gmra.mxu0 %vm8482_vm5, %v20128_v48  ;;  %8610 = vst.msk [vmem:[#allocation5 + $0x1c] sm:$0xf] %vm8578_vm6, %v8602_v30  ;;  %v8630_v46 = vld [vmem:[%s22695_s5 + $0x88] sm:$0xff]  ;;  %v8632_v6 = vld [vmem:[%s22695_s5 + $0x98] sm:$0xff]  ;;  %v8625_v14 = vld [vmem:[%s22695_s5 + $0x60] sm:$0xff] }
 0x4bf   : > { %16396 = vmatpush3.msra.mxu1 %v13957_v61  ;;  %8938 = vmatpush1.msra.mxu0 %v8648_v17  ;;  %v8626_v43 = vld [vmem:[%s22695_s5 + $0x68] sm:$0xff]  ;;  %v8627_v0 = vld [vmem:[%s22695_s5 + $0x70] sm:$0xff]  ;;  %v8621_v41 = vld [vmem:[%s22695_s5 + $0x40] sm:$0xff] }
 0x4c0   : > { %16397 = vmatprep.subr.mxu1 %v22944_v20  ;;  %8939 = vmatprep.subr.mxu0 %v8644_v56  ;;  %v8620_v21 = vld [vmem:[%s22695_s5 + $0x38] sm:$0xff]  ;;  %v8622_v18 = vld [vmem:[%s22695_s5 + $0x48] sm:$0xff]  ;;  %v8615_v26 = vld [vmem:[%s22695_s5 + $0x10] sm:$0xff] }
 0x4c1   : > { %16398 = vmatpush3.msra.mxu1 %v13952_v7  ;;  %8940 = vmatpush1.msra.mxu0 %v8643_v50  ;;  %v8616_v51 = vld [vmem:[%s22695_s5 + $0x18] sm:$0xff]  ;;  %v8617_v47 = vld [vmem:[%s22695_s5 + $0x20] sm:$0xff]  ;;  %v14002_v58 = vld [vmem:[%s22695_s5 + $0x3b0] sm:$0xff] }
 0x4c2   : > { %16399 = vmatprep.subr.mxu1 %v22944_v20  ;;  %8941 = vmatprep.subr.mxu0 %v8639_v55  ;;  %v14000_v24 = vld [vmem:[%s22695_s5 + $0x3a0] sm:$0xff]  ;;  %v13999_v38 = vld [vmem:[%s22695_s5 + $0x398] sm:$0xff]  ;;  %v14001_v60 = vld [vmem:[%s22695_s5 + $0x3a8] sm:$0xff] }
 0x4c3   : > { %16400 = vmatpush3.msra.mxu1 %v13947_v28  ;;  %8942 = vmatpush1.msra.mxu0 %v8638_v34  ;;  %v13995_v52 = vld [vmem:[%s22695_s5 + $0x378] sm:$0xff]  ;;  %v13997_v45 = vld [vmem:[%s22695_s5 + $0x388] sm:$0xff]  ;;  %v13994_v36 = vld [vmem:[%s22695_s5 + $0x370] sm:$0xff] }
 0x4c4   : > { %16401 = vmatprep.subr.mxu1 %v22944_v20  ;;  %8943 = vmatprep.subr.mxu0 %v8634_v13  ;;  %v13996_v49 = vld [vmem:[%s22695_s5 + $0x380] sm:$0xff]  ;;  %v13990_v5 = vld [vmem:[%s22695_s5 + $0x350] sm:$0xff]  ;;  %v13989_v61 = vld [vmem:[%s22695_s5 + $0x348] sm:$0xff] }
 0x4c5   : > { %16402 = vmatpush3.msra.mxu1 %v13942_v39  ;;  %8944 = vmatpush1.msra.mxu0 %v8633_v10  ;;  %v13992_v19 = vld [vmem:[%s22695_s5 + $0x360] sm:$0xff]  ;;  %v13991_v17 = vld [vmem:[%s22695_s5 + $0x358] sm:$0xff]  ;;  %v13985_v30 = vld [vmem:[%s22695_s5 + $0x328] sm:$0xff] }
 0x4c6   : > { %16403 = vmatprep.subr.mxu1 %v22944_v20  ;;  %8945 = vmatprep.subr.mxu0 %v8629_v63  ;;  %v13984_v56 = vld [vmem:[%s22695_s5 + $0x320] sm:$0xff]  ;;  %v13986_v7 = vld [vmem:[%s22695_s5 + $0x330] sm:$0xff]  ;;  %v13979_v28 = vld [vmem:[%s22695_s5 + $0x2f8] sm:$0xff] }
 0x4c7   : > { %16404 = vmatpush3.msra.mxu1 %v13937_v15  ;;  %8946 = vmatpush1.msra.mxu0 %v8628_v33  ;;  %v13980_v50 = vld [vmem:[%s22695_s5 + $0x300] sm:$0xff]  ;;  %v13982_v55 = vld [vmem:[%s22695_s5 + $0x310] sm:$0xff]  ;;  %v13981_v34 = vld [vmem:[%s22695_s5 + $0x308] sm:$0xff] }
 0x4c8   : > { %16405 = vmatprep.subr.mxu1 %v22944_v20  ;;  %8947 = vmatprep.subr.mxu0 %v8624_v57  ;;  %v13975_v13 = vld [vmem:[%s22695_s5 + $0x2d8] sm:$0xff]  ;;  %v13977_v39 = vld [vmem:[%s22695_s5 + $0x2e8] sm:$0xff]  ;;  %v13974_v10 = vld [vmem:[%s22695_s5 + $0x2d0] sm:$0xff] }
 0x4c9   : > { %16406 = vmatpush3.msra.mxu1 %v13932_v22  ;;  %8948 = vmatpush1.msra.mxu0 %v8623_v37  ;;  %v13976_v63 = vld [vmem:[%s22695_s5 + $0x2e0] sm:$0xff]  ;;  %v13970_v15 = vld [vmem:[%s22695_s5 + $0x2b0] sm:$0xff]  ;;  %v13969_v22 = vld [vmem:[%s22695_s5 + $0x2a8] sm:$0xff] }
 0x4ca   : > { %16407 = vmatprep.subr.mxu1 %v22944_v20  ;;  %8949 = vmatprep.subr.mxu0 %v8619_v32  ;;  %v13972_v33 = vld [vmem:[%s22695_s5 + $0x2c0] sm:$0xff]  ;;  %v9134_v57 = vld [vmem:[#allocation5 + $0x12] sm:$0x1]  ;;  %v13971_v37 = vld [vmem:[%s22695_s5 + $0x2b8] sm:$0xff] }
 0x4cb   : > { %16408 = vmatpush3.msra.mxu1 %v13927_v9  ;;  %8950 = vmatpush1.msra.mxu0 %v8618_v4  ;;  %v13965_v32 = vld [vmem:[%s22695_s5 + $0x288] sm:$0xff]  ;;  %v13967_v12 = vld [vmem:[%s22695_s5 + $0x298] sm:$0xff]  ;;  %v13964_v9 = vld [vmem:[%s22695_s5 + $0x280] sm:$0xff]  ;;  %v9178_v4 = vrot.slane %v9134_v57, 7 }
 0x4cc   : > { %16409 = vmatprep.subr.mxu1 %v22944_v20  ;;  %8951 = vmatprep.subr.mxu0 %v8614_v29  ;;  %v13966_v29 = vld [vmem:[%s22695_s5 + $0x290] sm:$0xff]  ;;  %v14043_v8 = vld [vmem:[%s22695_s5 + $0x4e0] sm:$0xff]  ;;  %v14003_v62 = vld [vmem:[%s22695_s5 + $0x3b8] sm:$0xff] }
 0x4cd   : > { %16410 = vmatpush3.msra.mxu1 %v13922_v54  ;;  %16411 = vmatprep.mubr.msk.f32.mxu1 %vm16836_vm8, %v22944_v20  ;;  %v9133_v54 = vld [vmem:[#allocation5 + $0x2] sm:$0x1]  ;;  %v14088_v57 = vld [vmem:[%s22695_s5 + $0x630] sm:$0xff] }
 0x4ce   : > { %8952 = vmatpush1.msra.mxu0 %v8613_v42  ;;  %8985 = vmatprep.mubr.f32.mxu0 %v22944_v20  ;;  %v20404_v42 = vsel %vm8699_vm7, %v9178_v4, %v9133_v54  ;;  %v14082_v4 = vld [vmem:[%s22695_s5 + $0x600] sm:$0xff] }
 0x4cf   : > { %16412 = vmatmul.mubr.msk.f32.vlgmr.msra.gmra.mxu1 %vm8482_vm5, %v20128_v48  ;;  %13961 = vmatmul.mubr.msk.f32.vlgmr.msra.gmra.mxu0 %vm8482_vm5, %v20212_v31  ;;  %v13987_v48 = vld [vmem:[%s22695_s5 + $0x338] sm:$0xff]  ;;  %v14078_v54 = vld [vmem:[%s22695_s5 + $0x5e0] sm:$0xff] }
 0x4d0   : > { %9008 = vmatprep.subr.mxu1 %v8651_v1  ;;  %16414 = vmatprep.subr.mxu0 %v22944_v20  ;;  %v14042_v1 = vld [vmem:[%s22695_s5 + $0x4d8] sm:$0xff] }
 0x4d1   : > { %9009 = vmatpush1.msra.mxu1 %v8650_v40  ;;  %16415 = vmatpush3.msra.mxu0 %v8652_v27  ;;  %v13998_v40 = vld [vmem:[%s22695_s5 + $0x390] sm:$0xff] }
 0x4d2   : > { %9010 = vmatprep.subr.mxu1 %v8646_v35  ;;  %16416 = vmatprep.subr.mxu0 %v22944_v20  ;;  %v14037_v27 = vld [vmem:[%s22695_s5 + $0x4b0] sm:$0xff] }
 0x4d3   : > { %9011 = vmatpush1.msra.mxu1 %v8645_v3  ;;  %16417 = vmatpush3.msra.mxu0 %v8647_v44  ;;  %v14033_v35 = vld [vmem:[%s22695_s5 + $0x490] sm:$0xff]  ;;  %v13993_v3 = vld [vmem:[%s22695_s5 + $0x368] sm:$0xff] }
 0x4d4   : > { %9012 = vmatprep.subr.mxu1 %v8641_v2  ;;  %16418 = vmatprep.subr.mxu0 %v22944_v20  ;;  %v14032_v44 = vld [vmem:[%s22695_s5 + $0x488] sm:$0xff] }
 0x4d5   : > { %9013 = vmatpush1.msra.mxu1 %v8640_v53  ;;  %16419 = vmatpush3.msra.mxu0 %v8642_v23  ;;  %v14028_v2 = vld [vmem:[%s22695_s5 + $0x468] sm:$0xff]  ;;  %v13988_v53 = vld [vmem:[%s22695_s5 + $0x340] sm:$0xff] }
 0x4d6   : > { %9014 = vmatprep.subr.mxu1 %v8636_v16  ;;  %16420 = vmatprep.subr.mxu0 %v22944_v20  ;;  %v14027_v23 = vld [vmem:[%s22695_s5 + $0x460] sm:$0xff] }
 0x4d7   : > { %9015 = vmatpush1.msra.mxu1 %v8635_v59  ;;  %16421 = vmatpush3.msra.mxu0 %v8637_v11  ;;  %v14023_v16 = vld [vmem:[%s22695_s5 + $0x440] sm:$0xff]  ;;  %v13983_v59 = vld [vmem:[%s22695_s5 + $0x318] sm:$0xff] }
 0x4d8   : > { %9016 = vmatprep.subr.mxu1 %v8631_v25  ;;  %16422 = vmatprep.subr.mxu0 %v22944_v20  ;;  %v14022_v11 = vld [vmem:[%s22695_s5 + $0x438] sm:$0xff] }
 0x4d9   : > { %9017 = vmatpush1.msra.mxu1 %v8630_v46  ;;  %16423 = vmatpush3.msra.mxu0 %v8632_v6  ;;  %v14018_v25 = vld [vmem:[%s22695_s5 + $0x418] sm:$0xff]  ;;  %v13978_v46 = vld [vmem:[%s22695_s5 + $0x2f0] sm:$0xff] }
 0x4da   : > { %9018 = vmatprep.subr.mxu1 %v8626_v43  ;;  %16424 = vmatprep.subr.mxu0 %v22944_v20  ;;  %v14017_v6 = vld [vmem:[%s22695_s5 + $0x410] sm:$0xff] }
 0x4db   : > { %9019 = vmatpush1.msra.mxu1 %v8625_v14  ;;  %16425 = vmatpush3.msra.mxu0 %v8627_v0  ;;  %v14013_v43 = vld [vmem:[%s22695_s5 + $0x3f0] sm:$0xff]  ;;  %v13973_v0 = vld [vmem:[%s22695_s5 + $0x2c8] sm:$0xff] }
 0x4dc   : > { %9020 = vmatprep.subr.mxu1 %v8621_v41  ;;  %16426 = vmatprep.subr.mxu0 %v22944_v20  ;;  %v9400_v14 = vld [vmem:[#allocation5 + $0x13] sm:$0x1]  ;;  %v14012_v41 = vld [vmem:[%s22695_s5 + $0x3e8] sm:$0xff] }
 0x4dd   : > { %9021 = vmatpush1.msra.mxu1 %v8620_v21  ;;  %16427 = vmatpush3.msra.mxu0 %v8622_v18  ;;  %v14008_v21 = vld [vmem:[%s22695_s5 + $0x3c8] sm:$0xff]  ;;  %v13968_v18 = vld [vmem:[%s22695_s5 + $0x2a0] sm:$0xff] }
 0x4de   : > { %9022 = vmatprep.subr.mxu1 %v8616_v51  ;;  %16428 = vmatprep.subr.mxu0 %v22944_v20  ;;  %v9444_v51 = vrot.slane %v9400_v14, 7  ;;  %v14053_v14 = vld [vmem:[%s22695_s5 + $0x518] sm:$0xff] }
 0x4df   : > { %9023 = vmatpush1.msra.mxu1 %v8615_v26  ;;  %9056 = vmatprep.mubr.f32.mxu1 %v22944_v20  ;;  %v14007_v26 = vld [vmem:[%s22695_s5 + $0x3c0] sm:$0xff] }
 0x4e0   : > { %16429 = vmatpush3.msra.mxu0 %v8617_v47  ;;  %16430 = vmatprep.mubr.msk.f32.mxu0 %vm16836_vm8, %v22944_v20  ;;  %v9399_v47 = vld [vmem:[#allocation5 + $0x3] sm:$0x1] }
 0x4e1   : > { %13962 = vmatmul.mubr.msk.f32.vlgmr.msra.gmra.mxu1 %vm8482_vm5, %v20212_v31  ;;  %16431 = vmatmul.mubr.msk.f32.vlgmr.msra.gmra.mxu0 %vm8482_vm5, %v20212_v31  ;;  %v14038_v31 = vld [vmem:[%s22695_s5 + $0x4b8] sm:$0xff] }
 0x4e2   : > { %9198 = vmatprep.subr.mxu1 %v14000_v24  ;;  %9269 = vmatprep.subr.mxu0 %v14002_v58  ;;  %v14045_v24 = vld [vmem:[%s22695_s5 + $0x4f0] sm:$0xff]  ;;  %v20494_v58 = vsel %vm8699_vm7, %v9444_v51, %v9399_v47  ;;  %v14129_v51 = vld [vmem:[%s22695_s5 + $0x760] sm:$0xff]  ;;  %v14089_v47 = vld [vmem:[%s22695_s5 + $0x638] sm:$0xff] }
 0x4e3   : > { %9199 = vmatpush1.msra.mxu1 %v13999_v38  ;;  %9270 = vmatpush1.msra.mxu0 %v14001_v60  ;;  %v14044_v38 = vld [vmem:[%s22695_s5 + $0x4e8] sm:$0xff]  ;;  %v14046_v60 = vld [vmem:[%s22695_s5 + $0x4f8] sm:$0xff] }
 0x4e4   : > { %9200 = vmatprep.subr.mxu1 %v13995_v52  ;;  %9271 = vmatprep.subr.mxu0 %v13997_v45  ;;  %v14040_v52 = vld [vmem:[%s22695_s5 + $0x4c8] sm:$0xff]  ;;  %v14039_v45 = vld [vmem:[%s22695_s5 + $0x4c0] sm:$0xff] }
 0x4e5   : > { %9201 = vmatpush1.msra.mxu1 %v13994_v36  ;;  %9272 = vmatpush1.msra.mxu0 %v13996_v49  ;;  %v14041_v36 = vld [vmem:[%s22695_s5 + $0x4d0] sm:$0xff]  ;;  %v14035_v49 = vld [vmem:[%s22695_s5 + $0x4a0] sm:$0xff] }
 0x4e6   : > { %9202 = vmatprep.subr.mxu1 %v13990_v5  ;;  %9273 = vmatprep.subr.mxu0 %v13992_v19  ;;  %v14034_v5 = vld [vmem:[%s22695_s5 + $0x498] sm:$0xff]  ;;  %v14036_v19 = vld [vmem:[%s22695_s5 + $0x4a8] sm:$0xff] }
 0x4e7   : > { %9203 = vmatpush1.msra.mxu1 %v13989_v61  ;;  %9274 = vmatpush1.msra.mxu0 %v13991_v17  ;;  %v14030_v61 = vld [vmem:[%s22695_s5 + $0x478] sm:$0xff]  ;;  %v14029_v17 = vld [vmem:[%s22695_s5 + $0x470] sm:$0xff] }
 0x4e8   : > { %9204 = vmatprep.subr.mxu1 %v13985_v30  ;;  %9275 = vmatprep.subr.mxu0 %v13987_v48  ;;  %v14031_v30 = vld [vmem:[%s22695_s5 + $0x480] sm:$0xff]  ;;  %v14025_v48 = vld [vmem:[%s22695_s5 + $0x450] sm:$0xff] }
 0x4e9   : > { %9205 = vmatpush1.msra.mxu1 %v13984_v56  ;;  %9276 = vmatpush1.msra.mxu0 %v13986_v7  ;;  %v14024_v56 = vld [vmem:[%s22695_s5 + $0x448] sm:$0xff]  ;;  %v14026_v7 = vld [vmem:[%s22695_s5 + $0x458] sm:$0xff] }
 0x4ea   : > { %9206 = vmatprep.subr.mxu1 %v13980_v50  ;;  %9277 = vmatprep.subr.mxu0 %v13982_v55  ;;  %v14020_v50 = vld [vmem:[%s22695_s5 + $0x428] sm:$0xff]  ;;  %v14019_v55 = vld [vmem:[%s22695_s5 + $0x420] sm:$0xff] }
 0x4eb   : > { %9207 = vmatpush1.msra.mxu1 %v13979_v28  ;;  %9278 = vmatpush1.msra.mxu0 %v13981_v34  ;;  %v14021_v28 = vld [vmem:[%s22695_s5 + $0x430] sm:$0xff]  ;;  %v14015_v34 = vld [vmem:[%s22695_s5 + $0x400] sm:$0xff] }
 0x4ec   : > { %9208 = vmatprep.subr.mxu1 %v13975_v13  ;;  %9279 = vmatprep.subr.mxu0 %v13977_v39  ;;  %v14014_v13 = vld [vmem:[%s22695_s5 + $0x3f8] sm:$0xff]  ;;  %v14016_v39 = vld [vmem:[%s22695_s5 + $0x408] sm:$0xff] }
 0x4ed   : > { %9209 = vmatpush1.msra.mxu1 %v13974_v10  ;;  %9280 = vmatpush1.msra.mxu0 %v13976_v63  ;;  %v14010_v10 = vld [vmem:[%s22695_s5 + $0x3d8] sm:$0xff]  ;;  %v14009_v63 = vld [vmem:[%s22695_s5 + $0x3d0] sm:$0xff] }
 0x4ee   : > { %9210 = vmatprep.subr.mxu1 %v13970_v15  ;;  %9281 = vmatprep.subr.mxu0 %v13972_v33  ;;  %v14011_v15 = vld [vmem:[%s22695_s5 + $0x3e0] sm:$0xff] }
 0x4ef   : > { %9211 = vmatpush1.msra.mxu1 %v13969_v22  ;;  %9282 = vmatpush1.msra.mxu0 %v13971_v37  ;;  %v14086_v33 = vld [vmem:[%s22695_s5 + $0x620] sm:$0xff]  ;;  %v14085_v22 = vld [vmem:[%s22695_s5 + $0x618] sm:$0xff]  ;;  %v14087_v37 = vld [vmem:[%s22695_s5 + $0x628] sm:$0xff] }
 0x4f0   : > { %9212 = vmatprep.subr.mxu1 %v13965_v32  ;;  %9283 = vmatprep.subr.mxu0 %v13967_v12  ;;  %v14081_v32 = vld [vmem:[%s22695_s5 + $0x5f8] sm:$0xff]  ;;  %v14083_v12 = vld [vmem:[%s22695_s5 + $0x608] sm:$0xff] }
 0x4f1   : > { %9213 = vmatpush1.msra.mxu1 %v13964_v9  ;;  %9246 = vmatprep.mubr.f32.mxu1 %v22944_v20  ;;  %v14080_v9 = vld [vmem:[%s22695_s5 + $0x5f0] sm:$0xff] }
 0x4f2   : > { %9284 = vmatpush1.msra.mxu0 %v13966_v29  ;;  %9317 = vmatprep.mubr.f32.mxu0 %v22944_v20  ;;  %v14076_v29 = vld [vmem:[%s22695_s5 + $0x5d0] sm:$0xff] }
 0x4f3   : > { %14004 = vmatmul.mubr.msk.f32.vlgmr.msra.gmra.mxu1 %vm8482_vm5, %v20404_v42  ;;  %14005 = vmatmul.mubr.msk.f32.vlgmr.msra.gmra.mxu0 %vm8482_vm5, %v20404_v42 }
 0x4f4   : > { %16433 = vmatprep.subr.mxu1 %v22944_v20  ;;  %9464 = vmatprep.subr.mxu0 %v14043_v8  ;;  %v14075_v8 = vld [vmem:[%s22695_s5 + $0x5c8] sm:$0xff] }
 0x4f5   : > { %16434 = vmatpush3.msra.mxu1 %v14003_v62  ;;  %9465 = vmatpush1.msra.mxu0 %v14042_v1  ;;  %v14071_v62 = vld [vmem:[%s22695_s5 + $0x5a8] sm:$0xff]  ;;  %v14073_v1 = vld [vmem:[%s22695_s5 + $0x5b8] sm:$0xff] }
 0x4f6   : > { %16435 = vmatprep.subr.mxu1 %v22944_v20  ;;  %9466 = vmatprep.subr.mxu0 %v14038_v31  ;;  %v14070_v31 = vld [vmem:[%s22695_s5 + $0x5a0] sm:$0xff] }
 0x4f7   : > { %16436 = vmatpush3.msra.mxu1 %v13998_v40  ;;  %9467 = vmatpush1.msra.mxu0 %v14037_v27  ;;  %v14072_v40 = vld [vmem:[%s22695_s5 + $0x5b0] sm:$0xff]  ;;  %v14066_v27 = vld [vmem:[%s22695_s5 + $0x580] sm:$0xff] }
 0x4f8   : > { %16437 = vmatprep.subr.mxu1 %v22944_v20  ;;  %9468 = vmatprep.subr.mxu0 %v14033_v35  ;;  %v14068_v35 = vld [vmem:[%s22695_s5 + $0x590] sm:$0xff] }
 0x4f9   : > { %16438 = vmatpush3.msra.mxu1 %v13993_v3  ;;  %9469 = vmatpush1.msra.mxu0 %v14032_v44  ;;  %v14065_v3 = vld [vmem:[%s22695_s5 + $0x578] sm:$0xff]  ;;  %v14067_v44 = vld [vmem:[%s22695_s5 + $0x588] sm:$0xff] }
 0x4fa   : > { %16439 = vmatprep.subr.mxu1 %v22944_v20  ;;  %9470 = vmatprep.subr.mxu0 %v14028_v2  ;;  %v14061_v2 = vld [vmem:[%s22695_s5 + $0x558] sm:$0xff] }
 0x4fb   : > { %16440 = vmatpush3.msra.mxu1 %v13988_v53  ;;  %9471 = vmatpush1.msra.mxu0 %v14027_v23  ;;  %v14063_v53 = vld [vmem:[%s22695_s5 + $0x568] sm:$0xff]  ;;  %v14060_v23 = vld [vmem:[%s22695_s5 + $0x550] sm:$0xff] }
 0x4fc   : > { %16441 = vmatprep.subr.mxu1 %v22944_v20  ;;  %9472 = vmatprep.subr.mxu0 %v14023_v16  ;;  %v14062_v16 = vld [vmem:[%s22695_s5 + $0x560] sm:$0xff] }
 0x4fd   : > { %16442 = vmatpush3.msra.mxu1 %v13983_v59  ;;  %9473 = vmatpush1.msra.mxu0 %v14022_v11  ;;  %v14056_v59 = vld [vmem:[%s22695_s5 + $0x530] sm:$0xff]  ;;  %v14058_v11 = vld [vmem:[%s22695_s5 + $0x540] sm:$0xff] }
 0x4fe   : > { %16443 = vmatprep.subr.mxu1 %v22944_v20  ;;  %9474 = vmatprep.subr.mxu0 %v14018_v25  ;;  %v9667_v25 = vld [vmem:[#allocation5 + $0x14] sm:$0x1] }
 0x4ff   : > { %16444 = vmatpush3.msra.mxu1 %v13978_v46  ;;  %9475 = vmatpush1.msra.mxu0 %v14017_v6  ;;  %v14055_v46 = vld [vmem:[%s22695_s5 + $0x528] sm:$0xff]  ;;  %v14057_v6 = vld [vmem:[%s22695_s5 + $0x538] sm:$0xff] }
 0x500   : > { %16445 = vmatprep.subr.mxu1 %v22944_v20  ;;  %9476 = vmatprep.subr.mxu0 %v14013_v43  ;;  %v14051_v43 = vld [vmem:[%s22695_s5 + $0x508] sm:$0xff] }
 0x501   : > { %16446 = vmatpush3.msra.mxu1 %v13973_v0  ;;  %9477 = vmatpush1.msra.mxu0 %v14012_v41  ;;  %v14050_v0 = vld [vmem:[%s22695_s5 + $0x500] sm:$0xff]  ;;  %v9711_v41 = vrot.slane %v9667_v25, 7  ;;  %v14174_v25 = vld [vmem:[%s22695_s5 + $0x8b0] sm:$0xff] }
 0x502   : > { %16447 = vmatprep.subr.mxu1 %v22944_v20  ;;  %9478 = vmatprep.subr.mxu0 %v14008_v21  ;;  %v14052_v21 = vld [vmem:[%s22695_s5 + $0x510] sm:$0xff] }
 0x503   : > { %16448 = vmatpush3.msra.mxu1 %v13968_v18  ;;  %16449 = vmatprep.mubr.msk.f32.mxu1 %vm16836_vm8, %v22944_v20  ;;  %v9666_v18 = vld [vmem:[#allocation5 + $0x4] sm:$0x1] }
 0x504   : > { %9479 = vmatpush1.msra.mxu0 %v14007_v26  ;;  %9512 = vmatprep.mubr.f32.mxu0 %v22944_v20  ;;  %v20686_v26 = vsel %vm8699_vm7, %v9711_v41, %v9666_v18  ;;  %v14168_v41 = vld [vmem:[%s22695_s5 + $0x880] sm:$0xff] }
 0x505   : > { %16450 = vmatmul.mubr.msk.f32.vlgmr.msra.gmra.mxu1 %vm8482_vm5, %v20404_v42  ;;  %14047 = vmatmul.mubr.msk.f32.vlgmr.msra.gmra.mxu0 %vm8482_vm5, %v20494_v58  ;;  %v14077_v42 = vld [vmem:[%s22695_s5 + $0x5d8] sm:$0xff]  ;;  %v14164_v18 = vld [vmem:[%s22695_s5 + $0x860] sm:$0xff] }
 0x506   : > { %9535 = vmatprep.subr.mxu1 %v14045_v24  ;;  %16452 = vmatprep.subr.mxu0 %v22944_v20  ;;  %v14128_v24 = vld [vmem:[%s22695_s5 + $0x758] sm:$0xff] }
 0x507   : > { %9536 = vmatpush1.msra.mxu1 %v14044_v38  ;;  %16453 = vmatpush3.msra.mxu0 %v14046_v60  ;;  %v14084_v38 = vld [vmem:[%s22695_s5 + $0x610] sm:$0xff] }
 0x508   : > { %9537 = vmatprep.subr.mxu1 %v14040_v52  ;;  %16454 = vmatprep.subr.mxu0 %v22944_v20  ;;  %v14123_v60 = vld [vmem:[%s22695_s5 + $0x730] sm:$0xff] }
 0x509   : > { %9538 = vmatpush1.msra.mxu1 %v14039_v45  ;;  %16455 = vmatpush3.msra.mxu0 %v14041_v36  ;;  %v14119_v52 = vld [vmem:[%s22695_s5 + $0x710] sm:$0xff]  ;;  %v14079_v45 = vld [vmem:[%s22695_s5 + $0x5e8] sm:$0xff] }
 0x50a   : > { %9539 = vmatprep.subr.mxu1 %v14035_v49  ;;  %16456 = vmatprep.subr.mxu0 %v22944_v20  ;;  %v14118_v36 = vld [vmem:[%s22695_s5 + $0x708] sm:$0xff] }
 0x50b   : > { %9540 = vmatpush1.msra.mxu1 %v14034_v5  ;;  %16457 = vmatpush3.msra.mxu0 %v14036_v19  ;;  %v14114_v49 = vld [vmem:[%s22695_s5 + $0x6e8] sm:$0xff]  ;;  %v14074_v5 = vld [vmem:[%s22695_s5 + $0x5c0] sm:$0xff] }
 0x50c   : > { %9541 = vmatprep.subr.mxu1 %v14030_v61  ;;  %16458 = vmatprep.subr.mxu0 %v22944_v20  ;;  %v14113_v19 = vld [vmem:[%s22695_s5 + $0x6e0] sm:$0xff] }
 0x50d   : > { %9542 = vmatpush1.msra.mxu1 %v14029_v17  ;;  %16459 = vmatpush3.msra.mxu0 %v14031_v30  ;;  %v14109_v61 = vld [vmem:[%s22695_s5 + $0x6c0] sm:$0xff]  ;;  %v14069_v17 = vld [vmem:[%s22695_s5 + $0x598] sm:$0xff] }
 0x50e   : > { %9543 = vmatprep.subr.mxu1 %v14025_v48  ;;  %16460 = vmatprep.subr.mxu0 %v22944_v20  ;;  %v14108_v30 = vld [vmem:[%s22695_s5 + $0x6b8] sm:$0xff] }
 0x50f   : > { %9544 = vmatpush1.msra.mxu1 %v14024_v56  ;;  %16461 = vmatpush3.msra.mxu0 %v14026_v7  ;;  %v14104_v48 = vld [vmem:[%s22695_s5 + $0x698] sm:$0xff]  ;;  %v14064_v56 = vld [vmem:[%s22695_s5 + $0x570] sm:$0xff] }
 0x510   : > { %9545 = vmatprep.subr.mxu1 %v14020_v50  ;;  %16462 = vmatprep.subr.mxu0 %v22944_v20  ;;  %v14103_v7 = vld [vmem:[%s22695_s5 + $0x690] sm:$0xff] }
 0x511   : > { %9546 = vmatpush1.msra.mxu1 %v14019_v55  ;;  %16463 = vmatpush3.msra.mxu0 %v14021_v28  ;;  %v14099_v50 = vld [vmem:[%s22695_s5 + $0x670] sm:$0xff]  ;;  %v14059_v28 = vld [vmem:[%s22695_s5 + $0x548] sm:$0xff] }
 0x512   : > { %9547 = vmatprep.subr.mxu1 %v14015_v34  ;;  %16464 = vmatprep.subr.mxu0 %v22944_v20  ;;  %v9933_v55 = vld [vmem:[#allocation5 + $0x15] sm:$0x1]  ;;  %v14098_v34 = vld [vmem:[%s22695_s5 + $0x668] sm:$0xff] }
 0x513   : > { %9548 = vmatpush1.msra.mxu1 %v14014_v13  ;;  %16465 = vmatpush3.msra.mxu0 %v14016_v39  ;;  %v14094_v13 = vld [vmem:[%s22695_s5 + $0x648] sm:$0xff]  ;;  %v14054_v39 = vld [vmem:[%s22695_s5 + $0x520] sm:$0xff] }
 0x514   : > { %9549 = vmatprep.subr.mxu1 %v14010_v10  ;;  %16466 = vmatprep.subr.mxu0 %v22944_v20  ;;  %v9977_v10 = vrot.slane %v9933_v55, 7  ;;  %v14139_v55 = vld [vmem:[%s22695_s5 + $0x798] sm:$0xff] }
 0x515   : > { %9550 = vmatpush1.msra.mxu1 %v14009_v63  ;;  %9583 = vmatprep.mubr.f32.mxu1 %v22944_v20  ;;  %v14093_v63 = vld [vmem:[%s22695_s5 + $0x640] sm:$0xff] }
 0x516   : > { %16467 = vmatpush3.msra.mxu0 %v14011_v15  ;;  %16468 = vmatprep.mubr.msk.f32.mxu0 %vm16836_vm8, %v22944_v20  ;;  %v9932_v15 = vld [vmem:[#allocation5 + $0x5] sm:$0x1] }
 0x517   : > { %14048 = vmatmul.mubr.msk.f32.vlgmr.msra.gmra.mxu1 %vm8482_vm5, %v20494_v58  ;;  %16469 = vmatmul.mubr.msk.f32.vlgmr.msra.gmra.mxu0 %vm8482_vm5, %v20494_v58  ;;  %v14124_v58 = vld [vmem:[%s22695_s5 + $0x738] sm:$0xff] }
 0x518   : > { %9731 = vmatprep.subr.mxu1 %v14086_v33  ;;  %9802 = vmatprep.subr.mxu0 %v14088_v57  ;;  %v14131_v33 = vld [vmem:[%s22695_s5 + $0x770] sm:$0xff]  ;;  %v20776_v57 = vsel %vm8699_vm7, %v9977_v10, %v9932_v15  ;;  %v14215_v10 = vld [vmem:[%s22695_s5 + $0x9e0] sm:$0xff]  ;;  %v14175_v15 = vld [vmem:[%s22695_s5 + $0x8b8] sm:$0xff] }
 0x519   : > { %9732 = vmatpush1.msra.mxu1 %v14085_v22  ;;  %9803 = vmatpush1.msra.mxu0 %v14087_v37  ;;  %v14130_v22 = vld [vmem:[%s22695_s5 + $0x768] sm:$0xff]  ;;  %v14132_v37 = vld [vmem:[%s22695_s5 + $0x778] sm:$0xff] }
 0x51a   : > { %9733 = vmatprep.subr.mxu1 %v14081_v32  ;;  %9804 = vmatprep.subr.mxu0 %v14083_v12  ;;  %v14126_v32 = vld [vmem:[%s22695_s5 + $0x748] sm:$0xff]  ;;  %v14125_v12 = vld [vmem:[%s22695_s5 + $0x740] sm:$0xff] }
 0x51b   : > { %9734 = vmatpush1.msra.mxu1 %v14080_v9  ;;  %9805 = vmatpush1.msra.mxu0 %v14082_v4  ;;  %v14127_v9 = vld [vmem:[%s22695_s5 + $0x750] sm:$0xff]  ;;  %v14121_v4 = vld [vmem:[%s22695_s5 + $0x720] sm:$0xff] }
 0x51c   : > { %9735 = vmatprep.subr.mxu1 %v14076_v29  ;;  %9806 = vmatprep.subr.mxu0 %v14078_v54  ;;  %v14120_v29 = vld [vmem:[%s22695_s5 + $0x718] sm:$0xff]  ;;  %v14122_v54 = vld [vmem:[%s22695_s5 + $0x728] sm:$0xff] }
 0x51d   : > { %9736 = vmatpush1.msra.mxu1 %v14075_v8  ;;  %9807 = vmatpush1.msra.mxu0 %v14077_v42  ;;  %v14116_v8 = vld [vmem:[%s22695_s5 + $0x6f8] sm:$0xff]  ;;  %v14115_v42 = vld [vmem:[%s22695_s5 + $0x6f0] sm:$0xff] }
 0x51e   : > { %9737 = vmatprep.subr.mxu1 %v14071_v62  ;;  %9808 = vmatprep.subr.mxu0 %v14073_v1  ;;  %v14117_v62 = vld [vmem:[%s22695_s5 + $0x700] sm:$0xff]  ;;  %v14111_v1 = vld [vmem:[%s22695_s5 + $0x6d0] sm:$0xff] }
 0x51f   : > { %9738 = vmatpush1.msra.mxu1 %v14070_v31  ;;  %9809 = vmatpush1.msra.mxu0 %v14072_v40  ;;  %v14110_v31 = vld [vmem:[%s22695_s5 + $0x6c8] sm:$0xff]  ;;  %v14112_v40 = vld [vmem:[%s22695_s5 + $0x6d8] sm:$0xff] }
 0x520   : > { %9739 = vmatprep.subr.mxu1 %v14066_v27  ;;  %9810 = vmatprep.subr.mxu0 %v14068_v35  ;;  %v14106_v27 = vld [vmem:[%s22695_s5 + $0x6a8] sm:$0xff]  ;;  %v14105_v35 = vld [vmem:[%s22695_s5 + $0x6a0] sm:$0xff] }
 0x521   : > { %9740 = vmatpush1.msra.mxu1 %v14065_v3  ;;  %9811 = vmatpush1.msra.mxu0 %v14067_v44  ;;  %v14107_v3 = vld [vmem:[%s22695_s5 + $0x6b0] sm:$0xff]  ;;  %v14101_v44 = vld [vmem:[%s22695_s5 + $0x680] sm:$0xff] }
 0x522   : > { %9741 = vmatprep.subr.mxu1 %v14061_v2  ;;  %9812 = vmatprep.subr.mxu0 %v14063_v53  ;;  %v14100_v2 = vld [vmem:[%s22695_s5 + $0x678] sm:$0xff]  ;;  %v14102_v53 = vld [vmem:[%s22695_s5 + $0x688] sm:$0xff] }
 0x523   : > { %9742 = vmatpush1.msra.mxu1 %v14060_v23  ;;  %9813 = vmatpush1.msra.mxu0 %v14062_v16  ;;  %v14096_v23 = vld [vmem:[%s22695_s5 + $0x658] sm:$0xff]  ;;  %v14095_v16 = vld [vmem:[%s22695_s5 + $0x650] sm:$0xff] }
 0x524   : > { %9743 = vmatprep.subr.mxu1 %v14056_v59  ;;  %9814 = vmatprep.subr.mxu0 %v14058_v11  ;;  %v14097_v59 = vld [vmem:[%s22695_s5 + $0x660] sm:$0xff] }
 0x525   : > { %9744 = vmatpush1.msra.mxu1 %v14055_v46  ;;  %9815 = vmatpush1.msra.mxu0 %v14057_v6  ;;  %v14172_v11 = vld [vmem:[%s22695_s5 + $0x8a0] sm:$0xff]  ;;  %v14171_v46 = vld [vmem:[%s22695_s5 + $0x898] sm:$0xff]  ;;  %v14173_v6 = vld [vmem:[%s22695_s5 + $0x8a8] sm:$0xff] }
 0x526   : > { %9745 = vmatprep.subr.mxu1 %v14051_v43  ;;  %9816 = vmatprep.subr.mxu0 %v14053_v14  ;;  %v14167_v43 = vld [vmem:[%s22695_s5 + $0x878] sm:$0xff]  ;;  %v14169_v14 = vld [vmem:[%s22695_s5 + $0x888] sm:$0xff] }
 0x527   : > { %9746 = vmatpush1.msra.mxu1 %v14050_v0  ;;  %9779 = vmatprep.mubr.f32.mxu1 %v22944_v20  ;;  %v14166_v0 = vld [vmem:[%s22695_s5 + $0x870] sm:$0xff] }
 0x528   : > { %9817 = vmatpush1.msra.mxu0 %v14052_v21  ;;  %9850 = vmatprep.mubr.f32.mxu0 %v22944_v20  ;;  %v14162_v21 = vld [vmem:[%s22695_s5 + $0x850] sm:$0xff] }
 0x529   : > { %14090 = vmatmul.mubr.msk.f32.vlgmr.msra.gmra.mxu1 %vm8482_vm5, %v20686_v26  ;;  %14091 = vmatmul.mubr.msk.f32.vlgmr.msra.gmra.mxu0 %vm8482_vm5, %v20686_v26 }
 0x52a   : > { %16471 = vmatprep.subr.mxu1 %v22944_v20  ;;  %9997 = vmatprep.subr.mxu0 %v14129_v51  ;;  %v14161_v51 = vld [vmem:[%s22695_s5 + $0x848] sm:$0xff] }
 0x52b   : > { %16472 = vmatpush3.msra.mxu1 %v14089_v47  ;;  %9998 = vmatpush1.msra.mxu0 %v14128_v24  ;;  %v14157_v47 = vld [vmem:[%s22695_s5 + $0x828] sm:$0xff]  ;;  %v14159_v24 = vld [vmem:[%s22695_s5 + $0x838] sm:$0xff] }
 0x52c   : > { %16473 = vmatprep.subr.mxu1 %v22944_v20  ;;  %9999 = vmatprep.subr.mxu0 %v14124_v58  ;;  %v14156_v58 = vld [vmem:[%s22695_s5 + $0x820] sm:$0xff] }
 0x52d   : > { %16474 = vmatpush3.msra.mxu1 %v14084_v38  ;;  %10000 = vmatpush1.msra.mxu0 %v14123_v60  ;;  %v14158_v38 = vld [vmem:[%s22695_s5 + $0x830] sm:$0xff]  ;;  %v14152_v60 = vld [vmem:[%s22695_s5 + $0x800] sm:$0xff] }
 0x52e   : > { %16475 = vmatprep.subr.mxu1 %v22944_v20  ;;  %10001 = vmatprep.subr.mxu0 %v14119_v52  ;;  %v14154_v52 = vld [vmem:[%s22695_s5 + $0x810] sm:$0xff] }
 0x52f   : > { %16476 = vmatpush3.msra.mxu1 %v14079_v45  ;;  %10002 = vmatpush1.msra.mxu0 %v14118_v36  ;;  %v14151_v45 = vld [vmem:[%s22695_s5 + $0x7f8] sm:$0xff]  ;;  %v14153_v36 = vld [vmem:[%s22695_s5 + $0x808] sm:$0xff] }
 0x530   : > { %16477 = vmatprep.subr.mxu1 %v22944_v20  ;;  %10003 = vmatprep.subr.mxu0 %v14114_v49  ;;  %v14147_v49 = vld [vmem:[%s22695_s5 + $0x7d8] sm:$0xff] }
 0x531   : > { %16478 = vmatpush3.msra.mxu1 %v14074_v5  ;;  %10004 = vmatpush1.msra.mxu0 %v14113_v19  ;;  %v14149_v5 = vld [vmem:[%s22695_s5 + $0x7e8] sm:$0xff]  ;;  %v14146_v19 = vld [vmem:[%s22695_s5 + $0x7d0] sm:$0xff] }
 0x532   : > { %16479 = vmatprep.subr.mxu1 %v22944_v20  ;;  %10005 = vmatprep.subr.mxu0 %v14109_v61  ;;  %v14148_v61 = vld [vmem:[%s22695_s5 + $0x7e0] sm:$0xff] }
 0x533   : > { %16480 = vmatpush3.msra.mxu1 %v14069_v17  ;;  %10006 = vmatpush1.msra.mxu0 %v14108_v30  ;;  %v14142_v17 = vld [vmem:[%s22695_s5 + $0x7b0] sm:$0xff]  ;;  %v14144_v30 = vld [vmem:[%s22695_s5 + $0x7c0] sm:$0xff] }
 0x534   : > { %16481 = vmatprep.subr.mxu1 %v22944_v20  ;;  %10007 = vmatprep.subr.mxu0 %v14104_v48  ;;  %v10199_v48 = vld [vmem:[#allocation5 + $0x16] sm:$0x1] }
 0x535   : > { %16482 = vmatpush3.msra.mxu1 %v14064_v56  ;;  %10008 = vmatpush1.msra.mxu0 %v14103_v7  ;;  %v14141_v56 = vld [vmem:[%s22695_s5 + $0x7a8] sm:$0xff]  ;;  %v14143_v7 = vld [vmem:[%s22695_s5 + $0x7b8] sm:$0xff] }
 0x536   : > { %16483 = vmatprep.subr.mxu1 %v22944_v20  ;;  %10009 = vmatprep.subr.mxu0 %v14099_v50  ;;  %v14137_v50 = vld [vmem:[%s22695_s5 + $0x788] sm:$0xff] }
 0x537   : > { %16484 = vmatpush3.msra.mxu1 %v14059_v28  ;;  %10010 = vmatpush1.msra.mxu0 %v14098_v34  ;;  %v14136_v28 = vld [vmem:[%s22695_s5 + $0x780] sm:$0xff]  ;;  %v10243_v34 = vrot.slane %v10199_v48, 7  ;;  %v14260_v48 = vld [vmem:[%s22695_s5 + $0xb30] sm:$0xff] }
 0x538   : > { %16485 = vmatprep.subr.mxu1 %v22944_v20  ;;  %10011 = vmatprep.subr.mxu0 %v14094_v13  ;;  %v14138_v13 = vld [vmem:[%s22695_s5 + $0x790] sm:$0xff] }
 0x539   : > { %16486 = vmatpush3.msra.mxu1 %v14054_v39  ;;  %16487 = vmatprep.mubr.msk.f32.mxu1 %vm16836_vm8, %v22944_v20  ;;  %v10198_v39 = vld [vmem:[#allocation5 + $0x6] sm:$0x1] }
 0x53a   : > { %10012 = vmatpush1.msra.mxu0 %v14093_v63  ;;  %10045 = vmatprep.mubr.f32.mxu0 %v22944_v20  ;;  %v20968_v63 = vsel %vm8699_vm7, %v10243_v34, %v10198_v39  ;;  %v14254_v34 = vld [vmem:[%s22695_s5 + $0xb00] sm:$0xff] }
 0x53b   : > { %16488 = vmatmul.mubr.msk.f32.vlgmr.msra.gmra.mxu1 %vm8482_vm5, %v20686_v26  ;;  %14133 = vmatmul.mubr.msk.f32.vlgmr.msra.gmra.mxu0 %vm8482_vm5, %v20776_v57  ;;  %v14163_v26 = vld [vmem:[%s22695_s5 + $0x858] sm:$0xff]  ;;  %v14250_v39 = vld [vmem:[%s22695_s5 + $0xae0] sm:$0xff] }
 0x53c   : > { %10068 = vmatprep.subr.mxu1 %v14131_v33  ;;  %16490 = vmatprep.subr.mxu0 %v22944_v20  ;;  %v14214_v33 = vld [vmem:[%s22695_s5 + $0x9d8] sm:$0xff] }
 0x53d   : > { %10069 = vmatpush1.msra.mxu1 %v14130_v22  ;;  %16491 = vmatpush3.msra.mxu0 %v14132_v37  ;;  %v14170_v22 = vld [vmem:[%s22695_s5 + $0x890] sm:$0xff] }
 0x53e   : > { %10070 = vmatprep.subr.mxu1 %v14126_v32  ;;  %16492 = vmatprep.subr.mxu0 %v22944_v20  ;;  %v14209_v37 = vld [vmem:[%s22695_s5 + $0x9b0] sm:$0xff] }
 0x53f   : > { %10071 = vmatpush1.msra.mxu1 %v14125_v12  ;;  %16493 = vmatpush3.msra.mxu0 %v14127_v9  ;;  %v14205_v32 = vld [vmem:[%s22695_s5 + $0x990] sm:$0xff]  ;;  %v14165_v12 = vld [vmem:[%s22695_s5 + $0x868] sm:$0xff] }
 0x540   : > { %10072 = vmatprep.subr.mxu1 %v14121_v4  ;;  %16494 = vmatprep.subr.mxu0 %v22944_v20  ;;  %v14204_v9 = vld [vmem:[%s22695_s5 + $0x988] sm:$0xff] }
 0x541   : > { %10073 = vmatpush1.msra.mxu1 %v14120_v29  ;;  %16495 = vmatpush3.msra.mxu0 %v14122_v54  ;;  %v14200_v4 = vld [vmem:[%s22695_s5 + $0x968] sm:$0xff]  ;;  %v14160_v29 = vld [vmem:[%s22695_s5 + $0x840] sm:$0xff] }
 0x542   : > { %10074 = vmatprep.subr.mxu1 %v14116_v8  ;;  %16496 = vmatprep.subr.mxu0 %v22944_v20  ;;  %v14199_v54 = vld [vmem:[%s22695_s5 + $0x960] sm:$0xff] }
 0x543   : > { %10075 = vmatpush1.msra.mxu1 %v14115_v42  ;;  %16497 = vmatpush3.msra.mxu0 %v14117_v62  ;;  %v14195_v8 = vld [vmem:[%s22695_s5 + $0x940] sm:$0xff]  ;;  %v14155_v42 = vld [vmem:[%s22695_s5 + $0x818] sm:$0xff] }
 0x544   : > { %10076 = vmatprep.subr.mxu1 %v14111_v1  ;;  %16498 = vmatprep.subr.mxu0 %v22944_v20  ;;  %v14194_v62 = vld [vmem:[%s22695_s5 + $0x938] sm:$0xff] }
 0x545   : > { %10077 = vmatpush1.msra.mxu1 %v14110_v31  ;;  %16499 = vmatpush3.msra.mxu0 %v14112_v40  ;;  %v14190_v1 = vld [vmem:[%s22695_s5 + $0x918] sm:$0xff]  ;;  %v14150_v31 = vld [vmem:[%s22695_s5 + $0x7f0] sm:$0xff] }
 0x546   : > { %10078 = vmatprep.subr.mxu1 %v14106_v27  ;;  %16500 = vmatprep.subr.mxu0 %v22944_v20  ;;  %v14189_v40 = vld [vmem:[%s22695_s5 + $0x910] sm:$0xff] }
 0x547   : > { %10079 = vmatpush1.msra.mxu1 %v14105_v35  ;;  %16501 = vmatpush3.msra.mxu0 %v14107_v3  ;;  %v14185_v27 = vld [vmem:[%s22695_s5 + $0x8f0] sm:$0xff]  ;;  %v14145_v3 = vld [vmem:[%s22695_s5 + $0x7c8] sm:$0xff] }
 0x548   : > { %10080 = vmatprep.subr.mxu1 %v14101_v44  ;;  %16502 = vmatprep.subr.mxu0 %v22944_v20  ;;  %v10465_v35 = vld [vmem:[#allocation5 + $0x17] sm:$0x1]  ;;  %v14184_v44 = vld [vmem:[%s22695_s5 + $0x8e8] sm:$0xff] }
 0x549   : > { %10081 = vmatpush1.msra.mxu1 %v14100_v2  ;;  %16503 = vmatpush3.msra.mxu0 %v14102_v53  ;;  %v14180_v2 = vld [vmem:[%s22695_s5 + $0x8c8] sm:$0xff]  ;;  %v14140_v53 = vld [vmem:[%s22695_s5 + $0x7a0] sm:$0xff] }
 0x54a   : > { %10082 = vmatprep.subr.mxu1 %v14096_v23  ;;  %16504 = vmatprep.subr.mxu0 %v22944_v20  ;;  %v10509_v23 = vrot.slane %v10465_v35, 7 }
 0x54b   : > { %10083 = vmatpush1.msra.mxu1 %v14095_v16  ;;  %10116 = vmatprep.mubr.f32.mxu1 %v22944_v20  ;;  %v14179_v16 = vld [vmem:[%s22695_s5 + $0x8c0] sm:$0xff] }
 0x54c   : > { %16505 = vmatpush3.msra.mxu0 %v14097_v59  ;;  %16506 = vmatprep.mubr.msk.f32.mxu0 %vm16836_vm8, %v22944_v20  ;;  %v10464_v59 = vld [vmem:[#allocation5 + $0x7] sm:$0x1] }
 0x54d   : > { %14134 = vmatmul.mubr.msk.f32.vlgmr.msra.gmra.mxu1 %vm8482_vm5, %v20776_v57  ;;  %16507 = vmatmul.mubr.msk.f32.vlgmr.msra.gmra.mxu0 %vm8482_vm5, %v20776_v57  ;;  %v14210_v57 = vld [vmem:[%s22695_s5 + $0x9b8] sm:$0xff] }
 0x54e   : > { %10263 = vmatprep.subr.mxu1 %v14172_v11  ;;  %10334 = vmatprep.subr.mxu0 %v14174_v25  ;;  %v14217_v11 = vld [vmem:[%s22695_s5 + $0x9f0] sm:$0xff]  ;;  %v21058_v25 = vsel %vm8699_vm7, %v10509_v23, %v10464_v59  ;;  %v14222_v59 = vld [vmem:[%s22695_s5 + $0xa00] sm:$0xff] }
 0x54f   : > { %10264 = vmatpush1.msra.mxu1 %v14171_v46  ;;  %10335 = vmatpush1.msra.mxu0 %v14173_v6  ;;  %v14216_v46 = vld [vmem:[%s22695_s5 + $0x9e8] sm:$0xff]  ;;  %v14218_v6 = vld [vmem:[%s22695_s5 + $0x9f8] sm:$0xff] }
 0x550   : > { %10265 = vmatprep.subr.mxu1 %v14167_v43  ;;  %10336 = vmatprep.subr.mxu0 %v14169_v14  ;;  %v14212_v43 = vld [vmem:[%s22695_s5 + $0x9c8] sm:$0xff]  ;;  %v14211_v14 = vld [vmem:[%s22695_s5 + $0x9c0] sm:$0xff] }
 0x551   : > { %10266 = vmatpush1.msra.mxu1 %v14166_v0  ;;  %10337 = vmatpush1.msra.mxu0 %v14168_v41  ;;  %v14213_v0 = vld [vmem:[%s22695_s5 + $0x9d0] sm:$0xff]  ;;  %v14207_v41 = vld [vmem:[%s22695_s5 + $0x9a0] sm:$0xff] }
 0x552   : > { %10267 = vmatprep.subr.mxu1 %v14162_v21  ;;  %10338 = vmatprep.subr.mxu0 %v14164_v18  ;;  %v14206_v21 = vld [vmem:[%s22695_s5 + $0x998] sm:$0xff]  ;;  %v14208_v18 = vld [vmem:[%s22695_s5 + $0x9a8] sm:$0xff] }
 0x553   : > { %10268 = vmatpush1.msra.mxu1 %v14161_v51  ;;  %10339 = vmatpush1.msra.mxu0 %v14163_v26  ;;  %v14202_v51 = vld [vmem:[%s22695_s5 + $0x978] sm:$0xff]  ;;  %v14201_v26 = vld [vmem:[%s22695_s5 + $0x970] sm:$0xff] }
 0x554   : > { %10269 = vmatprep.subr.mxu1 %v14157_v47  ;;  %10340 = vmatprep.subr.mxu0 %v14159_v24  ;;  %v14203_v47 = vld [vmem:[%s22695_s5 + $0x980] sm:$0xff]  ;;  %v14197_v24 = vld [vmem:[%s22695_s5 + $0x950] sm:$0xff] }
 0x555   : > { %10270 = vmatpush1.msra.mxu1 %v14156_v58  ;;  %10341 = vmatpush1.msra.mxu0 %v14158_v38  ;;  %v14196_v58 = vld [vmem:[%s22695_s5 + $0x948] sm:$0xff]  ;;  %v14198_v38 = vld [vmem:[%s22695_s5 + $0x958] sm:$0xff] }
 0x556   : > { %10271 = vmatprep.subr.mxu1 %v14152_v60  ;;  %10342 = vmatprep.subr.mxu0 %v14154_v52  ;;  %v14192_v60 = vld [vmem:[%s22695_s5 + $0x928] sm:$0xff]  ;;  %v14191_v52 = vld [vmem:[%s22695_s5 + $0x920] sm:$0xff] }
 0x557   : > { %10272 = vmatpush1.msra.mxu1 %v14151_v45  ;;  %10343 = vmatpush1.msra.mxu0 %v14153_v36  ;;  %v14193_v45 = vld [vmem:[%s22695_s5 + $0x930] sm:$0xff]  ;;  %v14187_v36 = vld [vmem:[%s22695_s5 + $0x900] sm:$0xff] }
 0x558   : > { %10273 = vmatprep.subr.mxu1 %v14147_v49  ;;  %10344 = vmatprep.subr.mxu0 %v14149_v5  ;;  %v14186_v49 = vld [vmem:[%s22695_s5 + $0x8f8] sm:$0xff]  ;;  %v14188_v5 = vld [vmem:[%s22695_s5 + $0x908] sm:$0xff] }
 0x559   : > { %10274 = vmatpush1.msra.mxu1 %v14146_v19  ;;  %10345 = vmatpush1.msra.mxu0 %v14148_v61  ;;  %v14182_v19 = vld [vmem:[%s22695_s5 + $0x8d8] sm:$0xff]  ;;  %v14181_v61 = vld [vmem:[%s22695_s5 + $0x8d0] sm:$0xff] }
 0x55a   : > { %10275 = vmatprep.subr.mxu1 %v14142_v17  ;;  %10346 = vmatprep.subr.mxu0 %v14144_v30  ;;  %v14183_v17 = vld [vmem:[%s22695_s5 + $0x8e0] sm:$0xff] }
 0x55b   : > { %10276 = vmatpush1.msra.mxu1 %v14141_v56  ;;  %10347 = vmatpush1.msra.mxu0 %v14143_v7  ;;  %v14258_v30 = vld [vmem:[%s22695_s5 + $0xb20] sm:$0xff]  ;;  %v14257_v56 = vld [vmem:[%s22695_s5 + $0xb18] sm:$0xff]  ;;  %v14259_v7 = vld [vmem:[%s22695_s5 + $0xb28] sm:$0xff] }
 0x55c   : > { %10277 = vmatprep.subr.mxu1 %v14137_v50  ;;  %10348 = vmatprep.subr.mxu0 %v14139_v55  ;;  %v14253_v50 = vld [vmem:[%s22695_s5 + $0xaf8] sm:$0xff]  ;;  %v14255_v55 = vld [vmem:[%s22695_s5 + $0xb08] sm:$0xff] }
 0x55d   : > { %10278 = vmatpush1.msra.mxu1 %v14136_v28  ;;  %10311 = vmatprep.mubr.f32.mxu1 %v22944_v20  ;;  %v14252_v28 = vld [vmem:[%s22695_s5 + $0xaf0] sm:$0xff] }
 0x55e   : > { %10349 = vmatpush1.msra.mxu0 %v14138_v13  ;;  %10382 = vmatprep.mubr.f32.mxu0 %v22944_v20  ;;  %v14248_v13 = vld [vmem:[%s22695_s5 + $0xad0] sm:$0xff] }
 0x55f   : > { %14176 = vmatmul.mubr.msk.f32.vlgmr.msra.gmra.mxu1 %vm8482_vm5, %v20968_v63  ;;  %14177 = vmatmul.mubr.msk.f32.vlgmr.msra.gmra.mxu0 %vm8482_vm5, %v20968_v63 }
 0x560   : > { %16509 = vmatprep.subr.mxu1 %v22944_v20  ;;  %10529 = vmatprep.subr.mxu0 %v14215_v10  ;;  %v14247_v10 = vld [vmem:[%s22695_s5 + $0xac8] sm:$0xff] }
 0x561   : > { %16510 = vmatpush3.msra.mxu1 %v14175_v15  ;;  %10530 = vmatpush1.msra.mxu0 %v14214_v33  ;;  %v14243_v15 = vld [vmem:[%s22695_s5 + $0xaa8] sm:$0xff]  ;;  %v14245_v33 = vld [vmem:[%s22695_s5 + $0xab8] sm:$0xff] }
 0x562   : > { %16511 = vmatprep.subr.mxu1 %v22944_v20  ;;  %10531 = vmatprep.subr.mxu0 %v14210_v57  ;;  %v14242_v57 = vld [vmem:[%s22695_s5 + $0xaa0] sm:$0xff] }
 0x563   : > { %16512 = vmatpush3.msra.mxu1 %v14170_v22  ;;  %10532 = vmatpush1.msra.mxu0 %v14209_v37  ;;  %v14244_v22 = vld [vmem:[%s22695_s5 + $0xab0] sm:$0xff]  ;;  %v14238_v37 = vld [vmem:[%s22695_s5 + $0xa80] sm:$0xff] }
 0x564   : > { %16513 = vmatprep.subr.mxu1 %v22944_v20  ;;  %10533 = vmatprep.subr.mxu0 %v14205_v32  ;;  %v14240_v32 = vld [vmem:[%s22695_s5 + $0xa90] sm:$0xff] }
 0x565   : > { %16514 = vmatpush3.msra.mxu1 %v14165_v12  ;;  %10534 = vmatpush1.msra.mxu0 %v14204_v9 }
 0x566   : > { %16515 = vmatprep.subr.mxu1 %v22944_v20  ;;  %10535 = vmatprep.subr.mxu0 %v14200_v4  ;;  %v14237_v4 = vld [vmem:[%s22695_s5 + $0xa78] sm:$0xff] }
 0x567   : > { %16516 = vmatpush3.msra.mxu1 %v14160_v29  ;;  %10536 = vmatpush1.msra.mxu0 %v14199_v54  ;;  %v14239_v29 = vld [vmem:[%s22695_s5 + $0xa88] sm:$0xff]  ;;  %v14233_v54 = vld [vmem:[%s22695_s5 + $0xa58] sm:$0xff] }
 0x568   : > { %16517 = vmatprep.subr.mxu1 %v22944_v20  ;;  %10537 = vmatprep.subr.mxu0 %v14195_v8  ;;  %v14235_v8 = vld [vmem:[%s22695_s5 + $0xa68] sm:$0xff] }
 0x569   : > { %16518 = vmatpush3.msra.mxu1 %v14155_v42  ;;  %10538 = vmatpush1.msra.mxu0 %v14194_v62  ;;  %v14232_v42 = vld [vmem:[%s22695_s5 + $0xa50] sm:$0xff]  ;;  %v14234_v62 = vld [vmem:[%s22695_s5 + $0xa60] sm:$0xff] }
 0x56a   : > { %16519 = vmatprep.subr.mxu1 %v22944_v20  ;;  %10539 = vmatprep.subr.mxu0 %v14190_v1  ;;  %v14228_v1 = vld [vmem:[%s22695_s5 + $0xa30] sm:$0xff] }
 0x56b   : > { %16520 = vmatpush3.msra.mxu1 %v14150_v31  ;;  %10540 = vmatpush1.msra.mxu0 %v14189_v40  ;;  %v14230_v31 = vld [vmem:[%s22695_s5 + $0xa40] sm:$0xff]  ;;  %v10732_v40 = vld [vmem:[#allocation5 + $0x18] sm:$0x1] }
 0x56c   : > { %16521 = vmatprep.subr.mxu1 %v22944_v20  ;;  %10541 = vmatprep.subr.mxu0 %v14185_v27 }
 0x56d   : > { %16522 = vmatpush3.msra.mxu1 %v14145_v3  ;;  %10542 = vmatpush1.msra.mxu0 %v14184_v44  ;;  %v14227_v3 = vld [vmem:[%s22695_s5 + $0xa28] sm:$0xff]  ;;  %v14229_v44 = vld [vmem:[%s22695_s5 + $0xa38] sm:$0xff] }
 0x56e   : > { %16523 = vmatprep.subr.mxu1 %v22944_v20  ;;  %10543 = vmatprep.subr.mxu0 %v14180_v2  ;;  %v14223_v2 = vld [vmem:[%s22695_s5 + $0xa08] sm:$0xff] }
 0x56f   : > { %16524 = vmatpush3.msra.mxu1 %v14140_v53  ;;  %16525 = vmatprep.mubr.msk.f32.mxu1 %vm16836_vm8, %v22944_v20  ;;  %v14225_v53 = vld [vmem:[%s22695_s5 + $0xa18] sm:$0xff] }
 0x570   : > { %10544 = vmatpush1.msra.mxu0 %v14179_v16  ;;  %10577 = vmatprep.mubr.f32.mxu0 %v22944_v20 }
 0x571   : > { %16526 = vmatmul.mubr.msk.f32.vlgmr.msra.gmra.mxu1 %vm8482_vm5, %v20968_v63  ;;  %14219 = vmatmul.mubr.msk.f32.vlgmr.msra.gmra.mxu0 %vm8482_vm5, %v21058_v25  ;;  %v14249_v63 = vld [vmem:[%s22695_s5 + $0xad8] sm:$0xff] }
 0x572   : > { %10600 = vmatprep.subr.mxu1 %v14217_v11  ;;  %16528 = vmatprep.subr.mxu0 %v22944_v20  ;;  %v10776_v11 = vrot.slane %v10732_v40, 7  ;;  %v14287_v40 = vld [vmem:[%s22695_s5 + $0xbf0] sm:$0xff] }
 0x573   : > { %10601 = vmatpush1.msra.mxu1 %v14216_v46  ;;  %16529 = vmatpush3.msra.mxu0 %v14218_v6  ;;  %v14224_v46 = vld [vmem:[%s22695_s5 + $0xa10] sm:$0xff] }
 0x574   : > { %10602 = vmatprep.subr.mxu1 %v14212_v43  ;;  %16530 = vmatprep.subr.mxu0 %v22944_v20 }
 0x575   : > { %10603 = vmatpush1.msra.mxu1 %v14211_v14  ;;  %16531 = vmatpush3.msra.mxu0 %v14213_v0  ;;  %v10731_v0 = vld [vmem:[#allocation5 + $0x8] sm:$0x1] }
 0x576   : > { %10604 = vmatprep.subr.mxu1 %v14207_v41  ;;  %16532 = vmatprep.subr.mxu0 %v22944_v20  ;;  %v14301_v41 = vld [vmem:[%s22695_s5 + $0xc60] sm:$0xff] }
 0x577   : > { %10605 = vmatpush1.msra.mxu1 %v14206_v21  ;;  %16533 = vmatpush3.msra.mxu0 %v14208_v18  ;;  %v21260_v21 = vsel %vm8699_vm7, %v10776_v11, %v10731_v0  ;;  %v14261_v18 = vld [vmem:[%s22695_s5 + $0xb38] sm:$0xff]  ;;  %v14274_v11 = vld [vmem:[%s22695_s5 + $0xb88] sm:$0xff]  ;;  %v14267_v0 = vld [vmem:[%s22695_s5 + $0xb50] sm:$0xff] }
 0x578   : > { %10606 = vmatprep.subr.mxu1 %v14202_v51  ;;  %16534 = vmatprep.subr.mxu0 %v22944_v20  ;;  %v14300_v51 = vld [vmem:[%s22695_s5 + $0xc58] sm:$0xff] }
 0x579   : > { %10607 = vmatpush1.msra.mxu1 %v14201_v26  ;;  %16535 = vmatpush3.msra.mxu0 %v14203_v47  ;;  %v14296_v26 = vld [vmem:[%s22695_s5 + $0xc38] sm:$0xff]  ;;  %v14256_v47 = vld [vmem:[%s22695_s5 + $0xb10] sm:$0xff] }
 0x57a   : > { %10608 = vmatprep.subr.mxu1 %v14197_v24  ;;  %16536 = vmatprep.subr.mxu0 %v22944_v20  ;;  %v14295_v24 = vld [vmem:[%s22695_s5 + $0xc30] sm:$0xff] }
 0x57b   : > { %10609 = vmatpush1.msra.mxu1 %v14196_v58  ;;  %16537 = vmatpush3.msra.mxu0 %v14198_v38  ;;  %v14291_v58 = vld [vmem:[%s22695_s5 + $0xc10] sm:$0xff]  ;;  %v14251_v38 = vld [vmem:[%s22695_s5 + $0xae8] sm:$0xff] }
 0x57c   : > { %10610 = vmatprep.subr.mxu1 %v14192_v60  ;;  %16538 = vmatprep.subr.mxu0 %v22944_v20  ;;  %v14290_v60 = vld [vmem:[%s22695_s5 + $0xc08] sm:$0xff] }
 0x57d   : > { %10611 = vmatpush1.msra.mxu1 %v14191_v52  ;;  %16539 = vmatpush3.msra.mxu0 %v14193_v45  ;;  %v14286_v52 = vld [vmem:[%s22695_s5 + $0xbe8] sm:$0xff]  ;;  %v14246_v45 = vld [vmem:[%s22695_s5 + $0xac0] sm:$0xff] }
 0x57e   : > { %10612 = vmatprep.subr.mxu1 %v14187_v36  ;;  %16540 = vmatprep.subr.mxu0 %v22944_v20  ;;  %v8769_v12 = vpop.f32.mrf.mxu1  ;;  %v21202_v9 = vpop.f32.mrf.mxu0  ;;  %v14285_v36 = vld [vmem:[%s22695_s5 + $0xbe0] sm:$0xff] }
 0x57f   : > { %10613 = vmatpush1.msra.mxu1 %v14186_v49  ;;  %16541 = vmatpush3.msra.mxu0 %v14188_v5  ;;  %v14281_v49 = vld [vmem:[%s22695_s5 + $0xbc0] sm:$0xff]  ;;  %v14241_v5 = vld [vmem:[%s22695_s5 + $0xa98] sm:$0xff] }
 0x580   : > { %10614 = vmatprep.subr.mxu1 %v14182_v19  ;;  %16542 = vmatprep.subr.mxu0 %v22944_v20  ;;  %v8771_v27 = vpop.f32.mrf.mxu1  ;;  %v21228_v35 = vpop.f32.mrf.mxu0  ;;  %v14280_v19 = vld [vmem:[%s22695_s5 + $0xbb8] sm:$0xff] }
 0x581   : > { %10615 = vmatpush1.msra.mxu1 %v14181_v61  ;;  %10648 = vmatprep.mubr.f32.mxu1 %v22944_v20  ;;  %v14276_v61 = vld [vmem:[%s22695_s5 + $0xb98] sm:$0xff] }
 0x582   : > { %16543 = vmatpush3.msra.mxu0 %v14183_v17  ;;  %16544 = vmatprep.mubr.msk.f32.mxu0 %vm16836_vm8, %v22944_v20  ;;  %v14236_v17 = vld [vmem:[%s22695_s5 + $0xa70] sm:$0xff] }
 0x583   : > { %14220 = vmatmul.mubr.msk.f32.vlgmr.msra.gmra.mxu1 %vm8482_vm5, %v21058_v25  ;;  %16545 = vmatmul.mubr.msk.f32.vlgmr.msra.gmra.mxu0 %vm8482_vm5, %v21058_v25 }
 0x584   : > { %10796 = vmatprep.subr.mxu1 %v14258_v30  ;;  %10867 = vmatprep.subr.mxu0 %v14260_v48  ;;  %v14275_v30 = vld [vmem:[%s22695_s5 + $0xb90] sm:$0xff] }
 0x585   : > { %10797 = vmatpush1.msra.mxu1 %v14257_v56  ;;  %10868 = vmatpush1.msra.mxu0 %v14259_v7  ;;  %v14271_v48 = vld [vmem:[%s22695_s5 + $0xb70] sm:$0xff]  ;;  %v10998_v56 = vld [vmem:[#allocation5 + $0x19] sm:$0x1]  ;;  %v14231_v7 = vld [vmem:[%s22695_s5 + $0xa48] sm:$0xff] }
 0x586   : > { %10798 = vmatprep.subr.mxu1 %v14253_v50  ;;  %10869 = vmatprep.subr.mxu0 %v14255_v55  ;;  %v14270_v50 = vld [vmem:[%s22695_s5 + $0xb68] sm:$0xff] }
 0x587   : > { %10799 = vmatpush1.msra.mxu1 %v14252_v28  ;;  %10870 = vmatpush1.msra.mxu0 %v14254_v34  ;;  %v14266_v55 = vld [vmem:[%s22695_s5 + $0xb48] sm:$0xff] }
 0x588   : > { %10800 = vmatprep.subr.mxu1 %v14248_v13  ;;  %10871 = vmatprep.subr.mxu0 %v14250_v39  ;;  %v14226_v13 = vld [vmem:[%s22695_s5 + $0xa20] sm:$0xff]  ;;  %v11042_v39 = vrot.slane %v10998_v56, 7  ;;  %v14330_v56 = vld [vmem:[%s22695_s5 + $0xd30] sm:$0xff] }
 0x589   : > { %10801 = vmatpush1.msra.mxu1 %v14247_v10  ;;  %10872 = vmatpush1.msra.mxu0 %v14249_v63 }
 0x58a   : > { %10802 = vmatprep.subr.mxu1 %v14243_v15  ;;  %10873 = vmatprep.subr.mxu0 %v14245_v33  ;;  %v14265_v15 = vld [vmem:[%s22695_s5 + $0xb40] sm:$0xff] }
 0x58b   : > { %10803 = vmatpush1.msra.mxu1 %v14242_v57  ;;  %10874 = vmatpush1.msra.mxu0 %v14244_v22 }
 0x58c   : > { %10804 = vmatprep.subr.mxu1 %v14238_v37  ;;  %10875 = vmatprep.subr.mxu0 %v14240_v32  ;;  %v10997_v37 = vld [vmem:[#allocation5 + $0x9] sm:$0x1]  ;;  %v14303_v32 = vld [vmem:[%s22695_s5 + $0xc70] sm:$0xff] }
 0x58d   : > { %10805 = vmatpush1.msra.mxu1 %v14237_v4  ;;  %10876 = vmatpush1.msra.mxu0 %v14239_v29  ;;  %v14304_v4 = vld [vmem:[%s22695_s5 + $0xc78] sm:$0xff]  ;;  %v14298_v29 = vld [vmem:[%s22695_s5 + $0xc48] sm:$0xff] }
 0x58e   : > { %10806 = vmatprep.subr.mxu1 %v14233_v54  ;;  %10877 = vmatprep.subr.mxu0 %v14235_v8  ;;  %v14297_v54 = vld [vmem:[%s22695_s5 + $0xc40] sm:$0xff]  ;;  %v14299_v8 = vld [vmem:[%s22695_s5 + $0xc50] sm:$0xff] }
 0x58f   : > { %10807 = vmatpush1.msra.mxu1 %v14232_v42  ;;  %10878 = vmatpush1.msra.mxu0 %v14234_v62  ;;  %v21242_v23 = vpop.f32.mrf.mxu1  ;;  %v8987_v16 = vpop.f32.mrf.mxu0  ;;  %v14293_v42 = vld [vmem:[%s22695_s5 + $0xc20] sm:$0xff]  ;;  %v14292_v62 = vld [vmem:[%s22695_s5 + $0xc18] sm:$0xff] }
 0x590   : > { %10808 = vmatprep.subr.mxu1 %v14228_v1  ;;  %10879 = vmatprep.subr.mxu0 %v14230_v31  ;;  %v21247_v25 = vadd.f32 %v8987_v16, %v8769_v12  ;;  %v21359_v12 = vsel %vm8699_vm7, %v11042_v39, %v10997_v37  ;;  %v14294_v1 = vld [vmem:[%s22695_s5 + $0xc28] sm:$0xff]  ;;  %v14288_v31 = vld [vmem:[%s22695_s5 + $0xbf8] sm:$0xff]  ;;  %v14273_v16 = vld [vmem:[%s22695_s5 + $0xb80] sm:$0xff] }
 0x591   : > { %10809 = vmatpush1.msra.mxu1 %v14227_v3  ;;  %10880 = vmatpush1.msra.mxu0 %v14229_v44  ;;  %v16413_v6 = vpop.f32.mrf.mxu1  ;;  %v8989_v43 = vpop.f32.mrf.mxu0  ;;  %v14282_v3 = vld [vmem:[%s22695_s5 + $0xbc8] sm:$0xff]  ;;  %v14284_v44 = vld [vmem:[%s22695_s5 + $0xbd8] sm:$0xff]  ;;  %v14318_v39 = vld [vmem:[%s22695_s5 + $0xcd0] sm:$0xff] }
 0x592   : > { %10810 = vmatprep.subr.mxu1 %v14223_v2  ;;  %10881 = vmatprep.subr.mxu0 %v14225_v53  ;;  %v21252_v14 = vadd.f32 %v8989_v43, %v8771_v27  ;;  %v14289_v27 = vld [vmem:[%s22695_s5 + $0xc00] sm:$0xff]  ;;  %v14278_v2 = vld [vmem:[%s22695_s5 + $0xba8] sm:$0xff]  ;;  %v14315_v37 = vld [vmem:[%s22695_s5 + $0xcb8] sm:$0xff] }
 0x593   : > { %10811 = vmatpush1.msra.mxu1 %v14222_v59  ;;  %10844 = vmatprep.mubr.f32.mxu1 %v22944_v20  ;;  %v14277_v53 = vld [vmem:[%s22695_s5 + $0xba0] sm:$0xff]  ;;  %v14272_v59 = vld [vmem:[%s22695_s5 + $0xb78] sm:$0xff] }
 0x594   : > { %10882 = vmatpush1.msra.mxu0 %v14224_v46  ;;  %10915 = vmatprep.mubr.f32.mxu0 %v22944_v20  ;;  %v14268_v46 = vld [vmem:[%s22695_s5 + $0xb58] sm:$0xff] }
 0x595   : > { %14262 = vmatmul.mubr.msk.f32.vlgmr.msra.gmra.mxu1 %vm8482_vm5, %v21260_v21  ;;  %14263 = vmatmul.mubr.msk.f32.vlgmr.msra.gmra.mxu0 %vm8482_vm5, %v21260_v21 }
 0x596   : > { %16547 = vmatprep.subr.mxu1 %v22944_v20  ;;  %11062 = vmatprep.subr.mxu0 %v14301_v41 }
 0x597   : > { %16548 = vmatpush3.msra.mxu1 %v14261_v18  ;;  %11063 = vmatpush1.msra.mxu0 %v14300_v51  ;;  %v14269_v18 = vld [vmem:[%s22695_s5 + $0xb60] sm:$0xff] }
 0x598   : > { %16549 = vmatprep.subr.mxu1 %v22944_v20  ;;  %11064 = vmatprep.subr.mxu0 %v14296_v26 }
 0x599   : > { %16550 = vmatpush3.msra.mxu1 %v14256_v47  ;;  %11065 = vmatpush1.msra.mxu0 %v14295_v24  ;;  %v14344_v24 = vld [vmem:[%s22695_s5 + $0xda0] sm:$0xff] }
 0x59a   : > { %16551 = vmatprep.subr.mxu1 %v22944_v20  ;;  %11066 = vmatprep.subr.mxu0 %v14291_v58  ;;  %v14346_v58 = vld [vmem:[%s22695_s5 + $0xdb0] sm:$0xff] }
 0x59b   : > { %16552 = vmatpush3.msra.mxu1 %v14251_v38  ;;  %11067 = vmatpush1.msra.mxu0 %v14290_v60  ;;  %v14345_v38 = vld [vmem:[%s22695_s5 + $0xda8] sm:$0xff]  ;;  %v14339_v60 = vld [vmem:[%s22695_s5 + $0xd78] sm:$0xff] }
 0x59c   : > { %16553 = vmatprep.subr.mxu1 %v22944_v20  ;;  %11068 = vmatprep.subr.mxu0 %v14286_v52  ;;  %v14341_v52 = vld [vmem:[%s22695_s5 + $0xd88] sm:$0xff] }
 0x59d   : > { %16554 = vmatpush3.msra.mxu1 %v14246_v45  ;;  %11069 = vmatpush1.msra.mxu0 %v14285_v36  ;;  %v14338_v45 = vld [vmem:[%s22695_s5 + $0xd70] sm:$0xff]  ;;  %v14340_v36 = vld [vmem:[%s22695_s5 + $0xd80] sm:$0xff] }
 0x59e   : > { %16555 = vmatprep.subr.mxu1 %v22944_v20  ;;  %11070 = vmatprep.subr.mxu0 %v14281_v49  ;;  %v14334_v49 = vld [vmem:[%s22695_s5 + $0xd50] sm:$0xff] }
 0x59f   : > { %16556 = vmatpush3.msra.mxu1 %v14241_v5  ;;  %11071 = vmatpush1.msra.mxu0 %v14280_v19  ;;  %v14336_v5 = vld [vmem:[%s22695_s5 + $0xd60] sm:$0xff]  ;;  %v14333_v19 = vld [vmem:[%s22695_s5 + $0xd48] sm:$0xff] }
 0x5a0   : > { %16557 = vmatprep.subr.mxu1 %v22944_v20  ;;  %11072 = vmatprep.subr.mxu0 %v14276_v61  ;;  %v14335_v61 = vld [vmem:[%s22695_s5 + $0xd58] sm:$0xff] }
 0x5a1   : > { %16558 = vmatpush3.msra.mxu1 %v14236_v17  ;;  %11073 = vmatpush1.msra.mxu0 %v14275_v30  ;;  %v9058_v28 = vpop.f32.mrf.mxu1  ;;  %v9129_v34 = vpop.f32.mrf.mxu0  ;;  %v14329_v17 = vld [vmem:[%s22695_s5 + $0xd28] sm:$0xff]  ;;  %v14331_v30 = vld [vmem:[%s22695_s5 + $0xd38] sm:$0xff] }
 0x5a2   : > { %16559 = vmatprep.subr.mxu1 %v22944_v20  ;;  %11074 = vmatprep.subr.mxu0 %v14271_v48  ;;  %v21340_v10 = vadd.f32 %v9058_v28, %v21202_v9  ;;  %v21343_v63 = vadd.f32 %v9129_v34, %v21242_v23  ;;  %v14302_v9 = vld [vmem:[%s22695_s5 + $0xc68] sm:$0xff]  ;;  %v14279_v23 = vld [vmem:[%s22695_s5 + $0xbb0] sm:$0xff]  ;;  %v14328_v48 = vld [vmem:[%s22695_s5 + $0xd20] sm:$0xff] }
 0x5a3   : > { %16560 = vmatpush3.msra.mxu1 %v14231_v7  ;;  %11075 = vmatpush1.msra.mxu0 %v14270_v50  ;;  %v9060_v33 = vpop.f32.mrf.mxu1  ;;  %v16432_v57 = vpop.f32.mrf.mxu0  ;;  %v14324_v7 = vld [vmem:[%s22695_s5 + $0xd00] sm:$0xff]  ;;  %v14326_v50 = vld [vmem:[%s22695_s5 + $0xd10] sm:$0xff]  ;;  %v14325_v28 = vld [vmem:[%s22695_s5 + $0xd08] sm:$0xff] }
 0x5a4   : > { %16561 = vmatprep.subr.mxu1 %v22944_v20  ;;  %11076 = vmatprep.subr.mxu0 %v14266_v55  ;;  %v21350_v22 = vadd.f32 %v9060_v33, %v21228_v35  ;;  %v14283_v35 = vld [vmem:[%s22695_s5 + $0xbd0] sm:$0xff]  ;;  %v14323_v55 = vld [vmem:[%s22695_s5 + $0xcf8] sm:$0xff]  ;;  %v14316_v33 = vld [vmem:[%s22695_s5 + $0xcc0] sm:$0xff] }
 0x5a5   : > { %16562 = vmatpush3.msra.mxu1 %v14226_v13  ;;  %16563 = vmatprep.mubr.msk.f32.mxu1 %vm16836_vm8, %v22944_v20  ;;  %v14319_v34 = vld [vmem:[%s22695_s5 + $0xcd8] sm:$0xff]  ;;  %v14321_v13 = vld [vmem:[%s22695_s5 + $0xce8] sm:$0xff] }
 0x5a6   : > { %11077 = vmatpush1.msra.mxu0 %v14265_v15  ;;  %11110 = vmatprep.mubr.f32.mxu0 %v22944_v20  ;;  %v14314_v15 = vld [vmem:[%s22695_s5 + $0xcb0] sm:$0xff]  ;;  %v11264_v57 = vld [vmem:[#allocation5 + $0x1a] sm:$0x1] }
 0x5a7   : > { %16564 = vmatmul.mubr.msk.f32.vlgmr.msra.gmra.mxu1 %vm8482_vm5, %v21260_v21  ;;  %14305 = vmatmul.mubr.msk.f32.vlgmr.msra.gmra.mxu0 %vm8482_vm5, %v21359_v12 }
 0x5a8   : > { %11133 = vmatprep.subr.mxu1 %v14303_v32  ;;  %16566 = vmatprep.subr.mxu0 %v22944_v20  ;;  %v14309_v32 = vld [vmem:[%s22695_s5 + $0xc88] sm:$0xff] }
 0x5a9   : > { %11134 = vmatpush1.msra.mxu1 %v14302_v9  ;;  %16567 = vmatpush3.msra.mxu0 %v14304_v4 }
 0x5aa   : > { %11135 = vmatprep.subr.mxu1 %v14298_v29  ;;  %16568 = vmatprep.subr.mxu0 %v22944_v20  ;;  %v14308_v29 = vld [vmem:[%s22695_s5 + $0xc80] sm:$0xff] }
 0x5ab   : > { %11136 = vmatpush1.msra.mxu1 %v14297_v54  ;;  %16569 = vmatpush3.msra.mxu0 %v14299_v8  ;;  %v11308_v54 = vrot.slane %v11264_v57, 7  ;;  %v14375_v57 = vld [vmem:[%s22695_s5 + $0xe80] sm:$0xff] }
 0x5ac   : > { %11137 = vmatprep.subr.mxu1 %v14293_v42  ;;  %16570 = vmatprep.subr.mxu0 %v22944_v20 }
 0x5ad   : > { %11138 = vmatpush1.msra.mxu1 %v14292_v62  ;;  %16571 = vmatpush3.msra.mxu0 %v14294_v1  ;;  %v14310_v62 = vld [vmem:[%s22695_s5 + $0xc90] sm:$0xff] }
 0x5ae   : > { %11139 = vmatprep.subr.mxu1 %v14288_v31  ;;  %16572 = vmatprep.subr.mxu0 %v22944_v20 }
 0x5af   : > { %11140 = vmatpush1.msra.mxu1 %v14287_v40  ;;  %16573 = vmatpush3.msra.mxu0 %v14289_v27  ;;  %v14387_v27 = vld [vmem:[%s22695_s5 + $0xee0] sm:$0xff] }
 0x5b0   : > { %11141 = vmatprep.subr.mxu1 %v14283_v35  ;;  %16574 = vmatprep.subr.mxu0 %v22944_v20 }
 0x5b1   : > { %11142 = vmatpush1.msra.mxu1 %v14282_v3  ;;  %16575 = vmatpush3.msra.mxu0 %v14284_v44  ;;  %v14347_v3 = vld [vmem:[%s22695_s5 + $0xdb8] sm:$0xff] }
 0x5b2   : > { %11143 = vmatprep.subr.mxu1 %v14278_v2  ;;  %16576 = vmatprep.subr.mxu0 %v22944_v20  ;;  %v14386_v44 = vld [vmem:[%s22695_s5 + $0xed8] sm:$0xff] }
 0x5b3   : > { %11144 = vmatpush1.msra.mxu1 %v14277_v53  ;;  %16577 = vmatpush3.msra.mxu0 %v14279_v23  ;;  %v9248_v6 = vpop.f32.mrf.mxu1  ;;  %v9319_v43 = vpop.f32.mrf.mxu0  ;;  %v14382_v2 = vld [vmem:[%s22695_s5 + $0xeb8] sm:$0xff]  ;;  %v14342_v53 = vld [vmem:[%s22695_s5 + $0xd90] sm:$0xff] }
 0x5b4   : > { %11145 = vmatprep.subr.mxu1 %v14273_v16  ;;  %16578 = vmatprep.subr.mxu0 %v22944_v20  ;;  %v21439_v41 = vadd.f32 %v9248_v6, %v21247_v25  ;;  %v21442_v21 = vadd.f32 %v9319_v43, %v21340_v10  ;;  %v14320_v10 = vld [vmem:[%s22695_s5 + $0xce0] sm:$0xff]  ;;  %v14381_v23 = vld [vmem:[%s22695_s5 + $0xeb0] sm:$0xff] }
 0x5b5   : > { %11146 = vmatpush1.msra.mxu1 %v14272_v59  ;;  %16579 = vmatpush3.msra.mxu0 %v14274_v11  ;;  %v9250_v51 = vpop.f32.mrf.mxu1  ;;  %v9321_v26 = vpop.f32.mrf.mxu0  ;;  %v14377_v16 = vld [vmem:[%s22695_s5 + $0xe90] sm:$0xff]  ;;  %v14337_v59 = vld [vmem:[%s22695_s5 + $0xd68] sm:$0xff]  ;;  %v14332_v6 = vld [vmem:[%s22695_s5 + $0xd40] sm:$0xff] }
 0x5b6   : > { %11147 = vmatprep.subr.mxu1 %v14268_v46  ;;  %16580 = vmatprep.subr.mxu0 %v22944_v20  ;;  %v21449_v47 = vadd.f32 %v9250_v51, %v21252_v14  ;;  %v21452_v25 = vadd.f32 %v9321_v26, %v21350_v22  ;;  %v14343_v14 = vld [vmem:[%s22695_s5 + $0xd98] sm:$0xff]  ;;  %v14313_v22 = vld [vmem:[%s22695_s5 + $0xca8] sm:$0xff]  ;;  %v14371_v43 = vld [vmem:[%s22695_s5 + $0xe60] sm:$0xff] }
 0x5b7   : > { %11148 = vmatpush1.msra.mxu1 %v14267_v0  ;;  %11181 = vmatprep.mubr.f32.mxu1 %v22944_v20  ;;  %v14376_v11 = vld [vmem:[%s22695_s5 + $0xe88] sm:$0xff]  ;;  %v14367_v0 = vld [vmem:[%s22695_s5 + $0xe40] sm:$0xff]  ;;  %v14362_v51 = vld [vmem:[%s22695_s5 + $0xe18] sm:$0xff] }
 0x5b8   : > { %16581 = vmatpush3.msra.mxu0 %v14269_v18  ;;  %16582 = vmatprep.mubr.msk.f32.mxu0 %vm16836_vm8, %v22944_v20  ;;  %v14372_v46 = vld [vmem:[%s22695_s5 + $0xe68] sm:$0xff]  ;;  %v14366_v18 = vld [vmem:[%s22695_s5 + $0xe38] sm:$0xff]  ;;  %v14322_v26 = vld [vmem:[%s22695_s5 + $0xcf0] sm:$0xff] }
 0x5b9   : > { %14306 = vmatmul.mubr.msk.f32.vlgmr.msra.gmra.mxu1 %vm8482_vm5, %v21359_v12  ;;  %16583 = vmatmul.mubr.msk.f32.vlgmr.msra.gmra.mxu0 %vm8482_vm5, %v21359_v12  ;;  %v14311_v12 = vld [vmem:[%s22695_s5 + $0xc98] sm:$0xff] }
 0x5ba   : > { %11328 = vmatprep.subr.mxu1 %v14344_v24  ;;  %11399 = vmatprep.subr.mxu0 %v14346_v58  ;;  %v14357_v24 = vld [vmem:[%s22695_s5 + $0xdf0] sm:$0xff]  ;;  %v11530_v58 = vld [vmem:[#allocation5 + $0x1b] sm:$0x1] }
 0x5bb   : > { %11329 = vmatpush1.msra.mxu1 %v14343_v14  ;;  %11400 = vmatpush1.msra.mxu0 %v14345_v38  ;;  %v14317_v14 = vld [vmem:[%s22695_s5 + $0xcc8] sm:$0xff] }
 0x5bc   : > { %11330 = vmatprep.subr.mxu1 %v14339_v60  ;;  %11401 = vmatprep.subr.mxu0 %v14341_v52  ;;  %v14356_v38 = vld [vmem:[%s22695_s5 + $0xde8] sm:$0xff] }
 0x5bd   : > { %11331 = vmatpush1.msra.mxu1 %v14338_v45  ;;  %11402 = vmatpush1.msra.mxu0 %v14340_v36  ;;  %v14352_v60 = vld [vmem:[%s22695_s5 + $0xdc8] sm:$0xff]  ;;  %v14312_v36 = vld [vmem:[%s22695_s5 + $0xca0] sm:$0xff] }
 0x5be   : > { %11332 = vmatprep.subr.mxu1 %v14334_v49  ;;  %11403 = vmatprep.subr.mxu0 %v14336_v5  ;;  %v11574_v49 = vrot.slane %v11530_v58, 7  ;;  %v14416_v58 = vld [vmem:[%s22695_s5 + $0xfb0] sm:$0xff] }
 0x5bf   : > { %11333 = vmatpush1.msra.mxu1 %v14333_v19  ;;  %11404 = vmatpush1.msra.mxu0 %v14335_v61  ;;  %v14351_v61 = vld [vmem:[%s22695_s5 + $0xdc0] sm:$0xff] }
 0x5c0   : > { %11334 = vmatprep.subr.mxu1 %v14329_v17  ;;  %11405 = vmatprep.subr.mxu0 %v14331_v30 }
 0x5c1   : > { %11335 = vmatpush1.msra.mxu1 %v14328_v48  ;;  %11406 = vmatpush1.msra.mxu0 %v14330_v56  ;;  %v14389_v56 = vld [vmem:[%s22695_s5 + $0xef0] sm:$0xff] }
 0x5c2   : > { %11336 = vmatprep.subr.mxu1 %v14324_v7  ;;  %11407 = vmatprep.subr.mxu0 %v14326_v50  ;;  %v14390_v50 = vld [vmem:[%s22695_s5 + $0xef8] sm:$0xff] }
 0x5c3   : > { %11337 = vmatpush1.msra.mxu1 %v14323_v55  ;;  %11408 = vmatpush1.msra.mxu0 %v14325_v28  ;;  %v14384_v55 = vld [vmem:[%s22695_s5 + $0xec8] sm:$0xff]  ;;  %v14383_v28 = vld [vmem:[%s22695_s5 + $0xec0] sm:$0xff] }
 0x5c4   : > { %11338 = vmatprep.subr.mxu1 %v14319_v34  ;;  %11409 = vmatprep.subr.mxu0 %v14321_v13  ;;  %v14385_v34 = vld [vmem:[%s22695_s5 + $0xed0] sm:$0xff]  ;;  %v14379_v13 = vld [vmem:[%s22695_s5 + $0xea0] sm:$0xff] }
 0x5c5   : > { %11339 = vmatpush1.msra.mxu1 %v14318_v39  ;;  %11410 = vmatpush1.msra.mxu0 %v14320_v10  ;;  %v9390_v9 = vpop.f32.mrf.mxu1  ;;  %v9514_v4 = vpop.f32.mrf.mxu0  ;;  %v14378_v39 = vld [vmem:[%s22695_s5 + $0xe98] sm:$0xff]  ;;  %v14380_v10 = vld [vmem:[%s22695_s5 + $0xea8] sm:$0xff] }
 0x5c6   : > { %11340 = vmatprep.subr.mxu1 %v14314_v15  ;;  %11411 = vmatprep.subr.mxu0 %v14316_v33  ;;  %v21555_v8 = vadd.f32 %v9390_v9, %v21343_v63  ;;  %v21558_v42 = vadd.f32 %v9514_v4, %v21439_v41  ;;  %v11263_v63 = vld [vmem:[#allocation5 + $0xa] sm:$0x1]  ;;  %v14327_v41 = vld [vmem:[%s22695_s5 + $0xd18] sm:$0xff]  ;;  %v14373_v33 = vld [vmem:[%s22695_s5 + $0xe70] sm:$0xff] }
 0x5c7   : > { %11341 = vmatpush1.msra.mxu1 %v14313_v22  ;;  %11412 = vmatpush1.msra.mxu0 %v14315_v37  ;;  %v16451_v1 = vpop.f32.mrf.mxu1  ;;  %v9516_v31 = vpop.f32.mrf.mxu0  ;;  %v21572_v35 = vsel %vm8699_vm7, %v11308_v54, %v11263_v63  ;;  %v14374_v15 = vld [vmem:[%s22695_s5 + $0xe78] sm:$0xff]  ;;  %v14369_v22 = vld [vmem:[%s22695_s5 + $0xe50] sm:$0xff]  ;;  %v14368_v37 = vld [vmem:[%s22695_s5 + $0xe48] sm:$0xff] }
 0x5c8   : > { %11342 = vmatprep.subr.mxu1 %v14309_v32  ;;  %11413 = vmatprep.subr.mxu0 %v14311_v12  ;;  %v21564_v40 = vadd.f32 %v9516_v31, %v21449_v47  ;;  %v14361_v47 = vld [vmem:[%s22695_s5 + $0xe10] sm:$0xff]  ;;  %v14370_v32 = vld [vmem:[%s22695_s5 + $0xe58] sm:$0xff]  ;;  %v14364_v12 = vld [vmem:[%s22695_s5 + $0xe28] sm:$0xff] }
 0x5c9   : > { %11343 = vmatpush1.msra.mxu1 %v14308_v29  ;;  %11376 = vmatprep.mubr.f32.mxu1 %v22944_v20  ;;  %v14363_v9 = vld [vmem:[%s22695_s5 + $0xe20] sm:$0xff]  ;;  %v14365_v4 = vld [vmem:[%s22695_s5 + $0xe30] sm:$0xff]  ;;  %v14358_v54 = vld [vmem:[%s22695_s5 + $0xdf8] sm:$0xff] }
 0x5ca   : > { %11414 = vmatpush1.msra.mxu0 %v14310_v62  ;;  %11447 = vmatprep.mubr.f32.mxu0 %v22944_v20  ;;  %v14359_v29 = vld [vmem:[%s22695_s5 + $0xe00] sm:$0xff]  ;;  %v14354_v62 = vld [vmem:[%s22695_s5 + $0xdd8] sm:$0xff]  ;;  %v14353_v63 = vld [vmem:[%s22695_s5 + $0xdd0] sm:$0xff] }
 0x5cb   : > { %14348 = vmatmul.mubr.msk.f32.vlgmr.msra.gmra.mxu1 %vm8482_vm5, %v21572_v35  ;;  %14349 = vmatmul.mubr.msk.f32.vlgmr.msra.gmra.mxu0 %vm8482_vm5, %v21572_v35 }
 0x5cc   : > { %16585 = vmatprep.subr.mxu1 %v22944_v20  ;;  %11594 = vmatprep.subr.mxu0 %v14387_v27 }
 0x5cd   : > { %16586 = vmatpush3.msra.mxu1 %v14347_v3  ;;  %11595 = vmatpush1.msra.mxu0 %v14386_v44  ;;  %v14355_v3 = vld [vmem:[%s22695_s5 + $0xde0] sm:$0xff] }
 0x5ce   : > { %16587 = vmatprep.subr.mxu1 %v22944_v20  ;;  %11596 = vmatprep.subr.mxu0 %v14382_v2 }
 0x5cf   : > { %16588 = vmatpush3.msra.mxu1 %v14342_v53  ;;  %11597 = vmatpush1.msra.mxu0 %v14381_v23  ;;  %v14430_v23 = vld [vmem:[%s22695_s5 + $0x1020] sm:$0xff] }
 0x5d0   : > { %16589 = vmatprep.subr.mxu1 %v22944_v20  ;;  %11598 = vmatprep.subr.mxu0 %v14377_v16  ;;  %v14432_v16 = vld [vmem:[%s22695_s5 + $0x1030] sm:$0xff] }
 0x5d1   : > { %16590 = vmatpush3.msra.mxu1 %v14337_v59  ;;  %11599 = vmatpush1.msra.mxu0 %v14376_v11  ;;  %v14431_v59 = vld [vmem:[%s22695_s5 + $0x1028] sm:$0xff]  ;;  %v14425_v11 = vld [vmem:[%s22695_s5 + $0xff8] sm:$0xff] }
 0x5d2   : > { %16591 = vmatprep.subr.mxu1 %v22944_v20  ;;  %11600 = vmatprep.subr.mxu0 %v14372_v46  ;;  %v14427_v46 = vld [vmem:[%s22695_s5 + $0x1008] sm:$0xff] }
 0x5d3   : > { %16592 = vmatpush3.msra.mxu1 %v14332_v6  ;;  %11601 = vmatpush1.msra.mxu0 %v14371_v43  ;;  %v14424_v6 = vld [vmem:[%s22695_s5 + $0xff0] sm:$0xff]  ;;  %v14426_v43 = vld [vmem:[%s22695_s5 + $0x1000] sm:$0xff] }
 0x5d4   : > { %16593 = vmatprep.subr.mxu1 %v22944_v20  ;;  %11602 = vmatprep.subr.mxu0 %v14367_v0  ;;  %v14420_v0 = vld [vmem:[%s22695_s5 + $0xfd0] sm:$0xff] }
 0x5d5   : > { %16594 = vmatpush3.msra.mxu1 %v14327_v41  ;;  %11603 = vmatpush1.msra.mxu0 %v14366_v18  ;;  %v14422_v41 = vld [vmem:[%s22695_s5 + $0xfe0] sm:$0xff]  ;;  %v14419_v18 = vld [vmem:[%s22695_s5 + $0xfc8] sm:$0xff] }
 0x5d6   : > { %16595 = vmatprep.subr.mxu1 %v22944_v20  ;;  %11604 = vmatprep.subr.mxu0 %v14362_v51  ;;  %v14421_v51 = vld [vmem:[%s22695_s5 + $0xfd8] sm:$0xff] }
 0x5d7   : > { %16596 = vmatpush3.msra.mxu1 %v14322_v26  ;;  %11605 = vmatpush1.msra.mxu0 %v14361_v47  ;;  %v9585_v52 = vpop.f32.mrf.mxu1  ;;  %v9656_v45 = vpop.f32.mrf.mxu0  ;;  %v14415_v26 = vld [vmem:[%s22695_s5 + $0xfa8] sm:$0xff]  ;;  %v14417_v47 = vld [vmem:[%s22695_s5 + $0xfb8] sm:$0xff] }
 0x5d8   : > { %16597 = vmatprep.subr.mxu1 %v22944_v20  ;;  %11606 = vmatprep.subr.mxu0 %v14357_v24  ;;  %v21652_v5 = vadd.f32 %v9585_v52, %v21442_v21  ;;  %v21655_v19 = vadd.f32 %v9656_v45, %v21555_v8  ;;  %v11529_v21 = vld [vmem:[#allocation5 + $0xb] sm:$0x1]  ;;  %v14414_v24 = vld [vmem:[%s22695_s5 + $0xfa0] sm:$0xff]  ;;  %v14405_v45 = vld [vmem:[%s22695_s5 + $0xf58] sm:$0xff] }
 0x5d9   : > { %16598 = vmatpush3.msra.mxu1 %v14317_v14  ;;  %11607 = vmatpush1.msra.mxu0 %v14356_v38  ;;  %v9587_v17 = vpop.f32.mrf.mxu1  ;;  %v16470_v30 = vpop.f32.mrf.mxu0  ;;  %v21671_v7 = vsel %vm8699_vm7, %v11574_v49, %v11529_v21  ;;  %v14360_v8 = vld [vmem:[%s22695_s5 + $0xe08] sm:$0xff]  ;;  %v14410_v14 = vld [vmem:[%s22695_s5 + $0xf80] sm:$0xff]  ;;  %v14412_v38 = vld [vmem:[%s22695_s5 + $0xf90] sm:$0xff] }
 0x5da   : > { %16599 = vmatprep.subr.mxu1 %v22944_v20  ;;  %11608 = vmatprep.subr.mxu0 %v14352_v60  ;;  %v21662_v48 = vadd.f32 %v9587_v17, %v21452_v25  ;;  %v14388_v25 = vld [vmem:[%s22695_s5 + $0xee8] sm:$0xff]  ;;  %v14409_v60 = vld [vmem:[%s22695_s5 + $0xf78] sm:$0xff]  ;;  %v14404_v49 = vld [vmem:[%s22695_s5 + $0xf50] sm:$0xff] }
 0x5db   : > { %16600 = vmatpush3.msra.mxu1 %v14312_v36  ;;  %16601 = vmatprep.mubr.msk.f32.mxu1 %vm16836_vm8, %v22944_v20  ;;  %v14411_v52 = vld [vmem:[%s22695_s5 + $0xf88] sm:$0xff]  ;;  %v14402_v17 = vld [vmem:[%s22695_s5 + $0xf40] sm:$0xff]  ;;  %v11797_v30 = vld [vmem:[#allocation5 + $0x1c] sm:$0x1] }
 0x5dc   : > { %11609 = vmatpush1.msra.mxu0 %v14351_v61  ;;  %11642 = vmatprep.mubr.f32.mxu0 %v22944_v20  ;;  %v14407_v36 = vld [vmem:[%s22695_s5 + $0xf68] sm:$0xff]  ;;  %v14400_v61 = vld [vmem:[%s22695_s5 + $0xf30] sm:$0xff]  ;;  %v14401_v21 = vld [vmem:[%s22695_s5 + $0xf38] sm:$0xff] }
 0x5dd   : > { %16602 = vmatmul.mubr.msk.f32.vlgmr.msra.gmra.mxu1 %vm8482_vm5, %v21572_v35  ;;  %14391 = vmatmul.mubr.msk.f32.vlgmr.msra.gmra.mxu0 %vm8482_vm5, %v21671_v7 }
 0x5de   : > { %11665 = vmatprep.subr.mxu1 %v14389_v56  ;;  %16604 = vmatprep.subr.mxu0 %v22944_v20  ;;  %v14395_v56 = vld [vmem:[%s22695_s5 + $0xf08] sm:$0xff] }
 0x5df   : > { %11666 = vmatpush1.msra.mxu1 %v14388_v25  ;;  %16605 = vmatpush3.msra.mxu0 %v14390_v50 }
 0x5e0   : > { %11667 = vmatprep.subr.mxu1 %v14384_v55  ;;  %16606 = vmatprep.subr.mxu0 %v22944_v20  ;;  %v14394_v55 = vld [vmem:[%s22695_s5 + $0xf00] sm:$0xff] }
 0x5e1   : > { %11668 = vmatpush1.msra.mxu1 %v14383_v28  ;;  %16607 = vmatpush3.msra.mxu0 %v14385_v34  ;;  %v11841_v28 = vrot.slane %v11797_v30, 7  ;;  %v14461_v30 = vld [vmem:[%s22695_s5 + $0x1100] sm:$0xff] }
 0x5e2   : > { %11669 = vmatprep.subr.mxu1 %v14379_v13  ;;  %16608 = vmatprep.subr.mxu0 %v22944_v20 }
 0x5e3   : > { %11670 = vmatpush1.msra.mxu1 %v14378_v39  ;;  %16609 = vmatpush3.msra.mxu0 %v14380_v10  ;;  %v14396_v39 = vld [vmem:[%s22695_s5 + $0xf10] sm:$0xff] }
 0x5e4   : > { %11671 = vmatprep.subr.mxu1 %v14374_v15  ;;  %16610 = vmatprep.subr.mxu0 %v22944_v20 }
 0x5e5   : > { %11672 = vmatpush1.msra.mxu1 %v14373_v33  ;;  %16611 = vmatpush3.msra.mxu0 %v14375_v57  ;;  %v14473_v57 = vld [vmem:[%s22695_s5 + $0x1160] sm:$0xff] }
 0x5e6   : > { %11673 = vmatprep.subr.mxu1 %v14369_v22  ;;  %16612 = vmatprep.subr.mxu0 %v22944_v20 }
 0x5e7   : > { %11674 = vmatpush1.msra.mxu1 %v14368_v37  ;;  %16613 = vmatpush3.msra.mxu0 %v14370_v32  ;;  %v14433_v37 = vld [vmem:[%s22695_s5 + $0x1038] sm:$0xff] }
 0x5e8   : > { %11675 = vmatprep.subr.mxu1 %v14364_v12  ;;  %16614 = vmatprep.subr.mxu0 %v22944_v20  ;;  %v14472_v32 = vld [vmem:[%s22695_s5 + $0x1158] sm:$0xff] }
 0x5e9   : > { %11676 = vmatpush1.msra.mxu1 %v14363_v9  ;;  %16615 = vmatpush3.msra.mxu0 %v14365_v4  ;;  %v9781_v1 = vpop.f32.mrf.mxu1  ;;  %v9852_v31 = vpop.f32.mrf.mxu0  ;;  %v14468_v12 = vld [vmem:[%s22695_s5 + $0x1138] sm:$0xff]  ;;  %v14428_v9 = vld [vmem:[%s22695_s5 + $0x1010] sm:$0xff] }
 0x5ea   : > { %11677 = vmatprep.subr.mxu1 %v14359_v29  ;;  %16616 = vmatprep.subr.mxu0 %v22944_v20  ;;  %v21751_v27 = vadd.f32 %v9781_v1, %v21558_v42  ;;  %v21754_v35 = vadd.f32 %v9852_v31, %v21652_v5  ;;  %v14406_v5 = vld [vmem:[%s22695_s5 + $0xf60] sm:$0xff]  ;;  %v14467_v4 = vld [vmem:[%s22695_s5 + $0x1130] sm:$0xff] }
 0x5eb   : > { %11678 = vmatpush1.msra.mxu1 %v14358_v54  ;;  %16617 = vmatpush3.msra.mxu0 %v14360_v8  ;;  %v9783_v44 = vpop.f32.mrf.mxu1  ;;  %v9854_v2 = vpop.f32.mrf.mxu0  ;;  %v14463_v29 = vld [vmem:[%s22695_s5 + $0x1110] sm:$0xff]  ;;  %v14423_v54 = vld [vmem:[%s22695_s5 + $0xfe8] sm:$0xff]  ;;  %v14418_v1 = vld [vmem:[%s22695_s5 + $0xfc0] sm:$0xff] }
 0x5ec   : > { %11679 = vmatprep.subr.mxu1 %v14354_v62  ;;  %16618 = vmatprep.subr.mxu0 %v22944_v20  ;;  %v21761_v53 = vadd.f32 %v9783_v44, %v21564_v40  ;;  %v21764_v42 = vadd.f32 %v9854_v2, %v21662_v48  ;;  %v14429_v40 = vld [vmem:[%s22695_s5 + $0x1018] sm:$0xff]  ;;  %v14399_v48 = vld [vmem:[%s22695_s5 + $0xf28] sm:$0xff]  ;;  %v14457_v31 = vld [vmem:[%s22695_s5 + $0x10e0] sm:$0xff] }
 0x5ed   : > { %11680 = vmatpush1.msra.mxu1 %v14353_v63  ;;  %11713 = vmatprep.mubr.f32.mxu1 %v22944_v20  ;;  %v14462_v8 = vld [vmem:[%s22695_s5 + $0x1108] sm:$0xff]  ;;  %v14453_v63 = vld [vmem:[%s22695_s5 + $0x10c0] sm:$0xff]  ;;  %v14448_v44 = vld [vmem:[%s22695_s5 + $0x1098] sm:$0xff] }
 0x5ee   : > { %16619 = vmatpush3.msra.mxu0 %v14355_v3  ;;  %16620 = vmatprep.mubr.msk.f32.mxu0 %vm16836_vm8, %v22944_v20  ;;  %v14458_v62 = vld [vmem:[%s22695_s5 + $0x10e8] sm:$0xff]  ;;  %v14452_v3 = vld [vmem:[%s22695_s5 + $0x10b8] sm:$0xff]  ;;  %v14408_v2 = vld [vmem:[%s22695_s5 + $0xf70] sm:$0xff] }
 0x5ef   : > { %14392 = vmatmul.mubr.msk.f32.vlgmr.msra.gmra.mxu1 %vm8482_vm5, %v21671_v7  ;;  %16621 = vmatmul.mubr.msk.f32.vlgmr.msra.gmra.mxu0 %vm8482_vm5, %v21671_v7  ;;  %v14397_v7 = vld [vmem:[%s22695_s5 + $0xf18] sm:$0xff] }
 0x5f0   : > { %11861 = vmatprep.subr.mxu1 %v14430_v23  ;;  %11932 = vmatprep.subr.mxu0 %v14432_v16  ;;  %v14443_v23 = vld [vmem:[%s22695_s5 + $0x1070] sm:$0xff]  ;;  %v12063_v16 = vld [vmem:[#allocation5 + $0x1d] sm:$0x1] }
 0x5f1   : > { %11862 = vmatpush1.msra.mxu1 %v14429_v40  ;;  %11933 = vmatpush1.msra.mxu0 %v14431_v59  ;;  %v14403_v40 = vld [vmem:[%s22695_s5 + $0xf48] sm:$0xff] }
 0x5f2   : > { %11863 = vmatprep.subr.mxu1 %v14425_v11  ;;  %11934 = vmatprep.subr.mxu0 %v14427_v46  ;;  %v14442_v59 = vld [vmem:[%s22695_s5 + $0x1068] sm:$0xff] }
 0x5f3   : > { %11864 = vmatpush1.msra.mxu1 %v14424_v6  ;;  %11935 = vmatpush1.msra.mxu0 %v14426_v43  ;;  %v14438_v11 = vld [vmem:[%s22695_s5 + $0x1048] sm:$0xff]  ;;  %v14398_v43 = vld [vmem:[%s22695_s5 + $0xf20] sm:$0xff] }
 0x5f4   : > { %11865 = vmatprep.subr.mxu1 %v14420_v0  ;;  %11936 = vmatprep.subr.mxu0 %v14422_v41  ;;  %v12107_v0 = vrot.slane %v12063_v16, 7  ;;  %v14502_v16 = vld [vmem:[%s22695_s5 + $0x1230] sm:$0xff] }
 0x5f5   : > { %11866 = vmatpush1.msra.mxu1 %v14419_v18  ;;  %11937 = vmatpush1.msra.mxu0 %v14421_v51  ;;  %v14437_v51 = vld [vmem:[%s22695_s5 + $0x1040] sm:$0xff] }
 0x5f6   : > { %11867 = vmatprep.subr.mxu1 %v14415_v26  ;;  %11938 = vmatprep.subr.mxu0 %v14417_v47 }
 0x5f7   : > { %11868 = vmatpush1.msra.mxu1 %v14414_v24  ;;  %11939 = vmatpush1.msra.mxu0 %v14416_v58  ;;  %v14475_v58 = vld [vmem:[%s22695_s5 + $0x1170] sm:$0xff] }
 0x5f8   : > { %11869 = vmatprep.subr.mxu1 %v14410_v14  ;;  %11940 = vmatprep.subr.mxu0 %v14412_v38  ;;  %v14476_v38 = vld [vmem:[%s22695_s5 + $0x1178] sm:$0xff] }
 0x5f9   : > { %11870 = vmatpush1.msra.mxu1 %v14409_v60  ;;  %11941 = vmatpush1.msra.mxu0 %v14411_v52  ;;  %v14470_v60 = vld [vmem:[%s22695_s5 + $0x1148] sm:$0xff]  ;;  %v14469_v52 = vld [vmem:[%s22695_s5 + $0x1140] sm:$0xff] }
 0x5fa   : > { %11871 = vmatprep.subr.mxu1 %v14405_v45  ;;  %11942 = vmatprep.subr.mxu0 %v14407_v36  ;;  %v14471_v45 = vld [vmem:[%s22695_s5 + $0x1150] sm:$0xff]  ;;  %v14465_v36 = vld [vmem:[%s22695_s5 + $0x1120] sm:$0xff] }
 0x5fb   : > { %11872 = vmatpush1.msra.mxu1 %v14404_v49  ;;  %11943 = vmatpush1.msra.mxu0 %v14406_v5  ;;  %v9923_v25 = vpop.f32.mrf.mxu1  ;;  %v10047_v50 = vpop.f32.mrf.mxu0  ;;  %v14464_v49 = vld [vmem:[%s22695_s5 + $0x1118] sm:$0xff]  ;;  %v14466_v5 = vld [vmem:[%s22695_s5 + $0x1128] sm:$0xff] }
 0x5fc   : > { %11873 = vmatprep.subr.mxu1 %v14400_v61  ;;  %11944 = vmatprep.subr.mxu0 %v14402_v17  ;;  %v21867_v34 = vadd.f32 %v9923_v25, %v21655_v19  ;;  %v21870_v13 = vadd.f32 %v10047_v50, %v21751_v27  ;;  %v11796_v19 = vld [vmem:[#allocation5 + $0xc] sm:$0x1]  ;;  %v14413_v27 = vld [vmem:[%s22695_s5 + $0xf98] sm:$0xff]  ;;  %v14459_v17 = vld [vmem:[%s22695_s5 + $0x10f0] sm:$0xff] }
 0x5fd   : > { %11874 = vmatpush1.msra.mxu1 %v14399_v48  ;;  %11945 = vmatpush1.msra.mxu0 %v14401_v21  ;;  %v16489_v10 = vpop.f32.mrf.mxu1  ;;  %v10049_v15 = vpop.f32.mrf.mxu0  ;;  %v21884_v22 = vsel %vm8699_vm7, %v11841_v28, %v11796_v19  ;;  %v14460_v61 = vld [vmem:[%s22695_s5 + $0x10f8] sm:$0xff]  ;;  %v14455_v48 = vld [vmem:[%s22695_s5 + $0x10d0] sm:$0xff]  ;;  %v14454_v21 = vld [vmem:[%s22695_s5 + $0x10c8] sm:$0xff] }
 0x5fe   : > { %11875 = vmatprep.subr.mxu1 %v14395_v56  ;;  %11946 = vmatprep.subr.mxu0 %v14397_v7  ;;  %v21876_v33 = vadd.f32 %v10049_v15, %v21761_v53  ;;  %v14447_v53 = vld [vmem:[%s22695_s5 + $0x1090] sm:$0xff]  ;;  %v14456_v56 = vld [vmem:[%s22695_s5 + $0x10d8] sm:$0xff]  ;;  %v14450_v7 = vld [vmem:[%s22695_s5 + $0x10a8] sm:$0xff] }
 0x5ff   : > { %11876 = vmatpush1.msra.mxu1 %v14394_v55  ;;  %11909 = vmatprep.mubr.f32.mxu1 %v22944_v20  ;;  %v14449_v25 = vld [vmem:[%s22695_s5 + $0x10a0] sm:$0xff]  ;;  %v14451_v50 = vld [vmem:[%s22695_s5 + $0x10b0] sm:$0xff]  ;;  %v14444_v28 = vld [vmem:[%s22695_s5 + $0x1078] sm:$0xff] }
 0x600   : > { %11947 = vmatpush1.msra.mxu0 %v14396_v39  ;;  %11980 = vmatprep.mubr.f32.mxu0 %v22944_v20  ;;  %v14445_v55 = vld [vmem:[%s22695_s5 + $0x1080] sm:$0xff]  ;;  %v14440_v39 = vld [vmem:[%s22695_s5 + $0x1058] sm:$0xff]  ;;  %v14439_v19 = vld [vmem:[%s22695_s5 + $0x1050] sm:$0xff] }
 0x601   : > { %14434 = vmatmul.mubr.msk.f32.vlgmr.msra.gmra.mxu1 %vm8482_vm5, %v21884_v22  ;;  %14435 = vmatmul.mubr.msk.f32.vlgmr.msra.gmra.mxu0 %vm8482_vm5, %v21884_v22 }
 0x602   : > { %16623 = vmatprep.subr.mxu1 %v22944_v20  ;;  %12127 = vmatprep.subr.mxu0 %v14473_v57 }
 0x603   : > { %16624 = vmatpush3.msra.mxu1 %v14433_v37  ;;  %12128 = vmatpush1.msra.mxu0 %v14472_v32  ;;  %v14441_v37 = vld [vmem:[%s22695_s5 + $0x1060] sm:$0xff] }
 0x604   : > { %16625 = vmatprep.subr.mxu1 %v22944_v20  ;;  %12129 = vmatprep.subr.mxu0 %v14468_v12 }
 0x605   : > { %16626 = vmatpush3.msra.mxu1 %v14428_v9  ;;  %12130 = vmatpush1.msra.mxu0 %v14467_v4  ;;  %v14516_v4 = vld [vmem:[%s22695_s5 + $0x12a0] sm:$0xff] }
 0x606   : > { %16627 = vmatprep.subr.mxu1 %v22944_v20  ;;  %12131 = vmatprep.subr.mxu0 %v14463_v29  ;;  %v14518_v29 = vld [vmem:[%s22695_s5 + $0x12b0] sm:$0xff] }
 0x607   : > { %16628 = vmatpush3.msra.mxu1 %v14423_v54  ;;  %12132 = vmatpush1.msra.mxu0 %v14462_v8  ;;  %v14517_v54 = vld [vmem:[%s22695_s5 + $0x12a8] sm:$0xff]  ;;  %v14511_v8 = vld [vmem:[%s22695_s5 + $0x1278] sm:$0xff] }
 0x608   : > { %16629 = vmatprep.subr.mxu1 %v22944_v20  ;;  %12133 = vmatprep.subr.mxu0 %v14458_v62  ;;  %v14513_v62 = vld [vmem:[%s22695_s5 + $0x1288] sm:$0xff] }
 0x609   : > { %16630 = vmatpush3.msra.mxu1 %v14418_v1  ;;  %12134 = vmatpush1.msra.mxu0 %v14457_v31  ;;  %v14510_v1 = vld [vmem:[%s22695_s5 + $0x1270] sm:$0xff]  ;;  %v14512_v31 = vld [vmem:[%s22695_s5 + $0x1280] sm:$0xff] }
 0x60a   : > { %16631 = vmatprep.subr.mxu1 %v22944_v20  ;;  %12135 = vmatprep.subr.mxu0 %v14453_v63  ;;  %v14506_v63 = vld [vmem:[%s22695_s5 + $0x1250] sm:$0xff] }
 0x60b   : > { %16632 = vmatpush3.msra.mxu1 %v14413_v27  ;;  %12136 = vmatpush1.msra.mxu0 %v14452_v3  ;;  %v14508_v27 = vld [vmem:[%s22695_s5 + $0x1260] sm:$0xff]  ;;  %v14505_v3 = vld [vmem:[%s22695_s5 + $0x1248] sm:$0xff] }
 0x60c   : > { %16633 = vmatprep.subr.mxu1 %v22944_v20  ;;  %12137 = vmatprep.subr.mxu0 %v14448_v44  ;;  %v14507_v44 = vld [vmem:[%s22695_s5 + $0x1258] sm:$0xff] }
 0x60d   : > { %16634 = vmatpush3.msra.mxu1 %v14408_v2  ;;  %12138 = vmatpush1.msra.mxu0 %v14447_v53  ;;  %v10118_v46 = vpop.f32.mrf.mxu1  ;;  %v10189_v6 = vpop.f32.mrf.mxu0  ;;  %v14501_v2 = vld [vmem:[%s22695_s5 + $0x1228] sm:$0xff]  ;;  %v14503_v53 = vld [vmem:[%s22695_s5 + $0x1238] sm:$0xff] }
 0x60e   : > { %16635 = vmatprep.subr.mxu1 %v22944_v20  ;;  %12139 = vmatprep.subr.mxu0 %v14443_v23  ;;  %v21964_v41 = vadd.f32 %v10118_v46, %v21754_v35  ;;  %v21967_v18 = vadd.f32 %v10189_v6, %v21867_v34  ;;  %v12062_v35 = vld [vmem:[#allocation5 + $0xd] sm:$0x1]  ;;  %v14500_v23 = vld [vmem:[%s22695_s5 + $0x1220] sm:$0xff]  ;;  %v14491_v6 = vld [vmem:[%s22695_s5 + $0x11d8] sm:$0xff] }
 0x60f   : > { %16636 = vmatpush3.msra.mxu1 %v14403_v40  ;;  %12140 = vmatpush1.msra.mxu0 %v14442_v59  ;;  %v10120_v26 = vpop.f32.mrf.mxu1  ;;  %v16508_v47 = vpop.f32.mrf.mxu0  ;;  %v21983_v14 = vsel %vm8699_vm7, %v12107_v0, %v12062_v35  ;;  %v14446_v34 = vld [vmem:[%s22695_s5 + $0x1088] sm:$0xff]  ;;  %v14496_v40 = vld [vmem:[%s22695_s5 + $0x1200] sm:$0xff]  ;;  %v14498_v59 = vld [vmem:[%s22695_s5 + $0x1210] sm:$0xff] }
 0x610   : > { %16637 = vmatprep.subr.mxu1 %v22944_v20  ;;  %12141 = vmatprep.subr.mxu0 %v14438_v11  ;;  %v21974_v24 = vadd.f32 %v10120_v26, %v21764_v42  ;;  %v14474_v42 = vld [vmem:[%s22695_s5 + $0x1168] sm:$0xff]  ;;  %v14495_v11 = vld [vmem:[%s22695_s5 + $0x11f8] sm:$0xff]  ;;  %v14490_v0 = vld [vmem:[%s22695_s5 + $0x11d0] sm:$0xff] }
 0x611   : > { %16638 = vmatpush3.msra.mxu1 %v14398_v43  ;;  %16639 = vmatprep.mubr.msk.f32.mxu1 %vm16836_vm8, %v22944_v20  ;;  %v14497_v46 = vld [vmem:[%s22695_s5 + $0x1208] sm:$0xff]  ;;  %v14488_v26 = vld [vmem:[%s22695_s5 + $0x11c0] sm:$0xff]  ;;  %v12329_v47 = vld [vmem:[#allocation5 + $0x1e] sm:$0x1] }
 0x612   : > { %12142 = vmatpush1.msra.mxu0 %v14437_v51  ;;  %12175 = vmatprep.mubr.f32.mxu0 %v22944_v20  ;;  %v14493_v43 = vld [vmem:[%s22695_s5 + $0x11e8] sm:$0xff]  ;;  %v14486_v51 = vld [vmem:[%s22695_s5 + $0x11b0] sm:$0xff]  ;;  %v14487_v35 = vld [vmem:[%s22695_s5 + $0x11b8] sm:$0xff] }
 0x613   : > { %16640 = vmatmul.mubr.msk.f32.vlgmr.msra.gmra.mxu1 %vm8482_vm5, %v21884_v22  ;;  %14477 = vmatmul.mubr.msk.f32.vlgmr.msra.gmra.mxu0 %vm8482_vm5, %v21983_v14 }
 0x614   : > { %12198 = vmatprep.subr.mxu1 %v14475_v58  ;;  %16642 = vmatprep.subr.mxu0 %v22944_v20  ;;  %v14481_v58 = vld [vmem:[%s22695_s5 + $0x1188] sm:$0xff] }
 0x615   : > { %12199 = vmatpush1.msra.mxu1 %v14474_v42  ;;  %16643 = vmatpush3.msra.mxu0 %v14476_v38 }
 0x616   : > { %12200 = vmatprep.subr.mxu1 %v14470_v60  ;;  %16644 = vmatprep.subr.mxu0 %v22944_v20  ;;  %v14480_v60 = vld [vmem:[%s22695_s5 + $0x1180] sm:$0xff] }
 0x617   : > { %12201 = vmatpush1.msra.mxu1 %v14469_v52  ;;  %16645 = vmatpush3.msra.mxu0 %v14471_v45  ;;  %v12373_v52 = vrot.slane %v12329_v47, 7  ;;  %v14547_v47 = vld [vmem:[%s22695_s5 + $0x1380] sm:$0xff] }
 0x618   : > { %12202 = vmatprep.subr.mxu1 %v14465_v36  ;;  %16646 = vmatprep.subr.mxu0 %v22944_v20 }
 0x619   : > { %12203 = vmatpush1.msra.mxu1 %v14464_v49  ;;  %16647 = vmatpush3.msra.mxu0 %v14466_v5  ;;  %v14482_v49 = vld [vmem:[%s22695_s5 + $0x1190] sm:$0xff] }
 0x61a   : > { %12204 = vmatprep.subr.mxu1 %v14460_v61  ;;  %16648 = vmatprep.subr.mxu0 %v22944_v20 }
 0x61b   : > { %12205 = vmatpush1.msra.mxu1 %v14459_v17  ;;  %16649 = vmatpush3.msra.mxu0 %v14461_v30  ;;  %v14559_v30 = vld [vmem:[%s22695_s5 + $0x13e0] sm:$0xff] }
 0x61c   : > { %12206 = vmatprep.subr.mxu1 %v14455_v48  ;;  %16650 = vmatprep.subr.mxu0 %v22944_v20 }
 0x61d   : > { %12207 = vmatpush1.msra.mxu1 %v14454_v21  ;;  %16651 = vmatpush3.msra.mxu0 %v14456_v56  ;;  %v14519_v21 = vld [vmem:[%s22695_s5 + $0x12b8] sm:$0xff] }
 0x61e   : > { %12208 = vmatprep.subr.mxu1 %v14450_v7  ;;  %16652 = vmatprep.subr.mxu0 %v22944_v20  ;;  %v14558_v56 = vld [vmem:[%s22695_s5 + $0x13d8] sm:$0xff] }
 0x61f   : > { %12209 = vmatpush1.msra.mxu1 %v14449_v25  ;;  %16653 = vmatpush3.msra.mxu0 %v14451_v50  ;;  %v10313_v10 = vpop.f32.mrf.mxu1  ;;  %v10384_v15 = vpop.f32.mrf.mxu0  ;;  %v14554_v7 = vld [vmem:[%s22695_s5 + $0x13b8] sm:$0xff]  ;;  %v14514_v25 = vld [vmem:[%s22695_s5 + $0x1290] sm:$0xff] }
 0x620   : > { %12210 = vmatprep.subr.mxu1 %v14445_v55  ;;  %16654 = vmatprep.subr.mxu0 %v22944_v20  ;;  %v22063_v57 = vadd.f32 %v10313_v10, %v21870_v13  ;;  %v22066_v22 = vadd.f32 %v10384_v15, %v21964_v41  ;;  %v14492_v41 = vld [vmem:[%s22695_s5 + $0x11e0] sm:$0xff]  ;;  %v14553_v50 = vld [vmem:[%s22695_s5 + $0x13b0] sm:$0xff] }
 0x621   : > { %12211 = vmatpush1.msra.mxu1 %v14444_v28  ;;  %16655 = vmatpush3.msra.mxu0 %v14446_v34  ;;  %v10315_v32 = vpop.f32.mrf.mxu1  ;;  %v10386_v12 = vpop.f32.mrf.mxu0  ;;  %v14549_v55 = vld [vmem:[%s22695_s5 + $0x1390] sm:$0xff]  ;;  %v14509_v28 = vld [vmem:[%s22695_s5 + $0x1268] sm:$0xff]  ;;  %v14504_v10 = vld [vmem:[%s22695_s5 + $0x1240] sm:$0xff] }
 0x622   : > { %12212 = vmatprep.subr.mxu1 %v14440_v39  ;;  %16656 = vmatprep.subr.mxu0 %v22944_v20  ;;  %v22073_v9 = vadd.f32 %v10315_v32, %v21876_v33  ;;  %v22076_v13 = vadd.f32 %v10386_v12, %v21974_v24  ;;  %v14515_v33 = vld [vmem:[%s22695_s5 + $0x1298] sm:$0xff]  ;;  %v14485_v24 = vld [vmem:[%s22695_s5 + $0x11a8] sm:$0xff]  ;;  %v14543_v15 = vld [vmem:[%s22695_s5 + $0x1360] sm:$0xff] }
 0x623   : > { %12213 = vmatpush1.msra.mxu1 %v14439_v19  ;;  %12246 = vmatprep.mubr.f32.mxu1 %v22944_v20  ;;  %v14548_v34 = vld [vmem:[%s22695_s5 + $0x1388] sm:$0xff]  ;;  %v14539_v19 = vld [vmem:[%s22695_s5 + $0x1340] sm:$0xff]  ;;  %v14534_v32 = vld [vmem:[%s22695_s5 + $0x1318] sm:$0xff] }
 0x624   : > { %16657 = vmatpush3.msra.mxu0 %v14441_v37  ;;  %16658 = vmatprep.mubr.msk.f32.mxu0 %vm16836_vm8, %v22944_v20  ;;  %v14544_v39 = vld [vmem:[%s22695_s5 + $0x1368] sm:$0xff]  ;;  %v14538_v37 = vld [vmem:[%s22695_s5 + $0x1338] sm:$0xff]  ;;  %v14494_v12 = vld [vmem:[%s22695_s5 + $0x11f0] sm:$0xff] }
 0x625   : > { %14478 = vmatmul.mubr.msk.f32.vlgmr.msra.gmra.mxu1 %vm8482_vm5, %v21983_v14  ;;  %16659 = vmatmul.mubr.msk.f32.vlgmr.msra.gmra.mxu0 %vm8482_vm5, %v21983_v14  ;;  %v14483_v14 = vld [vmem:[%s22695_s5 + $0x1198] sm:$0xff] }
 0x626   : > { %12393 = vmatprep.subr.mxu1 %v14516_v4  ;;  %12464 = vmatprep.subr.mxu0 %v14518_v29  ;;  %v14529_v4 = vld [vmem:[%s22695_s5 + $0x12f0] sm:$0xff]  ;;  %v12595_v29 = vld [vmem:[#allocation5 + $0x1f] sm:$0x1] }
 0x627   : > { %12394 = vmatpush1.msra.mxu1 %v14515_v33  ;;  %12465 = vmatpush1.msra.mxu0 %v14517_v54  ;;  %v14489_v33 = vld [vmem:[%s22695_s5 + $0x11c8] sm:$0xff] }
 0x628   : > { %12395 = vmatprep.subr.mxu1 %v14511_v8  ;;  %12466 = vmatprep.subr.mxu0 %v14513_v62  ;;  %v14528_v54 = vld [vmem:[%s22695_s5 + $0x12e8] sm:$0xff] }
 0x629   : > { %12396 = vmatpush1.msra.mxu1 %v14510_v1  ;;  %12467 = vmatpush1.msra.mxu0 %v14512_v31  ;;  %v14524_v8 = vld [vmem:[%s22695_s5 + $0x12c8] sm:$0xff]  ;;  %v14484_v31 = vld [vmem:[%s22695_s5 + $0x11a0] sm:$0xff] }
 0x62a   : > { %12397 = vmatprep.subr.mxu1 %v14506_v63  ;;  %12468 = vmatprep.subr.mxu0 %v14508_v27  ;;  %v12639_v63 = vrot.slane %v12595_v29, 7  ;;  %v12924_v29 = vld [vmem:[%s22697_s7 + $0xd8] sm:$0xff] }
 0x62b   : > { %12398 = vmatpush1.msra.mxu1 %v14505_v3  ;;  %12469 = vmatpush1.msra.mxu0 %v14507_v44  ;;  %v14523_v44 = vld [vmem:[%s22695_s5 + $0x12c0] sm:$0xff] }
 0x62c   : > { %12399 = vmatprep.subr.mxu1 %v14501_v2  ;;  %12470 = vmatprep.subr.mxu0 %v14503_v53 }
 0x62d   : > { %12400 = vmatpush1.msra.mxu1 %v14500_v23  ;;  %12471 = vmatpush1.msra.mxu0 %v14502_v16  ;;  %v14561_v16 = vld [vmem:[%s22695_s5 + $0x13f0] sm:$0xff] }
 0x62e   : > { %12401 = vmatprep.subr.mxu1 %v14496_v40  ;;  %12472 = vmatprep.subr.mxu0 %v14498_v59  ;;  %v14562_v59 = vld [vmem:[%s22695_s5 + $0x13f8] sm:$0xff] }
 0x62f   : > { %12402 = vmatpush1.msra.mxu1 %v14495_v11  ;;  %12473 = vmatpush1.msra.mxu0 %v14497_v46  ;;  %v14556_v11 = vld [vmem:[%s22695_s5 + $0x13c8] sm:$0xff]  ;;  %v14555_v46 = vld [vmem:[%s22695_s5 + $0x13c0] sm:$0xff] }
 0x630   : > { %12403 = vmatprep.subr.mxu1 %v14491_v6  ;;  %12474 = vmatprep.subr.mxu0 %v14493_v43  ;;  %v14557_v6 = vld [vmem:[%s22695_s5 + $0x13d0] sm:$0xff]  ;;  %v14551_v43 = vld [vmem:[%s22695_s5 + $0x13a0] sm:$0xff] }
 0x631   : > { %12404 = vmatpush1.msra.mxu1 %v14490_v0  ;;  %12475 = vmatpush1.msra.mxu0 %v14492_v41  ;;  %v10455_v42 = vpop.f32.mrf.mxu1  ;;  %v10579_v38 = vpop.f32.mrf.mxu0  ;;  %v14550_v0 = vld [vmem:[%s22695_s5 + $0x1398] sm:$0xff]  ;;  %v14552_v41 = vld [vmem:[%s22695_s5 + $0x13a8] sm:$0xff] }
 0x632   : > { %12405 = vmatprep.subr.mxu1 %v14486_v51  ;;  %12476 = vmatprep.subr.mxu0 %v14488_v26  ;;  %v22179_v45 = vadd.f32 %v10455_v42, %v21967_v18  ;;  %v22182_v36 = vadd.f32 %v10579_v38, %v22063_v57  ;;  %v12328_v18 = vld [vmem:[#allocation5 + $0xe] sm:$0x1]  ;;  %v14499_v57 = vld [vmem:[%s22695_s5 + $0x1218] sm:$0xff]  ;;  %v14545_v26 = vld [vmem:[%s22695_s5 + $0x1370] sm:$0xff] }
 0x633   : > { %12406 = vmatpush1.msra.mxu1 %v14485_v24  ;;  %12477 = vmatpush1.msra.mxu0 %v14487_v35  ;;  %v16527_v5 = vpop.f32.mrf.mxu1  ;;  %v10581_v61 = vpop.f32.mrf.mxu0  ;;  %v22196_v48 = vsel %vm8699_vm7, %v12373_v52, %v12328_v18  ;;  %v14546_v51 = vld [vmem:[%s22695_s5 + $0x1378] sm:$0xff]  ;;  %v14541_v24 = vld [vmem:[%s22695_s5 + $0x1350] sm:$0xff]  ;;  %v14540_v35 = vld [vmem:[%s22695_s5 + $0x1348] sm:$0xff] }
 0x634   : > { %12407 = vmatprep.subr.mxu1 %v14481_v58  ;;  %12478 = vmatprep.subr.mxu0 %v14483_v14  ;;  %v22188_v17 = vadd.f32 %v10581_v61, %v22073_v9  ;;  %v14533_v9 = vld [vmem:[%s22695_s5 + $0x1310] sm:$0xff]  ;;  %v14542_v58 = vld [vmem:[%s22695_s5 + $0x1358] sm:$0xff]  ;;  %v14536_v14 = vld [vmem:[%s22695_s5 + $0x1328] sm:$0xff] }
 0x635   : > { %12408 = vmatpush1.msra.mxu1 %v14480_v60  ;;  %12441 = vmatprep.mubr.f32.mxu1 %v22944_v20  ;;  %v14535_v42 = vld [vmem:[%s22695_s5 + $0x1320] sm:$0xff]  ;;  %v14537_v38 = vld [vmem:[%s22695_s5 + $0x1330] sm:$0xff]  ;;  %v14530_v52 = vld [vmem:[%s22695_s5 + $0x12f8] sm:$0xff] }
 0x636   : > { %12479 = vmatpush1.msra.mxu0 %v14482_v49  ;;  %12512 = vmatprep.mubr.f32.mxu0 %v22944_v20  ;;  %v14531_v60 = vld [vmem:[%s22695_s5 + $0x1300] sm:$0xff]  ;;  %v14526_v49 = vld [vmem:[%s22695_s5 + $0x12d8] sm:$0xff]  ;;  %v14525_v18 = vld [vmem:[%s22695_s5 + $0x12d0] sm:$0xff] }
 0x637   : > { %14520 = vmatmul.mubr.msk.f32.vlgmr.msra.gmra.mxu1 %vm8482_vm5, %v22196_v48  ;;  %14521 = vmatmul.mubr.msk.f32.vlgmr.msra.gmra.mxu0 %vm8482_vm5, %v22196_v48 }
 0x638   : > { %16661 = vmatprep.subr.mxu1 %v22944_v20  ;;  %12659 = vmatprep.subr.mxu0 %v14559_v30 }
 0x639   : > { %16662 = vmatpush3.msra.mxu1 %v14519_v21  ;;  %12660 = vmatpush1.msra.mxu0 %v14558_v56  ;;  %v14527_v21 = vld [vmem:[%s22695_s5 + $0x12e0] sm:$0xff] }
 0x63a   : > { %16663 = vmatprep.subr.mxu1 %v22944_v20  ;;  %12661 = vmatprep.subr.mxu0 %v14554_v7 }
 0x63b   : > { %16664 = vmatpush3.msra.mxu1 %v14514_v25  ;;  %12662 = vmatpush1.msra.mxu0 %v14553_v50 }
 0x63c   : > { %16665 = vmatprep.subr.mxu1 %v22944_v20  ;;  %12663 = vmatprep.subr.mxu0 %v14549_v55 }
 0x63d   : > { %16666 = vmatpush3.msra.mxu1 %v14509_v28  ;;  %12664 = vmatpush1.msra.mxu0 %v14548_v34  ;;  %v12928_v34 = vld [vmem:[%s22697_s7 + $0xf8] sm:$0xff] }
 0x63e   : > { %16667 = vmatprep.subr.mxu1 %v22944_v20  ;;  %12665 = vmatprep.subr.mxu0 %v14544_v39  ;;  %v12912_v39 = vld [vmem:[%s22697_s7 + $0x78] sm:$0xff] }
 0x63f   : > { %16668 = vmatpush3.msra.mxu1 %v14504_v10  ;;  %12666 = vmatpush1.msra.mxu0 %v14543_v15  ;;  %v12927_v10 = vld [vmem:[%s22697_s7 + $0xf0] sm:$0xff] }
 0x640   : > { %16669 = vmatprep.subr.mxu1 %v22944_v20  ;;  %12667 = vmatprep.subr.mxu0 %v14539_v19 }
 0x641   : > { %16670 = vmatpush3.msra.mxu1 %v14499_v57  ;;  %12668 = vmatpush1.msra.mxu0 %v14538_v37  ;;  %v12911_v57 = vld [vmem:[%s22697_s7 + $0x70] sm:$0xff] }
 0x642   : > { %16671 = vmatprep.subr.mxu1 %v22944_v20  ;;  %12669 = vmatprep.subr.mxu0 %v14534_v32  ;;  %v12926_v32 = vld [vmem:[%s22697_s7 + $0xe8] sm:$0xff] }
 0x643   : > { %16672 = vmatpush3.msra.mxu1 %v14494_v12  ;;  %12670 = vmatpush1.msra.mxu0 %v14533_v9  ;;  %v10650_v62 = vpop.f32.mrf.mxu1  ;;  %v10721_v1 = vpop.f32.mrf.mxu0  ;;  %v12910_v12 = vld [vmem:[%s22697_s7 + $0x68] sm:$0xff]  ;;  %v12925_v9 = vld [vmem:[%s22697_s7 + $0xe0] sm:$0xff] }
 0x644   : > { %16673 = vmatprep.subr.mxu1 %v22944_v20  ;;  %12671 = vmatprep.subr.mxu0 %v14529_v4  ;;  %v22276_v27 = vadd.f32 %v10650_v62, %v22066_v22  ;;  %v22279_v3 = vadd.f32 %v10721_v1, %v22179_v45  ;;  %v12594_v22 = vld [vmem:[#allocation5 + $0xf] sm:$0x1]  ;;  %v12909_v4 = vld [vmem:[%s22697_s7 + $0x60] sm:$0xff]  ;;  %v12908_v1 = vld [vmem:[%s22697_s7 + $0x58] sm:$0xff] }
 0x645   : > { %16674 = vmatpush3.msra.mxu1 %v14489_v33  ;;  %12672 = vmatpush1.msra.mxu0 %v14528_v54  ;;  %v10652_v2 = vpop.f32.mrf.mxu1  ;;  %v16546_v53 = vpop.f32.mrf.mxu0  ;;  %v22295_v40 = vsel %vm8699_vm7, %v12639_v63, %v12594_v22  ;;  %v14532_v45 = vld [vmem:[%s22695_s5 + $0x1308] sm:$0xff]  ;;  %v12907_v63 = vld [vmem:[%s22697_s7 + $0x50] sm:$0xff]  ;;  %v12960_v22 = vld [vmem:[%s22697_s7 + $0x1f8] sm:$0xff] }
 0x646   : > { %16675 = vmatprep.subr.mxu1 %v22944_v20  ;;  %12673 = vmatprep.subr.mxu0 %v14524_v8  ;;  %v22286_v23 = vadd.f32 %v10652_v2, %v22076_v13  ;;  %v14560_v13 = vld [vmem:[%s22695_s5 + $0x13e8] sm:$0xff] }
 0x647   : > { %16676 = vmatpush3.msra.mxu1 %v14484_v31  ;;  %16677 = vmatprep.mubr.msk.f32.mxu1 %vm16836_vm8, %v22944_v20  ;;  %v12923_v31 = vld [vmem:[%s22697_s7 + $0xd0] sm:$0xff]  ;;  %v12906_v53 = vld [vmem:[%s22697_s7 + $0x48] sm:$0xff] }
 0x648   : > { %12674 = vmatpush1.msra.mxu0 %v14523_v44  ;;  %12707 = vmatprep.mubr.f32.mxu0 %v22944_v20  ;;  %v12922_v44 = vld [vmem:[%s22697_s7 + $0xc8] sm:$0xff] }
 0x649   : > { %16678 = vmatmul.mubr.msk.f32.vlgmr.msra.gmra.mxu1 %vm8482_vm5, %v22196_v48  ;;  %14563 = vmatmul.mubr.msk.f32.vlgmr.msra.gmra.mxu0 %vm8482_vm5, %v22295_v40 }
 0x64a   : > { %12730 = vmatprep.subr.mxu1 %v14561_v16  ;;  %16680 = vmatprep.subr.mxu0 %v22944_v20  ;;  %v12944_v16 = vld [vmem:[%s22697_s7 + $0x178] sm:$0xff] }
 0x64b   : > { %12731 = vmatpush1.msra.mxu1 %v14560_v13  ;;  %16681 = vmatpush3.msra.mxu0 %v14562_v59  ;;  %v12959_v13 = vld [vmem:[%s22697_s7 + $0x1f0] sm:$0xff]  ;;  %v12920_v59 = vld [vmem:[%s22697_s7 + $0xb8] sm:$0xff] }
 0x64c   : > { %12732 = vmatprep.subr.mxu1 %v14556_v11  ;;  %16682 = vmatprep.subr.mxu0 %v22944_v20  ;;  %v12943_v11 = vld [vmem:[%s22697_s7 + $0x170] sm:$0xff] }
 0x64d   : > { %12733 = vmatpush1.msra.mxu1 %v14555_v46  ;;  %16683 = vmatpush3.msra.mxu0 %v14557_v6  ;;  %v12958_v46 = vld [vmem:[%s22697_s7 + $0x1e8] sm:$0xff]  ;;  %v12904_v6 = vld [vmem:[%s22697_s7 + $0x38] sm:$0xff] }
 0x64e   : > { %12734 = vmatprep.subr.mxu1 %v14551_v43  ;;  %16684 = vmatprep.subr.mxu0 %v22944_v20  ;;  %v12942_v43 = vld [vmem:[%s22697_s7 + $0x168] sm:$0xff] }
 0x64f   : > { %12735 = vmatpush1.msra.mxu1 %v14550_v0  ;;  %16685 = vmatpush3.msra.mxu0 %v14552_v41  ;;  %v12919_v0 = vld [vmem:[%s22697_s7 + $0xb0] sm:$0xff] }
 0x650   : > { %12736 = vmatprep.subr.mxu1 %v14546_v51  ;;  %16686 = vmatprep.subr.mxu0 %v22944_v20  ;;  %v12903_v41 = vld [vmem:[%s22697_s7 + $0x30] sm:$0xff]  ;;  %v12918_v51 = vld [vmem:[%s22697_s7 + $0xa8] sm:$0xff] }
 0x651   : > { %12737 = vmatpush1.msra.mxu1 %v14545_v26  ;;  %16687 = vmatpush3.msra.mxu0 %v14547_v47  ;;  %v12902_v26 = vld [vmem:[%s22697_s7 + $0x28] sm:$0xff]  ;;  %v12917_v47 = vld [vmem:[%s22697_s7 + $0xa0] sm:$0xff] }
 0x652   : > { %12738 = vmatprep.subr.mxu1 %v14541_v24  ;;  %16688 = vmatprep.subr.mxu0 %v22944_v20  ;;  %v12901_v24 = vld [vmem:[%s22697_s7 + $0x20] sm:$0xff] }
 0x653   : > { %12739 = vmatpush1.msra.mxu1 %v14540_v35  ;;  %16689 = vmatpush3.msra.mxu0 %v14542_v58  ;;  %v12957_v35 = vld [vmem:[%s22697_s7 + $0x1e0] sm:$0xff] }
 0x654   : > { %12740 = vmatprep.subr.mxu1 %v14536_v14  ;;  %16690 = vmatprep.subr.mxu0 %v22944_v20 }
 0x655   : > { %12741 = vmatpush1.msra.mxu1 %v14535_v42  ;;  %16691 = vmatpush3.msra.mxu0 %v14537_v38  ;;  %v10846_v5 = vpop.f32.mrf.mxu1  ;;  %v10917_v61 = vpop.f32.mrf.mxu0  ;;  %v12916_v42 = vld [vmem:[%s22697_s7 + $0x98] sm:$0xff]  ;;  %v12941_v38 = vld [vmem:[%s22697_s7 + $0x160] sm:$0xff] }
 0x656   : > { %12742 = vmatprep.subr.mxu1 %v14531_v60  ;;  %16692 = vmatprep.subr.mxu0 %v22944_v20  ;;  %v10992_v30 = vadd.f32 %v10846_v5, %v22182_v36  ;;  %v10994_v48 = vadd.f32 %v10917_v61, %v22276_v27 }
 0x657   : > { %12743 = vmatpush1.msra.mxu1 %v14530_v52  ;;  %16693 = vmatpush3.msra.mxu0 %v14532_v45  ;;  %v10848_v56 = vpop.f32.mrf.mxu1  ;;  %v10919_v7 = vpop.f32.mrf.mxu0  ;;  %v12900_v45 = vld [vmem:[%s22697_s7 + $0x18] sm:$0xff] }
 0x658   : > { %12744 = vmatprep.subr.mxu1 %v14526_v49  ;;  %16694 = vmatprep.subr.mxu0 %v22944_v20  ;;  %v10993_v25 = vadd.f32 %v10848_v56, %v22188_v17  ;;  %v10995_v50 = vadd.f32 %v10919_v7, %v22286_v23  ;;  %v12921_v23 = vld [vmem:[%s22697_s7 + $0xc0] sm:$0xff]  ;;  %v12956_v49 = vld [vmem:[%s22697_s7 + $0x1d8] sm:$0xff]  ;;  %v12899_v56 = vld [vmem:[%s22697_s7 + $0x10] sm:$0xff] }
 0x659   : > { %12745 = vmatpush1.msra.mxu1 %v14525_v18  ;;  %12778 = vmatprep.mubr.f32.mxu1 %v22944_v20  ;;  %v12915_v18 = vld [vmem:[%s22697_s7 + $0x90] sm:$0xff] }
 0x65a   : > { %16695 = vmatpush3.msra.mxu0 %v14527_v21  ;;  %16696 = vmatprep.mubr.msk.f32.mxu0 %vm16836_vm8, %v22944_v20  ;;  %v12955_v7 = vld [vmem:[%s22697_s7 + $0x1d0] sm:$0xff] }
 0x65b   : > { %14564 = vmatmul.mubr.msk.f32.vlgmr.msra.gmra.mxu1 %vm8482_vm5, %v22295_v40  ;;  %16697 = vmatmul.mubr.msk.f32.vlgmr.msra.gmra.mxu0 %vm8482_vm5, %v22295_v40  ;;  %v12905_v40 = vld [vmem:[%s22697_s7 + $0x40] sm:$0xff] }
 0x65c   : > { %15339 = vmatprep.subr.mxu1 %v12928_v34  ;;  %15374 = vmatprep.subr.mxu0 %v12960_v22  ;;  %v12897_v34 = vld [vmem:[%s22697_s7] sm:$0xff] }
 0x65d   : > { %15340 = vmatpush3.msra.mxu1 %v12912_v39  ;;  %15375 = vmatpush3.msra.mxu0 %v12944_v16  ;;  %v12953_v39 = vld [vmem:[%s22697_s7 + $0x1c0] sm:$0xff] }
 0x65e   : > { %15341 = vmatprep.subr.mxu1 %v12927_v10  ;;  %15376 = vmatprep.subr.mxu0 %v12959_v13  ;;  %v12937_v10 = vld [vmem:[%s22697_s7 + $0x140] sm:$0xff] }
 0x65f   : > { %15342 = vmatpush3.msra.mxu1 %v12911_v57  ;;  %15377 = vmatpush3.msra.mxu0 %v12943_v11  ;;  %v12951_v57 = vld [vmem:[%s22697_s7 + $0x1b0] sm:$0xff]  ;;  %v12929_v22 = vld [vmem:[%s22697_s7 + $0x100] sm:$0xff] }
 0x660   : > { %15343 = vmatprep.subr.mxu1 %v12926_v32  ;;  %15378 = vmatprep.subr.mxu0 %v12958_v46  ;;  %v12950_v32 = vld [vmem:[%s22697_s7 + $0x1a8] sm:$0xff] }
 0x661   : > { %15344 = vmatpush3.msra.mxu1 %v12910_v12  ;;  %15379 = vmatpush3.msra.mxu0 %v12942_v43  ;;  %v12934_v12 = vld [vmem:[%s22697_s7 + $0x128] sm:$0xff] }
 0x662   : > { %15345 = vmatprep.subr.mxu1 %v12925_v9  ;;  %15380 = vmatprep.subr.mxu0 %v12957_v35  ;;  %v12949_v9 = vld [vmem:[%s22697_s7 + $0x1a0] sm:$0xff] }
 0x663   : > { %15346 = vmatpush3.msra.mxu1 %v12909_v4  ;;  %15381 = vmatpush3.msra.mxu0 %v12941_v38  ;;  %v12933_v4 = vld [vmem:[%s22697_s7 + $0x120] sm:$0xff] }
 0x664   : > { %15347 = vmatprep.subr.mxu1 %v12924_v29  ;;  %15382 = vmatprep.subr.mxu0 %v12956_v49  ;;  %v12948_v29 = vld [vmem:[%s22697_s7 + $0x198] sm:$0xff] }
 0x665   : > { %15348 = vmatpush3.msra.mxu1 %v12908_v1 }
 0x666   : > { %15349 = vmatprep.subr.mxu1 %v12923_v31 }
 0x667   : > { %v10988_v36 = vpop.f32.mrf.mxu1  ;;  %v11112_v55 = vpop.f32.mrf.mxu0  ;;  %15350 = vmatpush3.msra.mxu1 %v12907_v63  ;;  %v12947_v63 = vld [vmem:[%s22697_s7 + $0x190] sm:$0xff] }
 0x668   : > { %v10996_v28 = vadd.f32 %v10988_v36, %v22279_v3  ;;  %v22390_v17 = vadd.f32 %v11112_v55, %v10992_v30  ;;  %15351 = vmatprep.subr.mxu1 %v12922_v44  ;;  %v12940_v30 = vld [vmem:[%s22697_s7 + $0x158] sm:$0xff]  ;;  %v12898_v36 = vld [vmem:[%s22697_s7 + $0x8] sm:$0xff]  ;;  %v12931_v44 = vld [vmem:[%s22697_s7 + $0x110] sm:$0xff] }
 0x669   : > { %v16565_v15 = vpop.f32.mrf.mxu1  ;;  %v11114_v19 = vpop.f32.mrf.mxu0  ;;  %15352 = vmatpush3.msra.mxu1 %v12906_v53  ;;  %15383 = vmatpush3.msra.mxu0 %v12940_v30  ;;  %v12954_v55 = vld [vmem:[%s22697_s7 + $0x1c8] sm:$0xff] }
 0x66a   : > { %v22404_v37 = vadd.f32 %v11114_v19, %v10993_v25  ;;  %15353 = vmatprep.subr.mxu1 %v12921_v23  ;;  %15384 = vmatprep.subr.mxu0 %v12955_v7  ;;  %v12914_v25 = vld [vmem:[%s22697_s7 + $0x88] sm:$0xff]  ;;  %v12952_v15 = vld [vmem:[%s22697_s7 + $0x1b8] sm:$0xff]  ;;  %v12945_v23 = vld [vmem:[%s22697_s7 + $0x180] sm:$0xff] }
 0x66b   : > { %15354 = vmatpush3.msra.mxu1 %v12905_v40  ;;  %v12936_v19 = vld [vmem:[%s22697_s7 + $0x138] sm:$0xff]  ;;  %v12946_v53 = vld [vmem:[%s22697_s7 + $0x188] sm:$0xff] }
 0x66c   : > { %15355 = vmatprep.subr.mxu1 %v12920_v59 }
 0x66d   : > { %15356 = vmatpush3.msra.mxu1 %v12904_v6 }
 0x66e   : > { %15357 = vmatprep.subr.mxu1 %v12919_v0 }
 0x66f   : > { %15358 = vmatpush3.msra.mxu1 %v12903_v41 }
 0x670   : > { %15359 = vmatprep.subr.mxu1 %v12918_v51 }
 0x671   : > { %15360 = vmatpush3.msra.mxu1 %v12902_v26 }
 0x672   : > { %15361 = vmatprep.subr.mxu1 %v12917_v47 }
 0x673   : > { %15362 = vmatpush3.msra.mxu1 %v12901_v24 }
 0x674   : > { %15363 = vmatprep.subr.mxu1 %v12916_v42 }
 0x675   : > { %15364 = vmatpush3.msra.mxu1 %v12900_v45 }
 0x676   : > { %15365 = vmatprep.subr.mxu1 %v12915_v18 }
 0x677   : > { %15366 = vmatpush3.msra.mxu1 %v12899_v56 }
 0x678   : > { %15367 = vmatprep.subr.mxu1 %v12914_v25 }
 0x679   : > { %v11183_v33 = vpop.f32.mrf.mxu1  ;;  %v11254_v54 = vpop.f32.mrf.mxu0  ;;  %15368 = vmatpush3.msra.mxu1 %v12898_v36 }
 0x67a   : > { %v11260_v8 = vadd.f32 %v11183_v33, %v10994_v48  ;;  %v22421_v62 = vadd.f32 %v11254_v54, %v10996_v28  ;;  %v12913_v28 = vld [vmem:[%s22697_s7 + $0x80] sm:$0xff] }
 0x67b   : > { %v11185_v27 = vpop.f32.mrf.mxu1  ;;  %v16584_v3 = vpop.f32.mrf.mxu0  ;;  %15369 = vmatprep.subr.mxu1 %v12913_v28 }
 0x67c   : > { %v11261_v2 = vadd.f32 %v11185_v27, %v10995_v50  ;;  %v12939_v50 = vld [vmem:[%s22697_s7 + $0x150] sm:$0xff]  ;;  %15370 = vmatpush3.msra.mxu1 %v12897_v34 }
 0x67d   : > { %15385 = vmatpush3.msra.mxu0 %v12939_v50  ;;  %16699 = vmatprep.subr.mxu1 %v22944_v20 }
 0x67e   : > { %15386 = vmatprep.subr.mxu0 %v12954_v55 }
 0x68b   : > { %v11378_v58 = vpop.f32.mrf.mxu1  ;;  %v11449_v14 = vpop.f32.mrf.mxu0 }
 0x68c   : > { %v11524_v60 = vadd.f32 %v11378_v58, %v22390_v17  ;;  %v22496_v52 = vadd.f32 %v11449_v14, %v11260_v8  ;;  %v12938_v17 = vld [vmem:[%s22697_s7 + $0x148] sm:$0xff]  ;;  %v12932_v8 = vld [vmem:[%s22697_s7 + $0x118] sm:$0xff] }
 0x68d   : > { %v11380_v5 = vpop.f32.mrf.mxu1  ;;  %v11451_v61 = vpop.f32.mrf.mxu0  ;;  %15387 = vmatpush3.msra.mxu0 %v12938_v17 }
 0x68e   : > { %v11525_v48 = vadd.f32 %v11380_v5, %v22404_v37  ;;  %v22511_v21 = vadd.f32 %v11451_v61, %v11261_v2  ;;  %15388 = vmatprep.subr.mxu0 %v12953_v39  ;;  %v12935_v37 = vld [vmem:[%s22697_s7 + $0x130] sm:$0xff] }
 0x68f   : > { %15389 = vmatpush3.msra.mxu0 %v12937_v10 }
 0x690   : > { %15390 = vmatprep.subr.mxu0 %v12952_v15 }
 0x691   : > { %15391 = vmatpush3.msra.mxu0 %v12936_v19 }
 0x692   : > { %15392 = vmatprep.subr.mxu0 %v12951_v57 }
 0x693   : > { %15393 = vmatpush3.msra.mxu0 %v12935_v37 }
 0x694   : > { %15394 = vmatprep.subr.mxu0 %v12950_v32 }
 0x695   : > { %15395 = vmatpush3.msra.mxu0 %v12934_v12 }
 0x696   : > { %15396 = vmatprep.subr.mxu0 %v12949_v9 }
 0x697   : > { %15397 = vmatpush3.msra.mxu0 %v12933_v4  ;;  %v12971_v4 = vld [vmem:[%s22697_s7 + $0x250] sm:$0xff] }
 0x698   : > { %15398 = vmatprep.subr.mxu0 %v12948_v29  ;;  %v12970_v29 = vld [vmem:[%s22697_s7 + $0x248] sm:$0xff] }
 0x699   : > { %15399 = vmatpush3.msra.mxu0 %v12932_v8 }
 0x69a   : > { %15400 = vmatprep.subr.mxu0 %v12947_v63 }
 0x69b   : > { %15401 = vmatpush3.msra.mxu0 %v12931_v44 }
 0x69c   : > { %15402 = vmatprep.subr.mxu0 %v12946_v53 }
 0x69d   : > { %v11520_v33 = vpop.f32.mrf.mxu1  ;;  %v11644_v54 = vpop.f32.mrf.mxu0 }
 0x69e   : > { %v11528_v1 = vadd.f32 %v11520_v33, %v22421_v62  ;;  %v11790_v31 = vadd.f32 %v11644_v54, %v11524_v60  ;;  %v12930_v62 = vld [vmem:[%s22697_s7 + $0x108] sm:$0xff]  ;;  %v12862_v60 = vlaneseq  ;;  %v12969_v33 = vld [vmem:[%s22697_s7 + $0x240] sm:$0xff] }
 0x69f   : > { %v16603_v27 = vpop.f32.mrf.mxu1  ;;  %v11646_v3 = vpop.f32.mrf.mxu0  ;;  %15403 = vmatpush3.msra.mxu0 %v12930_v62 }
 0x6a0   : > { %v11791_v2 = vadd.f32 %v11646_v3, %v11525_v48  ;;  %15404 = vmatprep.subr.mxu0 %v12945_v23  ;;  %v12967_v3 = vld [vmem:[%s22697_s7 + $0x230] sm:$0xff] }
 0x6a1   : > { %15405 = vmatpush3.msra.mxu0 %v12929_v22 }
 0x6af   : > { %v11715_v16 = vpop.f32.mrf.mxu1  ;;  %v11786_v40 = vpop.f32.mrf.mxu0 }
 0x6b0   : > { %v11792_v13 = vadd.f32 %v11715_v16, %v22496_v52  ;;  %v11794_v59 = vadd.f32 %v11786_v40, %v11528_v1  ;;  %v22598_v52 = vshrl.u32 %v12862_v60, 7  ;;  %v12968_v1 = vld [vmem:[%s22697_s7 + $0x238] sm:$0xff]  ;;  %v12966_v40 = vld [vmem:[%s22697_s7 + $0x228] sm:$0xff] }
 0x6b1   : > { %v11717_v11 = vpop.f32.mrf.mxu1  ;;  %v16622_v46 = vpop.f32.mrf.mxu0  ;;  %v12962_v60 = vld [vmem:[%s22697_s7 + $0x208] sm:$0xff] }
 0x6b2   : > { %v11793_v6 = vadd.f32 %v11717_v11, %v22511_v21  ;;  %v12864_v18 = vsub.s32 0, %v22598_v52  ;;  %v12860_v21 = vld [vmem:[%s22696_s6] sm:$0x1f]  ;;  %v12868_v56 = vsub.s32 1, %v22598_v52  ;;  %v12872_v8 = vsub.s32 2, %v22598_v52 }
 0x6b3   : > { %v12876_v27 = vsub.s32 3, %v22598_v52  ;;  %v12880_v16 = vsub.s32 4, %v22598_v52 }
 0x6b4   : > { %v12865_v17 = vrot.slane %v12860_v21, %v12864_v18  ;;  %v12869_v10 = vrot.slane %v12860_v21, %v12868_v56  ;;  %v12873_v23 = vrot.slane %v12860_v21, %v12872_v8  ;;  %v14566_v18 = vld [vmem:[%s22698_s8] ss:$0 sm:$0xff] }
 0x6b5   : > { %v12877_v11 = vrot.slane %v12860_v21, %v12876_v27 }
 0x6c1   : > { %v11911_v43 = vpop.f32.mrf.mxu1  ;;  %v11982_v47 = vpop.f32.mrf.mxu0 }
 0x6c2   : > { %v12057_v61 = vadd.f32 %v11911_v43, %v11790_v31  ;;  %v12059_v54 = vadd.f32 %v11982_v47, %v11792_v13  ;;  %v12881_v47 = vrot.slane %v12860_v21, %v12880_v16 }
 0x6c3   : > { %v11913_v0 = vpop.f32.mrf.mxu1  ;;  %v11984_v24 = vpop.f32.mrf.mxu0 }
 0x6c4   : > { %v12058_v30 = vadd.f32 %v11913_v0, %v11791_v2  ;;  %v12060_v31 = vadd.f32 %v11984_v24, %v11793_v6  ;;  %v12965_v0 = vld [vmem:[%s22697_s7 + $0x220] sm:$0xff]  ;;  %v12964_v24 = vld [vmem:[%s22697_s7 + $0x218] sm:$0xff] }
 0x6d3   : > { %v12053_v41 = vpop.f32.mrf.mxu1  ;;  %v12177_v35 = vpop.f32.mrf.mxu0 }
 0x6d4   : > { %v12061_v51 = vadd.f32 %v12053_v41, %v11794_v59  ;;  %v12323_v48 = vadd.f32 %v12177_v35, %v12057_v61 }
 0x6d5   : > { %v16641_v26 = vpop.f32.mrf.mxu1  ;;  %v12179_v58 = vpop.f32.mrf.mxu0 }
 0x6d6   : > { %v12324_v50 = vadd.f32 %v12179_v58, %v12058_v30  ;;  %v12963_v58 = vld [vmem:[%s22697_s7 + $0x210] sm:$0xff] }
 0x6e5   : > { %v12319_v14 = vpop.f32.mrf.mxu0  ;;  %v12248_v38 = vpop.f32.mrf.mxu1 }
 0x6e6   : > { %v12325_v63 = vadd.f32 %v12248_v38, %v12059_v54  ;;  %v12327_v53 = vadd.f32 %v12319_v14, %v12061_v51 }
 0x6e7   : > { %v16660_v42 = vpop.f32.mrf.mxu0  ;;  %v12250_v45 = vpop.f32.mrf.mxu1 }
 0x6e8   : > { %v12326_v44 = vadd.f32 %v12250_v45, %v12060_v31  ;;  %v12961_v45 = vld [vmem:[%s22697_s7 + $0x200] sm:$0xff] }
 0x6f7   : > { %v12443_v49 = vpop.f32.mrf.mxu1  ;;  %v12514_v5 = vpop.f32.mrf.mxu0 }
 0x6f8   : > { %v12589_v36 = vadd.f32 %v12443_v49, %v12323_v48  ;;  %v12591_v2 = vadd.f32 %v12514_v5, %v12325_v63 }
 0x6f9   : > { %v12445_v7 = vpop.f32.mrf.mxu1  ;;  %v12516_v25 = vpop.f32.mrf.mxu0 }
 0x6fa   : > { %v12590_v34 = vadd.f32 %v12445_v7, %v12324_v50  ;;  %v12592_v13 = vadd.f32 %v12516_v25, %v12326_v44 }
 0x709   : > { %v12585_v55 = vpop.f32.mrf.mxu1  ;;  %v12709_v28 = vpop.f32.mrf.mxu0 }
 0x70a   : > { %v12855_v39 = vadd.f32 %v12709_v28, %v12589_v36  ;;  %v12593_v46 = vadd.f32 %v12585_v55, %v12327_v53 }
 0x70b   : > { %v16679_v15 = vpop.f32.mrf.mxu1  ;;  %v12711_v19 = vpop.f32.mrf.mxu0 }
 0x70c   : > { %v12856_v57 = vadd.f32 %v12711_v19, %v12590_v34  ;;  %v12887_v37 = vadd.f32 %v12865_v17, %v12855_v39 }
 0x70e   : > { %v12888_v32 = vadd.f32 %v12869_v10, %v12856_v57  ;;  %v12892_v9 = vmax.f32 %v12887_v37, 0.0 }
 0x710   : > { %v12893_v12 = vmax.f32 %v12888_v32, 0.0 }
 0x712   : > { %13047 = vmatprep.mubr.f32.mxu1 %v12893_v12 }
 0x713   : > { %13048 = vmatmul.mubr.f32.vlgmr.msra.gmra.mxu1 %v12892_v9 }
 0x714   : > { %16700 = vmatpush3.msra.mxu1 %v12971_v4  ;;  %16721 = vmatprep.mubr.msk.f32.mxu1 %vm16836_vm8, %v22944_v20 }
 0x715   : > { %16701 = vmatprep.subr.mxu1 %v22944_v20 }
 0x716   : > { %16702 = vmatpush3.msra.mxu1 %v12970_v29 }
 0x717   : > { %16703 = vmatprep.subr.mxu1 %v22944_v20 }
 0x718   : > { %16704 = vmatpush3.msra.mxu1 %v12969_v33 }
 0x719   : > { %16705 = vmatprep.subr.mxu1 %v22944_v20 }
 0x71a   : > { %16706 = vmatpush3.msra.mxu1 %v12968_v1 }
 0x71b   : > { %v12780_v62 = vpop.f32.mrf.mxu1  ;;  %v12851_v22 = vpop.f32.mrf.mxu0  ;;  %16707 = vmatprep.subr.mxu1 %v22944_v20 }
 0x71c   : > { %v12857_v59 = vadd.f32 %v12780_v62, %v12591_v2  ;;  %16708 = vmatpush3.msra.mxu1 %v12967_v3  ;;  %v12859_v26 = vadd.f32 %v12851_v22, %v12593_v46 }
 0x71d   : > { %v12782_v6 = vpop.f32.mrf.mxu1  ;;  %v16698_v43 = vpop.f32.mrf.mxu0  ;;  %16709 = vmatprep.subr.mxu1 %v22944_v20 }
 0x71e   : > { %v12858_v41 = vadd.f32 %v12782_v6, %v12592_v13  ;;  %16710 = vmatpush3.msra.mxu1 %v12966_v40  ;;  %v12889_v51 = vadd.f32 %v12873_v23, %v12857_v59  ;;  %v12891_v38 = vadd.f32 %v12881_v47, %v12859_v26 }
 0x71f   : > { %16711 = vmatprep.subr.mxu1 %v22944_v20 }
 0x720   : > { %v12890_v35 = vadd.f32 %v12877_v11, %v12858_v41  ;;  %16712 = vmatpush3.msra.mxu1 %v12965_v0  ;;  %v12894_v42 = vmax.f32 %v12889_v51, 0.0  ;;  %v12896_v52 = vmax.f32 %v12891_v38, 0.0 }
 0x721   : > { %16713 = vmatprep.subr.mxu1 %v22944_v20 }
 0x722   : > { %v12895_v14 = vmax.f32 %v12890_v35, 0.0  ;;  %16714 = vmatpush3.msra.mxu1 %v12964_v24 }
 0x723   : > { %16715 = vmatprep.subr.mxu1 %v22944_v20 }
 0x724   : > { %13117 = vmatprep.mubr.f32.mxu0 %v12895_v14  ;;  %16716 = vmatpush3.msra.mxu1 %v12963_v58 }
 0x725   : > { %13118 = vmatmul.mubr.f32.vlgmr.msra.gmra.mxu0 %v12894_v42  ;;  %16717 = vmatprep.subr.mxu1 %v22944_v20 }
 0x726   : > { %16718 = vmatpush3.msra.mxu1 %v12962_v60 }
 0x727   : > { %16719 = vmatprep.subr.mxu1 %v22944_v20 }
 0x728   : > { %16720 = vmatpush3.msra.mxu1 %v12961_v45 }
 0x729   : > { %16722 = vmatmul.mubr.msk.f32.vlgmr.msra.gmra.mxu1 %vm12979_vm9, %v12896_v52 }
 0x7d3   : > { %v15371_v49 = vpop.f32.mrf.mxu1 }
 0x7d5   : > { %v15372_v5 = vpop.f32.mrf.mxu1 }
 0x7d6   : > { %v15373_v61 = vadd.f32 %v15372_v5, %v15371_v49 }
 0x7d8   : > { %v13050_v21 = vadd.f32 %v15373_v61, %v14566_v18 }
 0x7e5   : > { %v15406_v30 = vpop.f32.mrf.mxu0 }
 0x7e7   : > { %v15407_v48 = vpop.f32.mrf.mxu0 }
 0x7e8   : > { %v15408_v56 = vadd.f32 %v15407_v48, %v15406_v30 }
 0x7e9   : > { %v13189_v7 = vpop.f32.mrf.mxu1 }
 0x7ea   : > { %v13120_v20 = vadd.f32 %v15408_v56, %v13050_v21 }
 0x7eb   : > { %v16723_v25 = vpop.f32.mrf.mxu1 }
 0x7ec   : > { %v13190_v50 = vadd.f32 %v13189_v7, %v13120_v20 }
 0x7ee   : > { %13194 = vst.msk [vmem:[%s326_s21] sm:$0x3] %vm13193_vm10, %v13190_v50 }
 0x7ef   : > { %16786 = shalt.err (!%p16783_p3)
}
 0x7f0   : > { %s16787_s16 = scalar_lea.hbm %s13207_s25, 32  ;;  %s16791_s21 = scalar_lea.hbm %s22699_s9, 128 }
 0x7f1   : > { %p16788_p4 = scmp.ne.s32.totalorder %s13207_s25, %s16787_s16  ;;  %p16792_p9 = scmp.lt.s32.totalorder %s13207_s25, %s22699_s9 }
 0x7f2   : > { %p16793_p10 = scmp.lt.s32.totalorder %s16791_s21, %s16787_s16 }
 0x7f3   : > { %p16789_p7 = pnand %p16788_p4, %p16926_p5 }
 0x7f4   : > { %p16794_p11 = por %p16793_p10, %p16792_p9 }
 0x7f5   : > { %p16790_p8 = pneg %p16789_p7 }
 0x7f7   : > { %p16795_p12 = pnand %p16794_p11, %p16790_p8 }
 0x7f9   : > { %16798 = shalt.err (!%p16795_p12)
}
 0x7fa   : > { %16730 = dma.vmem_to_hbm [thread:$0]  (%p16926_p5), %s13210_s22, 32, %s13207_s25, %s13196_s26  }
 0x7fb PF: > { %p16736_p13 = scmp.ge.s32.totalorder %s16833_s12, 2  ;;  %s13221_s27 = sand.u32 1, %s16821_s30  }
 0x7fc   : > { %s13222_s14 = scalar_lea.sflag [#allocation7], %s13221_s27 }
 0x7fd   : > { %p16733_p0 = pnand %p16736_p13, %p16930_p6 }
 0x7ff   : > { %p16734_p1 = pneg %p16733_p0 }
 0x801   : > { %16816 = dma.done.wait (%p16734_p1), %s13222_s14, 32  }
 0x802   : > { %16818 = vsyncadd (%p16734_p1), %s13222_s14, 4294967264  ;;  %p19_p2 = scmp.ge.s32.totalorder %s16913_s15, 6   ;;  %s22945_s30 = smov %s16825_s10 }
 0x803   : > { %s22946_s10 = smov %s16829_s11  ;;  %s22947_s11 = smov %s16924_s18 }
 0x804   : > { %s22948_s12 = smov %s16913_s15  ;;  %21 = sbr.rel (!%p19_p2) target bundleno = 3 (0x3), region = 359 }
 0x809   :  { %13227 = vsyncpa [#allocation7], 1 }
 0x80a   :  { %13229 = vsyncpa [#allocation7 + $0x1], 1 }

</bundles_post_ra>
